<compile_context>
chip_gen: v5e
topology: v5e:2x2
jax: 0.10.0
libtpu: 0.0.40
codegen_flags: <defaults>
</compile_context>

<pallas_src>
import jax
import jax.numpy as jnp
import numpy as np
from jax.experimental import pallas as pl
from jax.experimental.pallas import tpu as pltpu

EPS = 1e-5

_VMEM = pl.BlockSpec(memory_space=pltpu.MemorySpace.VMEM)
_CP = pltpu.CompilerParams(vmem_limit_bytes=32 * 1024 * 1024)


# ----------------------------- Pallas kernels ------------------------------ #

def fc_fused_kernel(x_ref, w1_ref, b1_ref, g1_ref, be1_ref,
                    w2_ref, b2_ref, g2_ref, be2_ref, o_ref):
    # fc1 + BN1d + ReLU + fc2(column tile) + BN1d + ReLU in one program.
    x = x_ref[...].astype(jnp.bfloat16)
    h = jnp.dot(x, w1_ref[...], preferred_element_type=jnp.float32) + b1_ref[...]
    m1 = jnp.mean(h, axis=0, keepdims=True)                 # torch train-mode batch stats
    hc = h - m1
    v1 = jnp.mean(hc * hc, axis=0, keepdims=True)           # biased variance
    h = jnp.maximum(hc * (g1_ref[...] * jax.lax.rsqrt(v1 + EPS)) + be1_ref[...], 0.0)

    y = jnp.dot(h.astype(jnp.bfloat16), w2_ref[...],
                preferred_element_type=jnp.float32) + b2_ref[...]
    m2 = jnp.mean(y, axis=0, keepdims=True)
    yc = y - m2
    v2 = jnp.mean(yc * yc, axis=0, keepdims=True)
    o_ref[...] = jnp.maximum(
        yc * (g2_ref[...] * jax.lax.rsqrt(v2 + EPS)) + be2_ref[...], 0.0)


def _phase_matmuls(t_ref, w_ref):
    # t_ref: (9, Cin, L) bf16 -- shifted channel-major input slabs
    # w_ref: (4, 4, Cout, Cin) bf16 -- per (output phase, tap) weight slices
    # returns (Cout, 4*L) f32, the 4 output phases concatenated along the lane axis.
    ys = []
    for ph in range(4):
        py, px = divmod(ph, 2)
        acc = None
        for t in range(4):
            dy, dx = divmod(t, 2)
            tap = (py + dy) * 3 + (px + dx)
            part = jnp.dot(w_ref[ph, t], t_ref[tap],
                           preferred_element_type=jnp.float32)
            acc = part if acc is None else acc + part
        ys.append(acc)
    return jnp.concatenate(ys, axis=1)


def deconv_bn_relu_kernel(t_ref, w_ref, b_ref, g_ref, be_ref, o_ref):
    # ConvTranspose2d(4,2,1) (phase-decomposed) + BatchNorm2d + ReLU, channel-major.
    y = _phase_matmuls(t_ref, w_ref) + b_ref[...]            # (Cout, N*OH*OW)
    m = jnp.mean(y, axis=1, keepdims=True)                   # per-channel over N,OH,OW
    yc = y - m
    v = jnp.mean(yc * yc, axis=1, keepdims=True)
    o_ref[...] = jnp.maximum(
        yc * (g_ref[...] * jax.lax.rsqrt(v + EPS)) + be_ref[...], 0.0)


def deconv_tanh_kernel(t_ref, w_ref, b_ref, o_ref):
    # ConvTranspose2d(4,2,1) (phase-decomposed) + Tanh, channel-major output.
    o_ref[...] = jnp.tanh(_phase_matmuls(t_ref, w_ref) + b_ref[...])


# ------------------------------ kernel wrappers ----------------------------- #

def fc_fused(x, w1, b1, g1, be1, w2, b2, g2, be2, *, tile=512):
    N, Din = x.shape
    F1 = w1.shape[1]
    F2 = w2.shape[1]
    if F2 % tile != 0:
        tile = F2
    rep = lambda j: (0, 0)
    col = lambda j: (0, j)
    return pl.pallas_call(
        fc_fused_kernel,
        out_shape=jax.ShapeDtypeStruct((N, F2), jnp.float32),
        grid=(F2 // tile,),
        in_specs=[
            pl.BlockSpec((N, Din), rep),
            pl.BlockSpec((Din, F1), rep),
            pl.BlockSpec((1, F1), rep),
            pl.BlockSpec((1, F1), rep),
            pl.BlockSpec((1, F1), rep),
            pl.BlockSpec((F1, tile), col),      # fc2 weight: feature-axis tiles
            pl.BlockSpec((1, tile), col),
            pl.BlockSpec((1, tile), col),
            pl.BlockSpec((1, tile), col),
        ],
        out_specs=pl.BlockSpec((N, tile), col),
        compiler_params=pltpu.CompilerParams(
            dimension_semantics=("parallel",),
            vmem_limit_bytes=32 * 1024 * 1024),
    )(x, w1, b1.reshape(1, F1), g1.reshape(1, F1), be1.reshape(1, F1),
      w2, b2.reshape(1, F2), g2.reshape(1, F2), be2.reshape(1, F2))


def deconv_bn_relu(taps, wm, bias, gamma, beta):
    cout, L = wm.shape[2], taps.shape[2]
    return pl.pallas_call(
        deconv_bn_relu_kernel,
        out_shape=jax.ShapeDtypeStruct((cout, 4 * L), jnp.float32),
        in_specs=[_VMEM] * 5,
        out_specs=_VMEM,
        compiler_params=_CP,
    )(taps, wm, bias.reshape(cout, 1), gamma.reshape(cout, 1), beta.reshape(cout, 1))


def deconv_tanh(taps, wm, bias):
    cout, L = wm.shape[2], taps.shape[2]
    return pl.pallas_call(
        deconv_tanh_kernel,
        out_shape=jax.ShapeDtypeStruct((cout, 4 * L), jnp.float32),
        in_specs=[_VMEM] * 3,
        out_specs=_VMEM,
        compiler_params=_CP,
    )(taps, wm, bias.reshape(cout, 1))


# ------------------------------ plain-JAX glue ------------------------------ #

def _tap_stack(x_nchw):
    # pad(1) + the 9 shifted windows needed by a k4/s2/p1 ConvTranspose, as
    # channel-major (Cin, N*H*W) slabs (lane axis = N*H*W, dense).  One XLA fusion.
    N, C, H, W = x_nchw.shape
    xp = jnp.pad(x_nchw, ((0, 0), (0, 0), (1, 1), (1, 1)))
    slabs = []
    for a in range(3):
        for b in range(3):
            s = xp[:, :, a:a + H, b:b + W]
            slabs.append(s.transpose(1, 0, 2, 3).reshape(C, N * H * W))
    return jnp.stack(slabs).astype(jnp.bfloat16)             # (9, C, N*H*W)


def _convT_weight_phases(wt):
    # ConvTranspose2d weight (Cin, Cout, 4, 4) -> (4 phases, 4 taps, Cout, Cin) bf16.
    phases = []
    for py in range(2):
        for px in range(2):
            taps = []
            for dy in range(2):
                for dx in range(2):
                    taps.append(wt[:, :, 3 - py - 2 * dy, 3 - px - 2 * dx].T)
            phases.append(jnp.stack(taps))
    return jnp.stack(phases).astype(jnp.bfloat16)


def _interleave_phases(o, N, C, H, W):
    # (C, 4*N*H*W) phase-major kernel output -> NCHW (N, C, 2H, 2W).
    o = o.reshape(C, 2, 2, N, H, W)                          # (c, py, px, n, qy, qx)
    return o.transpose(3, 0, 4, 1, 5, 2).reshape(N, C, 2 * H, 2 * W)


# ----------------------------- generator forward ---------------------------- #

def generator_forward(params, z, y, input_height, input_width, output_dim):
    N = z.shape[0]
    H4, W4 = input_height // 4, input_width // 4

    x = jnp.concatenate([z, y], axis=1)
    x = fc_fused(x,
                 params["fc1_w"].astype(jnp.bfloat16), params["fc1_b"],
                 params["bn1_g"], params["bn1_b"],
                 params["fc2_w"].astype(jnp.bfloat16), params["fc2_b"],
                 params["bn2_g"], params["bn2_b"])
    h = x.reshape(N, 128, H4, W4)

    # deconv1: ConvTranspose2d(128, 64, 4, 2, 1) + BN2d + ReLU
    o1 = deconv_bn_relu(_tap_stack(h), _convT_weight_phases(params["dc1_w"]),
                        params["dc1_b"], params["bn3_g"], params["bn3_b"])
    h = _interleave_phases(o1, N, 64, H4, W4)                # (N, 64, H/2, W/2)

    # deconv2: ConvTranspose2d(64, output_dim, 4, 2, 1) + Tanh
    o2 = deconv_tanh(_tap_stack(h), _convT_weight_phases(params["dc2_w"]),
                     params["dc2_b"])
    return _interleave_phases(o2, N, output_dim, 2 * H4, 2 * W4)


# --------------------------- pure-JAX reference ----------------------------- #

def reference_forward(params, z, y, input_height, input_width, output_dim):
    def bn(x, g, b, axes):
        m = x.mean(axes, keepdims=True)
        v = ((x - m) ** 2).mean(axes, keepdims=True)
        return (x - m) * jax.lax.rsqrt(v + EPS) * g + b

    def convT(x, wt, b):
        cin, cout, k, _ = wt.shape
        wconv = wt[:, :, ::-1, ::-1].transpose(1, 0, 2, 3)   # (Cout, Cin, k, k)
        out = jax.lax.conv_general_dilated(
            x, wconv, window_strides=(1, 1), padding=[(2, 2), (2, 2)],
            lhs_dilation=(2, 2), dimension_numbers=("NCHW", "OIHW", "NCHW"))
        return out + b.reshape(1, cout, 1, 1)

    N = z.shape[0]
    x = jnp.concatenate([z, y], axis=1)
    x = jax.nn.relu(bn(x @ params["fc1_w"] + params["fc1_b"],
                       params["bn1_g"], params["bn1_b"], (0,)))
    x = jax.nn.relu(bn(x @ params["fc2_w"] + params["fc2_b"],
                       params["bn2_g"], params["bn2_b"], (0,)))
    x = x.reshape(N, 128, input_height // 4, input_width // 4)
    x = convT(x, params["dc1_w"], params["dc1_b"])
    x = jax.nn.relu(bn(x, params["bn3_g"].reshape(1, -1, 1, 1),
                       params["bn3_b"].reshape(1, -1, 1, 1), (0, 2, 3)))
    x = convT(x, params["dc2_w"], params["dc2_b"])
    return jnp.tanh(x)


# ------------------------------- params init -------------------------------- #

def init_params(key, z_dim, y_dim, input_height, input_width, output_dim):
    H4, W4 = input_height // 4, input_width // 4
    fc2_out = 128 * H4 * W4
    keys = jax.random.split(key, 7)
    s = 0.02  # util.initialize_weights-style N(0, 0.02) weights, zero biases
    return {
        "fc1_w": jax.random.normal(keys[0], (z_dim + y_dim, 1024), jnp.float32) * s,
        "fc1_b": jnp.zeros((1024,), jnp.float32),
        "bn1_g": 1.0 + jax.random.normal(keys[1], (1024,), jnp.float32) * s,
        "bn1_b": jnp.zeros((1024,), jnp.float32),
        "fc2_w": jax.random.normal(keys[2], (1024, fc2_out), jnp.float32) * s,
        "fc2_b": jnp.zeros((fc2_out,), jnp.float32),
        "bn2_g": 1.0 + jax.random.normal(keys[3], (fc2_out,), jnp.float32) * s,
        "bn2_b": jnp.zeros((fc2_out,), jnp.float32),
        "dc1_w": jax.random.normal(keys[4], (128, 64, 4, 4), jnp.float32) * s,
        "dc1_b": jnp.zeros((64,), jnp.float32),
        "bn3_g": 1.0 + jax.random.normal(keys[5], (64,), jnp.float32) * s,
        "bn3_b": jnp.zeros((64,), jnp.float32),
        "dc2_w": jax.random.normal(keys[6], (64, output_dim, 4, 4), jnp.float32) * s,
        "dc2_b": jnp.zeros((output_dim,), jnp.float32),
    }


if __name__ == "__main__":
    input_height = input_width = 16
    z_dim, y_dim, output_dim = 16, 10, 3
    N = 8

    key = jax.random.PRNGKey(0)
    kz, ky, kp = jax.random.split(key, 3)
    z = jax.random.normal(kz, (N, z_dim), jnp.float32)
    y = jax.nn.one_hot(jax.random.randint(ky, (N,), 0, y_dim), y_dim, dtype=jnp.float32)
    params = init_params(kp, z_dim, y_dim, input_height, input_width, output_dim)

    gen = jax.jit(generator_forward, static_argnums=(3, 4, 5))
    out = jax.block_until_ready(gen(params, z, y, input_height, input_width, output_dim))
    assert out.shape == (N, output_dim, input_height, input_width)

    ref = jax.block_until_ready(
        reference_forward(params, z, y, input_height, input_width, output_dim))
    # bf16 MXU operands (f32 accumulation) -> loosened tolerance vs f32 reference.
    np.testing.assert_allclose(np.asarray(out), np.asarray(ref), atol=3e-2, rtol=3e-2)

    print("KERNEL_OK")
</pallas_src>

<mosaic_0001>
module attributes {stable_mosaic.version = 11 : i64} {
  func.func @fc_fused_kernel(%arg0: i32, %arg1: memref<8x26xf32, #tpu.memory_space<vmem>>, %arg2: memref<26x1024xbf16, #tpu.memory_space<vmem>>, %arg3: memref<1x1024xf32, #tpu.memory_space<vmem>>, %arg4: memref<1x1024xf32, #tpu.memory_space<vmem>>, %arg5: memref<1x1024xf32, #tpu.memory_space<vmem>>, %arg6: memref<1024x512xbf16, #tpu.memory_space<vmem>>, %arg7: memref<1x512xf32, #tpu.memory_space<vmem>>, %arg8: memref<1x512xf32, #tpu.memory_space<vmem>>, %arg9: memref<1x512xf32, #tpu.memory_space<vmem>>, %arg10: memref<8x512xf32, #tpu.memory_space<vmem>>) attributes {dimension_semantics = [#tpu.dimension_semantics<parallel>], iteration_bounds = array<i64: 4>, scalar_prefetch = 0 : i64, scratch_operands = 0 : i64, tpu.core_type = #tpu.core_type<tc>, window_params = [{pipeline_mode = #tpu.pipeline_mode<synchronous>, transform_indices = @transform_0, window_bounds = array<i64: 8, 26>}, {pipeline_mode = #tpu.pipeline_mode<synchronous>, transform_indices = @transform_1, window_bounds = array<i64: 26, 1024>}, {pipeline_mode = #tpu.pipeline_mode<synchronous>, transform_indices = @transform_2, window_bounds = array<i64: 1, 1024>}, {pipeline_mode = #tpu.pipeline_mode<synchronous>, transform_indices = @transform_3, window_bounds = array<i64: 1, 1024>}, {pipeline_mode = #tpu.pipeline_mode<synchronous>, transform_indices = @transform_4, window_bounds = array<i64: 1, 1024>}, {transform_indices = @transform_5, window_bounds = array<i64: 1024, 512>}, {transform_indices = @transform_6, window_bounds = array<i64: 1, 512>}, {transform_indices = @transform_7, window_bounds = array<i64: 1, 512>}, {transform_indices = @transform_8, window_bounds = array<i64: 1, 512>}, {transform_indices = @transform_9, window_bounds = array<i64: 8, 512>}]} {
    %c0 = arith.constant 0 : index
    %c0_0 = arith.constant 0 : index
    %0 = vector.load %arg1[%c0, %c0_0] : memref<8x26xf32, #tpu.memory_space<vmem>>, vector<8x26xf32>
    %1 = arith.truncf %0 : vector<8x26xf32> to vector<8x26xbf16>
    %c0_1 = arith.constant 0 : index
    %c0_2 = arith.constant 0 : index
    %2 = vector.load %arg2[%c0_1, %c0_2] : memref<26x1024xbf16, #tpu.memory_space<vmem>>, vector<26x1024xbf16>
    %cst = arith.constant dense<0.000000e+00> : vector<8x1024xf32>
    %3 = tpu.matmul %1, %2, %cst {dimension_numbers = #tpu.dot_dimension_numbers<[1], [0], [0], [1], [0, 0, 1, 1], [], []>} : vector<8x26xbf16>, vector<26x1024xbf16>, vector<8x1024xf32> -> vector<8x1024xf32>
    %c0_3 = arith.constant 0 : index
    %c0_4 = arith.constant 0 : index
    %4 = vector.load %arg3[%c0_3, %c0_4] : memref<1x1024xf32, #tpu.memory_space<vmem>>, vector<1x1024xf32>
    %5 = vector.broadcast %4 : vector<1x1024xf32> to vector<8x1024xf32>
    %6 = arith.addf %3, %5 : vector<8x1024xf32>
    %cst_5 = arith.constant dense<0.000000e+00> : vector<1024xf32>
    %7 = vector.multi_reduction <add>, %6, %cst_5 [0] : vector<8x1024xf32> to vector<1024xf32>
    %8 = vector.shape_cast %7 : vector<1024xf32> to vector<1x1024xf32>
    %cst_6 = arith.constant 8.000000e+00 : f32
    %9 = vector.broadcast %cst_6 : f32 to vector<1x1024xf32>
    %10 = arith.divf %8, %9 : vector<1x1024xf32>
    %11 = vector.broadcast %10 : vector<1x1024xf32> to vector<8x1024xf32>
    %12 = arith.subf %6, %11 : vector<8x1024xf32>
    %13 = arith.mulf %12, %12 : vector<8x1024xf32>
    %cst_7 = arith.constant dense<0.000000e+00> : vector<1024xf32>
    %14 = vector.multi_reduction <add>, %13, %cst_7 [0] : vector<8x1024xf32> to vector<1024xf32>
    %15 = vector.shape_cast %14 : vector<1024xf32> to vector<1x1024xf32>
    %cst_8 = arith.constant 8.000000e+00 : f32
    %16 = vector.broadcast %cst_8 : f32 to vector<1x1024xf32>
    %17 = arith.divf %15, %16 : vector<1x1024xf32>
    %c0_9 = arith.constant 0 : index
    %c0_10 = arith.constant 0 : index
    %18 = vector.load %arg4[%c0_9, %c0_10] : memref<1x1024xf32, #tpu.memory_space<vmem>>, vector<1x1024xf32>
    %cst_11 = arith.constant 9.99999974E-6 : f32
    %19 = vector.broadcast %cst_11 : f32 to vector<1x1024xf32>
    %20 = arith.addf %17, %19 : vector<1x1024xf32>
    %21 = math.rsqrt %20 : vector<1x1024xf32>
    %22 = arith.mulf %18, %21 : vector<1x1024xf32>
    %23 = vector.broadcast %22 : vector<1x1024xf32> to vector<8x1024xf32>
    %24 = arith.mulf %12, %23 : vector<8x1024xf32>
    %c0_12 = arith.constant 0 : index
    %c0_13 = arith.constant 0 : index
    %25 = vector.load %arg5[%c0_12, %c0_13] : memref<1x1024xf32, #tpu.memory_space<vmem>>, vector<1x1024xf32>
    %26 = vector.broadcast %25 : vector<1x1024xf32> to vector<8x1024xf32>
    %27 = arith.addf %24, %26 : vector<8x1024xf32>
    %cst_14 = arith.constant 0.000000e+00 : f32
    %28 = vector.broadcast %cst_14 : f32 to vector<8x1024xf32>
    %29 = arith.maximumf %27, %28 : vector<8x1024xf32>
    %30 = arith.truncf %29 : vector<8x1024xf32> to vector<8x1024xbf16>
    %c0_15 = arith.constant 0 : index
    %c0_16 = arith.constant 0 : index
    %31 = vector.load %arg6[%c0_15, %c0_16] : memref<1024x512xbf16, #tpu.memory_space<vmem>>, vector<1024x512xbf16>
    %cst_17 = arith.constant dense<0.000000e+00> : vector<8x512xf32>
    %32 = tpu.matmul %30, %31, %cst_17 {dimension_numbers = #tpu.dot_dimension_numbers<[1], [0], [0], [1], [0, 0, 1, 1], [], []>} : vector<8x1024xbf16>, vector<1024x512xbf16>, vector<8x512xf32> -> vector<8x512xf32>
    %c0_18 = arith.constant 0 : index
    %c0_19 = arith.constant 0 : index
    %33 = vector.load %arg7[%c0_18, %c0_19] : memref<1x512xf32, #tpu.memory_space<vmem>>, vector<1x512xf32>
    %34 = vector.broadcast %33 : vector<1x512xf32> to vector<8x512xf32>
    %35 = arith.addf %32, %34 : vector<8x512xf32>
    %cst_20 = arith.constant dense<0.000000e+00> : vector<512xf32>
    %36 = vector.multi_reduction <add>, %35, %cst_20 [0] : vector<8x512xf32> to vector<512xf32>
    %37 = vector.shape_cast %36 : vector<512xf32> to vector<1x512xf32>
    %cst_21 = arith.constant 8.000000e+00 : f32
    %38 = vector.broadcast %cst_21 : f32 to vector<1x512xf32>
    %39 = arith.divf %37, %38 : vector<1x512xf32>
    %40 = vector.broadcast %39 : vector<1x512xf32> to vector<8x512xf32>
    %41 = arith.subf %35, %40 : vector<8x512xf32>
    %42 = arith.mulf %41, %41 : vector<8x512xf32>
    %cst_22 = arith.constant dense<0.000000e+00> : vector<512xf32>
    %43 = vector.multi_reduction <add>, %42, %cst_22 [0] : vector<8x512xf32> to vector<512xf32>
    %44 = vector.shape_cast %43 : vector<512xf32> to vector<1x512xf32>
    %cst_23 = arith.constant 8.000000e+00 : f32
    %45 = vector.broadcast %cst_23 : f32 to vector<1x512xf32>
    %46 = arith.divf %44, %45 : vector<1x512xf32>
    %c0_24 = arith.constant 0 : index
    %c0_25 = arith.constant 0 : index
    %47 = vector.load %arg8[%c0_24, %c0_25] : memref<1x512xf32, #tpu.memory_space<vmem>>, vector<1x512xf32>
    %cst_26 = arith.constant 9.99999974E-6 : f32
    %48 = vector.broadcast %cst_26 : f32 to vector<1x512xf32>
    %49 = arith.addf %46, %48 : vector<1x512xf32>
    %50 = math.rsqrt %49 : vector<1x512xf32>
    %51 = arith.mulf %47, %50 : vector<1x512xf32>
    %52 = vector.broadcast %51 : vector<1x512xf32> to vector<8x512xf32>
    %53 = arith.mulf %41, %52 : vector<8x512xf32>
    %c0_27 = arith.constant 0 : index
    %c0_28 = arith.constant 0 : index
    %54 = vector.load %arg9[%c0_27, %c0_28] : memref<1x512xf32, #tpu.memory_space<vmem>>, vector<1x512xf32>
    %55 = vector.broadcast %54 : vector<1x512xf32> to vector<8x512xf32>
    %56 = arith.addf %53, %55 : vector<8x512xf32>
    %cst_29 = arith.constant 0.000000e+00 : f32
    %57 = vector.broadcast %cst_29 : f32 to vector<8x512xf32>
    %58 = arith.maximumf %56, %57 : vector<8x512xf32>
    %c0_30 = arith.constant 0 : index
    %c0_31 = arith.constant 0 : index
    %59 = vector.load %arg10[%c0_30, %c0_31] : memref<8x512xf32, #tpu.memory_space<vmem>>, vector<8x512xf32>
    tpu.vector_store %arg10[%c0_30, %c0_31], %58 {strides = array<i32>} : memref<8x512xf32, #tpu.memory_space<vmem>>, vector<8x512xf32>,
    return
  }
  func.func @transform_0(%arg0: i32) -> (i32, i32) {
    %c0_i32 = arith.constant 0 : i32
    %c0_i32_0 = arith.constant 0 : i32
    %c0_i32_1 = arith.constant 0 : i32
    return %c0_i32, %c0_i32_0 : i32, i32
  }
  func.func @transform_1(%arg0: i32) -> (i32, i32) {
    %c0_i32 = arith.constant 0 : i32
    %c0_i32_0 = arith.constant 0 : i32
    %c0_i32_1 = arith.constant 0 : i32
    return %c0_i32, %c0_i32_0 : i32, i32
  }
  func.func @transform_2(%arg0: i32) -> (i32, i32) {
    %c0_i32 = arith.constant 0 : i32
    %c0_i32_0 = arith.constant 0 : i32
    %c0_i32_1 = arith.constant 0 : i32
    return %c0_i32, %c0_i32_0 : i32, i32
  }
  func.func @transform_3(%arg0: i32) -> (i32, i32) {
    %c0_i32 = arith.constant 0 : i32
    %c0_i32_0 = arith.constant 0 : i32
    %c0_i32_1 = arith.constant 0 : i32
    return %c0_i32, %c0_i32_0 : i32, i32
  }
  func.func @transform_4(%arg0: i32) -> (i32, i32) {
    %c0_i32 = arith.constant 0 : i32
    %c0_i32_0 = arith.constant 0 : i32
    %c0_i32_1 = arith.constant 0 : i32
    return %c0_i32, %c0_i32_0 : i32, i32
  }
  func.func @transform_5(%arg0: i32) -> (i32, i32) {
    %c0_i32 = arith.constant 0 : i32
    %c0_i32_0 = arith.constant 0 : i32
    return %c0_i32, %arg0 : i32, i32
  }
  func.func @transform_6(%arg0: i32) -> (i32, i32) {
    %c0_i32 = arith.constant 0 : i32
    %c0_i32_0 = arith.constant 0 : i32
    return %c0_i32, %arg0 : i32, i32
  }
  func.func @transform_7(%arg0: i32) -> (i32, i32) {
    %c0_i32 = arith.constant 0 : i32
    %c0_i32_0 = arith.constant 0 : i32
    return %c0_i32, %arg0 : i32, i32
  }
  func.func @transform_8(%arg0: i32) -> (i32, i32) {
    %c0_i32 = arith.constant 0 : i32
    %c0_i32_0 = arith.constant 0 : i32
    return %c0_i32, %arg0 : i32, i32
  }
  func.func @transform_9(%arg0: i32) -> (i32, i32) {
    %c0_i32 = arith.constant 0 : i32
    %c0_i32_0 = arith.constant 0 : i32
    return %c0_i32, %arg0 : i32, i32
  }
}

module attributes {stable_mosaic.version = 11 : i64} {
  func.func @deconv_bn_relu_kernel(%arg0: memref<9x128x128xbf16, #tpu.memory_space<vmem>>, %arg1: memref<4x4x64x128xbf16, #tpu.memory_space<vmem>>, %arg2: memref<64x1xf32, #tpu.memory_space<vmem>>, %arg3: memref<64x1xf32, #tpu.memory_space<vmem>>, %arg4: memref<64x1xf32, #tpu.memory_space<vmem>>, %arg5: memref<64x512xf32, #tpu.memory_space<vmem>>) attributes {dimension_semantics = [], scalar_prefetch = 0 : i64, scratch_operands = 0 : i64, tpu.core_type = #tpu.core_type<tc>} {
    %c0 = arith.constant 0 : index
    %c0_0 = arith.constant 0 : index
    %c0_1 = arith.constant 0 : index
    %c0_2 = arith.constant 0 : index
    %0 = vector.load %arg1[%c0, %c0_0, %c0_1, %c0_2] : memref<4x4x64x128xbf16, #tpu.memory_space<vmem>>, vector<1x1x64x128xbf16>
    %1 = vector.shape_cast %0 : vector<1x1x64x128xbf16> to vector<64x128xbf16>
    %c0_3 = arith.constant 0 : index
    %c0_4 = arith.constant 0 : index
    %c0_5 = arith.constant 0 : index
    %2 = vector.load %arg0[%c0_3, %c0_4, %c0_5] : memref<9x128x128xbf16, #tpu.memory_space<vmem>>, vector<1x128x128xbf16>
    %3 = vector.shape_cast %2 : vector<1x128x128xbf16> to vector<128x128xbf16>
    %cst = arith.constant dense<0.000000e+00> : vector<64x128xf32>
    %4 = tpu.matmul %1, %3, %cst {dimension_numbers = #tpu.dot_dimension_numbers<[1], [0], [0], [1], [0, 0, 1, 1], [], []>} : vector<64x128xbf16>, vector<128x128xbf16>, vector<64x128xf32> -> vector<64x128xf32>
    %c0_6 = arith.constant 0 : index
    %c1 = arith.constant 1 : index
    %c0_7 = arith.constant 0 : index
    %c0_8 = arith.constant 0 : index
    %5 = vector.load %arg1[%c0_6, %c1, %c0_7, %c0_8] : memref<4x4x64x128xbf16, #tpu.memory_space<vmem>>, vector<1x1x64x128xbf16>
    %6 = vector.shape_cast %5 : vector<1x1x64x128xbf16> to vector<64x128xbf16>
    %c1_9 = arith.constant 1 : index
    %c0_10 = arith.constant 0 : index
    %c0_11 = arith.constant 0 : index
    %7 = vector.load %arg0[%c1_9, %c0_10, %c0_11] : memref<9x128x128xbf16, #tpu.memory_space<vmem>>, vector<1x128x128xbf16>
    %8 = vector.shape_cast %7 : vector<1x128x128xbf16> to vector<128x128xbf16>
    %cst_12 = arith.constant dense<0.000000e+00> : vector<64x128xf32>
    %9 = tpu.matmul %6, %8, %cst_12 {dimension_numbers = #tpu.dot_dimension_numbers<[1], [0], [0], [1], [0, 0, 1, 1], [], []>} : vector<64x128xbf16>, vector<128x128xbf16>, vector<64x128xf32> -> vector<64x128xf32>
    %10 = arith.addf %4, %9 : vector<64x128xf32>
    %c0_13 = arith.constant 0 : index
    %c2 = arith.constant 2 : index
    %c0_14 = arith.constant 0 : index
    %c0_15 = arith.constant 0 : index
    %11 = vector.load %arg1[%c0_13, %c2, %c0_14, %c0_15] : memref<4x4x64x128xbf16, #tpu.memory_space<vmem>>, vector<1x1x64x128xbf16>
    %12 = vector.shape_cast %11 : vector<1x1x64x128xbf16> to vector<64x128xbf16>
    %c3 = arith.constant 3 : index
    %c0_16 = arith.constant 0 : index
    %c0_17 = arith.constant 0 : index
    %13 = vector.load %arg0[%c3, %c0_16, %c0_17] : memref<9x128x128xbf16, #tpu.memory_space<vmem>>, vector<1x128x128xbf16>
    %14 = vector.shape_cast %13 : vector<1x128x128xbf16> to vector<128x128xbf16>
    %cst_18 = arith.constant dense<0.000000e+00> : vector<64x128xf32>
    %15 = tpu.matmul %12, %14, %cst_18 {dimension_numbers = #tpu.dot_dimension_numbers<[1], [0], [0], [1], [0, 0, 1, 1], [], []>} : vector<64x128xbf16>, vector<128x128xbf16>, vector<64x128xf32> -> vector<64x128xf32>
    %16 = arith.addf %10, %15 : vector<64x128xf32>
    %c0_19 = arith.constant 0 : index
    %c3_20 = arith.constant 3 : index
    %c0_21 = arith.constant 0 : index
    %c0_22 = arith.constant 0 : index
    %17 = vector.load %arg1[%c0_19, %c3_20, %c0_21, %c0_22] : memref<4x4x64x128xbf16, #tpu.memory_space<vmem>>, vector<1x1x64x128xbf16>
    %18 = vector.shape_cast %17 : vector<1x1x64x128xbf16> to vector<64x128xbf16>
    %c4 = arith.constant 4 : index
    %c0_23 = arith.constant 0 : index
    %c0_24 = arith.constant 0 : index
    %19 = vector.load %arg0[%c4, %c0_23, %c0_24] : memref<9x128x128xbf16, #tpu.memory_space<vmem>>, vector<1x128x128xbf16>
    %20 = vector.shape_cast %19 : vector<1x128x128xbf16> to vector<128x128xbf16>
    %cst_25 = arith.constant dense<0.000000e+00> : vector<64x128xf32>
    %21 = tpu.matmul %18, %20, %cst_25 {dimension_numbers = #tpu.dot_dimension_numbers<[1], [0], [0], [1], [0, 0, 1, 1], [], []>} : vector<64x128xbf16>, vector<128x128xbf16>, vector<64x128xf32> -> vector<64x128xf32>
    %22 = arith.addf %16, %21 : vector<64x128xf32>
    %c1_26 = arith.constant 1 : index
    %c0_27 = arith.constant 0 : index
    %c0_28 = arith.constant 0 : index
    %c0_29 = arith.constant 0 : index
    %23 = vector.load %arg1[%c1_26, %c0_27, %c0_28, %c0_29] : memref<4x4x64x128xbf16, #tpu.memory_space<vmem>>, vector<1x1x64x128xbf16>
    %24 = vector.shape_cast %23 : vector<1x1x64x128xbf16> to vector<64x128xbf16>
    %c1_30 = arith.constant 1 : index
    %c0_31 = arith.constant 0 : index
    %c0_32 = arith.constant 0 : index
    %25 = vector.load %arg0[%c1_30, %c0_31, %c0_32] : memref<9x128x128xbf16, #tpu.memory_space<vmem>>, vector<1x128x128xbf16>
    %26 = vector.shape_cast %25 : vector<1x128x128xbf16> to vector<128x128xbf16>
    %cst_33 = arith.constant dense<0.000000e+00> : vector<64x128xf32>
    %27 = tpu.matmul %24, %26, %cst_33 {dimension_numbers = #tpu.dot_dimension_numbers<[1], [0], [0], [1], [0, 0, 1, 1], [], []>} : vector<64x128xbf16>, vector<128x128xbf16>, vector<64x128xf32> -> vector<64x128xf32>
    %c1_34 = arith.constant 1 : index
    %c1_35 = arith.constant 1 : index
    %c0_36 = arith.constant 0 : index
    %c0_37 = arith.constant 0 : index
    %28 = vector.load %arg1[%c1_34, %c1_35, %c0_36, %c0_37] : memref<4x4x64x128xbf16, #tpu.memory_space<vmem>>, vector<1x1x64x128xbf16>
    %29 = vector.shape_cast %28 : vector<1x1x64x128xbf16> to vector<64x128xbf16>
    %c2_38 = arith.constant 2 : index
    %c0_39 = arith.constant 0 : index
    %c0_40 = arith.constant 0 : index
    %30 = vector.load %arg0[%c2_38, %c0_39, %c0_40] : memref<9x128x128xbf16, #tpu.memory_space<vmem>>, vector<1x128x128xbf16>
    %31 = vector.shape_cast %30 : vector<1x128x128xbf16> to vector<128x128xbf16>
    %cst_41 = arith.constant dense<0.000000e+00> : vector<64x128xf32>
    %32 = tpu.matmul %29, %31, %cst_41 {dimension_numbers = #tpu.dot_dimension_numbers<[1], [0], [0], [1], [0, 0, 1, 1], [], []>} : vector<64x128xbf16>, vector<128x128xbf16>, vector<64x128xf32> -> vector<64x128xf32>
    %33 = arith.addf %27, %32 : vector<64x128xf32>
    %c1_42 = arith.constant 1 : index
    %c2_43 = arith.constant 2 : index
    %c0_44 = arith.constant 0 : index
    %c0_45 = arith.constant 0 : index
    %34 = vector.load %arg1[%c1_42, %c2_43, %c0_44, %c0_45] : memref<4x4x64x128xbf16, #tpu.memory_space<vmem>>, vector<1x1x64x128xbf16>
    %35 = vector.shape_cast %34 : vector<1x1x64x128xbf16> to vector<64x128xbf16>
    %c4_46 = arith.constant 4 : index
    %c0_47 = arith.constant 0 : index
    %c0_48 = arith.constant 0 : index
    %36 = vector.load %arg0[%c4_46, %c0_47, %c0_48] : memref<9x128x128xbf16, #tpu.memory_space<vmem>>, vector<1x128x128xbf16>
    %37 = vector.shape_cast %36 : vector<1x128x128xbf16> to vector<128x128xbf16>
    %cst_49 = arith.constant dense<0.000000e+00> : vector<64x128xf32>
    %38 = tpu.matmul %35, %37, %cst_49 {dimension_numbers = #tpu.dot_dimension_numbers<[1], [0], [0], [1], [0, 0, 1, 1], [], []>} : vector<64x128xbf16>, vector<128x128xbf16>, vector<64x128xf32> -> vector<64x128xf32>
    %39 = arith.addf %33, %38 : vector<64x128xf32>
    %c1_50 = arith.constant 1 : index
    %c3_51 = arith.constant 3 : index
    %c0_52 = arith.constant 0 : index
    %c0_53 = arith.constant 0 : index
    %40 = vector.load %arg1[%c1_50, %c3_51, %c0_52, %c0_53] : memref<4x4x64x128xbf16, #tpu.memory_space<vmem>>, vector<1x1x64x128xbf16>
    %41 = vector.shape_cast %40 : vector<1x1x64x128xbf16> to vector<64x128xbf16>
    %c5 = arith.constant 5 : index
    %c0_54 = arith.constant 0 : index
    %c0_55 = arith.constant 0 : index
    %42 = vector.load %arg0[%c5, %c0_54, %c0_55] : memref<9x128x128xbf16, #tpu.memory_space<vmem>>, vector<1x128x128xbf16>
    %43 = vector.shape_cast %42 : vector<1x128x128xbf16> to vector<128x128xbf16>
    %cst_56 = arith.constant dense<0.000000e+00> : vector<64x128xf32>
    %44 = tpu.matmul %41, %43, %cst_56 {dimension_numbers = #tpu.dot_dimension_numbers<[1], [0], [0], [1], [0, 0, 1, 1], [], []>} : vector<64x128xbf16>, vector<128x128xbf16>, vector<64x128xf32> -> vector<64x128xf32>
    %45 = arith.addf %39, %44 : vector<64x128xf32>
    %c2_57 = arith.constant 2 : index
    %c0_58 = arith.constant 0 : index
    %c0_59 = arith.constant 0 : index
    %c0_60 = arith.constant 0 : index
    %46 = vector.load %arg1[%c2_57, %c0_58, %c0_59, %c0_60] : memref<4x4x64x128xbf16, #tpu.memory_space<vmem>>, vector<1x1x64x128xbf16>
    %47 = vector.shape_cast %46 : vector<1x1x64x128xbf16> to vector<64x128xbf16>
    %c3_61 = arith.constant 3 : index
    %c0_62 = arith.constant 0 : index
    %c0_63 = arith.constant 0 : index
    %48 = vector.load %arg0[%c3_61, %c0_62, %c0_63] : memref<9x128x128xbf16, #tpu.memory_space<vmem>>, vector<1x128x128xbf16>
    %49 = vector.shape_cast %48 : vector<1x128x128xbf16> to vector<128x128xbf16>
    %cst_64 = arith.constant dense<0.000000e+00> : vector<64x128xf32>
    %50 = tpu.matmul %47, %49, %cst_64 {dimension_numbers = #tpu.dot_dimension_numbers<[1], [0], [0], [1], [0, 0, 1, 1], [], []>} : vector<64x128xbf16>, vector<128x128xbf16>, vector<64x128xf32> -> vector<64x128xf32>
    %c2_65 = arith.constant 2 : index
    %c1_66 = arith.constant 1 : index
    %c0_67 = arith.constant 0 : index
    %c0_68 = arith.constant 0 : index
    %51 = vector.load %arg1[%c2_65, %c1_66, %c0_67, %c0_68] : memref<4x4x64x128xbf16, #tpu.memory_space<vmem>>, vector<1x1x64x128xbf16>
    %52 = vector.shape_cast %51 : vector<1x1x64x128xbf16> to vector<64x128xbf16>
    %c4_69 = arith.constant 4 : index
    %c0_70 = arith.constant 0 : index
    %c0_71 = arith.constant 0 : index
    %53 = vector.load %arg0[%c4_69, %c0_70, %c0_71] : memref<9x128x128xbf16, #tpu.memory_space<vmem>>, vector<1x128x128xbf16>
    %54 = vector.shape_cast %53 : vector<1x128x128xbf16> to vector<128x128xbf16>
    %cst_72 = arith.constant dense<0.000000e+00> : vector<64x128xf32>
    %55 = tpu.matmul %52, %54, %cst_72 {dimension_numbers = #tpu.dot_dimension_numbers<[1], [0], [0], [1], [0, 0, 1, 1], [], []>} : vector<64x128xbf16>, vector<128x128xbf16>, vector<64x128xf32> -> vector<64x128xf32>
    %56 = arith.addf %50, %55 : vector<64x128xf32>
    %c2_73 = arith.constant 2 : index
    %c2_74 = arith.constant 2 : index
    %c0_75 = arith.constant 0 : index
    %c0_76 = arith.constant 0 : index
    %57 = vector.load %arg1[%c2_73, %c2_74, %c0_75, %c0_76] : memref<4x4x64x128xbf16, #tpu.memory_space<vmem>>, vector<1x1x64x128xbf16>
    %58 = vector.shape_cast %57 : vector<1x1x64x128xbf16> to vector<64x128xbf16>
    %c6 = arith.constant 6 : index
    %c0_77 = arith.constant 0 : index
    %c0_78 = arith.constant 0 : index
    %59 = vector.load %arg0[%c6, %c0_77, %c0_78] : memref<9x128x128xbf16, #tpu.memory_space<vmem>>, vector<1x128x128xbf16>
    %60 = vector.shape_cast %59 : vector<1x128x128xbf16> to vector<128x128xbf16>
    %cst_79 = arith.constant dense<0.000000e+00> : vector<64x128xf32>
    %61 = tpu.matmul %58, %60, %cst_79 {dimension_numbers = #tpu.dot_dimension_numbers<[1], [0], [0], [1], [0, 0, 1, 1], [], []>} : vector<64x128xbf16>, vector<128x128xbf16>, vector<64x128xf32> -> vector<64x128xf32>
    %62 = arith.addf %56, %61 : vector<64x128xf32>
    %c2_80 = arith.constant 2 : index
    %c3_81 = arith.constant 3 : index
    %c0_82 = arith.constant 0 : index
    %c0_83 = arith.constant 0 : index
    %63 = vector.load %arg1[%c2_80, %c3_81, %c0_82, %c0_83] : memref<4x4x64x128xbf16, #tpu.memory_space<vmem>>, vector<1x1x64x128xbf16>
    %64 = vector.shape_cast %63 : vector<1x1x64x128xbf16> to vector<64x128xbf16>
    %c7 = arith.constant 7 : index
    %c0_84 = arith.constant 0 : index
    %c0_85 = arith.constant 0 : index
    %65 = vector.load %arg0[%c7, %c0_84, %c0_85] : memref<9x128x128xbf16, #tpu.memory_space<vmem>>, vector<1x128x128xbf16>
    %66 = vector.shape_cast %65 : vector<1x128x128xbf16> to vector<128x128xbf16>
    %cst_86 = arith.constant dense<0.000000e+00> : vector<64x128xf32>
    %67 = tpu.matmul %64, %66, %cst_86 {dimension_numbers = #tpu.dot_dimension_numbers<[1], [0], [0], [1], [0, 0, 1, 1], [], []>} : vector<64x128xbf16>, vector<128x128xbf16>, vector<64x128xf32> -> vector<64x128xf32>
    %68 = arith.addf %62, %67 : vector<64x128xf32>
    %c3_87 = arith.constant 3 : index
    %c0_88 = arith.constant 0 : index
    %c0_89 = arith.constant 0 : index
    %c0_90 = arith.constant 0 : index
    %69 = vector.load %arg1[%c3_87, %c0_88, %c0_89, %c0_90] : memref<4x4x64x128xbf16, #tpu.memory_space<vmem>>, vector<1x1x64x128xbf16>
    %70 = vector.shape_cast %69 : vector<1x1x64x128xbf16> to vector<64x128xbf16>
    %c4_91 = arith.constant 4 : index
    %c0_92 = arith.constant 0 : index
    %c0_93 = arith.constant 0 : index
    %71 = vector.load %arg0[%c4_91, %c0_92, %c0_93] : memref<9x128x128xbf16, #tpu.memory_space<vmem>>, vector<1x128x128xbf16>
    %72 = vector.shape_cast %71 : vector<1x128x128xbf16> to vector<128x128xbf16>
    %cst_94 = arith.constant dense<0.000000e+00> : vector<64x128xf32>
    %73 = tpu.matmul %70, %72, %cst_94 {dimension_numbers = #tpu.dot_dimension_numbers<[1], [0], [0], [1], [0, 0, 1, 1], [], []>} : vector<64x128xbf16>, vector<128x128xbf16>, vector<64x128xf32> -> vector<64x128xf32>
    %c3_95 = arith.constant 3 : index
    %c1_96 = arith.constant 1 : index
    %c0_97 = arith.constant 0 : index
    %c0_98 = arith.constant 0 : index
    %74 = vector.load %arg1[%c3_95, %c1_96, %c0_97, %c0_98] : memref<4x4x64x128xbf16, #tpu.memory_space<vmem>>, vector<1x1x64x128xbf16>
    %75 = vector.shape_cast %74 : vector<1x1x64x128xbf16> to vector<64x128xbf16>
    %c5_99 = arith.constant 5 : index
    %c0_100 = arith.constant 0 : index
    %c0_101 = arith.constant 0 : index
    %76 = vector.load %arg0[%c5_99, %c0_100, %c0_101] : memref<9x128x128xbf16, #tpu.memory_space<vmem>>, vector<1x128x128xbf16>
    %77 = vector.shape_cast %76 : vector<1x128x128xbf16> to vector<128x128xbf16>
    %cst_102 = arith.constant dense<0.000000e+00> : vector<64x128xf32>
    %78 = tpu.matmul %75, %77, %cst_102 {dimension_numbers = #tpu.dot_dimension_numbers<[1], [0], [0], [1], [0, 0, 1, 1], [], []>} : vector<64x128xbf16>, vector<128x128xbf16>, vector<64x128xf32> -> vector<64x128xf32>
    %79 = arith.addf %73, %78 : vector<64x128xf32>
    %c3_103 = arith.constant 3 : index
    %c2_104 = arith.constant 2 : index
    %c0_105 = arith.constant 0 : index
    %c0_106 = arith.constant 0 : index
    %80 = vector.load %arg1[%c3_103, %c2_104, %c0_105, %c0_106] : memref<4x4x64x128xbf16, #tpu.memory_space<vmem>>, vector<1x1x64x128xbf16>
    %81 = vector.shape_cast %80 : vector<1x1x64x128xbf16> to vector<64x128xbf16>
    %c7_107 = arith.constant 7 : index
    %c0_108 = arith.constant 0 : index
    %c0_109 = arith.constant 0 : index
    %82 = vector.load %arg0[%c7_107, %c0_108, %c0_109] : memref<9x128x128xbf16, #tpu.memory_space<vmem>>, vector<1x128x128xbf16>
    %83 = vector.shape_cast %82 : vector<1x128x128xbf16> to vector<128x128xbf16>
    %cst_110 = arith.constant dense<0.000000e+00> : vector<64x128xf32>
    %84 = tpu.matmul %81, %83, %cst_110 {dimension_numbers = #tpu.dot_dimension_numbers<[1], [0], [0], [1], [0, 0, 1, 1], [], []>} : vector<64x128xbf16>, vector<128x128xbf16>, vector<64x128xf32> -> vector<64x128xf32>
    %85 = arith.addf %79, %84 : vector<64x128xf32>
    %c3_111 = arith.constant 3 : index
    %c3_112 = arith.constant 3 : index
    %c0_113 = arith.constant 0 : index
    %c0_114 = arith.constant 0 : index
    %86 = vector.load %arg1[%c3_111, %c3_112, %c0_113, %c0_114] : memref<4x4x64x128xbf16, #tpu.memory_space<vmem>>, vector<1x1x64x128xbf16>
    %87 = vector.shape_cast %86 : vector<1x1x64x128xbf16> to vector<64x128xbf16>
    %c8 = arith.constant 8 : index
    %c0_115 = arith.constant 0 : index
    %c0_116 = arith.constant 0 : index
    %88 = vector.load %arg0[%c8, %c0_115, %c0_116] : memref<9x128x128xbf16, #tpu.memory_space<vmem>>, vector<1x128x128xbf16>
    %89 = vector.shape_cast %88 : vector<1x128x128xbf16> to vector<128x128xbf16>
    %cst_117 = arith.constant dense<0.000000e+00> : vector<64x128xf32>
    %90 = tpu.matmul %87, %89, %cst_117 {dimension_numbers = #tpu.dot_dimension_numbers<[1], [0], [0], [1], [0, 0, 1, 1], [], []>} : vector<64x128xbf16>, vector<128x128xbf16>, vector<64x128xf32> -> vector<64x128xf32>
    %91 = arith.addf %85, %90 : vector<64x128xf32>
    %92 = tpu.concatenate %22, %45, %68, %91 in 1 : vector<64x128xf32>, vector<64x128xf32>, vector<64x128xf32>, vector<64x128xf32> -> vector<64x512xf32>
    %c0_118 = arith.constant 0 : index
    %c0_119 = arith.constant 0 : index
    %93 = vector.load %arg2[%c0_118, %c0_119] : memref<64x1xf32, #tpu.memory_space<vmem>>, vector<64x1xf32>
    %94 = vector.broadcast %93 : vector<64x1xf32> to vector<64x512xf32>
    %95 = arith.addf %92, %94 : vector<64x512xf32>
    %cst_120 = arith.constant dense<0.000000e+00> : vector<64xf32>
    %96 = vector.multi_reduction <add>, %95, %cst_120 [1] : vector<64x512xf32> to vector<64xf32>
    %97 = vector.shape_cast %96 : vector<64xf32> to vector<64x1xf32>
    %cst_121 = arith.constant 5.120000e+02 : f32
    %98 = vector.broadcast %cst_121 : f32 to vector<64x1xf32>
    %99 = arith.divf %97, %98 : vector<64x1xf32>
    %100 = vector.broadcast %99 : vector<64x1xf32> to vector<64x512xf32>
    %101 = arith.subf %95, %100 : vector<64x512xf32>
    %102 = arith.mulf %101, %101 : vector<64x512xf32>
    %cst_122 = arith.constant dense<0.000000e+00> : vector<64xf32>
    %103 = vector.multi_reduction <add>, %102, %cst_122 [1] : vector<64x512xf32> to vector<64xf32>
    %104 = vector.shape_cast %103 : vector<64xf32> to vector<64x1xf32>
    %cst_123 = arith.constant 5.120000e+02 : f32
    %105 = vector.broadcast %cst_123 : f32 to vector<64x1xf32>
    %106 = arith.divf %104, %105 : vector<64x1xf32>
    %c0_124 = arith.constant 0 : index
    %c0_125 = arith.constant 0 : index
    %107 = vector.load %arg3[%c0_124, %c0_125] : memref<64x1xf32, #tpu.memory_space<vmem>>, vector<64x1xf32>
    %cst_126 = arith.constant 9.99999974E-6 : f32
    %108 = vector.broadcast %cst_126 : f32 to vector<64x1xf32>
    %109 = arith.addf %106, %108 : vector<64x1xf32>
    %110 = math.rsqrt %109 : vector<64x1xf32>
    %111 = arith.mulf %107, %110 : vector<64x1xf32>
    %112 = vector.broadcast %111 : vector<64x1xf32> to vector<64x512xf32>
    %113 = arith.mulf %101, %112 : vector<64x512xf32>
    %c0_127 = arith.constant 0 : index
    %c0_128 = arith.constant 0 : index
    %114 = vector.load %arg4[%c0_127, %c0_128] : memref<64x1xf32, #tpu.memory_space<vmem>>, vector<64x1xf32>
    %115 = vector.broadcast %114 : vector<64x1xf32> to vector<64x512xf32>
    %116 = arith.addf %113, %115 : vector<64x512xf32>
    %cst_129 = arith.constant 0.000000e+00 : f32
    %117 = vector.broadcast %cst_129 : f32 to vector<64x512xf32>
    %118 = arith.maximumf %116, %117 : vector<64x512xf32>
    %c0_130 = arith.constant 0 : index
    %c0_131 = arith.constant 0 : index
    %119 = vector.load %arg5[%c0_130, %c0_131] : memref<64x512xf32, #tpu.memory_space<vmem>>, vector<64x512xf32>
    tpu.vector_store %arg5[%c0_130, %c0_131], %118 {strides = array<i32>} : memref<64x512xf32, #tpu.memory_space<vmem>>, vector<64x512xf32>,
    return
  }
}

module attributes {stable_mosaic.version = 11 : i64} {
  func.func @deconv_tanh_kernel(%arg0: memref<9x64x512xbf16, #tpu.memory_space<vmem>>, %arg1: memref<4x4x3x64xbf16, #tpu.memory_space<vmem>>, %arg2: memref<3x1xf32, #tpu.memory_space<vmem>>, %arg3: memref<3x2048xf32, #tpu.memory_space<vmem>>) attributes {dimension_semantics = [], scalar_prefetch = 0 : i64, scratch_operands = 0 : i64, tpu.core_type = #tpu.core_type<tc>} {
    %c0 = arith.constant 0 : index
    %c0_0 = arith.constant 0 : index
    %c0_1 = arith.constant 0 : index
    %c0_2 = arith.constant 0 : index
    %0 = vector.load %arg1[%c0, %c0_0, %c0_1, %c0_2] : memref<4x4x3x64xbf16, #tpu.memory_space<vmem>>, vector<1x1x3x64xbf16>
    %1 = vector.shape_cast %0 : vector<1x1x3x64xbf16> to vector<3x64xbf16>
    %c0_3 = arith.constant 0 : index
    %c0_4 = arith.constant 0 : index
    %c0_5 = arith.constant 0 : index
    %2 = vector.load %arg0[%c0_3, %c0_4, %c0_5] : memref<9x64x512xbf16, #tpu.memory_space<vmem>>, vector<1x64x512xbf16>
    %3 = vector.shape_cast %2 : vector<1x64x512xbf16> to vector<64x512xbf16>
    %cst = arith.constant dense<0.000000e+00> : vector<3x512xf32>
    %4 = tpu.matmul %1, %3, %cst {dimension_numbers = #tpu.dot_dimension_numbers<[1], [0], [0], [1], [0, 0, 1, 1], [], []>} : vector<3x64xbf16>, vector<64x512xbf16>, vector<3x512xf32> -> vector<3x512xf32>
    %c0_6 = arith.constant 0 : index
    %c1 = arith.constant 1 : index
    %c0_7 = arith.constant 0 : index
    %c0_8 = arith.constant 0 : index
    %5 = vector.load %arg1[%c0_6, %c1, %c0_7, %c0_8] : memref<4x4x3x64xbf16, #tpu.memory_space<vmem>>, vector<1x1x3x64xbf16>
    %6 = vector.shape_cast %5 : vector<1x1x3x64xbf16> to vector<3x64xbf16>
    %c1_9 = arith.constant 1 : index
    %c0_10 = arith.constant 0 : index
    %c0_11 = arith.constant 0 : index
    %7 = vector.load %arg0[%c1_9, %c0_10, %c0_11] : memref<9x64x512xbf16, #tpu.memory_space<vmem>>, vector<1x64x512xbf16>
    %8 = vector.shape_cast %7 : vector<1x64x512xbf16> to vector<64x512xbf16>
    %cst_12 = arith.constant dense<0.000000e+00> : vector<3x512xf32>
    %9 = tpu.matmul %6, %8, %cst_12 {dimension_numbers = #tpu.dot_dimension_numbers<[1], [0], [0], [1], [0, 0, 1, 1], [], []>} : vector<3x64xbf16>, vector<64x512xbf16>, vector<3x512xf32> -> vector<3x512xf32>
    %10 = arith.addf %4, %9 : vector<3x512xf32>
    %c0_13 = arith.constant 0 : index
    %c2 = arith.constant 2 : index
    %c0_14 = arith.constant 0 : index
    %c0_15 = arith.constant 0 : index
    %11 = vector.load %arg1[%c0_13, %c2, %c0_14, %c0_15] : memref<4x4x3x64xbf16, #tpu.memory_space<vmem>>, vector<1x1x3x64xbf16>
    %12 = vector.shape_cast %11 : vector<1x1x3x64xbf16> to vector<3x64xbf16>
    %c3 = arith.constant 3 : index
    %c0_16 = arith.constant 0 : index
    %c0_17 = arith.constant 0 : index
    %13 = vector.load %arg0[%c3, %c0_16, %c0_17] : memref<9x64x512xbf16, #tpu.memory_space<vmem>>, vector<1x64x512xbf16>
    %14 = vector.shape_cast %13 : vector<1x64x512xbf16> to vector<64x512xbf16>
    %cst_18 = arith.constant dense<0.000000e+00> : vector<3x512xf32>
    %15 = tpu.matmul %12, %14, %cst_18 {dimension_numbers = #tpu.dot_dimension_numbers<[1], [0], [0], [1], [0, 0, 1, 1], [], []>} : vector<3x64xbf16>, vector<64x512xbf16>, vector<3x512xf32> -> vector<3x512xf32>
    %16 = arith.addf %10, %15 : vector<3x512xf32>
    %c0_19 = arith.constant 0 : index
    %c3_20 = arith.constant 3 : index
    %c0_21 = arith.constant 0 : index
    %c0_22 = arith.constant 0 : index
    %17 = vector.load %arg1[%c0_19, %c3_20, %c0_21, %c0_22] : memref<4x4x3x64xbf16, #tpu.memory_space<vmem>>, vector<1x1x3x64xbf16>
    %18 = vector.shape_cast %17 : vector<1x1x3x64xbf16> to vector<3x64xbf16>
    %c4 = arith.constant 4 : index
    %c0_23 = arith.constant 0 : index
    %c0_24 = arith.constant 0 : index
    %19 = vector.load %arg0[%c4, %c0_23, %c0_24] : memref<9x64x512xbf16, #tpu.memory_space<vmem>>, vector<1x64x512xbf16>
    %20 = vector.shape_cast %19 : vector<1x64x512xbf16> to vector<64x512xbf16>
    %cst_25 = arith.constant dense<0.000000e+00> : vector<3x512xf32>
    %21 = tpu.matmul %18, %20, %cst_25 {dimension_numbers = #tpu.dot_dimension_numbers<[1], [0], [0], [1], [0, 0, 1, 1], [], []>} : vector<3x64xbf16>, vector<64x512xbf16>, vector<3x512xf32> -> vector<3x512xf32>
    %22 = arith.addf %16, %21 : vector<3x512xf32>
    %c1_26 = arith.constant 1 : index
    %c0_27 = arith.constant 0 : index
    %c0_28 = arith.constant 0 : index
    %c0_29 = arith.constant 0 : index
    %23 = vector.load %arg1[%c1_26, %c0_27, %c0_28, %c0_29] : memref<4x4x3x64xbf16, #tpu.memory_space<vmem>>, vector<1x1x3x64xbf16>
    %24 = vector.shape_cast %23 : vector<1x1x3x64xbf16> to vector<3x64xbf16>
    %c1_30 = arith.constant 1 : index
    %c0_31 = arith.constant 0 : index
    %c0_32 = arith.constant 0 : index
    %25 = vector.load %arg0[%c1_30, %c0_31, %c0_32] : memref<9x64x512xbf16, #tpu.memory_space<vmem>>, vector<1x64x512xbf16>
    %26 = vector.shape_cast %25 : vector<1x64x512xbf16> to vector<64x512xbf16>
    %cst_33 = arith.constant dense<0.000000e+00> : vector<3x512xf32>
    %27 = tpu.matmul %24, %26, %cst_33 {dimension_numbers = #tpu.dot_dimension_numbers<[1], [0], [0], [1], [0, 0, 1, 1], [], []>} : vector<3x64xbf16>, vector<64x512xbf16>, vector<3x512xf32> -> vector<3x512xf32>
    %c1_34 = arith.constant 1 : index
    %c1_35 = arith.constant 1 : index
    %c0_36 = arith.constant 0 : index
    %c0_37 = arith.constant 0 : index
    %28 = vector.load %arg1[%c1_34, %c1_35, %c0_36, %c0_37] : memref<4x4x3x64xbf16, #tpu.memory_space<vmem>>, vector<1x1x3x64xbf16>
    %29 = vector.shape_cast %28 : vector<1x1x3x64xbf16> to vector<3x64xbf16>
    %c2_38 = arith.constant 2 : index
    %c0_39 = arith.constant 0 : index
    %c0_40 = arith.constant 0 : index
    %30 = vector.load %arg0[%c2_38, %c0_39, %c0_40] : memref<9x64x512xbf16, #tpu.memory_space<vmem>>, vector<1x64x512xbf16>
    %31 = vector.shape_cast %30 : vector<1x64x512xbf16> to vector<64x512xbf16>
    %cst_41 = arith.constant dense<0.000000e+00> : vector<3x512xf32>
    %32 = tpu.matmul %29, %31, %cst_41 {dimension_numbers = #tpu.dot_dimension_numbers<[1], [0], [0], [1], [0, 0, 1, 1], [], []>} : vector<3x64xbf16>, vector<64x512xbf16>, vector<3x512xf32> -> vector<3x512xf32>
    %33 = arith.addf %27, %32 : vector<3x512xf32>
    %c1_42 = arith.constant 1 : index
    %c2_43 = arith.constant 2 : index
    %c0_44 = arith.constant 0 : index
    %c0_45 = arith.constant 0 : index
    %34 = vector.load %arg1[%c1_42, %c2_43, %c0_44, %c0_45] : memref<4x4x3x64xbf16, #tpu.memory_space<vmem>>, vector<1x1x3x64xbf16>
    %35 = vector.shape_cast %34 : vector<1x1x3x64xbf16> to vector<3x64xbf16>
    %c4_46 = arith.constant 4 : index
    %c0_47 = arith.constant 0 : index
    %c0_48 = arith.constant 0 : index
    %36 = vector.load %arg0[%c4_46, %c0_47, %c0_48] : memref<9x64x512xbf16, #tpu.memory_space<vmem>>, vector<1x64x512xbf16>
    %37 = vector.shape_cast %36 : vector<1x64x512xbf16> to vector<64x512xbf16>
    %cst_49 = arith.constant dense<0.000000e+00> : vector<3x512xf32>
    %38 = tpu.matmul %35, %37, %cst_49 {dimension_numbers = #tpu.dot_dimension_numbers<[1], [0], [0], [1], [0, 0, 1, 1], [], []>} : vector<3x64xbf16>, vector<64x512xbf16>, vector<3x512xf32> -> vector<3x512xf32>
    %39 = arith.addf %33, %38 : vector<3x512xf32>
    %c1_50 = arith.constant 1 : index
    %c3_51 = arith.constant 3 : index
    %c0_52 = arith.constant 0 : index
    %c0_53 = arith.constant 0 : index
    %40 = vector.load %arg1[%c1_50, %c3_51, %c0_52, %c0_53] : memref<4x4x3x64xbf16, #tpu.memory_space<vmem>>, vector<1x1x3x64xbf16>
    %41 = vector.shape_cast %40 : vector<1x1x3x64xbf16> to vector<3x64xbf16>
    %c5 = arith.constant 5 : index
    %c0_54 = arith.constant 0 : index
    %c0_55 = arith.constant 0 : index
    %42 = vector.load %arg0[%c5, %c0_54, %c0_55] : memref<9x64x512xbf16, #tpu.memory_space<vmem>>, vector<1x64x512xbf16>
    %43 = vector.shape_cast %42 : vector<1x64x512xbf16> to vector<64x512xbf16>
    %cst_56 = arith.constant dense<0.000000e+00> : vector<3x512xf32>
    %44 = tpu.matmul %41, %43, %cst_56 {dimension_numbers = #tpu.dot_dimension_numbers<[1], [0], [0], [1], [0, 0, 1, 1], [], []>} : vector<3x64xbf16>, vector<64x512xbf16>, vector<3x512xf32> -> vector<3x512xf32>
    %45 = arith.addf %39, %44 : vector<3x512xf32>
    %c2_57 = arith.constant 2 : index
    %c0_58 = arith.constant 0 : index
    %c0_59 = arith.constant 0 : index
    %c0_60 = arith.constant 0 : index
    %46 = vector.load %arg1[%c2_57, %c0_58, %c0_59, %c0_60] : memref<4x4x3x64xbf16, #tpu.memory_space<vmem>>, vector<1x1x3x64xbf16>
    %47 = vector.shape_cast %46 : vector<1x1x3x64xbf16> to vector<3x64xbf16>
    %c3_61 = arith.constant 3 : index
    %c0_62 = arith.constant 0 : index
    %c0_63 = arith.constant 0 : index
    %48 = vector.load %arg0[%c3_61, %c0_62, %c0_63] : memref<9x64x512xbf16, #tpu.memory_space<vmem>>, vector<1x64x512xbf16>
    %49 = vector.shape_cast %48 : vector<1x64x512xbf16> to vector<64x512xbf16>
    %cst_64 = arith.constant dense<0.000000e+00> : vector<3x512xf32>
    %50 = tpu.matmul %47, %49, %cst_64 {dimension_numbers = #tpu.dot_dimension_numbers<[1], [0], [0], [1], [0, 0, 1, 1], [], []>} : vector<3x64xbf16>, vector<64x512xbf16>, vector<3x512xf32> -> vector<3x512xf32>
    %c2_65 = arith.constant 2 : index
    %c1_66 = arith.constant 1 : index
    %c0_67 = arith.constant 0 : index
    %c0_68 = arith.constant 0 : index
    %51 = vector.load %arg1[%c2_65, %c1_66, %c0_67, %c0_68] : memref<4x4x3x64xbf16, #tpu.memory_space<vmem>>, vector<1x1x3x64xbf16>
    %52 = vector.shape_cast %51 : vector<1x1x3x64xbf16> to vector<3x64xbf16>
    %c4_69 = arith.constant 4 : index
    %c0_70 = arith.constant 0 : index
    %c0_71 = arith.constant 0 : index
    %53 = vector.load %arg0[%c4_69, %c0_70, %c0_71] : memref<9x64x512xbf16, #tpu.memory_space<vmem>>, vector<1x64x512xbf16>
    %54 = vector.shape_cast %53 : vector<1x64x512xbf16> to vector<64x512xbf16>
    %cst_72 = arith.constant dense<0.000000e+00> : vector<3x512xf32>
    %55 = tpu.matmul %52, %54, %cst_72 {dimension_numbers = #tpu.dot_dimension_numbers<[1], [0], [0], [1], [0, 0, 1, 1], [], []>} : vector<3x64xbf16>, vector<64x512xbf16>, vector<3x512xf32> -> vector<3x512xf32>
    %56 = arith.addf %50, %55 : vector<3x512xf32>
    %c2_73 = arith.constant 2 : index
    %c2_74 = arith.constant 2 : index
    %c0_75 = arith.constant 0 : index
    %c0_76 = arith.constant 0 : index
    %57 = vector.load %arg1[%c2_73, %c2_74, %c0_75, %c0_76] : memref<4x4x3x64xbf16, #tpu.memory_space<vmem>>, vector<1x1x3x64xbf16>
    %58 = vector.shape_cast %57 : vector<1x1x3x64xbf16> to vector<3x64xbf16>
    %c6 = arith.constant 6 : index
    %c0_77 = arith.constant 0 : index
    %c0_78 = arith.constant 0 : index
    %59 = vector.load %arg0[%c6, %c0_77, %c0_78] : memref<9x64x512xbf16, #tpu.memory_space<vmem>>, vector<1x64x512xbf16>
    %60 = vector.shape_cast %59 : vector<1x64x512xbf16> to vector<64x512xbf16>
    %cst_79 = arith.constant dense<0.000000e+00> : vector<3x512xf32>
    %61 = tpu.matmul %58, %60, %cst_79 {dimension_numbers = #tpu.dot_dimension_numbers<[1], [0], [0], [1], [0, 0, 1, 1], [], []>} : vector<3x64xbf16>, vector<64x512xbf16>, vector<3x512xf32> -> vector<3x512xf32>
    %62 = arith.addf %56, %61 : vector<3x512xf32>
    %c2_80 = arith.constant 2 : index
    %c3_81 = arith.constant 3 : index
    %c0_82 = arith.constant 0 : index
    %c0_83 = arith.constant 0 : index
    %63 = vector.load %arg1[%c2_80, %c3_81, %c0_82, %c0_83] : memref<4x4x3x64xbf16, #tpu.memory_space<vmem>>, vector<1x1x3x64xbf16>
    %64 = vector.shape_cast %63 : vector<1x1x3x64xbf16> to vector<3x64xbf16>
    %c7 = arith.constant 7 : index
    %c0_84 = arith.constant 0 : index
    %c0_85 = arith.constant 0 : index
    %65 = vector.load %arg0[%c7, %c0_84, %c0_85] : memref<9x64x512xbf16, #tpu.memory_space<vmem>>, vector<1x64x512xbf16>
    %66 = vector.shape_cast %65 : vector<1x64x512xbf16> to vector<64x512xbf16>
    %cst_86 = arith.constant dense<0.000000e+00> : vector<3x512xf32>
    %67 = tpu.matmul %64, %66, %cst_86 {dimension_numbers = #tpu.dot_dimension_numbers<[1], [0], [0], [1], [0, 0, 1, 1], [], []>} : vector<3x64xbf16>, vector<64x512xbf16>, vector<3x512xf32> -> vector<3x512xf32>
    %68 = arith.addf %62, %67 : vector<3x512xf32>
    %c3_87 = arith.constant 3 : index
    %c0_88 = arith.constant 0 : index
    %c0_89 = arith.constant 0 : index
    %c0_90 = arith.constant 0 : index
    %69 = vector.load %arg1[%c3_87, %c0_88, %c0_89, %c0_90] : memref<4x4x3x64xbf16, #tpu.memory_space<vmem>>, vector<1x1x3x64xbf16>
    %70 = vector.shape_cast %69 : vector<1x1x3x64xbf16> to vector<3x64xbf16>
    %c4_91 = arith.constant 4 : index
    %c0_92 = arith.constant 0 : index
    %c0_93 = arith.constant 0 : index
    %71 = vector.load %arg0[%c4_91, %c0_92, %c0_93] : memref<9x64x512xbf16, #tpu.memory_space<vmem>>, vector<1x64x512xbf16>
    %72 = vector.shape_cast %71 : vector<1x64x512xbf16> to vector<64x512xbf16>
    %cst_94 = arith.constant dense<0.000000e+00> : vector<3x512xf32>
    %73 = tpu.matmul %70, %72, %cst_94 {dimension_numbers = #tpu.dot_dimension_numbers<[1], [0], [0], [1], [0, 0, 1, 1], [], []>} : vector<3x64xbf16>, vector<64x512xbf16>, vector<3x512xf32> -> vector<3x512xf32>
    %c3_95 = arith.constant 3 : index
    %c1_96 = arith.constant 1 : index
    %c0_97 = arith.constant 0 : index
    %c0_98 = arith.constant 0 : index
    %74 = vector.load %arg1[%c3_95, %c1_96, %c0_97, %c0_98] : memref<4x4x3x64xbf16, #tpu.memory_space<vmem>>, vector<1x1x3x64xbf16>
    %75 = vector.shape_cast %74 : vector<1x1x3x64xbf16> to vector<3x64xbf16>
    %c5_99 = arith.constant 5 : index
    %c0_100 = arith.constant 0 : index
    %c0_101 = arith.constant 0 : index
    %76 = vector.load %arg0[%c5_99, %c0_100, %c0_101] : memref<9x64x512xbf16, #tpu.memory_space<vmem>>, vector<1x64x512xbf16>
    %77 = vector.shape_cast %76 : vector<1x64x512xbf16> to vector<64x512xbf16>
    %cst_102 = arith.constant dense<0.000000e+00> : vector<3x512xf32>
    %78 = tpu.matmul %75, %77, %cst_102 {dimension_numbers = #tpu.dot_dimension_numbers<[1], [0], [0], [1], [0, 0, 1, 1], [], []>} : vector<3x64xbf16>, vector<64x512xbf16>, vector<3x512xf32> -> vector<3x512xf32>
    %79 = arith.addf %73, %78 : vector<3x512xf32>
    %c3_103 = arith.constant 3 : index
    %c2_104 = arith.constant 2 : index
    %c0_105 = arith.constant 0 : index
    %c0_106 = arith.constant 0 : index
    %80 = vector.load %arg1[%c3_103, %c2_104, %c0_105, %c0_106] : memref<4x4x3x64xbf16, #tpu.memory_space<vmem>>, vector<1x1x3x64xbf16>
    %81 = vector.shape_cast %80 : vector<1x1x3x64xbf16> to vector<3x64xbf16>
    %c7_107 = arith.constant 7 : index
    %c0_108 = arith.constant 0 : index
    %c0_109 = arith.constant 0 : index
    %82 = vector.load %arg0[%c7_107, %c0_108, %c0_109] : memref<9x64x512xbf16, #tpu.memory_space<vmem>>, vector<1x64x512xbf16>
    %83 = vector.shape_cast %82 : vector<1x64x512xbf16> to vector<64x512xbf16>
    %cst_110 = arith.constant dense<0.000000e+00> : vector<3x512xf32>
    %84 = tpu.matmul %81, %83, %cst_110 {dimension_numbers = #tpu.dot_dimension_numbers<[1], [0], [0], [1], [0, 0, 1, 1], [], []>} : vector<3x64xbf16>, vector<64x512xbf16>, vector<3x512xf32> -> vector<3x512xf32>
    %85 = arith.addf %79, %84 : vector<3x512xf32>
    %c3_111 = arith.constant 3 : index
    %c3_112 = arith.constant 3 : index
    %c0_113 = arith.constant 0 : index
    %c0_114 = arith.constant 0 : index
    %86 = vector.load %arg1[%c3_111, %c3_112, %c0_113, %c0_114] : memref<4x4x3x64xbf16, #tpu.memory_space<vmem>>, vector<1x1x3x64xbf16>
    %87 = vector.shape_cast %86 : vector<1x1x3x64xbf16> to vector<3x64xbf16>
    %c8 = arith.constant 8 : index
    %c0_115 = arith.constant 0 : index
    %c0_116 = arith.constant 0 : index
    %88 = vector.load %arg0[%c8, %c0_115, %c0_116] : memref<9x64x512xbf16, #tpu.memory_space<vmem>>, vector<1x64x512xbf16>
    %89 = vector.shape_cast %88 : vector<1x64x512xbf16> to vector<64x512xbf16>
    %cst_117 = arith.constant dense<0.000000e+00> : vector<3x512xf32>
    %90 = tpu.matmul %87, %89, %cst_117 {dimension_numbers = #tpu.dot_dimension_numbers<[1], [0], [0], [1], [0, 0, 1, 1], [], []>} : vector<3x64xbf16>, vector<64x512xbf16>, vector<3x512xf32> -> vector<3x512xf32>
    %91 = arith.addf %85, %90 : vector<3x512xf32>
    %92 = tpu.concatenate %22, %45, %68, %91 in 1 : vector<3x512xf32>, vector<3x512xf32>, vector<3x512xf32>, vector<3x512xf32> -> vector<3x2048xf32>
    %c0_118 = arith.constant 0 : index
    %c0_119 = arith.constant 0 : index
    %93 = vector.load %arg2[%c0_118, %c0_119] : memref<3x1xf32, #tpu.memory_space<vmem>>, vector<3x1xf32>
    %94 = vector.broadcast %93 : vector<3x1xf32> to vector<3x2048xf32>
    %95 = arith.addf %92, %94 : vector<3x2048xf32>
    %96 = math.tanh %95 : vector<3x2048xf32>
    %c0_120 = arith.constant 0 : index
    %c0_121 = arith.constant 0 : index
    %97 = vector.load %arg3[%c0_120, %c0_121] : memref<3x2048xf32, #tpu.memory_space<vmem>>, vector<3x2048xf32>
    tpu.vector_store %arg3[%c0_120, %c0_121], %96 {strides = array<i32>} : memref<3x2048xf32, #tpu.memory_space<vmem>>, vector<3x2048xf32>,
    return
  }
}

</mosaic_0001>

<bundles_post_ra>
// kernel: generator_forward.3
= control target key start
LH: loop header
LB: loop body
LE: loop exit
PB: predicated region body
PF: predicated region fallthrough
CT: control target
= control target key end

     0   :  { %s5204_s30 = smov 0   ;;  %s5206_s10 = smov 0   ;;  %s6833_s0 = inlined_call_operand.vmem [shape: f32[8,26], index: 0, kind: input, shape index: {}]   ;;  %s6834_s1 = inlined_call_operand.vmem [shape: bf16[26,1024], index: 1, kind: input, shape index: {}]   ;;  %s6835_s2 = inlined_call_operand.vmem [shape: f32[1,1024], index: 2, kind: input, shape index: {}]   ;;  %s6836_s3 = inlined_call_operand.vmem [shape: f32[1,1024], index: 3, kind: input, shape index: {}]   ;;  %s6837_s4 = inlined_call_operand.vmem [shape: f32[1,1024], index: 4, kind: input, shape index: {}]   ;;  %s6838_s5 = inlined_call_operand.vmem [shape: bf16[1024,2048], index: 5, kind: input, shape index: {}]   ;;  %s6839_s6 = inlined_call_operand.vmem [shape: f32[1,2048], index: 6, kind: input, shape index: {}]   ;;  %s6840_s7 = inlined_call_operand.vmem [shape: f32[1,2048], index: 7, kind: input, shape index: {}]   ;;  %s6841_s8 = inlined_call_operand.vmem [shape: f32[1,2048], index: 8, kind: input, shape index: {}]   ;;  %s6842_s9 = inlined_call_operand.vmem [shape: f32[8,2048], index: 9, kind: output, shape index: {}]  }
   0x1   :  { %s5208_s11 = smov 0  }
   0x2 LB: > { %s3693_s12 = sadd.s32 4294967295, %s5151_s11   ;;  %s5221_s13 = sadd.s32 1, %s5151_s11   ;;  %s5151_s11 = sphi %s5208_s11, %s6859_s11   ;;  %s5147_s10 = sphi %s5206_s10, %s6858_s10   ;;  %s5143_s30 = sphi %s5204_s30, %s6857_s30  }
   0x3   : > { %s128_s14 = ssub.s32 %s5151_s11, %s5221_s13  ;;  %s131_s15 = sadd.s32 1, %s5147_s10 }
   0x4   : > { %p129_p0 = scmp.eq.s32.totalorder %s128_s14, 0  ;;  %p138_p1 = scmp.ne.s32.totalorder %s5147_s10, %s5143_s30 }
   0x5   : > { %p139_p2 = scmp.eq.s32.totalorder %s5151_s11, 0  ;;  %p3696_p4 = scmp.ge.s32.totalorder %s5151_s11, 4 }
   0x6   : > { %s5230_s16 = scalar_select %p129_p0, %s5147_s10, %s131_s15  }
   0x7   : > { %p140_p3 = por %p139_p2, %p138_p1  ;;  %283 = sbr.rel (%p3696_p4) target bundleno = 272 (0x110), region = 36 }
   0xc   : > { %286 = sbr.rel (!%p140_p3) target bundleno = 272 (0x110), region = 40  ;;  %s288_s17 = sand.u32 (%p140_p3), 1, %s5147_s10  }
   0xd   : > { %s4805_s18 = sshll.u32 (%p140_p3), %s5151_s11, 4  ;;  %s3697_s19 = sshll.u32 (%p140_p3), %s288_s17, 11 }
   0xe   : > { %s5238_s22 = scalar_lea.vmem (%p140_p3), %s6838_s5, %s4805_s18  ;;  %s5243_s23 = scalar_lea.vmem (%p140_p3), [#allocation2], %s3697_s19 }
   0xf   : > { %v306_v0 = vld [vmem:[%s5238_s22] sm:$0xff] (%p140_p3)  ;;  %v308_v1 = vld [vmem:[%s5238_s22 + $0x8] sm:$0xff] (%p140_p3) }
  0x10   : > { %v310_v2 = vld [vmem:[%s5238_s22 + $0x40] sm:$0xff] (%p140_p3)  ;;  %307 = vst [vmem:[%s5243_s23] sm:$0xff] (%p140_p3), %v306_v0  ;;  %v312_v3 = vld [vmem:[%s5238_s22 + $0x48] sm:$0xff] (%p140_p3) }
  0x11   : > { %309 = vst [vmem:[%s5243_s23 + $0x8] sm:$0xff] %v308_v1  ;;  %v314_v4 = vld [vmem:[%s5238_s22 + $0x80] sm:$0xff]  ;;  %v316_v5 = vld [vmem:[%s5238_s22 + $0x88] sm:$0xff] }
  0x12   : > { %311 = vst [vmem:[%s5243_s23 + $0x10] sm:$0xff] %v310_v2  ;;  %v318_v6 = vld [vmem:[%s5238_s22 + $0xc0] sm:$0xff]  ;;  %v320_v7 = vld [vmem:[%s5238_s22 + $0xc8] sm:$0xff] }
  0x13   : > { %313 = vst [vmem:[%s5243_s23 + $0x18] sm:$0xff] %v312_v3  ;;  %v322_v8 = vld [vmem:[%s5238_s22 + $0x100] sm:$0xff]  ;;  %v324_v9 = vld [vmem:[%s5238_s22 + $0x108] sm:$0xff] }
  0x14   : > { %315 = vst [vmem:[%s5243_s23 + $0x20] sm:$0xff] %v314_v4  ;;  %v326_v10 = vld [vmem:[%s5238_s22 + $0x140] sm:$0xff]  ;;  %v328_v11 = vld [vmem:[%s5238_s22 + $0x148] sm:$0xff] }
  0x15   : > { %317 = vst [vmem:[%s5243_s23 + $0x28] sm:$0xff] %v316_v5  ;;  %v330_v12 = vld [vmem:[%s5238_s22 + $0x180] sm:$0xff]  ;;  %v332_v13 = vld [vmem:[%s5238_s22 + $0x188] sm:$0xff] }
  0x16   : > { %319 = vst [vmem:[%s5243_s23 + $0x30] sm:$0xff] %v318_v6  ;;  %v334_v14 = vld [vmem:[%s5238_s22 + $0x1c0] sm:$0xff]  ;;  %v336_v15 = vld [vmem:[%s5238_s22 + $0x1c8] sm:$0xff] }
  0x17   : > { %321 = vst [vmem:[%s5243_s23 + $0x38] sm:$0xff] %v320_v7  ;;  %v338_v16 = vld [vmem:[%s5238_s22 + $0x200] sm:$0xff]  ;;  %v340_v17 = vld [vmem:[%s5238_s22 + $0x208] sm:$0xff] }
  0x18   : > { %323 = vst [vmem:[%s5243_s23 + $0x40] sm:$0xff] %v322_v8  ;;  %v342_v18 = vld [vmem:[%s5238_s22 + $0x240] sm:$0xff]  ;;  %v344_v19 = vld [vmem:[%s5238_s22 + $0x248] sm:$0xff] }
  0x19   : > { %325 = vst [vmem:[%s5243_s23 + $0x48] sm:$0xff] %v324_v9  ;;  %v346_v20 = vld [vmem:[%s5238_s22 + $0x280] sm:$0xff]  ;;  %v348_v21 = vld [vmem:[%s5238_s22 + $0x288] sm:$0xff] }
  0x1a   : > { %327 = vst [vmem:[%s5243_s23 + $0x50] sm:$0xff] %v326_v10  ;;  %v350_v22 = vld [vmem:[%s5238_s22 + $0x2c0] sm:$0xff]  ;;  %v352_v23 = vld [vmem:[%s5238_s22 + $0x2c8] sm:$0xff] }
  0x1b   : > { %329 = vst [vmem:[%s5243_s23 + $0x58] sm:$0xff] %v328_v11  ;;  %v354_v24 = vld [vmem:[%s5238_s22 + $0x300] sm:$0xff]  ;;  %v356_v25 = vld [vmem:[%s5238_s22 + $0x308] sm:$0xff] }
  0x1c   : > { %331 = vst [vmem:[%s5243_s23 + $0x60] sm:$0xff] %v330_v12  ;;  %v358_v26 = vld [vmem:[%s5238_s22 + $0x340] sm:$0xff]  ;;  %v360_v27 = vld [vmem:[%s5238_s22 + $0x348] sm:$0xff] }
  0x1d   : > { %333 = vst [vmem:[%s5243_s23 + $0x68] sm:$0xff] %v332_v13  ;;  %v362_v28 = vld [vmem:[%s5238_s22 + $0x380] sm:$0xff]  ;;  %v364_v29 = vld [vmem:[%s5238_s22 + $0x388] sm:$0xff] }
  0x1e   : > { %335 = vst [vmem:[%s5243_s23 + $0x70] sm:$0xff] %v334_v14  ;;  %v366_v30 = vld [vmem:[%s5238_s22 + $0x3c0] sm:$0xff]  ;;  %v368_v31 = vld [vmem:[%s5238_s22 + $0x3c8] sm:$0xff] }
  0x1f   : > { %337 = vst [vmem:[%s5243_s23 + $0x78] sm:$0xff] %v336_v15  ;;  %v370_v32 = vld [vmem:[%s5238_s22 + $0x400] sm:$0xff]  ;;  %v372_v33 = vld [vmem:[%s5238_s22 + $0x408] sm:$0xff] }
  0x20   : > { %339 = vst [vmem:[%s5243_s23 + $0x80] sm:$0xff] %v338_v16  ;;  %v374_v34 = vld [vmem:[%s5238_s22 + $0x440] sm:$0xff]  ;;  %v376_v35 = vld [vmem:[%s5238_s22 + $0x448] sm:$0xff] }
  0x21   : > { %341 = vst [vmem:[%s5243_s23 + $0x88] sm:$0xff] %v340_v17  ;;  %v378_v36 = vld [vmem:[%s5238_s22 + $0x480] sm:$0xff]  ;;  %v380_v37 = vld [vmem:[%s5238_s22 + $0x488] sm:$0xff] }
  0x22   : > { %343 = vst [vmem:[%s5243_s23 + $0x90] sm:$0xff] %v342_v18  ;;  %v382_v38 = vld [vmem:[%s5238_s22 + $0x4c0] sm:$0xff]  ;;  %v384_v39 = vld [vmem:[%s5238_s22 + $0x4c8] sm:$0xff] }
  0x23   : > { %345 = vst [vmem:[%s5243_s23 + $0x98] sm:$0xff] %v344_v19  ;;  %v386_v40 = vld [vmem:[%s5238_s22 + $0x500] sm:$0xff]  ;;  %v388_v41 = vld [vmem:[%s5238_s22 + $0x508] sm:$0xff] }
  0x24   : > { %347 = vst [vmem:[%s5243_s23 + $0xa0] sm:$0xff] %v346_v20  ;;  %v390_v42 = vld [vmem:[%s5238_s22 + $0x540] sm:$0xff]  ;;  %v392_v43 = vld [vmem:[%s5238_s22 + $0x548] sm:$0xff] }
  0x25   : > { %349 = vst [vmem:[%s5243_s23 + $0xa8] sm:$0xff] %v348_v21  ;;  %v394_v44 = vld [vmem:[%s5238_s22 + $0x580] sm:$0xff]  ;;  %v396_v45 = vld [vmem:[%s5238_s22 + $0x588] sm:$0xff] }
  0x26   : > { %351 = vst [vmem:[%s5243_s23 + $0xb0] sm:$0xff] %v350_v22  ;;  %v398_v46 = vld [vmem:[%s5238_s22 + $0x5c0] sm:$0xff]  ;;  %v400_v47 = vld [vmem:[%s5238_s22 + $0x5c8] sm:$0xff] }
  0x27   : > { %353 = vst [vmem:[%s5243_s23 + $0xb8] sm:$0xff] %v352_v23  ;;  %v402_v48 = vld [vmem:[%s5238_s22 + $0x600] sm:$0xff]  ;;  %v404_v49 = vld [vmem:[%s5238_s22 + $0x608] sm:$0xff] }
  0x28   : > { %355 = vst [vmem:[%s5243_s23 + $0xc0] sm:$0xff] %v354_v24  ;;  %v406_v50 = vld [vmem:[%s5238_s22 + $0x640] sm:$0xff]  ;;  %v408_v51 = vld [vmem:[%s5238_s22 + $0x648] sm:$0xff] }
  0x29   : > { %357 = vst [vmem:[%s5243_s23 + $0xc8] sm:$0xff] %v356_v25  ;;  %v410_v52 = vld [vmem:[%s5238_s22 + $0x680] sm:$0xff]  ;;  %v412_v53 = vld [vmem:[%s5238_s22 + $0x688] sm:$0xff] }
  0x2a   : > { %359 = vst [vmem:[%s5243_s23 + $0xd0] sm:$0xff] %v358_v26  ;;  %v414_v54 = vld [vmem:[%s5238_s22 + $0x6c0] sm:$0xff]  ;;  %v416_v55 = vld [vmem:[%s5238_s22 + $0x6c8] sm:$0xff] }
  0x2b   : > { %361 = vst [vmem:[%s5243_s23 + $0xd8] sm:$0xff] %v360_v27  ;;  %v418_v56 = vld [vmem:[%s5238_s22 + $0x700] sm:$0xff]  ;;  %v420_v57 = vld [vmem:[%s5238_s22 + $0x708] sm:$0xff] }
  0x2c   : > { %363 = vst [vmem:[%s5243_s23 + $0xe0] sm:$0xff] %v362_v28  ;;  %v422_v58 = vld [vmem:[%s5238_s22 + $0x740] sm:$0xff]  ;;  %v424_v59 = vld [vmem:[%s5238_s22 + $0x748] sm:$0xff] }
  0x2d   : > { %365 = vst [vmem:[%s5243_s23 + $0xe8] sm:$0xff] %v364_v29  ;;  %v426_v60 = vld [vmem:[%s5238_s22 + $0x780] sm:$0xff]  ;;  %v428_v61 = vld [vmem:[%s5238_s22 + $0x788] sm:$0xff] }
  0x2e   : > { %367 = vst [vmem:[%s5243_s23 + $0xf0] sm:$0xff] %v366_v30  ;;  %v430_v62 = vld [vmem:[%s5238_s22 + $0x7c0] sm:$0xff]  ;;  %v432_v63 = vld [vmem:[%s5238_s22 + $0x7c8] sm:$0xff] }
  0x2f   : > { %369 = vst [vmem:[%s5243_s23 + $0xf8] sm:$0xff] %v368_v31  ;;  %v434_v0 = vld [vmem:[%s5238_s22 + $0x800] sm:$0xff]  ;;  %v436_v1 = vld [vmem:[%s5238_s22 + $0x808] sm:$0xff] }
  0x30   : > { %371 = vst [vmem:[%s5243_s23 + $0x100] sm:$0xff] %v370_v32  ;;  %v438_v2 = vld [vmem:[%s5238_s22 + $0x840] sm:$0xff]  ;;  %v440_v3 = vld [vmem:[%s5238_s22 + $0x848] sm:$0xff] }
  0x31   : > { %373 = vst [vmem:[%s5243_s23 + $0x108] sm:$0xff] %v372_v33  ;;  %v442_v4 = vld [vmem:[%s5238_s22 + $0x880] sm:$0xff]  ;;  %v444_v5 = vld [vmem:[%s5238_s22 + $0x888] sm:$0xff] }
  0x32   : > { %375 = vst [vmem:[%s5243_s23 + $0x110] sm:$0xff] %v374_v34  ;;  %v446_v6 = vld [vmem:[%s5238_s22 + $0x8c0] sm:$0xff]  ;;  %v448_v7 = vld [vmem:[%s5238_s22 + $0x8c8] sm:$0xff] }
  0x33   : > { %377 = vst [vmem:[%s5243_s23 + $0x118] sm:$0xff] %v376_v35  ;;  %v450_v8 = vld [vmem:[%s5238_s22 + $0x900] sm:$0xff]  ;;  %v452_v9 = vld [vmem:[%s5238_s22 + $0x908] sm:$0xff] }
  0x34   : > { %379 = vst [vmem:[%s5243_s23 + $0x120] sm:$0xff] %v378_v36  ;;  %v454_v10 = vld [vmem:[%s5238_s22 + $0x940] sm:$0xff]  ;;  %v456_v11 = vld [vmem:[%s5238_s22 + $0x948] sm:$0xff] }
  0x35   : > { %381 = vst [vmem:[%s5243_s23 + $0x128] sm:$0xff] %v380_v37  ;;  %v458_v12 = vld [vmem:[%s5238_s22 + $0x980] sm:$0xff]  ;;  %v460_v13 = vld [vmem:[%s5238_s22 + $0x988] sm:$0xff] }
  0x36   : > { %383 = vst [vmem:[%s5243_s23 + $0x130] sm:$0xff] %v382_v38  ;;  %v462_v14 = vld [vmem:[%s5238_s22 + $0x9c0] sm:$0xff]  ;;  %v464_v15 = vld [vmem:[%s5238_s22 + $0x9c8] sm:$0xff] }
  0x37   : > { %385 = vst [vmem:[%s5243_s23 + $0x138] sm:$0xff] %v384_v39  ;;  %v466_v16 = vld [vmem:[%s5238_s22 + $0xa00] sm:$0xff]  ;;  %v468_v17 = vld [vmem:[%s5238_s22 + $0xa08] sm:$0xff] }
  0x38   : > { %387 = vst [vmem:[%s5243_s23 + $0x140] sm:$0xff] %v386_v40  ;;  %v470_v18 = vld [vmem:[%s5238_s22 + $0xa40] sm:$0xff]  ;;  %v472_v19 = vld [vmem:[%s5238_s22 + $0xa48] sm:$0xff] }
  0x39   : > { %389 = vst [vmem:[%s5243_s23 + $0x148] sm:$0xff] %v388_v41  ;;  %v474_v20 = vld [vmem:[%s5238_s22 + $0xa80] sm:$0xff]  ;;  %v476_v21 = vld [vmem:[%s5238_s22 + $0xa88] sm:$0xff] }
  0x3a   : > { %391 = vst [vmem:[%s5243_s23 + $0x150] sm:$0xff] %v390_v42  ;;  %v478_v22 = vld [vmem:[%s5238_s22 + $0xac0] sm:$0xff]  ;;  %v480_v23 = vld [vmem:[%s5238_s22 + $0xac8] sm:$0xff] }
  0x3b   : > { %393 = vst [vmem:[%s5243_s23 + $0x158] sm:$0xff] %v392_v43  ;;  %v482_v24 = vld [vmem:[%s5238_s22 + $0xb00] sm:$0xff]  ;;  %v484_v25 = vld [vmem:[%s5238_s22 + $0xb08] sm:$0xff] }
  0x3c   : > { %395 = vst [vmem:[%s5243_s23 + $0x160] sm:$0xff] %v394_v44  ;;  %v486_v26 = vld [vmem:[%s5238_s22 + $0xb40] sm:$0xff]  ;;  %v488_v27 = vld [vmem:[%s5238_s22 + $0xb48] sm:$0xff] }
  0x3d   : > { %397 = vst [vmem:[%s5243_s23 + $0x168] sm:$0xff] %v396_v45  ;;  %v490_v28 = vld [vmem:[%s5238_s22 + $0xb80] sm:$0xff]  ;;  %v492_v29 = vld [vmem:[%s5238_s22 + $0xb88] sm:$0xff] }
  0x3e   : > { %399 = vst [vmem:[%s5243_s23 + $0x170] sm:$0xff] %v398_v46  ;;  %v494_v30 = vld [vmem:[%s5238_s22 + $0xbc0] sm:$0xff]  ;;  %v496_v31 = vld [vmem:[%s5238_s22 + $0xbc8] sm:$0xff] }
  0x3f   : > { %401 = vst [vmem:[%s5243_s23 + $0x178] sm:$0xff] %v400_v47  ;;  %v498_v32 = vld [vmem:[%s5238_s22 + $0xc00] sm:$0xff]  ;;  %v500_v33 = vld [vmem:[%s5238_s22 + $0xc08] sm:$0xff] }
  0x40   : > { %403 = vst [vmem:[%s5243_s23 + $0x180] sm:$0xff] %v402_v48  ;;  %v502_v34 = vld [vmem:[%s5238_s22 + $0xc40] sm:$0xff]  ;;  %v504_v35 = vld [vmem:[%s5238_s22 + $0xc48] sm:$0xff] }
  0x41   : > { %405 = vst [vmem:[%s5243_s23 + $0x188] sm:$0xff] %v404_v49  ;;  %v506_v36 = vld [vmem:[%s5238_s22 + $0xc80] sm:$0xff]  ;;  %v508_v37 = vld [vmem:[%s5238_s22 + $0xc88] sm:$0xff] }
  0x42   : > { %407 = vst [vmem:[%s5243_s23 + $0x190] sm:$0xff] %v406_v50  ;;  %v510_v38 = vld [vmem:[%s5238_s22 + $0xcc0] sm:$0xff]  ;;  %v512_v39 = vld [vmem:[%s5238_s22 + $0xcc8] sm:$0xff] }
  0x43   : > { %409 = vst [vmem:[%s5243_s23 + $0x198] sm:$0xff] %v408_v51  ;;  %v514_v40 = vld [vmem:[%s5238_s22 + $0xd00] sm:$0xff]  ;;  %v516_v41 = vld [vmem:[%s5238_s22 + $0xd08] sm:$0xff] }
  0x44   : > { %411 = vst [vmem:[%s5243_s23 + $0x1a0] sm:$0xff] %v410_v52  ;;  %v518_v42 = vld [vmem:[%s5238_s22 + $0xd40] sm:$0xff]  ;;  %v520_v43 = vld [vmem:[%s5238_s22 + $0xd48] sm:$0xff] }
  0x45   : > { %413 = vst [vmem:[%s5243_s23 + $0x1a8] sm:$0xff] %v412_v53  ;;  %v522_v44 = vld [vmem:[%s5238_s22 + $0xd80] sm:$0xff]  ;;  %v524_v45 = vld [vmem:[%s5238_s22 + $0xd88] sm:$0xff] }
  0x46   : > { %415 = vst [vmem:[%s5243_s23 + $0x1b0] sm:$0xff] %v414_v54  ;;  %v526_v46 = vld [vmem:[%s5238_s22 + $0xdc0] sm:$0xff]  ;;  %v528_v47 = vld [vmem:[%s5238_s22 + $0xdc8] sm:$0xff] }
  0x47   : > { %417 = vst [vmem:[%s5243_s23 + $0x1b8] sm:$0xff] %v416_v55  ;;  %v530_v48 = vld [vmem:[%s5238_s22 + $0xe00] sm:$0xff]  ;;  %v532_v49 = vld [vmem:[%s5238_s22 + $0xe08] sm:$0xff] }
  0x48   : > { %419 = vst [vmem:[%s5243_s23 + $0x1c0] sm:$0xff] %v418_v56  ;;  %v534_v50 = vld [vmem:[%s5238_s22 + $0xe40] sm:$0xff]  ;;  %v536_v51 = vld [vmem:[%s5238_s22 + $0xe48] sm:$0xff] }
  0x49   : > { %421 = vst [vmem:[%s5243_s23 + $0x1c8] sm:$0xff] %v420_v57  ;;  %v538_v52 = vld [vmem:[%s5238_s22 + $0xe80] sm:$0xff]  ;;  %v540_v53 = vld [vmem:[%s5238_s22 + $0xe88] sm:$0xff] }
  0x4a   : > { %423 = vst [vmem:[%s5243_s23 + $0x1d0] sm:$0xff] %v422_v58  ;;  %v542_v54 = vld [vmem:[%s5238_s22 + $0xec0] sm:$0xff]  ;;  %v544_v55 = vld [vmem:[%s5238_s22 + $0xec8] sm:$0xff] }
  0x4b   : > { %425 = vst [vmem:[%s5243_s23 + $0x1d8] sm:$0xff] %v424_v59  ;;  %v546_v56 = vld [vmem:[%s5238_s22 + $0xf00] sm:$0xff]  ;;  %v548_v57 = vld [vmem:[%s5238_s22 + $0xf08] sm:$0xff] }
  0x4c   : > { %427 = vst [vmem:[%s5243_s23 + $0x1e0] sm:$0xff] %v426_v60  ;;  %v550_v58 = vld [vmem:[%s5238_s22 + $0xf40] sm:$0xff]  ;;  %v552_v59 = vld [vmem:[%s5238_s22 + $0xf48] sm:$0xff] }
  0x4d   : > { %429 = vst [vmem:[%s5243_s23 + $0x1e8] sm:$0xff] %v428_v61  ;;  %v554_v60 = vld [vmem:[%s5238_s22 + $0xf80] sm:$0xff]  ;;  %v556_v61 = vld [vmem:[%s5238_s22 + $0xf88] sm:$0xff] }
  0x4e   : > { %431 = vst [vmem:[%s5243_s23 + $0x1f0] sm:$0xff] %v430_v62  ;;  %v558_v62 = vld [vmem:[%s5238_s22 + $0xfc0] sm:$0xff] }
  0x4f   : > { %433 = vst [vmem:[%s5243_s23 + $0x1f8] sm:$0xff] %v432_v63  ;;  %v560_v63 = vld [vmem:[%s5238_s22 + $0xfc8] sm:$0xff] }
  0x50   : > { %435 = vst [vmem:[%s5243_s23 + $0x200] sm:$0xff] %v434_v0  ;;  %v562_v0 = vld [vmem:[%s5238_s22 + $0x1000] sm:$0xff] }
  0x51   : > { %437 = vst [vmem:[%s5243_s23 + $0x208] sm:$0xff] %v436_v1  ;;  %v564_v1 = vld [vmem:[%s5238_s22 + $0x1008] sm:$0xff] }
  0x52   : > { %439 = vst [vmem:[%s5243_s23 + $0x210] sm:$0xff] %v438_v2  ;;  %v566_v2 = vld [vmem:[%s5238_s22 + $0x1040] sm:$0xff] }
  0x53   : > { %441 = vst [vmem:[%s5243_s23 + $0x218] sm:$0xff] %v440_v3  ;;  %v568_v3 = vld [vmem:[%s5238_s22 + $0x1048] sm:$0xff] }
  0x54   : > { %443 = vst [vmem:[%s5243_s23 + $0x220] sm:$0xff] %v442_v4  ;;  %v570_v4 = vld [vmem:[%s5238_s22 + $0x1080] sm:$0xff] }
  0x55   : > { %445 = vst [vmem:[%s5243_s23 + $0x228] sm:$0xff] %v444_v5  ;;  %v572_v5 = vld [vmem:[%s5238_s22 + $0x1088] sm:$0xff] }
  0x56   : > { %447 = vst [vmem:[%s5243_s23 + $0x230] sm:$0xff] %v446_v6  ;;  %v574_v6 = vld [vmem:[%s5238_s22 + $0x10c0] sm:$0xff] }
  0x57   : > { %449 = vst [vmem:[%s5243_s23 + $0x238] sm:$0xff] %v448_v7  ;;  %v576_v7 = vld [vmem:[%s5238_s22 + $0x10c8] sm:$0xff] }
  0x58   : > { %451 = vst [vmem:[%s5243_s23 + $0x240] sm:$0xff] %v450_v8  ;;  %v578_v8 = vld [vmem:[%s5238_s22 + $0x1100] sm:$0xff] }
  0x59   : > { %453 = vst [vmem:[%s5243_s23 + $0x248] sm:$0xff] %v452_v9  ;;  %v580_v9 = vld [vmem:[%s5238_s22 + $0x1108] sm:$0xff] }
  0x5a   : > { %455 = vst [vmem:[%s5243_s23 + $0x250] sm:$0xff] %v454_v10  ;;  %v582_v10 = vld [vmem:[%s5238_s22 + $0x1140] sm:$0xff] }
  0x5b   : > { %457 = vst [vmem:[%s5243_s23 + $0x258] sm:$0xff] %v456_v11  ;;  %v584_v11 = vld [vmem:[%s5238_s22 + $0x1148] sm:$0xff] }
  0x5c   : > { %459 = vst [vmem:[%s5243_s23 + $0x260] sm:$0xff] %v458_v12  ;;  %v586_v12 = vld [vmem:[%s5238_s22 + $0x1180] sm:$0xff] }
  0x5d   : > { %461 = vst [vmem:[%s5243_s23 + $0x268] sm:$0xff] %v460_v13  ;;  %v588_v13 = vld [vmem:[%s5238_s22 + $0x1188] sm:$0xff] }
  0x5e   : > { %463 = vst [vmem:[%s5243_s23 + $0x270] sm:$0xff] %v462_v14  ;;  %v590_v14 = vld [vmem:[%s5238_s22 + $0x11c0] sm:$0xff] }
  0x5f   : > { %465 = vst [vmem:[%s5243_s23 + $0x278] sm:$0xff] %v464_v15  ;;  %v592_v15 = vld [vmem:[%s5238_s22 + $0x11c8] sm:$0xff] }
  0x60   : > { %467 = vst [vmem:[%s5243_s23 + $0x280] sm:$0xff] %v466_v16  ;;  %v594_v16 = vld [vmem:[%s5238_s22 + $0x1200] sm:$0xff] }
  0x61   : > { %469 = vst [vmem:[%s5243_s23 + $0x288] sm:$0xff] %v468_v17  ;;  %v596_v17 = vld [vmem:[%s5238_s22 + $0x1208] sm:$0xff] }
  0x62   : > { %471 = vst [vmem:[%s5243_s23 + $0x290] sm:$0xff] %v470_v18  ;;  %v598_v18 = vld [vmem:[%s5238_s22 + $0x1240] sm:$0xff] }
  0x63   : > { %473 = vst [vmem:[%s5243_s23 + $0x298] sm:$0xff] %v472_v19  ;;  %v600_v19 = vld [vmem:[%s5238_s22 + $0x1248] sm:$0xff] }
  0x64   : > { %475 = vst [vmem:[%s5243_s23 + $0x2a0] sm:$0xff] %v474_v20  ;;  %v602_v20 = vld [vmem:[%s5238_s22 + $0x1280] sm:$0xff] }
  0x65   : > { %477 = vst [vmem:[%s5243_s23 + $0x2a8] sm:$0xff] %v476_v21  ;;  %v604_v21 = vld [vmem:[%s5238_s22 + $0x1288] sm:$0xff] }
  0x66   : > { %479 = vst [vmem:[%s5243_s23 + $0x2b0] sm:$0xff] %v478_v22  ;;  %v606_v22 = vld [vmem:[%s5238_s22 + $0x12c0] sm:$0xff] }
  0x67   : > { %481 = vst [vmem:[%s5243_s23 + $0x2b8] sm:$0xff] %v480_v23  ;;  %v608_v23 = vld [vmem:[%s5238_s22 + $0x12c8] sm:$0xff] }
  0x68   : > { %483 = vst [vmem:[%s5243_s23 + $0x2c0] sm:$0xff] %v482_v24  ;;  %v610_v24 = vld [vmem:[%s5238_s22 + $0x1300] sm:$0xff] }
  0x69   : > { %485 = vst [vmem:[%s5243_s23 + $0x2c8] sm:$0xff] %v484_v25  ;;  %v612_v25 = vld [vmem:[%s5238_s22 + $0x1308] sm:$0xff] }
  0x6a   : > { %487 = vst [vmem:[%s5243_s23 + $0x2d0] sm:$0xff] %v486_v26  ;;  %v614_v26 = vld [vmem:[%s5238_s22 + $0x1340] sm:$0xff] }
  0x6b   : > { %489 = vst [vmem:[%s5243_s23 + $0x2d8] sm:$0xff] %v488_v27  ;;  %v616_v27 = vld [vmem:[%s5238_s22 + $0x1348] sm:$0xff] }
  0x6c   : > { %491 = vst [vmem:[%s5243_s23 + $0x2e0] sm:$0xff] %v490_v28  ;;  %v618_v28 = vld [vmem:[%s5238_s22 + $0x1380] sm:$0xff] }
  0x6d   : > { %493 = vst [vmem:[%s5243_s23 + $0x2e8] sm:$0xff] %v492_v29  ;;  %v620_v29 = vld [vmem:[%s5238_s22 + $0x1388] sm:$0xff] }
  0x6e   : > { %495 = vst [vmem:[%s5243_s23 + $0x2f0] sm:$0xff] %v494_v30  ;;  %v622_v30 = vld [vmem:[%s5238_s22 + $0x13c0] sm:$0xff] }
  0x6f   : > { %497 = vst [vmem:[%s5243_s23 + $0x2f8] sm:$0xff] %v496_v31  ;;  %v624_v31 = vld [vmem:[%s5238_s22 + $0x13c8] sm:$0xff] }
  0x70   : > { %499 = vst [vmem:[%s5243_s23 + $0x300] sm:$0xff] %v498_v32  ;;  %v626_v32 = vld [vmem:[%s5238_s22 + $0x1400] sm:$0xff] }
  0x71   : > { %501 = vst [vmem:[%s5243_s23 + $0x308] sm:$0xff] %v500_v33  ;;  %v628_v33 = vld [vmem:[%s5238_s22 + $0x1408] sm:$0xff] }
  0x72   : > { %503 = vst [vmem:[%s5243_s23 + $0x310] sm:$0xff] %v502_v34  ;;  %v630_v34 = vld [vmem:[%s5238_s22 + $0x1440] sm:$0xff] }
  0x73   : > { %505 = vst [vmem:[%s5243_s23 + $0x318] sm:$0xff] %v504_v35  ;;  %v632_v35 = vld [vmem:[%s5238_s22 + $0x1448] sm:$0xff] }
  0x74   : > { %507 = vst [vmem:[%s5243_s23 + $0x320] sm:$0xff] %v506_v36  ;;  %v634_v36 = vld [vmem:[%s5238_s22 + $0x1480] sm:$0xff] }
  0x75   : > { %509 = vst [vmem:[%s5243_s23 + $0x328] sm:$0xff] %v508_v37  ;;  %v636_v37 = vld [vmem:[%s5238_s22 + $0x1488] sm:$0xff] }
  0x76   : > { %511 = vst [vmem:[%s5243_s23 + $0x330] sm:$0xff] %v510_v38  ;;  %v638_v38 = vld [vmem:[%s5238_s22 + $0x14c0] sm:$0xff] }
  0x77   : > { %513 = vst [vmem:[%s5243_s23 + $0x338] sm:$0xff] %v512_v39  ;;  %v640_v39 = vld [vmem:[%s5238_s22 + $0x14c8] sm:$0xff] }
  0x78   : > { %515 = vst [vmem:[%s5243_s23 + $0x340] sm:$0xff] %v514_v40  ;;  %v642_v40 = vld [vmem:[%s5238_s22 + $0x1500] sm:$0xff] }
  0x79   : > { %517 = vst [vmem:[%s5243_s23 + $0x348] sm:$0xff] %v516_v41  ;;  %v644_v41 = vld [vmem:[%s5238_s22 + $0x1508] sm:$0xff] }
  0x7a   : > { %519 = vst [vmem:[%s5243_s23 + $0x350] sm:$0xff] %v518_v42  ;;  %v646_v42 = vld [vmem:[%s5238_s22 + $0x1540] sm:$0xff] }
  0x7b   : > { %521 = vst [vmem:[%s5243_s23 + $0x358] sm:$0xff] %v520_v43  ;;  %v648_v43 = vld [vmem:[%s5238_s22 + $0x1548] sm:$0xff] }
  0x7c   : > { %523 = vst [vmem:[%s5243_s23 + $0x360] sm:$0xff] %v522_v44  ;;  %v650_v44 = vld [vmem:[%s5238_s22 + $0x1580] sm:$0xff] }
  0x7d   : > { %525 = vst [vmem:[%s5243_s23 + $0x368] sm:$0xff] %v524_v45  ;;  %v652_v45 = vld [vmem:[%s5238_s22 + $0x1588] sm:$0xff] }
  0x7e   : > { %527 = vst [vmem:[%s5243_s23 + $0x370] sm:$0xff] %v526_v46  ;;  %v654_v46 = vld [vmem:[%s5238_s22 + $0x15c0] sm:$0xff] }
  0x7f   : > { %529 = vst [vmem:[%s5243_s23 + $0x378] sm:$0xff] %v528_v47  ;;  %v656_v47 = vld [vmem:[%s5238_s22 + $0x15c8] sm:$0xff] }
  0x80   : > { %531 = vst [vmem:[%s5243_s23 + $0x380] sm:$0xff] %v530_v48  ;;  %v658_v48 = vld [vmem:[%s5238_s22 + $0x1600] sm:$0xff] }
  0x81   : > { %533 = vst [vmem:[%s5243_s23 + $0x388] sm:$0xff] %v532_v49  ;;  %v660_v49 = vld [vmem:[%s5238_s22 + $0x1608] sm:$0xff] }
  0x82   : > { %535 = vst [vmem:[%s5243_s23 + $0x390] sm:$0xff] %v534_v50  ;;  %v662_v50 = vld [vmem:[%s5238_s22 + $0x1640] sm:$0xff] }
  0x83   : > { %537 = vst [vmem:[%s5243_s23 + $0x398] sm:$0xff] %v536_v51  ;;  %v664_v51 = vld [vmem:[%s5238_s22 + $0x1648] sm:$0xff] }
  0x84   : > { %539 = vst [vmem:[%s5243_s23 + $0x3a0] sm:$0xff] %v538_v52  ;;  %v666_v52 = vld [vmem:[%s5238_s22 + $0x1680] sm:$0xff] }
  0x85   : > { %541 = vst [vmem:[%s5243_s23 + $0x3a8] sm:$0xff] %v540_v53  ;;  %v668_v53 = vld [vmem:[%s5238_s22 + $0x1688] sm:$0xff] }
  0x86   : > { %543 = vst [vmem:[%s5243_s23 + $0x3b0] sm:$0xff] %v542_v54  ;;  %v670_v54 = vld [vmem:[%s5238_s22 + $0x16c0] sm:$0xff] }
  0x87   : > { %545 = vst [vmem:[%s5243_s23 + $0x3b8] sm:$0xff] %v544_v55  ;;  %v672_v55 = vld [vmem:[%s5238_s22 + $0x16c8] sm:$0xff] }
  0x88   : > { %547 = vst [vmem:[%s5243_s23 + $0x3c0] sm:$0xff] %v546_v56  ;;  %v674_v56 = vld [vmem:[%s5238_s22 + $0x1700] sm:$0xff] }
  0x89   : > { %549 = vst [vmem:[%s5243_s23 + $0x3c8] sm:$0xff] %v548_v57  ;;  %v676_v57 = vld [vmem:[%s5238_s22 + $0x1708] sm:$0xff] }
  0x8a   : > { %551 = vst [vmem:[%s5243_s23 + $0x3d0] sm:$0xff] %v550_v58  ;;  %v678_v58 = vld [vmem:[%s5238_s22 + $0x1740] sm:$0xff] }
  0x8b   : > { %553 = vst [vmem:[%s5243_s23 + $0x3d8] sm:$0xff] %v552_v59  ;;  %v680_v59 = vld [vmem:[%s5238_s22 + $0x1748] sm:$0xff] }
  0x8c   : > { %555 = vst [vmem:[%s5243_s23 + $0x3e0] sm:$0xff] %v554_v60  ;;  %v682_v60 = vld [vmem:[%s5238_s22 + $0x1780] sm:$0xff] }
  0x8d   : > { %557 = vst [vmem:[%s5243_s23 + $0x3e8] sm:$0xff] %v556_v61  ;;  %v684_v61 = vld [vmem:[%s5238_s22 + $0x1788] sm:$0xff] }
  0x8e   : > { %559 = vst [vmem:[%s5243_s23 + $0x3f0] sm:$0xff] %v558_v62  ;;  %v686_v62 = vld [vmem:[%s5238_s22 + $0x17c0] sm:$0xff] }
  0x8f   : > { %561 = vst [vmem:[%s5243_s23 + $0x3f8] sm:$0xff] %v560_v63  ;;  %v688_v63 = vld [vmem:[%s5238_s22 + $0x17c8] sm:$0xff] }
  0x90   : > { %563 = vst [vmem:[%s5243_s23 + $0x400] sm:$0xff] %v562_v0  ;;  %v690_v0 = vld [vmem:[%s5238_s22 + $0x1800] sm:$0xff] }
  0x91   : > { %565 = vst [vmem:[%s5243_s23 + $0x408] sm:$0xff] %v564_v1  ;;  %v692_v1 = vld [vmem:[%s5238_s22 + $0x1808] sm:$0xff] }
  0x92   : > { %567 = vst [vmem:[%s5243_s23 + $0x410] sm:$0xff] %v566_v2  ;;  %v694_v2 = vld [vmem:[%s5238_s22 + $0x1840] sm:$0xff] }
  0x93   : > { %569 = vst [vmem:[%s5243_s23 + $0x418] sm:$0xff] %v568_v3  ;;  %v696_v3 = vld [vmem:[%s5238_s22 + $0x1848] sm:$0xff] }
  0x94   : > { %571 = vst [vmem:[%s5243_s23 + $0x420] sm:$0xff] %v570_v4  ;;  %v698_v4 = vld [vmem:[%s5238_s22 + $0x1880] sm:$0xff] }
  0x95   : > { %573 = vst [vmem:[%s5243_s23 + $0x428] sm:$0xff] %v572_v5  ;;  %v700_v5 = vld [vmem:[%s5238_s22 + $0x1888] sm:$0xff] }
  0x96   : > { %575 = vst [vmem:[%s5243_s23 + $0x430] sm:$0xff] %v574_v6  ;;  %v702_v6 = vld [vmem:[%s5238_s22 + $0x18c0] sm:$0xff] }
  0x97   : > { %577 = vst [vmem:[%s5243_s23 + $0x438] sm:$0xff] %v576_v7  ;;  %v704_v7 = vld [vmem:[%s5238_s22 + $0x18c8] sm:$0xff] }
  0x98   : > { %579 = vst [vmem:[%s5243_s23 + $0x440] sm:$0xff] %v578_v8  ;;  %v706_v8 = vld [vmem:[%s5238_s22 + $0x1900] sm:$0xff] }
  0x99   : > { %581 = vst [vmem:[%s5243_s23 + $0x448] sm:$0xff] %v580_v9  ;;  %v708_v9 = vld [vmem:[%s5238_s22 + $0x1908] sm:$0xff] }
  0x9a   : > { %583 = vst [vmem:[%s5243_s23 + $0x450] sm:$0xff] %v582_v10  ;;  %v710_v10 = vld [vmem:[%s5238_s22 + $0x1940] sm:$0xff] }
  0x9b   : > { %585 = vst [vmem:[%s5243_s23 + $0x458] sm:$0xff] %v584_v11  ;;  %v712_v11 = vld [vmem:[%s5238_s22 + $0x1948] sm:$0xff] }
  0x9c   : > { %587 = vst [vmem:[%s5243_s23 + $0x460] sm:$0xff] %v586_v12  ;;  %v714_v12 = vld [vmem:[%s5238_s22 + $0x1980] sm:$0xff] }
  0x9d   : > { %589 = vst [vmem:[%s5243_s23 + $0x468] sm:$0xff] %v588_v13  ;;  %v716_v13 = vld [vmem:[%s5238_s22 + $0x1988] sm:$0xff] }
  0x9e   : > { %591 = vst [vmem:[%s5243_s23 + $0x470] sm:$0xff] %v590_v14  ;;  %v718_v14 = vld [vmem:[%s5238_s22 + $0x19c0] sm:$0xff] }
  0x9f   : > { %593 = vst [vmem:[%s5243_s23 + $0x478] sm:$0xff] %v592_v15  ;;  %v720_v15 = vld [vmem:[%s5238_s22 + $0x19c8] sm:$0xff] }
  0xa0   : > { %595 = vst [vmem:[%s5243_s23 + $0x480] sm:$0xff] %v594_v16  ;;  %v722_v16 = vld [vmem:[%s5238_s22 + $0x1a00] sm:$0xff] }
  0xa1   : > { %597 = vst [vmem:[%s5243_s23 + $0x488] sm:$0xff] %v596_v17  ;;  %v724_v17 = vld [vmem:[%s5238_s22 + $0x1a08] sm:$0xff] }
  0xa2   : > { %599 = vst [vmem:[%s5243_s23 + $0x490] sm:$0xff] %v598_v18  ;;  %v726_v18 = vld [vmem:[%s5238_s22 + $0x1a40] sm:$0xff] }
  0xa3   : > { %601 = vst [vmem:[%s5243_s23 + $0x498] sm:$0xff] %v600_v19  ;;  %v728_v19 = vld [vmem:[%s5238_s22 + $0x1a48] sm:$0xff] }
  0xa4   : > { %603 = vst [vmem:[%s5243_s23 + $0x4a0] sm:$0xff] %v602_v20  ;;  %v730_v20 = vld [vmem:[%s5238_s22 + $0x1a80] sm:$0xff] }
  0xa5   : > { %605 = vst [vmem:[%s5243_s23 + $0x4a8] sm:$0xff] %v604_v21  ;;  %v732_v21 = vld [vmem:[%s5238_s22 + $0x1a88] sm:$0xff] }
  0xa6   : > { %607 = vst [vmem:[%s5243_s23 + $0x4b0] sm:$0xff] %v606_v22  ;;  %v734_v22 = vld [vmem:[%s5238_s22 + $0x1ac0] sm:$0xff] }
  0xa7   : > { %609 = vst [vmem:[%s5243_s23 + $0x4b8] sm:$0xff] %v608_v23  ;;  %v736_v23 = vld [vmem:[%s5238_s22 + $0x1ac8] sm:$0xff] }
  0xa8   : > { %611 = vst [vmem:[%s5243_s23 + $0x4c0] sm:$0xff] %v610_v24  ;;  %v738_v24 = vld [vmem:[%s5238_s22 + $0x1b00] sm:$0xff] }
  0xa9   : > { %613 = vst [vmem:[%s5243_s23 + $0x4c8] sm:$0xff] %v612_v25  ;;  %v740_v25 = vld [vmem:[%s5238_s22 + $0x1b08] sm:$0xff] }
  0xaa   : > { %615 = vst [vmem:[%s5243_s23 + $0x4d0] sm:$0xff] %v614_v26  ;;  %v742_v26 = vld [vmem:[%s5238_s22 + $0x1b40] sm:$0xff] }
  0xab   : > { %617 = vst [vmem:[%s5243_s23 + $0x4d8] sm:$0xff] %v616_v27  ;;  %v744_v27 = vld [vmem:[%s5238_s22 + $0x1b48] sm:$0xff] }
  0xac   : > { %619 = vst [vmem:[%s5243_s23 + $0x4e0] sm:$0xff] %v618_v28  ;;  %v746_v28 = vld [vmem:[%s5238_s22 + $0x1b80] sm:$0xff] }
  0xad   : > { %621 = vst [vmem:[%s5243_s23 + $0x4e8] sm:$0xff] %v620_v29  ;;  %v748_v29 = vld [vmem:[%s5238_s22 + $0x1b88] sm:$0xff] }
  0xae   : > { %623 = vst [vmem:[%s5243_s23 + $0x4f0] sm:$0xff] %v622_v30  ;;  %v750_v30 = vld [vmem:[%s5238_s22 + $0x1bc0] sm:$0xff] }
  0xaf   : > { %625 = vst [vmem:[%s5243_s23 + $0x4f8] sm:$0xff] %v624_v31  ;;  %v752_v31 = vld [vmem:[%s5238_s22 + $0x1bc8] sm:$0xff] }
  0xb0   : > { %627 = vst [vmem:[%s5243_s23 + $0x500] sm:$0xff] %v626_v32  ;;  %v754_v32 = vld [vmem:[%s5238_s22 + $0x1c00] sm:$0xff] }
  0xb1   : > { %629 = vst [vmem:[%s5243_s23 + $0x508] sm:$0xff] %v628_v33  ;;  %v756_v33 = vld [vmem:[%s5238_s22 + $0x1c08] sm:$0xff] }
  0xb2   : > { %631 = vst [vmem:[%s5243_s23 + $0x510] sm:$0xff] %v630_v34  ;;  %v758_v34 = vld [vmem:[%s5238_s22 + $0x1c40] sm:$0xff] }
  0xb3   : > { %633 = vst [vmem:[%s5243_s23 + $0x518] sm:$0xff] %v632_v35  ;;  %v760_v35 = vld [vmem:[%s5238_s22 + $0x1c48] sm:$0xff] }
  0xb4   : > { %635 = vst [vmem:[%s5243_s23 + $0x520] sm:$0xff] %v634_v36  ;;  %v762_v36 = vld [vmem:[%s5238_s22 + $0x1c80] sm:$0xff] }
  0xb5   : > { %637 = vst [vmem:[%s5243_s23 + $0x528] sm:$0xff] %v636_v37  ;;  %v764_v37 = vld [vmem:[%s5238_s22 + $0x1c88] sm:$0xff] }
  0xb6   : > { %639 = vst [vmem:[%s5243_s23 + $0x530] sm:$0xff] %v638_v38  ;;  %v766_v38 = vld [vmem:[%s5238_s22 + $0x1cc0] sm:$0xff] }
  0xb7   : > { %641 = vst [vmem:[%s5243_s23 + $0x538] sm:$0xff] %v640_v39  ;;  %v768_v39 = vld [vmem:[%s5238_s22 + $0x1cc8] sm:$0xff] }
  0xb8   : > { %643 = vst [vmem:[%s5243_s23 + $0x540] sm:$0xff] %v642_v40  ;;  %v770_v40 = vld [vmem:[%s5238_s22 + $0x1d00] sm:$0xff] }
  0xb9   : > { %645 = vst [vmem:[%s5243_s23 + $0x548] sm:$0xff] %v644_v41  ;;  %v772_v41 = vld [vmem:[%s5238_s22 + $0x1d08] sm:$0xff] }
  0xba   : > { %647 = vst [vmem:[%s5243_s23 + $0x550] sm:$0xff] %v646_v42  ;;  %v774_v42 = vld [vmem:[%s5238_s22 + $0x1d40] sm:$0xff] }
  0xbb   : > { %649 = vst [vmem:[%s5243_s23 + $0x558] sm:$0xff] %v648_v43  ;;  %v776_v43 = vld [vmem:[%s5238_s22 + $0x1d48] sm:$0xff] }
  0xbc   : > { %651 = vst [vmem:[%s5243_s23 + $0x560] sm:$0xff] %v650_v44  ;;  %v778_v44 = vld [vmem:[%s5238_s22 + $0x1d80] sm:$0xff] }
  0xbd   : > { %653 = vst [vmem:[%s5243_s23 + $0x568] sm:$0xff] %v652_v45  ;;  %v780_v45 = vld [vmem:[%s5238_s22 + $0x1d88] sm:$0xff] }
  0xbe   : > { %655 = vst [vmem:[%s5243_s23 + $0x570] sm:$0xff] %v654_v46  ;;  %v782_v46 = vld [vmem:[%s5238_s22 + $0x1dc0] sm:$0xff] }
  0xbf   : > { %657 = vst [vmem:[%s5243_s23 + $0x578] sm:$0xff] %v656_v47  ;;  %v784_v47 = vld [vmem:[%s5238_s22 + $0x1dc8] sm:$0xff] }
  0xc0   : > { %659 = vst [vmem:[%s5243_s23 + $0x580] sm:$0xff] %v658_v48  ;;  %v786_v48 = vld [vmem:[%s5238_s22 + $0x1e00] sm:$0xff] }
  0xc1   : > { %661 = vst [vmem:[%s5243_s23 + $0x588] sm:$0xff] %v660_v49  ;;  %v788_v49 = vld [vmem:[%s5238_s22 + $0x1e08] sm:$0xff] }
  0xc2   : > { %663 = vst [vmem:[%s5243_s23 + $0x590] sm:$0xff] %v662_v50  ;;  %v790_v50 = vld [vmem:[%s5238_s22 + $0x1e40] sm:$0xff] }
  0xc3   : > { %665 = vst [vmem:[%s5243_s23 + $0x598] sm:$0xff] %v664_v51  ;;  %v792_v51 = vld [vmem:[%s5238_s22 + $0x1e48] sm:$0xff] }
  0xc4   : > { %667 = vst [vmem:[%s5243_s23 + $0x5a0] sm:$0xff] %v666_v52  ;;  %v794_v52 = vld [vmem:[%s5238_s22 + $0x1e80] sm:$0xff] }
  0xc5   : > { %669 = vst [vmem:[%s5243_s23 + $0x5a8] sm:$0xff] %v668_v53  ;;  %v796_v53 = vld [vmem:[%s5238_s22 + $0x1e88] sm:$0xff] }
  0xc6   : > { %671 = vst [vmem:[%s5243_s23 + $0x5b0] sm:$0xff] %v670_v54  ;;  %v798_v54 = vld [vmem:[%s5238_s22 + $0x1ec0] sm:$0xff] }
  0xc7   : > { %673 = vst [vmem:[%s5243_s23 + $0x5b8] sm:$0xff] %v672_v55  ;;  %v800_v55 = vld [vmem:[%s5238_s22 + $0x1ec8] sm:$0xff] }
  0xc8   : > { %675 = vst [vmem:[%s5243_s23 + $0x5c0] sm:$0xff] %v674_v56  ;;  %v802_v56 = vld [vmem:[%s5238_s22 + $0x1f00] sm:$0xff] }
  0xc9   : > { %677 = vst [vmem:[%s5243_s23 + $0x5c8] sm:$0xff] %v676_v57  ;;  %v804_v57 = vld [vmem:[%s5238_s22 + $0x1f08] sm:$0xff] }
  0xca   : > { %679 = vst [vmem:[%s5243_s23 + $0x5d0] sm:$0xff] %v678_v58  ;;  %v806_v58 = vld [vmem:[%s5238_s22 + $0x1f40] sm:$0xff] }
  0xcb   : > { %681 = vst [vmem:[%s5243_s23 + $0x5d8] sm:$0xff] %v680_v59  ;;  %v808_v59 = vld [vmem:[%s5238_s22 + $0x1f48] sm:$0xff] }
  0xcc   : > { %683 = vst [vmem:[%s5243_s23 + $0x5e0] sm:$0xff] %v682_v60  ;;  %v810_v60 = vld [vmem:[%s5238_s22 + $0x1f80] sm:$0xff] }
  0xcd   : > { %685 = vst [vmem:[%s5243_s23 + $0x5e8] sm:$0xff] %v684_v61  ;;  %v812_v61 = vld [vmem:[%s5238_s22 + $0x1f88] sm:$0xff] }
  0xce   : > { %687 = vst [vmem:[%s5243_s23 + $0x5f0] sm:$0xff] %v686_v62  ;;  %v814_v62 = vld [vmem:[%s5238_s22 + $0x1fc0] sm:$0xff] }
  0xcf   : > { %689 = vst [vmem:[%s5243_s23 + $0x5f8] sm:$0xff] %v688_v63  ;;  %v816_v63 = vld [vmem:[%s5238_s22 + $0x1fc8] sm:$0xff] }
  0xd0   : > { %691 = vst [vmem:[%s5243_s23 + $0x600] sm:$0xff] %v690_v0 }
  0xd1   : > { %693 = vst [vmem:[%s5243_s23 + $0x608] sm:$0xff] %v692_v1 }
  0xd2   : > { %695 = vst [vmem:[%s5243_s23 + $0x610] sm:$0xff] %v694_v2 }
  0xd3   : > { %697 = vst [vmem:[%s5243_s23 + $0x618] sm:$0xff] %v696_v3 }
  0xd4   : > { %699 = vst [vmem:[%s5243_s23 + $0x620] sm:$0xff] %v698_v4 }
  0xd5   : > { %701 = vst [vmem:[%s5243_s23 + $0x628] sm:$0xff] %v700_v5 }
  0xd6   : > { %703 = vst [vmem:[%s5243_s23 + $0x630] sm:$0xff] %v702_v6 }
  0xd7   : > { %705 = vst [vmem:[%s5243_s23 + $0x638] sm:$0xff] %v704_v7 }
  0xd8   : > { %707 = vst [vmem:[%s5243_s23 + $0x640] sm:$0xff] %v706_v8 }
  0xd9   : > { %709 = vst [vmem:[%s5243_s23 + $0x648] sm:$0xff] %v708_v9 }
  0xda   : > { %711 = vst [vmem:[%s5243_s23 + $0x650] sm:$0xff] %v710_v10 }
  0xdb   : > { %713 = vst [vmem:[%s5243_s23 + $0x658] sm:$0xff] %v712_v11 }
  0xdc   : > { %715 = vst [vmem:[%s5243_s23 + $0x660] sm:$0xff] %v714_v12 }
  0xdd   : > { %717 = vst [vmem:[%s5243_s23 + $0x668] sm:$0xff] %v716_v13 }
  0xde   : > { %719 = vst [vmem:[%s5243_s23 + $0x670] sm:$0xff] %v718_v14 }
  0xdf   : > { %721 = vst [vmem:[%s5243_s23 + $0x678] sm:$0xff] %v720_v15 }
  0xe0   : > { %723 = vst [vmem:[%s5243_s23 + $0x680] sm:$0xff] %v722_v16 }
  0xe1   : > { %725 = vst [vmem:[%s5243_s23 + $0x688] sm:$0xff] %v724_v17 }
  0xe2   : > { %727 = vst [vmem:[%s5243_s23 + $0x690] sm:$0xff] %v726_v18 }
  0xe3   : > { %729 = vst [vmem:[%s5243_s23 + $0x698] sm:$0xff] %v728_v19 }
  0xe4   : > { %731 = vst [vmem:[%s5243_s23 + $0x6a0] sm:$0xff] %v730_v20 }
  0xe5   : > { %733 = vst [vmem:[%s5243_s23 + $0x6a8] sm:$0xff] %v732_v21 }
  0xe6   : > { %735 = vst [vmem:[%s5243_s23 + $0x6b0] sm:$0xff] %v734_v22 }
  0xe7   : > { %737 = vst [vmem:[%s5243_s23 + $0x6b8] sm:$0xff] %v736_v23 }
  0xe8   : > { %739 = vst [vmem:[%s5243_s23 + $0x6c0] sm:$0xff] %v738_v24 }
  0xe9   : > { %741 = vst [vmem:[%s5243_s23 + $0x6c8] sm:$0xff] %v740_v25 }
  0xea   : > { %743 = vst [vmem:[%s5243_s23 + $0x6d0] sm:$0xff] %v742_v26 }
  0xeb   : > { %745 = vst [vmem:[%s5243_s23 + $0x6d8] sm:$0xff] %v744_v27 }
  0xec   : > { %747 = vst [vmem:[%s5243_s23 + $0x6e0] sm:$0xff] %v746_v28 }
  0xed   : > { %749 = vst [vmem:[%s5243_s23 + $0x6e8] sm:$0xff] %v748_v29 }
  0xee   : > { %751 = vst [vmem:[%s5243_s23 + $0x6f0] sm:$0xff] %v750_v30 }
  0xef   : > { %753 = vst [vmem:[%s5243_s23 + $0x6f8] sm:$0xff] %v752_v31 }
  0xf0   : > { %755 = vst [vmem:[%s5243_s23 + $0x700] sm:$0xff] %v754_v32 }
  0xf1   : > { %757 = vst [vmem:[%s5243_s23 + $0x708] sm:$0xff] %v756_v33 }
  0xf2   : > { %759 = vst [vmem:[%s5243_s23 + $0x710] sm:$0xff] %v758_v34 }
  0xf3   : > { %761 = vst [vmem:[%s5243_s23 + $0x718] sm:$0xff] %v760_v35 }
  0xf4   : > { %763 = vst [vmem:[%s5243_s23 + $0x720] sm:$0xff] %v762_v36 }
  0xf5   : > { %765 = vst [vmem:[%s5243_s23 + $0x728] sm:$0xff] %v764_v37 }
  0xf6   : > { %767 = vst [vmem:[%s5243_s23 + $0x730] sm:$0xff] %v766_v38 }
  0xf7   : > { %769 = vst [vmem:[%s5243_s23 + $0x738] sm:$0xff] %v768_v39 }
  0xf8   : > { %771 = vst [vmem:[%s5243_s23 + $0x740] sm:$0xff] %v770_v40 }
  0xf9   : > { %773 = vst [vmem:[%s5243_s23 + $0x748] sm:$0xff] %v772_v41 }
  0xfa   : > { %775 = vst [vmem:[%s5243_s23 + $0x750] sm:$0xff] %v774_v42 }
  0xfb   : > { %777 = vst [vmem:[%s5243_s23 + $0x758] sm:$0xff] %v776_v43 }
  0xfc   : > { %779 = vst [vmem:[%s5243_s23 + $0x760] sm:$0xff] %v778_v44 }
  0xfd   : > { %781 = vst [vmem:[%s5243_s23 + $0x768] sm:$0xff] %v780_v45 }
  0xfe   : > { %783 = vst [vmem:[%s5243_s23 + $0x770] sm:$0xff] %v782_v46 }
  0xff   : > { %785 = vst [vmem:[%s5243_s23 + $0x778] sm:$0xff] %v784_v47 }
 0x100   : > { %787 = vst [vmem:[%s5243_s23 + $0x780] sm:$0xff] %v786_v48 }
 0x101   : > { %789 = vst [vmem:[%s5243_s23 + $0x788] sm:$0xff] %v788_v49 }
 0x102   : > { %791 = vst [vmem:[%s5243_s23 + $0x790] sm:$0xff] %v790_v50 }
 0x103   : > { %793 = vst [vmem:[%s5243_s23 + $0x798] sm:$0xff] %v792_v51 }
 0x104   : > { %795 = vst [vmem:[%s5243_s23 + $0x7a0] sm:$0xff] %v794_v52 }
 0x105   : > { %797 = vst [vmem:[%s5243_s23 + $0x7a8] sm:$0xff] %v796_v53 }
 0x106   : > { %799 = vst [vmem:[%s5243_s23 + $0x7b0] sm:$0xff] %v798_v54 }
 0x107   : > { %801 = vst [vmem:[%s5243_s23 + $0x7b8] sm:$0xff] %v800_v55 }
 0x108   : > { %803 = vst [vmem:[%s5243_s23 + $0x7c0] sm:$0xff] %v802_v56 }
 0x109   : > { %805 = vst [vmem:[%s5243_s23 + $0x7c8] sm:$0xff] %v804_v57 }
 0x10a   : > { %807 = vst [vmem:[%s5243_s23 + $0x7d0] sm:$0xff] %v806_v58 }
 0x10b   : > { %809 = vst [vmem:[%s5243_s23 + $0x7d8] sm:$0xff] %v808_v59 }
 0x10c   : > { %811 = vst [vmem:[%s5243_s23 + $0x7e0] sm:$0xff] %v810_v60 }
 0x10d   : > { %813 = vst [vmem:[%s5243_s23 + $0x7e8] sm:$0xff] %v812_v61 }
 0x10e   : > { %815 = vst [vmem:[%s5243_s23 + $0x7f0] sm:$0xff] %v814_v62 }
 0x10f   : > { %817 = vst [vmem:[%s5243_s23 + $0x7f8] sm:$0xff] %v816_v63 }
 0x110 PF: > { %p3700_p5 = scmp.ge.s32.totalorder %s5151_s11, 1  ;;  %p846_p6 = scmp.lt.s32.totalorder %s5151_s11, 5 }
 0x112   : > { %p847_p7 = pnand %p3700_p5, %p846_p6 }
 0x113   : > { %s853_s17 = sand.u32 (!%p847_p7), 1, %s5143_s30   ;;  %s3702_s23 = sshll.u32 (!%p847_p7), %s3693_s12, 2 }
 0x114   : > { %850 = sbr.rel (%p847_p7) target bundleno = 918 (0x396), region = 75  ;;  %s3701_s18 = sshll.u32 (!%p847_p7), %s853_s17, 11 }
 0x115   : > { %s5905_s30 = scalar_lea.vmem (!%p847_p7), [#allocation2], %s3701_s18  ;;  %p902_p8 = scmp.lt.s32.totalorder (!%p847_p7), %s3702_s23, 15 }
 0x119   : > { %v3741_v0 = vld [vmem:[%s6834_s1 + $0x40] sm:$0xf]  ;;  %vm1035_vm0 = vcmask 1044480   ;;  %v4814_v3 = vld [vmem:[%s6834_s1 + $0x44] sm:$0xf]  ;;  %vm1031_vm1 = vcmask 211968  }
 0x11a   : > { %v4818_v1 = vld [vmem:[%s6834_s1 + $0x5c] sm:$0x10]  ;;  %v3743_v4 = vld [vmem:[%s6834_s1 + $0x60] sm:$0x10]  ;;  %v3749_v5 = vld [vmem:[%s6834_s1 + $0x48] sm:$0xf] }
 0x11b   : > { %v3742_v2 = vor.u32 %v4818_v1, %v3741_v0  ;;  %v3746_v6 = vor.u32 %v4814_v3, %v3743_v4  ;;  %v4819_v7 = vld [vmem:[%s6834_s1 + $0x64] sm:$0x10]  ;;  %v4815_v8 = vld [vmem:[%s6834_s1 + $0x4c] sm:$0xf]  ;;  %v3709_v13 = vld [vmem:[%s6834_s1] sm:$0xf] }
 0x11c   : > { %v3751_v9 = vld [vmem:[%s6834_s1 + $0x68] sm:$0x10]  ;;  %v3750_v11 = vor.u32 %v4819_v7, %v3749_v5  ;;  %v4810_v14 = vld [vmem:[%s6834_s1 + $0x1c] sm:$0xf0]  ;;  %v4806_v18 = vld [vmem:[%s6834_s1 + $0x4] sm:$0xf] }
 0x11d   : > { %v1037_v10 = vsel %vm1035_vm0, %v3742_v2, 0  ;;  %v3754_v12 = vor.u32 %v4815_v8, %v3751_v9  ;;  %v923_v15 = vld [vmem:[%s6833_s0] sm:$0xff]  ;;  %v1040_v16 = vsel %vm1035_vm0, %v3746_v6, 0  ;;  %v3710_v17 = vor.u32 %v4810_v14, %v3709_v13  ;;  %v3717_v23 = vld [vmem:[%s6834_s1 + $0x8] sm:$0xf]  ;;  %s6861_s23 = smov (!%p902_p8, %s3702_s23), 15 }
 0x11e   : > { %1066 = vmatpush.bf16.msra.mxu0 %v1037_v10  ;;  %v3711_v19 = vld [vmem:[%s6834_s1 + $0x20] sm:$0xf0]  ;;  %1079 = vmatpush.bf16.msra.mxu1 %v1040_v16  ;;  %v1043_v20 = vsel %vm1035_vm0, %v3750_v11, 0  ;;  %v4811_v24 = vld [vmem:[%s6834_s1 + $0x24] sm:$0xf0]  ;;  %v924_v30 = vpack.c.bf16 %v923_v15, %v923_v15  ;;  %v5153_v58 = vmov 8.0   ;;  %s904_s24 = scalar_lea.vmem %s6839_s6, %s6861_s23  ;;  %s909_s27 = scalar_lea.vmem %s6840_s7, %s6861_s23 }
 0x11f   : > { %v1046_v21 = vsel %vm1035_vm0, %v3754_v12, 0  ;;  %v3714_v22 = vor.u32 %v4806_v18, %v3711_v19  ;;  %1092 = vmatpush.bf16.msra.mxu2 %v1043_v20  ;;  %v3718_v25 = vor.u32 %v4811_v24, %v3717_v23  ;;  %v4807_v26 = vld [vmem:[%s6834_s1 + $0xc] sm:$0xf]  ;;  %v3757_v28 = vld [vmem:[%s6834_s1 + $0x50] sm:$0xf]  ;;  %5103 = vrcp.f32 %v5153_v58  ;;  %v5874_v60 = vld [vmem:[%s6835_s2] sm:$0xff]  ;;  %s914_s14 = scalar_lea.vmem %s6841_s8, %s6861_s23 }
 0x120   : > { %1105 = vmatpush.bf16.msra.mxu3 %v1046_v21  ;;  %v3719_v27 = vld [vmem:[%s6834_s1 + $0x28] sm:$0xf0]  ;;  %v4820_v31 = vld [vmem:[%s6834_s1 + $0x6c] sm:$0x10]  ;;  %v4816_v32 = vld [vmem:[%s6834_s1 + $0x54] sm:$0xf] }
 0x121   : > { %v3722_v29 = vor.u32 %v4807_v26, %v3719_v27  ;;  %v3759_v33 = vld [vmem:[%s6834_s1 + $0x70] sm:$0x10]  ;;  %v3758_v34 = vor.u32 %v4820_v31, %v3757_v28  ;;  %v3765_v36 = vld [vmem:[%s6834_s1 + $0x58] sm:$0xf]  ;;  %v4817_v38 = vld [vmem:[%s6834_s1 + $0x5c] sm:$0xf] }
 0x122   : > { %1067 = vmatpush.bf16.msra.mxu0 %v3710_v17  ;;  %v3762_v35 = vor.u32 %v4816_v32, %v3759_v33  ;;  %v4821_v37 = vld [vmem:[%s6834_s1 + $0x74] sm:$0x10]  ;;  %1080 = vmatpush.bf16.msra.mxu1 %v3714_v22  ;;  %v3767_v40 = vld [vmem:[%s6834_s1 + $0x78] sm:$0x10]  ;;  %v3725_v41 = vld [vmem:[%s6834_s1 + $0x10] sm:$0xf] }
 0x123   : > { %v3766_v39 = vor.u32 %v4821_v37, %v3765_v36  ;;  %v4812_v42 = vld [vmem:[%s6834_s1 + $0x2c] sm:$0xf0]  ;;  %1093 = vmatpush.bf16.msra.mxu2 %v3718_v25  ;;  %v1049_v43 = vsel %vm1035_vm0, %v3758_v34, 0  ;;  %v3770_v45 = vor.u32 %v4817_v38, %v3767_v40  ;;  %v4808_v46 = vld [vmem:[%s6834_s1 + $0x14] sm:$0xf]  ;;  %v943_v62 = vperm.slane %v5874_v60, 0 }
 0x124   : > { %1106 = vmatpush.bf16.msra.mxu3 %v3722_v29  ;;  %v1052_v44 = vsel %vm1035_vm0, %v3762_v35, 0  ;;  %v3727_v47 = vld [vmem:[%s6834_s1 + $0x30] sm:$0xf0]  ;;  %v3733_v50 = vld [vmem:[%s6834_s1 + $0x18] sm:$0xf]  ;;  %v3726_v53 = vor.u32 %v4812_v42, %v3725_v41  ;;  %v944_v63 = vperm.slane %v5874_v60, 1 }
 0x125   : > { %3771 = vmatmul.msk.bf16.vlgmr.msra.gmra.mxu0 %vm1031_vm1, %v924_v30  ;;  %v1055_v48 = vsel %vm1035_vm0, %v3766_v39, 0  ;;  %v3730_v49 = vor.u32 %v4808_v46, %v3727_v47  ;;  %v4813_v51 = vld [vmem:[%s6834_s1 + $0x34] sm:$0xf0]  ;;  %3772 = vmatmul.msk.bf16.vlgmr.msra.gmra.mxu1 %vm1031_vm1, %v924_v30  ;;  %v1058_v52 = vsel %vm1035_vm0, %v3770_v45, 0  ;;  %v4809_v54 = vld [vmem:[%s6834_s1 + $0x1c] sm:$0xf]  ;;  %v5104_v59 = vpop.eup %5103 }
 0x126   : > { %1131 = vmatpush.bf16.msrb.mxu1 %v1052_v44  ;;  %1118 = vmatpush.bf16.msrb.mxu0 %v1049_v43  ;;  %v3735_v55 = vld [vmem:[%s6834_s1 + $0x38] sm:$0xf0]  ;;  %v3734_v56 = vor.u32 %v4813_v51, %v3733_v50  ;;  %v1213_v61 = vmul.f32 8.0, %v5104_v59  ;;  %v945_v9 = vperm.slane %v5874_v60, 2  ;;  %v946_v10 = vperm.slane %v5874_v60, 3  ;;  %s3706_s15 = sshll.u32 %s6861_s23, 3 }
 0x127   : > { %3773 = vmatmul.msk.bf16.vlgmr.msra.gmra.mxu2 %vm1031_vm1, %v924_v30  ;;  %3774 = vmatmul.msk.bf16.vlgmr.msra.gmra.mxu3 %vm1031_vm1, %v924_v30  ;;  %v3738_v57 = vor.u32 %v4809_v54, %v3735_v55  ;;  %vm1217_vm2 = vweird.f32 %v5104_v59  ;;  %v947_v32 = vperm.slane %v5874_v60, 4  ;;  %v948_v33 = vperm.slane %v5874_v60, 5  ;;  %v3893_v50 = vld [vmem:[%s5905_s30 + $0xe0] sm:$0xf]  ;;  %v4852_v51 = vld [vmem:[%s5905_s30 + $0xec] sm:$0xf0] }
 0x128   : > { %1144 = vmatpush.bf16.msrb.mxu2 %v1055_v48  ;;  %1157 = vmatpush.bf16.msrb.mxu3 %v1058_v52  ;;  %v1214_v1 = vsub.f32 1.0, %v1213_v61  ;;  %v949_v40 = vperm.slane %v5874_v60, 6  ;;  %v950_v46 = vperm.slane %v5874_v60, 7  ;;  %v4021_v52 = vld [vmem:[%s5905_s30 + $0x1e0] sm:$0xf]  ;;  %vm1405_vm12 = vcmask 1042434  }
 0x129   : > { %v4149_v58 = vld [vmem:[%s5905_s30 + $0x2e0] sm:$0xf]  ;;  %vm1403_vm0 = vcmask 1040384  }
 0x12a   : > { %1132 = vmatpush.bf16.msrb.mxu1 %v3730_v49  ;;  %1119 = vmatpush.bf16.msrb.mxu0 %v3726_v53  ;;  %v1215_v6 = vmul.f32 %v5104_v59, %v1214_v1 }
 0x12c   : > { %1145 = vmatpush.bf16.msrb.mxu2 %v3734_v56  ;;  %1158 = vmatpush.bf16.msrb.mxu3 %v3738_v57  ;;  %v1216_v13 = vadd.f32 %v5104_v59, %v1215_v6  ;;  %v3894_v56 = vor.u32 %v4852_v51, %v3893_v50  ;;  %v4884_v57 = vld [vmem:[%s5905_s30 + $0x1ec] sm:$0xf0] }
 0x12e   : > { %v5887_v26 = vsel %vm1217_vm2, %v5104_v59, %v1216_v13  ;;  %3032 = vmatpush.bf16.msra.mxu0 %v3894_v56 }
 0x135   : > { %3775 = vmatmul.msk.bf16.vlgmr.msrb.gmra.mxu0 %vm1031_vm1, %v924_v30  ;;  %3776 = vmatmul.msk.bf16.vlgmr.msrb.gmra.mxu1 %vm1031_vm1, %v924_v30 }
 0x137   : > { %3777 = vmatmul.msk.bf16.vlgmr.msrb.gmra.mxu2 %vm1031_vm1, %v924_v30  ;;  %3778 = vmatmul.msk.bf16.vlgmr.msrb.gmra.mxu3 %vm1031_vm1, %v924_v30 }
 0x1a2   : > { %v1069_v0 = vpop.f32.mrf.mxu0  ;;  %v1082_v3 = vpop.f32.mrf.mxu1 }
 0x1a3   : > { %v1070_v2 = vadd.f32 %v1069_v0, %v943_v62  ;;  %v1083_v4 = vadd.f32 %v1082_v3, %v944_v63  ;;  %v4022_v62 = vor.u32 %v4884_v57, %v4021_v52  ;;  %v4916_v63 = vld [vmem:[%s5905_s30 + $0x2ec] sm:$0xf0]  ;;  %v4277_v0 = vld [vmem:[%s5905_s30 + $0x3e0] sm:$0xf] }
 0x1a5   : > { %v1164_v5 = vrot.slane %v1070_v2, 4  ;;  %v1170_v7 = vrot.slane %v1083_v4, 4  ;;  %3045 = vmatpush.bf16.msra.mxu1 %v4022_v62 }
 0x1a7   : > { %v1165_v8 = vadd.f32 %v1164_v5, %v1070_v2  ;;  %v1171_v11 = vadd.f32 %v1170_v7, %v1083_v4  ;;  %v4948_v5 = vld [vmem:[%s5905_s30 + $0x3ec] sm:$0xf0] }
 0x1a9   : > { %v1166_v12 = vrot.slane %v1165_v8, 2  ;;  %v1172_v14 = vrot.slane %v1171_v11, 2 }
 0x1aa   : > { %v1095_v15 = vpop.f32.mrf.mxu2  ;;  %v1108_v16 = vpop.f32.mrf.mxu3 }
 0x1ab   : > { %v1167_v17 = vadd.f32 %v1166_v12, %v1165_v8  ;;  %v5880_v18 = vadd.f32 %v1095_v15, %v945_v9  ;;  %v5882_v19 = vadd.f32 %v1108_v16, %v946_v10  ;;  %v1071_v20 = vpop.f32.mrf.mxu0  ;;  %v1084_v21 = vpop.f32.mrf.mxu1  ;;  %v1173_v22 = vadd.f32 %v1172_v14, %v1171_v11  ;;  %v3877_v10 = vld [vmem:[%s5905_s30 + $0xc0] sm:$0xf]  ;;  %v4848_v11 = vld [vmem:[%s5905_s30 + $0xcc] sm:$0xf0] }
 0x1ac   : > { %v4278_v9 = vor.u32 %v4948_v5, %v4277_v0  ;;  %v3878_v14 = vor.u32 %v4848_v11, %v3877_v10  ;;  %v4005_v5 = vld [vmem:[%s5905_s30 + $0x1c0] sm:$0xf] }
 0x1ad   : > { %v1168_v23 = vrot.slane %v1167_v17, 1  ;;  %v1176_v24 = vrot.slane %v5880_v18, 4  ;;  %v1182_v25 = vrot.slane %v5882_v19, 4  ;;  %v1174_v27 = vrot.slane %v1173_v22, 1 }
 0x1ae   : > { %3071 = vmatpush.bf16.msra.mxu3 %v4278_v9  ;;  %3033 = vmatpush.bf16.msra.mxu0 %v3878_v14 }
 0x1af   : > { %v1169_v28 = vadd.f32 %v1168_v23, %v1167_v17  ;;  %v1177_v29 = vadd.f32 %v1176_v24, %v5880_v18  ;;  %v1183_v30 = vadd.f32 %v1182_v25, %v5882_v19  ;;  %v1175_v31 = vadd.f32 %v1174_v27, %v1173_v22 }
 0x1b1   : > { %v1219_v34 = vmul.f32 %v5887_v26, %v1169_v28  ;;  %v1178_v35 = vrot.slane %v1177_v29, 2  ;;  %v1184_v36 = vrot.slane %v1183_v30, 2  ;;  %v1220_v37 = vmul.f32 %v5887_v26, %v1175_v31 }
 0x1b2   : > { %v1097_v38 = vpop.f32.mrf.mxu2  ;;  %v1110_v39 = vpop.f32.mrf.mxu3 }
 0x1b3   : > { %v5896_v41 = vsub.f32 %v1070_v2, %v1219_v34  ;;  %v1179_v42 = vadd.f32 %v1178_v35, %v1177_v29  ;;  %v1185_v43 = vadd.f32 %v1184_v36, %v1183_v30  ;;  %v1121_v44 = vpop.f32.mrf.mxu0  ;;  %v1134_v45 = vpop.f32.mrf.mxu1  ;;  %v5899_v47 = vsub.f32 %v1083_v4, %v1220_v37 }
 0x1b4   : > { %v5901_v48 = vadd.f32 %v1121_v44, %v947_v32  ;;  %v5903_v49 = vadd.f32 %v1134_v45, %v948_v33  ;;  %v4150_v4 = vor.u32 %v4916_v63, %v4149_v58 }
 0x1b5   : > { %v1235_v53 = vmul.f32 %v5896_v41, %v5896_v41  ;;  %v1180_v54 = vrot.slane %v1179_v42, 1  ;;  %v1186_v55 = vrot.slane %v1185_v43, 1  ;;  %v1236_v59 = vmul.f32 %v5899_v47, %v5899_v47 }
 0x1b6   : > { %v1188_v60 = vrot.slane %v5901_v48, 4  ;;  %v1194_v61 = vrot.slane %v5903_v49, 4  ;;  %3058 = vmatpush.bf16.msra.mxu2 %v4150_v4 }
 0x1b7   : > { %v1243_v1 = vrot.slane %v1235_v53, 4  ;;  %v1181_v2 = vadd.f32 %v1180_v54, %v1179_v42  ;;  %v1187_v3 = vadd.f32 %v1186_v55, %v1185_v43  ;;  %v1249_v6 = vrot.slane %v1236_v59, 4 }
 0x1b8   : > { %v1189_v7 = vadd.f32 %v1188_v60, %v5901_v48  ;;  %v1195_v8 = vadd.f32 %v1194_v61, %v5903_v49 }
 0x1b9   : > { %v1221_v12 = vmul.f32 %v5887_v26, %v1181_v2  ;;  %v1222_v13 = vmul.f32 %v5887_v26, %v1187_v3  ;;  %v1250_v15 = vadd.f32 %v1249_v6, %v1236_v59  ;;  %v1244_v22 = vadd.f32 %v1243_v1, %v1235_v53 }
 0x1ba   : > { %v1190_v16 = vrot.slane %v1189_v7, 2  ;;  %v1196_v17 = vrot.slane %v1195_v8, 2  ;;  %v1147_v20 = vpop.f32.mrf.mxu2  ;;  %v1160_v21 = vpop.f32.mrf.mxu3 }
 0x1bb   : > { %v5928_v23 = vsub.f32 %v5880_v18, %v1221_v12  ;;  %v5931_v24 = vsub.f32 %v5882_v19, %v1222_v13  ;;  %v5933_v25 = vadd.f32 %v1147_v20, %v949_v40  ;;  %v1123_v27 = vpop.f32.mrf.mxu0  ;;  %v1136_v28 = vpop.f32.mrf.mxu1  ;;  %v1251_v29 = vrot.slane %v1250_v15, 2 }
 0x1bc   : > { %v1191_v30 = vadd.f32 %v1190_v16, %v1189_v7  ;;  %v1197_v31 = vadd.f32 %v1196_v17, %v1195_v8  ;;  %v5935_v32 = vadd.f32 %v1160_v21, %v950_v46  ;;  %v1245_v42 = vrot.slane %v1244_v22, 2  ;;  %v4880_v7 = vld [vmem:[%s5905_s30 + $0x1cc] sm:$0xf0]  ;;  %v3861_v27 = vld [vmem:[%s5905_s30 + $0xa0] sm:$0xf] }
 0x1bd   : > { %v1237_v33 = vmul.f32 %v5928_v23, %v5928_v23  ;;  %v1238_v18 = vmul.f32 %v5931_v24, %v5931_v24  ;;  %v1200_v34 = vrot.slane %v5933_v25, 4  ;;  %v1252_v37 = vadd.f32 %v1251_v29, %v1250_v15  ;;  %v4261_v15 = vld [vmem:[%s5905_s30 + $0x3c0] sm:$0xf]  ;;  %v4944_v16 = vld [vmem:[%s5905_s30 + $0x3cc] sm:$0xf0] }
 0x1be   : > { %v1192_v19 = vrot.slane %v1191_v30, 1  ;;  %v1198_v35 = vrot.slane %v1197_v31, 1  ;;  %v1206_v36 = vrot.slane %v5935_v32, 4  ;;  %v1246_v60 = vadd.f32 %v1245_v42, %v1244_v22  ;;  %v4844_v28 = vld [vmem:[%s5905_s30 + $0xac] sm:$0xf0] }
 0x1bf   : > { %v1255_v38 = vrot.slane %v1237_v33, 4  ;;  %v1261_v39 = vrot.slane %v1238_v18, 4  ;;  %v1201_v40 = vadd.f32 %v1200_v34, %v5933_v25  ;;  %v1253_v56 = vrot.slane %v1252_v37, 1  ;;  %v3989_v42 = vld [vmem:[%s5905_s30 + $0x1a0] sm:$0xf] }
 0x1c0   : > { %v1193_v43 = vadd.f32 %v1192_v19, %v1191_v30  ;;  %v1199_v44 = vadd.f32 %v1198_v35, %v1197_v31  ;;  %v1207_v53 = vadd.f32 %v1206_v36, %v5935_v32  ;;  %v1247_v8 = vrot.slane %v1246_v60, 1 }
 0x1c1   : > { %v1256_v45 = vadd.f32 %v1255_v38, %v1237_v33  ;;  %v1262_v46 = vadd.f32 %v1261_v39, %v1238_v18  ;;  %v1202_v50 = vrot.slane %v1201_v40, 2  ;;  %v1254_v6 = vadd.f32 %v1253_v56, %v1252_v37 }
 0x1c2   : > { %v1223_v51 = vmul.f32 %v5887_v26, %v1193_v43  ;;  %v1224_v52 = vmul.f32 %v5887_v26, %v1199_v44  ;;  %v1149_v54 = vpop.f32.mrf.mxu2  ;;  %v1162_v55 = vpop.f32.mrf.mxu3  ;;  %v1208_v4 = vrot.slane %v1207_v53, 2  ;;  %v4006_v21 = vor.u32 %v4880_v7, %v4005_v5  ;;  %v4876_v43 = vld [vmem:[%s5905_s30 + $0x1ac] sm:$0xf0] }
 0x1c3   : > { %v1257_v57 = vrot.slane %v1256_v45, 2  ;;  %v1263_v58 = vrot.slane %v1262_v46, 2  ;;  %v1203_v59 = vadd.f32 %v1202_v50, %v1201_v40  ;;  %v1292_v29 = vmul.f32 %v1254_v6, %v5887_v26 }
 0x1c4   : > { %v5948_v61 = vsub.f32 %v5901_v48, %v1223_v51  ;;  %v5951_v62 = vsub.f32 %v5903_v49, %v1224_v52  ;;  %v4133_v48 = vld [vmem:[%s5905_s30 + $0x2c0] sm:$0xf]  ;;  %v4912_v49 = vld [vmem:[%s5905_s30 + $0x2cc] sm:$0xf0]  ;;  %v1209_v14 = vadd.f32 %v1208_v4, %v1207_v53  ;;  %v1248_v31 = vadd.f32 %v1247_v8, %v1246_v60  ;;  %3046 = vmatpush.bf16.msra.mxu1 %v4006_v21 }
 0x1c5   : > { %v1258_v63 = vadd.f32 %v1257_v57, %v1256_v45  ;;  %v1264_v0 = vadd.f32 %v1263_v58, %v1262_v46  ;;  %v1204_v1 = vrot.slane %v1203_v59, 1  ;;  %v4134_v22 = vor.u32 %v4912_v49, %v4133_v48  ;;  %v4117_v45 = vld [vmem:[%s5905_s30 + $0x2a0] sm:$0xf]  ;;  %v4908_v46 = vld [vmem:[%s5905_s30 + $0x2ac] sm:$0xf0] }
 0x1c6   : > { %v1239_v2 = vmul.f32 %v5948_v61, %v5948_v61  ;;  %v1240_v3 = vmul.f32 %v5951_v62, %v5951_v62  ;;  %v4262_v34 = vor.u32 %v4944_v16, %v4261_v15  ;;  %v1210_v36 = vrot.slane %v1209_v14, 1  ;;  %v4245_v51 = vld [vmem:[%s5905_s30 + $0x3a0] sm:$0xf]  ;;  %v4940_v52 = vld [vmem:[%s5905_s30 + $0x3ac] sm:$0xf0] }
 0x1c7   : > { %v1259_v11 = vrot.slane %v1258_v63, 1  ;;  %v1265_v12 = vrot.slane %v1264_v0, 1  ;;  %v1205_v13 = vadd.f32 %v1204_v1, %v1203_v59  ;;  %3059 = vmatpush.bf16.msra.mxu2 %v4134_v22  ;;  %v3862_v37 = vor.u32 %v4844_v28, %v3861_v27  ;;  %v3845_v57 = vld [vmem:[%s5905_s30 + $0x80] sm:$0xf]  ;;  %v4840_v58 = vld [vmem:[%s5905_s30 + $0x8c] sm:$0xf0] }
 0x1c8   : > { %v1267_v9 = vrot.slane %v1239_v2, 4  ;;  %v1273_v10 = vrot.slane %v1240_v3, 4  ;;  %3072 = vmatpush.bf16.msra.mxu3 %v4262_v34  ;;  %v5972_v44 = vadd.f32 1e-05, %v1292_v29  ;;  %v1291_v50 = vmul.f32 %v1248_v31, %v5887_v26  ;;  %v4904_v15 = vld [vmem:[%s5905_s30 + $0x28c] sm:$0xf0] }
 0x1c9   : > { %v1225_v30 = vmul.f32 %v5887_v26, %v1205_v13  ;;  %v1260_v19 = vadd.f32 %v1259_v11, %v1258_v63  ;;  %v1266_v38 = vadd.f32 %v1265_v12, %v1264_v0  ;;  %3034 = vmatpush.bf16.msra.mxu0 %v3862_v37  ;;  %v1211_v56 = vadd.f32 %v1210_v36, %v1209_v14  ;;  %v3973_v11 = vld [vmem:[%s5905_s30 + $0x180] sm:$0xf]  ;;  %v4872_v12 = vld [vmem:[%s5905_s30 + $0x18c] sm:$0xf0] }
 0x1ca   : > { %v1268_v17 = vadd.f32 %v1267_v9, %v1239_v2  ;;  %v1274_v20 = vadd.f32 %v1273_v10, %v1240_v3  ;;  %v3990_v63 = vor.u32 %v4876_v43, %v3989_v42  ;;  %v4118_v0 = vor.u32 %v4908_v46, %v4117_v45  ;;  %v4101_v13 = vld [vmem:[%s5905_s30 + $0x280] sm:$0xf]  ;;  %v4836_v22 = vld [vmem:[%s5905_s30 + $0x6c] sm:$0xf0] }
 0x1cb   : > { %v5968_v35 = vsub.f32 %v5933_v25, %v1225_v30  ;;  %v1293_v53 = vmul.f32 %v1260_v19, %v5887_v26  ;;  %v1294_v59 = vmul.f32 %v1266_v38, %v5887_v26  ;;  %5105 = vrsqrt.f32 %v5972_v44  ;;  %v4229_v16 = vld [vmem:[%s5905_s30 + $0x380] sm:$0xf]  ;;  %v4868_v28 = vld [vmem:[%s5905_s30 + $0x16c] sm:$0xf0] }
 0x1cc   : > { %v1269_v33 = vrot.slane %v1268_v17, 2  ;;  %v1275_v18 = vrot.slane %v1274_v20, 2  ;;  %v1226_v3 = vmul.f32 %v5887_v26, %v1211_v56  ;;  %v5987_v4 = vadd.f32 1e-05, %v1291_v50  ;;  %3047 = vmatpush.bf16.msra.mxu1 %v3990_v63  ;;  %3060 = vmatpush.bf16.msra.mxu2 %v4118_v0  ;;  %v3957_v27 = vld [vmem:[%s5905_s30 + $0x160] sm:$0xf] }
 0x1cd   : > { %v1241_v55 = vmul.f32 %v5968_v35, %v5968_v35  ;;  %v4246_v6 = vor.u32 %v4940_v52, %v4245_v51  ;;  %v3846_v7 = vor.u32 %v4840_v58, %v3845_v57  ;;  %v5990_v48 = vadd.f32 1e-05, %v1293_v53  ;;  %v4085_v31 = vld [vmem:[%s5905_s30 + $0x260] sm:$0xf]  ;;  %v4932_v37 = vld [vmem:[%s5905_s30 + $0x36c] sm:$0xf0] }
 0x1ce   : > { %v1270_v39 = vadd.f32 %v1269_v33, %v1268_v17  ;;  %v1276_v40 = vadd.f32 %v1275_v18, %v1274_v20  ;;  %v5993_v8 = vadd.f32 1e-05, %v1294_v59  ;;  %v5996_v10 = vsub.f32 %v5935_v32, %v1226_v3  ;;  %v4936_v20 = vld [vmem:[%s5905_s30 + $0x38c] sm:$0xf0]  ;;  %v3829_v32 = vld [vmem:[%s5905_s30 + $0x60] sm:$0xf] }
 0x1cf   : > { %v1279_v2 = vrot.slane %v1241_v55, 4  ;;  %3073 = vmatpush.bf16.msra.mxu3 %v4246_v6  ;;  %3035 = vmatpush.bf16.msra.mxu0 %v3846_v7  ;;  %5107 = vrsqrt.f32 %v5987_v4  ;;  %v4900_v33 = vld [vmem:[%s5905_s30 + $0x26c] sm:$0xf0]  ;;  %v3974_v18 = vor.u32 %v4872_v12, %v3973_v11  ;;  %v4102_v34 = vor.u32 %v4904_v15, %v4101_v13  ;;  %v4213_v36 = vld [vmem:[%s5905_s30 + $0x360] sm:$0xf] }
 0x1d0   : > { %v1271_v25 = vrot.slane %v1270_v39, 1  ;;  %v1277_v54 = vrot.slane %v1276_v40, 1  ;;  %5109 = vrsqrt.f32 %v5990_v48  ;;  %v1242_v30 = vmul.f32 %v5996_v10, %v5996_v10  ;;  %v3813_v53 = vld [vmem:[%s5905_s30 + $0x40] sm:$0xf]  ;;  %v4864_v58 = vld [vmem:[%s5905_s30 + $0x14c] sm:$0xf0] }
 0x1d1   : > { %v1280_v9 = vadd.f32 %v1279_v2, %v1241_v55  ;;  %v6010_v21 = vpop.eup %5105  ;;  %5111 = vrsqrt.f32 %v5993_v8  ;;  %v4230_v19 = vor.u32 %v4936_v20, %v4229_v16  ;;  %3048 = vmatpush.bf16.msra.mxu1 %v3974_v18  ;;  %3061 = vmatpush.bf16.msra.mxu2 %v4102_v34  ;;  %v3830_v42 = vor.u32 %v4836_v22, %v3829_v32  ;;  %v3941_v55 = vld [vmem:[%s5905_s30 + $0x140] sm:$0xf]  ;;  %v4928_v3 = vld [vmem:[%s5905_s30 + $0x34c] sm:$0xf0] }
 0x1d2   : > { %v1272_v60 = vadd.f32 %v1271_v25, %v1270_v39  ;;  %v1278_v1 = vadd.f32 %v1277_v54, %v1276_v40  ;;  %v1319_v38 = vmul.f32 %v6010_v21, %v5972_v44  ;;  %v1285_v40 = vrot.slane %v1242_v30, 4  ;;  %v4832_v54 = vld [vmem:[%s5905_s30 + $0x4c] sm:$0xf0]  ;;  %v4069_v59 = vld [vmem:[%s5905_s30 + $0x240] sm:$0xf] }
 0x1d3   : > { %v1281_v29 = vrot.slane %v1280_v9, 2  ;;  %v3958_v43 = vor.u32 %v4868_v28, %v3957_v27  ;;  %v4086_v45 = vor.u32 %v4900_v33, %v4085_v31  ;;  %3074 = vmatpush.bf16.msra.mxu3 %v4230_v19  ;;  %v4214_v51 = vor.u32 %v4932_v37, %v4213_v36  ;;  %3036 = vmatpush.bf16.msra.mxu0 %v3830_v42  ;;  %v4197_v2 = vld [vmem:[%s5905_s30 + $0x340] sm:$0xf]  ;;  %v4860_v12 = vld [vmem:[%s5905_s30 + $0x12c] sm:$0xf0] }
 0x1d4   : > { %v1295_v5 = vmul.f32 %v1272_v60, %v5887_v26  ;;  %v1296_v49 = vmul.f32 %v1278_v1, %v5887_v26  ;;  %v1286_v25 = vadd.f32 %v1285_v40, %v1242_v30  ;;  %v4896_v60 = vld [vmem:[%s5905_s30 + $0x24c] sm:$0xf0]  ;;  %v1320_v0 = vmul.f32 %v6010_v21, %v1319_v38  ;;  %v3925_v11 = vld [vmem:[%s5905_s30 + $0x120] sm:$0xf] }
 0x1d5   : > { %v1282_v39 = vadd.f32 %v1281_v29, %v1280_v9  ;;  %v6027_v46 = vpop.eup %5107  ;;  %3049 = vmatpush.bf16.msra.mxu1 %v3958_v43  ;;  %3062 = vmatpush.bf16.msra.mxu2 %v4086_v45  ;;  %v4828_v9 = vld [vmem:[%s5905_s30 + $0x2c] sm:$0xf0]  ;;  %v3814_v16 = vor.u32 %v4832_v54, %v3813_v53  ;;  %v4053_v20 = vld [vmem:[%s5905_s30 + $0x220] sm:$0xf]  ;;  %v3942_v30 = vor.u32 %v4864_v58, %v3941_v55  ;;  %vm1325_vm3 = vweird.f32 %v6010_v21 }
 0x1d6   : > { %v6001_v14 = vadd.f32 1e-05, %v1295_v5  ;;  %v6006_v17 = vadd.f32 1e-05, %v1296_v49  ;;  %v6029_v52 = vpop.eup %5109  ;;  %v1287_v1 = vrot.slane %v1286_v25, 2  ;;  %v1309_v27 = vmul.f32 %v6027_v46, %v5987_v4 }
 0x1d7   : > { %v1283_v50 = vrot.slane %v1282_v39, 1  ;;  %v6034_v56 = vpop.eup %5111  ;;  %v1329_v6 = vmul.f32 %v6029_v52, %v5990_v48  ;;  %3075 = vmatpush.bf16.msra.mxu3 %v4214_v51  ;;  %v3797_v49 = vld [vmem:[%s5905_s30 + $0x20] sm:$0xf]  ;;  %v4892_v32 = vld [vmem:[%s5905_s30 + $0x22c] sm:$0xf0]  ;;  %v6066_v18 = vmul.f32 0.5, %v1320_v0  ;;  %3037 = vmatpush.bf16.msra.mxu0 %v3814_v16  ;;  %v4070_v36 = vor.u32 %v4896_v60, %v4069_v59 }
 0x1d8   : > { %5113 = vrsqrt.f32 %v6001_v14  ;;  %v1339_v13 = vmul.f32 %v6034_v56, %v5993_v8  ;;  %v1288_v15 = vadd.f32 %v1287_v1, %v1286_v25  ;;  %v4181_v22 = vld [vmem:[%s5905_s30 + $0x320] sm:$0xf]  ;;  %v4924_v31 = vld [vmem:[%s5905_s30 + $0x32c] sm:$0xf0]  ;;  %v4198_v40 = vor.u32 %v4928_v3, %v4197_v2 }
 0x1d9   : > { %5115 = vrsqrt.f32 %v6006_v17  ;;  %v1284_v57 = vadd.f32 %v1283_v50, %v1282_v39  ;;  %v3781_v33 = vld [vmem:[%s5905_s30] sm:$0xf]  ;;  %v4824_v37 = vld [vmem:[%s5905_s30 + $0xc] sm:$0xf0]  ;;  %v1330_v39 = vmul.f32 %v6029_v52, %v1329_v6  ;;  %3050 = vmatpush.bf16.msra.mxu1 %v3942_v30  ;;  %3063 = vmatpush.bf16.msra.mxu2 %v4070_v36  ;;  %v3798_v51 = vor.u32 %v4828_v9, %v3797_v49 }
 0x1da   : > { %v1289_v19 = vrot.slane %v1288_v15, 1  ;;  %v3909_v38 = vld [vmem:[%s5905_s30 + $0x100] sm:$0xf]  ;;  %v4856_v42 = vld [vmem:[%s5905_s30 + $0x10c] sm:$0xf0]  ;;  %v1340_v50 = vmul.f32 %v6034_v56, %v1339_v13  ;;  %v3926_v53 = vor.u32 %v4860_v12, %v3925_v11  ;;  %v4054_v59 = vor.u32 %v4892_v32, %v4053_v20 }
 0x1db   : > { %v1297_v7 = vmul.f32 %v1284_v57, %v5887_v26  ;;  %v6076_v43 = vld [vmem:[%s5905_s30 + $0x200] sm:$0xf]  ;;  %v4888_v45 = vld [vmem:[%s5905_s30 + $0x20c] sm:$0xf0]  ;;  %3076 = vmatpush.bf16.msra.mxu3 %v4198_v40  ;;  %v4182_v60 = vor.u32 %v4924_v31, %v4181_v22  ;;  %v1310_v3 = vmul.f32 %v6027_v46, %v1309_v27  ;;  %3038 = vmatpush.bf16.msra.mxu0 %v3798_v51  ;;  %v1322_v13 = vsub.f32 1.5, %v6066_v18 }
 0x1dc   : > { %v1290_v25 = vadd.f32 %v1289_v19, %v1288_v15  ;;  %v6081_v54 = vld [vmem:[%s5905_s30 + $0x300] sm:$0xf]  ;;  %v4980_v57 = vld [vmem:[%s5905_s30 + $0x4ec] sm:$0xf0]  ;;  %v3782_v49 = vor.u32 %v4824_v37, %v3781_v33  ;;  %v6096_v15 = vmul.f32 0.5, %v1330_v39  ;;  %v3910_v16 = vor.u32 %v4856_v42, %v3909_v38 }
 0x1dd   : > { %v6062_v29 = vadd.f32 1e-05, %v1297_v7  ;;  %v4405_v55 = vld [vmem:[%s5905_s30 + $0x4e0] sm:$0xf]  ;;  %v4920_v0 = vld [vmem:[%s5905_s30 + $0x30c] sm:$0xf0]  ;;  %3051 = vmatpush.bf16.msra.mxu1 %v3926_v53  ;;  %3064 = vmatpush.bf16.msra.mxu2 %v4054_v59  ;;  %v4038_v30 = vor.u32 %v4888_v45, %v6076_v43  ;;  %vm1324_vm4 = vweird.f32 %v5972_v44  ;;  %vm1334_vm5 = vweird.f32 %v5990_v48 }
 0x1de   : > { %v6039_v63 = vpop.eup %5113  ;;  %v4533_v1 = vld [vmem:[%s5905_s30 + $0x5e0] sm:$0xf]  ;;  %v5012_v2 = vld [vmem:[%s5905_s30 + $0x5ec] sm:$0xf0]  ;;  %v1298_v7 = vmul.f32 %v1290_v25, %v5887_v26  ;;  %v4406_v20 = vor.u32 %v4980_v57, %v4405_v55  ;;  %v6100_v27 = vmul.f32 0.5, %v1340_v50  ;;  %v4166_v19 = vor.u32 %v4920_v0, %v6081_v54  ;;  %vm6146_vm7 = vmor %vm1324_vm4, %vm1325_vm3 }
 0x1df   : > { %v6044_v5 = vpop.eup %5115  ;;  %v1349_v28 = vmul.f32 %v6039_v63, %v6001_v14  ;;  %5117 = vrsqrt.f32 %v6062_v29  ;;  %v4661_v9 = vld [vmem:[%s5905_s30 + $0x6e0] sm:$0xf]  ;;  %v5044_v11 = vld [vmem:[%s5905_s30 + $0x6ec] sm:$0xf0]  ;;  %v4534_v31 = vor.u32 %v5012_v2, %v4533_v1  ;;  %3077 = vmatpush.bf16.msra.mxu3 %v4182_v60  ;;  %3039 = vmatpush.bf16.msra.mxu0 %v3782_v49  ;;  %v6120_v50 = vmul.f32 0.5, %v1310_v3 }
 0x1e0   : > { %v1359_v34 = vmul.f32 %v6044_v5, %v6006_v17  ;;  %v4789_v12 = vld [vmem:[%s5905_s30 + $0x7e0] sm:$0xf]  ;;  %v5076_v32 = vld [vmem:[%s5905_s30 + $0x7ec] sm:$0xf0]  ;;  %v4662_v36 = vor.u32 %v5044_v11, %v4661_v9  ;;  %v6123_v25 = vmul.f32 %v6010_v21, %v1322_v13  ;;  %v1332_v55 = vsub.f32 1.5, %v6096_v15 }
 0x1e1   : > { %v1350_v58 = vmul.f32 %v6039_v63, %v1349_v28  ;;  %v4389_v22 = vld [vmem:[%s5905_s30 + $0x4c0] sm:$0xf]  ;;  %v6102_v28 = vadd.f32 1e-05, %v1298_v7  ;;  %v4976_v33 = vld [vmem:[%s5905_s30 + $0x4cc] sm:$0xf0]  ;;  %v4790_v42 = vor.u32 %v5076_v32, %v4789_v12  ;;  %3052 = vmatpush.bf16.msra.mxu1 %v3910_v16  ;;  %3065 = vmatpush.bf16.msra.mxu2 %v4038_v30  ;;  %vm1344_vm6 = vweird.f32 %v5993_v8 }
 0x1e2   : > { %v1360_v6 = vmul.f32 %v6044_v5, %v1359_v34  ;;  %v4517_v37 = vld [vmem:[%s5905_s30 + $0x5c0] sm:$0xf]  ;;  %v5008_v38 = vld [vmem:[%s5905_s30 + $0x5cc] sm:$0xf0]  ;;  %v4390_v51 = vor.u32 %v4976_v33, %v4389_v22  ;;  %v1342_v57 = vsub.f32 1.5, %v6100_v27  ;;  %vm1335_vm8 = vweird.f32 %v6029_v52 }
 0x1e3   : > { %v6108_v34 = vmul.f32 0.5, %v1350_v58  ;;  %5119 = vrsqrt.f32 %v6102_v28  ;;  %v4645_v43 = vld [vmem:[%s5905_s30 + $0x6c0] sm:$0xf]  ;;  %v5040_v45 = vld [vmem:[%s5905_s30 + $0x6cc] sm:$0xf0]  ;;  %3084 = vmatpush.bf16.msrb.mxu0 %v4406_v20  ;;  %v4518_v59 = vor.u32 %v5008_v38, %v4517_v37  ;;  %3078 = vmatpush.bf16.msra.mxu3 %v4166_v19  ;;  %vm1345_vm9 = vweird.f32 %v6034_v56  ;;  %vm6177_vm14 = vmor %vm1334_vm5, %vm1335_vm8 }
 0x1e4   : > { %v6113_v39 = vmul.f32 0.5, %v1360_v6  ;;  %v4773_v53 = vld [vmem:[%s5905_s30 + $0x7c0] sm:$0xf]  ;;  %v5072_v54 = vld [vmem:[%s5905_s30 + $0x7cc] sm:$0xf0]  ;;  %v4646_v1 = vor.u32 %v5040_v45, %v4645_v43  ;;  %vm1354_vm10 = vweird.f32 %v6001_v14  ;;  %v1327_v44 = vsel %vm6146_vm7, %v6010_v21, %v6123_v25  ;;  %vm6190_vm1 = vmor %vm1344_vm6, %vm1345_vm9 }
 0x1e5   : > { %v6106_v18 = vpop.eup %5117  ;;  %3097 = vmatpush.bf16.msrb.mxu1 %v4534_v31  ;;  %v4373_v60 = vld [vmem:[%s5905_s30 + $0x4a0] sm:$0xf]  ;;  %v4972_v0 = vld [vmem:[%s5905_s30 + $0x4ac] sm:$0xf0]  ;;  %3110 = vmatpush.bf16.msrb.mxu2 %v4662_v36  ;;  %v1352_v7 = vsub.f32 1.5, %v6108_v34  ;;  %v4774_v11 = vor.u32 %v5072_v54, %v4773_v53  ;;  %v6162_v22 = vmul.f32 %v6029_v52, %v1332_v55  ;;  %vm1315_vm11 = vweird.f32 %v6027_v46 }
 0x1e6   : > { %v1369_v40 = vmul.f32 %v6106_v18, %v6062_v29  ;;  %v4501_v2 = vld [vmem:[%s5905_s30 + $0x5a0] sm:$0xf]  ;;  %v5004_v3 = vld [vmem:[%s5905_s30 + $0x5ac] sm:$0xf0]  ;;  %v1362_v49 = vsub.f32 1.5, %v6113_v39  ;;  %v4374_v15 = vor.u32 %v4972_v0, %v4373_v60  ;;  %v1343_v34 = vmul.f32 %v6034_v56, %v1342_v57 }
 0x1e7   : > { %v4629_v6 = vld [vmem:[%s5905_s30 + $0x6a0] sm:$0xf]  ;;  %3123 = vmatpush.bf16.msrb.mxu3 %v4790_v42  ;;  %v5036_v12 = vld [vmem:[%s5905_s30 + $0x6ac] sm:$0xf0]  ;;  %3085 = vmatpush.bf16.msrb.mxu0 %v4390_v51  ;;  %v4502_v30 = vor.u32 %v5004_v3, %v4501_v2  ;;  %vm1355_vm13 = vweird.f32 %v6039_v63  ;;  %v1353_v39 = vmul.f32 %v6039_v63, %v1352_v7  ;;  %vm1365_vm15 = vweird.f32 %v6044_v5 }
 0x1e8   : > { %v1370_v58 = vmul.f32 %v6106_v18, %v1369_v40  ;;  %v4757_v16 = vld [vmem:[%s5905_s30 + $0x7a0] sm:$0xf]  ;;  %v5068_v20 = vld [vmem:[%s5905_s30 + $0x7ac] sm:$0xf0]  ;;  %v4630_v19 = vor.u32 %v5036_v12, %v4629_v6  ;;  %v1363_v40 = vmul.f32 %v6044_v5, %v1362_v49  ;;  %vm1375_vm2 = vweird.f32 %v6106_v18  ;;  %vm6208_vm4 = vmor %vm1354_vm10, %vm1355_vm13 }
 0x1e9   : > { %v6155_v32 = vpop.eup %5119  ;;  %3098 = vmatpush.bf16.msrb.mxu1 %v4518_v59  ;;  %v4357_v31 = vld [vmem:[%s5905_s30 + $0x480] sm:$0xf]  ;;  %v4968_v33 = vld [vmem:[%s5905_s30 + $0x48c] sm:$0xf0]  ;;  %3111 = vmatpush.bf16.msrb.mxu2 %v4646_v1  ;;  %v4758_v42 = vor.u32 %v5068_v20, %v4757_v16  ;;  %v1312_v57 = vsub.f32 1.5, %v6120_v50  ;;  %v1337_v8 = vsel %vm6177_vm14, %v6029_v52, %v6162_v22  ;;  %vm1407_vm3 = vcmask 1041408  }
 0x1ea   : > { %v1371_v9 = vmul.f32 0.5, %v1370_v58  ;;  %v1379_v21 = vmul.f32 %v6155_v32, %v6102_v28  ;;  %v4485_v36 = vld [vmem:[%s5905_s30 + $0x580] sm:$0xf]  ;;  %v5000_v37 = vld [vmem:[%s5905_s30 + $0x58c] sm:$0xf0]  ;;  %v4358_v53 = vor.u32 %v4968_v33, %v4357_v31  ;;  %vm1364_vm5 = vweird.f32 %v6006_v17 }
 0x1eb   : > { %3124 = vmatpush.bf16.msrb.mxu3 %v4774_v11  ;;  %v4613_v43 = vld [vmem:[%s5905_s30 + $0x680] sm:$0xf]  ;;  %v5032_v45 = vld [vmem:[%s5905_s30 + $0x68c] sm:$0xf0]  ;;  %3086 = vmatpush.bf16.msrb.mxu0 %v4374_v15  ;;  %v4486_v59 = vor.u32 %v5000_v37, %v4485_v36  ;;  %v1347_v52 = vsel %vm6190_vm1, %v6034_v56, %v1343_v34  ;;  %vm6220_vm6 = vmor %vm1364_vm5, %vm1365_vm15  ;;  %vm1374_vm7 = vweird.f32 %v6062_v29  ;;  %v1396_v3 = vrot.slane %v1327_v44, 7 }
 0x1ec   : > { %v1372_v27 = vsub.f32 1.5, %v1371_v9  ;;  %v1380_v51 = vmul.f32 %v6155_v32, %v1379_v21  ;;  %v4741_v54 = vld [vmem:[%s5905_s30 + $0x780] sm:$0xf]  ;;  %v5064_v55 = vld [vmem:[%s5905_s30 + $0x78c] sm:$0xf0]  ;;  %v4614_v17 = vor.u32 %v5032_v45, %v4613_v43  ;;  %v1357_v56 = vsel %vm6208_vm4, %v6039_v63, %v1353_v39  ;;  %vm6235_vm8 = vmor %vm1374_vm7, %vm1375_vm2 }
 0x1ed   : > { %3099 = vmatpush.bf16.msrb.mxu1 %v4502_v30  ;;  %v4341_v50 = vld [vmem:[%s5905_s30 + $0x460] sm:$0xf]  ;;  %v4964_v60 = vld [vmem:[%s5905_s30 + $0x46c] sm:$0xf0]  ;;  %3112 = vmatpush.bf16.msrb.mxu2 %v4630_v19  ;;  %v1367_v6 = vsel %vm6220_vm6, %v6044_v5, %v1363_v40  ;;  %v4742_v7 = vor.u32 %v5064_v55, %v4741_v54  ;;  %vm1385_vm9 = vweird.f32 %v6155_v32  ;;  %v1313_v15 = vmul.f32 %v6027_v46, %v1312_v57 }
 0x1ee   : > { %v1373_v25 = vmul.f32 %v6106_v18, %v1372_v27  ;;  %v1381_v0 = vmul.f32 0.5, %v1380_v51  ;;  %v4469_v1 = vld [vmem:[%s5905_s30 + $0x560] sm:$0xf]  ;;  %v4996_v2 = vld [vmem:[%s5905_s30 + $0x56c] sm:$0xf0]  ;;  %v4342_v5 = vor.u32 %v4964_v60, %v4341_v50  ;;  %v1397_v16 = vrot.slane %v1337_v8, 6 }
 0x1ef   : > { %3125 = vmatpush.bf16.msrb.mxu3 %v4758_v42  ;;  %v4597_v49 = vld [vmem:[%s5905_s30 + $0x660] sm:$0xf]  ;;  %v5028_v9 = vld [vmem:[%s5905_s30 + $0x66c] sm:$0xf0]  ;;  %3087 = vmatpush.bf16.msrb.mxu0 %v4358_v53  ;;  %v1398_v20 = vrot.slane %v1347_v52, 5  ;;  %v4470_v44 = vor.u32 %v4996_v2, %v4469_v1  ;;  %vm1384_vm10 = vweird.f32 %v6102_v28  ;;  %vm1314_vm13 = vweird.f32 %v5987_v4 }
 0x1f0   : > { %v1377_v63 = vsel %vm6235_vm8, %v6106_v18, %v1373_v25  ;;  %v1382_v11 = vsub.f32 1.5, %v1381_v0  ;;  %v4725_v12 = vld [vmem:[%s5905_s30 + $0x760] sm:$0xf]  ;;  %v5060_v13 = vld [vmem:[%s5905_s30 + $0x76c] sm:$0xf0]  ;;  %v1399_v18 = vrot.slane %v1357_v56, 4  ;;  %v4598_v31 = vor.u32 %v5028_v9, %v4597_v49  ;;  %vm1386_vm14 = vmor %vm1384_vm10, %vm1385_vm9 }
 0x1f1   : > { %3100 = vmatpush.bf16.msrb.mxu1 %v4486_v59  ;;  %v4325_v22 = vld [vmem:[%s5905_s30 + $0x440] sm:$0xf]  ;;  %v4960_v27 = vld [vmem:[%s5905_s30 + $0x44c] sm:$0xf0]  ;;  %3113 = vmatpush.bf16.msrb.mxu2 %v4614_v17  ;;  %v1400_v21 = vrot.slane %v1367_v6, 3  ;;  %v1401_v19 = vrot.slane %v1377_v63, 2  ;;  %v4726_v36 = vor.u32 %v5060_v13, %v4725_v12  ;;  %vm6266_vm2 = vmor %vm1314_vm13, %vm1315_vm11  ;;  %v1406_v45 = vsel %vm1405_vm12, %v1397_v16, %v1398_v20 }
 0x1f2   : > { %v1383_v30 = vmul.f32 %v6155_v32, %v1382_v11  ;;  %v4453_v33 = vld [vmem:[%s5905_s30 + $0x540] sm:$0xf]  ;;  %v4992_v34 = vld [vmem:[%s5905_s30 + $0x54c] sm:$0xf0]  ;;  %vm1409_vm15 = vcmask 1044484   ;;  %vm1411_vm1 = vcmask 1046534   ;;  %v4326_v39 = vor.u32 %v4960_v27, %v4325_v22 }
 0x1f3   : > { %3126 = vmatpush.bf16.msrb.mxu3 %v4742_v7  ;;  %v4581_v37 = vld [vmem:[%s5905_s30 + $0x640] sm:$0xf]  ;;  %v5024_v38 = vld [vmem:[%s5905_s30 + $0x64c] sm:$0xf0]  ;;  %3088 = vmatpush.bf16.msrb.mxu0 %v4342_v5  ;;  %vm1413_vm4 = vcmask 1045508   ;;  %v4454_v25 = vor.u32 %v4992_v34, %v4453_v33  ;;  %v1317_v4 = vsel %vm6266_vm2, %v6027_v46, %v1313_v15  ;;  %vm1415_vm11 = vcmask 1043456  }
 0x1f4   : > { %v1387_v28 = vsel %vm1386_vm14, %v6155_v32, %v1383_v30  ;;  %v4709_v40 = vld [vmem:[%s5905_s30 + $0x740] sm:$0xf]  ;;  %v5056_v42 = vld [vmem:[%s5905_s30 + $0x74c] sm:$0xf0]  ;;  %v4582_v54 = vor.u32 %v5024_v38, %v4581_v37  ;;  %v1404_v58 = vsel %vm1403_vm0, %v1317_v4, %v1396_v3  ;;  %v1410_v59 = vsel %vm1409_vm15, %v1399_v18, %v1400_v21 }
 0x1f5   : > { %v1299_v32 = vld [vmem:[%s6836_s3] sm:$0xff]  ;;  %v1402_v48 = vrot.slane %v1387_v28, 1  ;;  %3101 = vmatpush.bf16.msrb.mxu1 %v4470_v44  ;;  %v4956_v53 = vld [vmem:[%s5905_s30 + $0x42c] sm:$0xf0]  ;;  %3114 = vmatpush.bf16.msrb.mxu2 %v4598_v31  ;;  %v4710_v46 = vor.u32 %v5056_v42, %v4709_v40  ;;  %v1408_v0 = vsel %vm1407_vm3, %v1404_v58, %v1406_v45  ;;  %v3895_v40 = vld [vmem:[%s5905_s30 + $0xf0] sm:$0xf0] }
 0x1f6   : > { %v4309_v51 = vld [vmem:[%s5905_s30 + $0x420] sm:$0xf]  ;;  %v4988_v57 = vld [vmem:[%s5905_s30 + $0x52c] sm:$0xf0]  ;;  %v4882_v42 = vld [vmem:[%s5905_s30 + $0x1e4] sm:$0xf] }
 0x1f7   : > { %v4437_v55 = vld [vmem:[%s5905_s30 + $0x520] sm:$0xf]  ;;  %v1412_v50 = vsel %vm1411_vm1, %v1401_v19, %v1402_v48  ;;  %3127 = vmatpush.bf16.msrb.mxu3 %v4726_v36  ;;  %v5020_v52 = vld [vmem:[%s5905_s30 + $0x62c] sm:$0xf0]  ;;  %3089 = vmatpush.bf16.msrb.mxu0 %v4326_v39  ;;  %v4310_v1 = vor.u32 %v4956_v53, %v4309_v51  ;;  %v4850_v39 = vld [vmem:[%s5905_s30 + $0xe4] sm:$0xf] }
 0x1f8   : > { %v6284_v8 = vld [vmem:[%s6837_s4] sm:$0xff]  ;;  %v1414_v17 = vsel %vm1413_vm4, %v1410_v59, %v1412_v50  ;;  %v5052_v2 = vld [vmem:[%s5905_s30 + $0x72c] sm:$0xf0]  ;;  %v4438_v29 = vor.u32 %v4988_v57, %v4437_v55  ;;  %v4279_v51 = vld [vmem:[%s5905_s30 + $0x3f0] sm:$0xf0] }
 0x1f9   : > { %v4565_v60 = vld [vmem:[%s5905_s30 + $0x620] sm:$0xf]  ;;  %v4952_v56 = vld [vmem:[%s5905_s30 + $0x40c] sm:$0xf0]  ;;  %v1416_v6 = vsel %vm1415_vm11, %v1408_v0, %v1414_v17  ;;  %3102 = vmatpush.bf16.msrb.mxu1 %v4454_v25  ;;  %3115 = vmatpush.bf16.msrb.mxu2 %v4582_v54  ;;  %v1446_v16 = vperm.slane %v6284_v8, 0  ;;  %v1447_v20 = vperm.slane %v6284_v8, 1  ;;  %v3898_v54 = vor.u32 %v4850_v39, %v3895_v40 }
 0x1fa   : > { %v4693_v14 = vld [vmem:[%s5905_s30 + $0x720] sm:$0xf]  ;;  %v6298_v7 = vmul.f32 %v1416_v6, %v1299_v32  ;;  %v4566_v49 = vor.u32 %v5020_v52, %v4565_v60  ;;  %v4984_v63 = vld [vmem:[%s5905_s30 + $0x50c] sm:$0xf0]  ;;  %v1448_v30 = vperm.slane %v6284_v8, 2  ;;  %v1449_v34 = vperm.slane %v6284_v8, 3 }
 0x1fb   : > { %v4293_v3 = vld [vmem:[%s5905_s30 + $0x400] sm:$0xf]  ;;  %3128 = vmatpush.bf16.msrb.mxu3 %v4710_v46  ;;  %v4694_v5 = vor.u32 %v5052_v2, %v4693_v14  ;;  %v5016_v13 = vld [vmem:[%s5905_s30 + $0x60c] sm:$0xf0]  ;;  %3090 = vmatpush.bf16.msrb.mxu0 %v4310_v1  ;;  %v4914_v48 = vld [vmem:[%s5905_s30 + $0x2e4] sm:$0xf] }
 0x1fc   : > { %v4421_v9 = vld [vmem:[%s5905_s30 + $0x500] sm:$0xf]  ;;  %v4294_v12 = vor.u32 %v4952_v56, %v4293_v3  ;;  %v5048_v44 = vld [vmem:[%s5905_s30 + $0x70c] sm:$0xf0]  ;;  %v1420_v22 = vperm.slane %v6298_v7, 0  ;;  %v1421_v27 = vperm.slane %v6298_v7, 1 }
 0x1fd   : > { %v4549_v11 = vld [vmem:[%s5905_s30 + $0x600] sm:$0xf]  ;;  %v1422_v18 = vperm.slane %v6298_v7, 2  ;;  %3103 = vmatpush.bf16.msrb.mxu1 %v4438_v29  ;;  %v4422_v31 = vor.u32 %v4984_v63, %v4421_v9  ;;  %v1423_v33 = vperm.slane %v6298_v7, 3  ;;  %3116 = vmatpush.bf16.msrb.mxu2 %v4566_v49  ;;  %v4946_v25 = vld [vmem:[%s5905_s30 + $0x3e4] sm:$0xf] }
 0x1fe   : > { %v4677_v15 = vld [vmem:[%s5905_s30 + $0x700] sm:$0xf]  ;;  %v4550_v21 = vor.u32 %v5016_v13, %v4549_v11  ;;  %v1436_v19 = vmul.f32 %v1420_v22, %v5896_v41  ;;  %v1437_v36 = vmul.f32 %v1421_v27, %v5899_v47  ;;  %v4023_v41 = vld [vmem:[%s5905_s30 + $0x1f0] sm:$0xf0]  ;;  %v4846_v55 = vld [vmem:[%s5905_s30 + $0xc4] sm:$0xf]  ;;  %v4282_v29 = vor.u32 %v4946_v25, %v4279_v51 }
 0x1ff   : > { %v1438_v37 = vmul.f32 %v1422_v18, %v5928_v23  ;;  %3129 = vmatpush.bf16.msrb.mxu3 %v4694_v5  ;;  %v4678_v38 = vor.u32 %v5048_v44, %v4677_v15  ;;  %v1439_v28 = vmul.f32 %v1423_v33, %v5931_v24  ;;  %3091 = vmatpush.bf16.msrb.mxu0 %v4294_v12  ;;  %v4151_v47 = vld [vmem:[%s5905_s30 + $0x2f0] sm:$0xf0]  ;;  %v4878_v46 = vld [vmem:[%s5905_s30 + $0x1c4] sm:$0xf]  ;;  %v1424_v52 = vperm.slane %v6298_v7, 4 }
 0x200   : > { %v1462_v43 = vadd.f32 %v1446_v16, %v1436_v19  ;;  %v1463_v45 = vadd.f32 %v1447_v20, %v1437_v36  ;;  %v3879_v57 = vld [vmem:[%s5905_s30 + $0xd0] sm:$0xf0]  ;;  %v4026_v59 = vor.u32 %v4882_v42, %v4023_v41  ;;  %v4154_v50 = vor.u32 %v4914_v48, %v4151_v47  ;;  %v4910_v1 = vld [vmem:[%s5905_s30 + $0x2c4] sm:$0xf] }
 0x201   : > { %v1464_v32 = vadd.f32 %v1448_v30, %v1438_v37  ;;  %3104 = vmatpush.bf16.msrb.mxu1 %v4422_v31  ;;  %v1465_v23 = vadd.f32 %v1449_v34, %v1439_v28  ;;  %3117 = vmatpush.bf16.msrb.mxu2 %v4550_v21  ;;  %v4007_v60 = vld [vmem:[%s5905_s30 + $0x1d0] sm:$0xf0]  ;;  %v1425_v3 = vperm.slane %v6298_v7, 5  ;;  %v1427_v56 = vperm.slane %v6298_v7, 7  ;;  %v4942_v49 = vld [vmem:[%s5905_s30 + $0x3c4] sm:$0xf] }
 0x202   : > { %v1470_v24 = vmax.f32 %v1462_v43, 0.0  ;;  %v1471_v53 = vmax.f32 %v1463_v45, 0.0  ;;  %v4135_v2 = vld [vmem:[%s5905_s30 + $0x2d0] sm:$0xf0]  ;;  %v1426_v63 = vperm.slane %v6298_v7, 6  ;;  %v3882_v11 = vor.u32 %v4846_v55, %v3879_v57 }
 0x203   : > { %v1472_v4 = vmax.f32 %v1464_v32, 0.0  ;;  %3130 = vmatpush.bf16.msrb.mxu3 %v4678_v38  ;;  %v1473_v58 = vmax.f32 %v1465_v23, 0.0  ;;  %v4263_v9 = vld [vmem:[%s5905_s30 + $0x3d0] sm:$0xf0]  ;;  %v4010_v5 = vor.u32 %v4878_v46, %v4007_v60  ;;  %v4138_v12 = vor.u32 %v4910_v1, %v4135_v2  ;;  %v4842_v13 = vld [vmem:[%s5905_s30 + $0xa4] sm:$0xf] }
 0x204   : > { %v6331_v14 = vpack.c.bf16 %v1470_v24, %v1470_v24  ;;  %v6333_v0 = vpack.c.bf16 %v1471_v53, %v1471_v53  ;;  %v3863_v15 = vld [vmem:[%s5905_s30 + $0xb0] sm:$0xf0]  ;;  %v1450_v16 = vperm.slane %v6284_v8, 4  ;;  %v4266_v7 = vor.u32 %v4942_v49, %v4263_v9  ;;  %v4874_v20 = vld [vmem:[%s5905_s30 + $0x1a4] sm:$0xf] }
 0x205   : > { %v6335_v17 = vpack.c.bf16 %v1472_v4, %v1472_v4  ;;  %v6341_v6 = vpack.c.bf16 %v1473_v58, %v1473_v58  ;;  %v3991_v44 = vld [vmem:[%s5905_s30 + $0x1b0] sm:$0xf0]  ;;  %v1440_v22 = vmul.f32 %v1424_v52, %v5948_v61  ;;  %v1441_v27 = vmul.f32 %v1425_v3, %v5951_v62  ;;  %v4906_v31 = vld [vmem:[%s5905_s30 + $0x2a4] sm:$0xf] }
 0x206   : > { %3040 = vmatmul.bf16.vlgmr.msra.gmra.mxu0 %v6331_v14  ;;  %3053 = vmatmul.bf16.vlgmr.msra.gmra.mxu1 %v6333_v0  ;;  %v1451_v18 = vperm.slane %v6284_v8, 5  ;;  %v1443_v30 = vmul.f32 %v1427_v56, %v5996_v10  ;;  %v4119_v33 = vld [vmem:[%s5905_s30 + $0x2b0] sm:$0xf0]  ;;  %v1442_v34 = vmul.f32 %v1426_v63, %v5968_v35  ;;  %v1452_v21 = vperm.slane %v6284_v8, 6  ;;  %v4938_v61 = vld [vmem:[%s5905_s30 + $0x3a4] sm:$0xf] }
 0x207   : > { %3066 = vmatmul.bf16.vlgmr.msra.gmra.mxu2 %v6335_v17  ;;  %3079 = vmatmul.bf16.vlgmr.msra.gmra.mxu3 %v6341_v6  ;;  %v1453_v19 = vperm.slane %v6284_v8, 7  ;;  %v4247_v62 = vld [vmem:[%s5905_s30 + $0x3b0] sm:$0xf0]  ;;  %v3866_v36 = vor.u32 %v4842_v13, %v3863_v15  ;;  %v3994_v37 = vor.u32 %v4874_v20, %v3991_v44  ;;  %v4122_v10 = vor.u32 %v4906_v31, %v4119_v33  ;;  %v4838_v38 = vld [vmem:[%s5905_s30 + $0x84] sm:$0xf] }
 0x208   : > { %3136 = vmatpush.bf16.msra.mxu0 %v3898_v54  ;;  %3149 = vmatpush.bf16.msra.mxu1 %v4026_v59  ;;  %v3847_v35 = vld [vmem:[%s5905_s30 + $0x90] sm:$0xf0]  ;;  %v1466_v28 = vadd.f32 %v1450_v16, %v1440_v22  ;;  %v1467_v39 = vadd.f32 %v1451_v18, %v1441_v27  ;;  %v4250_v8 = vor.u32 %v4938_v61, %v4247_v62  ;;  %v4870_v40 = vld [vmem:[%s5905_s30 + $0x184] sm:$0xf] }
 0x209   : > { %3162 = vmatpush.bf16.msra.mxu2 %v4154_v50  ;;  %3175 = vmatpush.bf16.msra.mxu3 %v4282_v29  ;;  %v3975_v42 = vld [vmem:[%s5905_s30 + $0x190] sm:$0xf0]  ;;  %v4902_v43 = vld [vmem:[%s5905_s30 + $0x284] sm:$0xf]  ;;  %v1468_v45 = vadd.f32 %v1452_v21, %v1442_v34  ;;  %v1469_v32 = vadd.f32 %v1453_v19, %v1443_v30  ;;  %v3850_v51 = vor.u32 %v4838_v38, %v3847_v35 }
 0x20a   : > { %v4103_v41 = vld [vmem:[%s5905_s30 + $0x290] sm:$0xf0]  ;;  %v4934_v48 = vld [vmem:[%s5905_s30 + $0x384] sm:$0xf]  ;;  %v3978_v24 = vor.u32 %v4870_v40, %v3975_v42  ;;  %v1474_v53 = vmax.f32 %v1466_v28, 0.0  ;;  %v1475_v4 = vmax.f32 %v1467_v39, 0.0 }
 0x20b   : > { %v4231_v47 = vld [vmem:[%s5905_s30 + $0x390] sm:$0xf0]  ;;  %v4834_v23 = vld [vmem:[%s5905_s30 + $0x64] sm:$0xf]  ;;  %v4106_v57 = vor.u32 %v4902_v43, %v4103_v41  ;;  %v1476_v59 = vmax.f32 %v1468_v45, 0.0  ;;  %v1477_v50 = vmax.f32 %v1469_v32, 0.0 }
 0x20c   : > { %3137 = vmatpush.bf16.msra.mxu0 %v3882_v11  ;;  %3150 = vmatpush.bf16.msra.mxu1 %v4010_v5  ;;  %v3831_v25 = vld [vmem:[%s5905_s30 + $0x70] sm:$0xf0]  ;;  %v4866_v54 = vld [vmem:[%s5905_s30 + $0x164] sm:$0xf]  ;;  %v4234_v58 = vor.u32 %v4934_v48, %v4231_v47  ;;  %v6382_v56 = vpack.c.bf16 %v1474_v53, %v1474_v53  ;;  %v6384_v29 = vpack.c.bf16 %v1475_v4, %v1475_v4 }
 0x20d   : > { %3163 = vmatpush.bf16.msra.mxu2 %v4138_v12  ;;  %3176 = vmatpush.bf16.msra.mxu3 %v4266_v7  ;;  %v3959_v55 = vld [vmem:[%s5905_s30 + $0x170] sm:$0xf0]  ;;  %v4898_v46 = vld [vmem:[%s5905_s30 + $0x264] sm:$0xf]  ;;  %v3834_v2 = vor.u32 %v4834_v23, %v3831_v25  ;;  %v6388_v11 = vpack.c.bf16 %v1476_v59, %v1476_v59  ;;  %v6390_v5 = vpack.c.bf16 %v1477_v50, %v1477_v50 }
 0x20e   : > { %v4087_v60 = vld [vmem:[%s5905_s30 + $0x270] sm:$0xf0]  ;;  %v4930_v52 = vld [vmem:[%s5905_s30 + $0x364] sm:$0xf]  ;;  %v3962_v3 = vor.u32 %v4866_v54, %v3959_v55 }
 0x20f   : > { %v4215_v1 = vld [vmem:[%s5905_s30 + $0x370] sm:$0xf0]  ;;  %v4090_v49 = vor.u32 %v4898_v46, %v4087_v60  ;;  %v4830_v9 = vld [vmem:[%s5905_s30 + $0x44] sm:$0xf] }
 0x210   : > { %3138 = vmatpush.bf16.msra.mxu0 %v3866_v36  ;;  %3151 = vmatpush.bf16.msra.mxu1 %v3994_v37  ;;  %v3815_v63 = vld [vmem:[%s5905_s30 + $0x50] sm:$0xf0]  ;;  %v4218_v12 = vor.u32 %v4930_v52, %v4215_v1  ;;  %v4862_v13 = vld [vmem:[%s5905_s30 + $0x144] sm:$0xf] }
 0x211   : > { %3164 = vmatpush.bf16.msra.mxu2 %v4122_v10  ;;  %3177 = vmatpush.bf16.msra.mxu3 %v4250_v8  ;;  %v3943_v15 = vld [vmem:[%s5905_s30 + $0x150] sm:$0xf0]  ;;  %v4894_v16 = vld [vmem:[%s5905_s30 + $0x244] sm:$0xf]  ;;  %v3818_v22 = vor.u32 %v4830_v9, %v3815_v63 }
 0x212   : > { %v4071_v7 = vld [vmem:[%s5905_s30 + $0x250] sm:$0xf0]  ;;  %v4926_v20 = vld [vmem:[%s5905_s30 + $0x344] sm:$0xf]  ;;  %v3946_v27 = vor.u32 %v4862_v13, %v3943_v15 }
 0x213   : > { %v4199_v44 = vld [vmem:[%s5905_s30 + $0x350] sm:$0xf0]  ;;  %v4826_v18 = vld [vmem:[%s5905_s30 + $0x24] sm:$0xf]  ;;  %v4074_v31 = vor.u32 %v4894_v16, %v4071_v7 }
 0x214   : > { %3139 = vmatpush.bf16.msra.mxu0 %v3850_v51  ;;  %3152 = vmatpush.bf16.msra.mxu1 %v3978_v24  ;;  %v3799_v30 = vld [vmem:[%s5905_s30 + $0x30] sm:$0xf0]  ;;  %v4202_v33 = vor.u32 %v4926_v20, %v4199_v44  ;;  %v4858_v34 = vld [vmem:[%s5905_s30 + $0x124] sm:$0xf] }
 0x215   : > { %3165 = vmatpush.bf16.msra.mxu2 %v4106_v57  ;;  %3178 = vmatpush.bf16.msra.mxu3 %v4234_v58  ;;  %v3927_v21 = vld [vmem:[%s5905_s30 + $0x130] sm:$0xf0]  ;;  %v4890_v19 = vld [vmem:[%s5905_s30 + $0x224] sm:$0xf]  ;;  %v3802_v10 = vor.u32 %v4826_v18, %v3799_v30 }
 0x216   : > { %3092 = vmatmul.bf16.vlgmr.msrb.gmra.mxu0 %v6382_v56  ;;  %3105 = vmatmul.bf16.vlgmr.msrb.gmra.mxu1 %v6384_v29  ;;  %v4055_v61 = vld [vmem:[%s5905_s30 + $0x230] sm:$0xf0]  ;;  %v4922_v62 = vld [vmem:[%s5905_s30 + $0x324] sm:$0xf]  ;;  %v3930_v38 = vor.u32 %v4858_v34, %v3927_v21 }
 0x217   : > { %3118 = vmatmul.bf16.vlgmr.msrb.gmra.mxu2 %v6388_v11  ;;  %3131 = vmatmul.bf16.vlgmr.msrb.gmra.mxu3 %v6390_v5  ;;  %v4183_v36 = vld [vmem:[%s5905_s30 + $0x330] sm:$0xf0]  ;;  %v4822_v37 = vld [vmem:[%s5905_s30 + $0x4] sm:$0xf]  ;;  %v4058_v8 = vor.u32 %v4890_v19, %v4055_v61 }
 0x218   : > { %3140 = vmatpush.bf16.msra.mxu0 %v3834_v2  ;;  %3153 = vmatpush.bf16.msra.mxu1 %v3962_v3  ;;  %v3783_v35 = vld [vmem:[%s5905_s30 + $0x10] sm:$0xf0]  ;;  %v4854_v28 = vld [vmem:[%s5905_s30 + $0x104] sm:$0xf]  ;;  %v4186_v40 = vor.u32 %v4922_v62, %v4183_v36 }
 0x219   : > { %3166 = vmatpush.bf16.msra.mxu2 %v4090_v49  ;;  %3179 = vmatpush.bf16.msra.mxu3 %v4218_v12  ;;  %v3911_v39 = vld [vmem:[%s5905_s30 + $0x110] sm:$0xf0]  ;;  %v4886_v42 = vld [vmem:[%s5905_s30 + $0x204] sm:$0xf]  ;;  %v3786_v51 = vor.u32 %v4822_v37, %v3783_v35 }
 0x21a   : > { %v4039_v43 = vld [vmem:[%s5905_s30 + $0x210] sm:$0xf0]  ;;  %v4918_v45 = vld [vmem:[%s5905_s30 + $0x304] sm:$0xf]  ;;  %v3914_v24 = vor.u32 %v4854_v28, %v3911_v39 }
 0x21b   : > { %v4167_v32 = vld [vmem:[%s5905_s30 + $0x310] sm:$0xf0]  ;;  %v4978_v41 = vld [vmem:[%s5905_s30 + $0x4e4] sm:$0xf]  ;;  %v4042_v55 = vor.u32 %v4886_v42, %v4039_v43 }
 0x21c   : > { %3141 = vmatpush.bf16.msra.mxu0 %v3818_v22  ;;  %3154 = vmatpush.bf16.msra.mxu1 %v3946_v27  ;;  %v4407_v48 = vld [vmem:[%s5905_s30 + $0x4f0] sm:$0xf0]  ;;  %v5010_v47 = vld [vmem:[%s5905_s30 + $0x5e4] sm:$0xf]  ;;  %v4170_v57 = vor.u32 %v4918_v45, %v4167_v32 }
 0x21d   : > { %3167 = vmatpush.bf16.msra.mxu2 %v4074_v31  ;;  %3180 = vmatpush.bf16.msra.mxu3 %v4202_v33  ;;  %v4535_v23 = vld [vmem:[%s5905_s30 + $0x5f0] sm:$0xf0]  ;;  %v5042_v25 = vld [vmem:[%s5905_s30 + $0x6e4] sm:$0xf]  ;;  %v4410_v58 = vor.u32 %v4978_v41, %v4407_v48 }
 0x21e   : > { %v4663_v53 = vld [vmem:[%s5905_s30 + $0x6f0] sm:$0xf0]  ;;  %v5074_v4 = vld [vmem:[%s5905_s30 + $0x7e4] sm:$0xf]  ;;  %v4538_v59 = vor.u32 %v5010_v47, %v4535_v23 }
 0x21f   : > { %v4791_v54 = vld [vmem:[%s5905_s30 + $0x7f0] sm:$0xf0]  ;;  %v4974_v50 = vld [vmem:[%s5905_s30 + $0x4c4] sm:$0xf]  ;;  %v4666_v60 = vor.u32 %v5042_v25, %v4663_v53 }
 0x220   : > { %3142 = vmatpush.bf16.msra.mxu0 %v3802_v10  ;;  %3155 = vmatpush.bf16.msra.mxu1 %v3930_v38  ;;  %v4391_v46 = vld [vmem:[%s5905_s30 + $0x4d0] sm:$0xf0]  ;;  %v4794_v52 = vor.u32 %v5074_v4, %v4791_v54  ;;  %v5006_v1 = vld [vmem:[%s5905_s30 + $0x5c4] sm:$0xf] }
 0x221   : > { %3168 = vmatpush.bf16.msra.mxu2 %v4058_v8  ;;  %3181 = vmatpush.bf16.msra.mxu3 %v4186_v40  ;;  %v4519_v2 = vld [vmem:[%s5905_s30 + $0x5d0] sm:$0xf0]  ;;  %v5038_v3 = vld [vmem:[%s5905_s30 + $0x6c4] sm:$0xf]  ;;  %v4394_v12 = vor.u32 %v4974_v50, %v4391_v46 }
 0x222   : > { %v4647_v49 = vld [vmem:[%s5905_s30 + $0x6d0] sm:$0xf0]  ;;  %v5070_v9 = vld [vmem:[%s5905_s30 + $0x7c4] sm:$0xf]  ;;  %v4522_v13 = vor.u32 %v5006_v1, %v4519_v2 }
 0x223   : > { %v4775_v63 = vld [vmem:[%s5905_s30 + $0x7d0] sm:$0xf0]  ;;  %v4970_v15 = vld [vmem:[%s5905_s30 + $0x4a4] sm:$0xf]  ;;  %v4650_v7 = vor.u32 %v5038_v3, %v4647_v49 }
 0x224   : > { %3143 = vmatpush.bf16.msra.mxu0 %v3786_v51  ;;  %3156 = vmatpush.bf16.msra.mxu1 %v3914_v24  ;;  %v4375_v16 = vld [vmem:[%s5905_s30 + $0x4b0] sm:$0xf0]  ;;  %v4778_v20 = vor.u32 %v5070_v9, %v4775_v63  ;;  %v5002_v44 = vld [vmem:[%s5905_s30 + $0x5a4] sm:$0xf] }
 0x225   : > { %3169 = vmatpush.bf16.msra.mxu2 %v4042_v55  ;;  %3182 = vmatpush.bf16.msra.mxu3 %v4170_v57  ;;  %v4503_v22 = vld [vmem:[%s5905_s30 + $0x5b0] sm:$0xf0]  ;;  %v5034_v27 = vld [vmem:[%s5905_s30 + $0x6a4] sm:$0xf]  ;;  %v4378_v33 = vor.u32 %v4970_v15, %v4375_v16 }
 0x226   : > { %v4631_v18 = vld [vmem:[%s5905_s30 + $0x6b0] sm:$0xf0]  ;;  %v5066_v30 = vld [vmem:[%s5905_s30 + $0x7a4] sm:$0xf]  ;;  %v4506_v34 = vor.u32 %v5002_v44, %v4503_v22 }
 0x227   : > { %3144 = vmatmul.bf16.vlgmr.msra.gmra.mxu0 %v6331_v14  ;;  %3157 = vmatmul.bf16.vlgmr.msra.gmra.mxu1 %v6333_v0  ;;  %v4759_v31 = vld [vmem:[%s5905_s30 + $0x7b0] sm:$0xf0]  ;;  %v4966_v21 = vld [vmem:[%s5905_s30 + $0x484] sm:$0xf]  ;;  %v4634_v61 = vor.u32 %v5034_v27, %v4631_v18 }
 0x228   : > { %3188 = vmatpush.bf16.msrb.mxu0 %v4410_v58  ;;  %3201 = vmatpush.bf16.msrb.mxu1 %v4538_v59  ;;  %v4359_v19 = vld [vmem:[%s5905_s30 + $0x490] sm:$0xf0]  ;;  %v4762_v62 = vor.u32 %v5066_v30, %v4759_v31  ;;  %v4998_v36 = vld [vmem:[%s5905_s30 + $0x584] sm:$0xf] }
 0x229   : > { %3214 = vmatpush.bf16.msrb.mxu2 %v4666_v60  ;;  %3227 = vmatpush.bf16.msrb.mxu3 %v4794_v52  ;;  %v4487_v37 = vld [vmem:[%s5905_s30 + $0x590] sm:$0xf0]  ;;  %v5030_v10 = vld [vmem:[%s5905_s30 + $0x684] sm:$0xf]  ;;  %v4362_v39 = vor.u32 %v4966_v21, %v4359_v19 }
 0x22a   : > { %3170 = vmatmul.bf16.vlgmr.msra.gmra.mxu2 %v6335_v17  ;;  %3183 = vmatmul.bf16.vlgmr.msra.gmra.mxu3 %v6341_v6  ;;  %v4615_v38 = vld [vmem:[%s5905_s30 + $0x690] sm:$0xf0]  ;;  %v5062_v35 = vld [vmem:[%s5905_s30 + $0x784] sm:$0xf]  ;;  %v4490_v8 = vor.u32 %v4998_v36, %v4487_v37  ;;  %v4853_v36 = vld [vmem:[%s5905_s30 + $0xf4] sm:$0xf0] }
 0x22b   : > { %v4743_v28 = vld [vmem:[%s5905_s30 + $0x790] sm:$0xf0]  ;;  %v4962_v40 = vld [vmem:[%s5905_s30 + $0x464] sm:$0xf]  ;;  %v4618_v43 = vor.u32 %v5030_v10, %v4615_v38  ;;  %v4029_v37 = vld [vmem:[%s5905_s30 + $0x1e8] sm:$0xf] }
 0x22c   : > { %3189 = vmatpush.bf16.msrb.mxu0 %v4394_v12  ;;  %3202 = vmatpush.bf16.msrb.mxu1 %v4522_v13  ;;  %v4343_v42 = vld [vmem:[%s5905_s30 + $0x470] sm:$0xf0]  ;;  %v4746_v45 = vor.u32 %v5062_v35, %v4743_v28  ;;  %v4994_v32 = vld [vmem:[%s5905_s30 + $0x564] sm:$0xf]  ;;  %v4885_v10 = vld [vmem:[%s5905_s30 + $0x1f4] sm:$0xf0] }
 0x22d   : > { %3215 = vmatpush.bf16.msrb.mxu2 %v4650_v7  ;;  %3228 = vmatpush.bf16.msrb.mxu3 %v4778_v20  ;;  %v4471_v41 = vld [vmem:[%s5905_s30 + $0x570] sm:$0xf0]  ;;  %v5026_v48 = vld [vmem:[%s5905_s30 + $0x664] sm:$0xf]  ;;  %v4346_v51 = vor.u32 %v4962_v40, %v4343_v42  ;;  %v4157_v38 = vld [vmem:[%s5905_s30 + $0x2e8] sm:$0xf] }
 0x22e   : > { %v4599_v47 = vld [vmem:[%s5905_s30 + $0x670] sm:$0xf0]  ;;  %v5058_v23 = vld [vmem:[%s5905_s30 + $0x764] sm:$0xf]  ;;  %v4474_v24 = vor.u32 %v4994_v32, %v4471_v41  ;;  %v4949_v40 = vld [vmem:[%s5905_s30 + $0x3f4] sm:$0xf0]  ;;  %v4030_v32 = vor.u32 %v4885_v10, %v4029_v37 }
 0x22f   : > { %v4727_v25 = vld [vmem:[%s5905_s30 + $0x770] sm:$0xf0]  ;;  %v4958_v53 = vld [vmem:[%s5905_s30 + $0x444] sm:$0xf]  ;;  %v4602_v54 = vor.u32 %v5026_v48, %v4599_v47  ;;  %v3885_v41 = vld [vmem:[%s5905_s30 + $0xc8] sm:$0xf] }
 0x230   : > { %3190 = vmatpush.bf16.msrb.mxu0 %v4378_v33  ;;  %3203 = vmatpush.bf16.msrb.mxu1 %v4506_v34  ;;  %v4327_v4 = vld [vmem:[%s5905_s30 + $0x450] sm:$0xf0]  ;;  %v4730_v55 = vor.u32 %v5058_v23, %v4727_v25  ;;  %v4990_v57 = vld [vmem:[%s5905_s30 + $0x544] sm:$0xf]  ;;  %v4849_v48 = vld [vmem:[%s5905_s30 + $0xd4] sm:$0xf0] }
 0x231   : > { %3216 = vmatpush.bf16.msrb.mxu2 %v4634_v61  ;;  %3229 = vmatpush.bf16.msrb.mxu3 %v4762_v62  ;;  %v4455_v58 = vld [vmem:[%s5905_s30 + $0x550] sm:$0xf0]  ;;  %v5022_v59 = vld [vmem:[%s5905_s30 + $0x644] sm:$0xf]  ;;  %v4330_v52 = vor.u32 %v4958_v53, %v4327_v4  ;;  %v3901_v62 = vld [vmem:[%s5905_s30 + $0xe8] sm:$0xf] }
 0x232   : > { %v4583_v50 = vld [vmem:[%s5905_s30 + $0x650] sm:$0xf0]  ;;  %v5054_v46 = vld [vmem:[%s5905_s30 + $0x744] sm:$0xf]  ;;  %v4458_v1 = vor.u32 %v4990_v57, %v4455_v58  ;;  %v4013_v25 = vld [vmem:[%s5905_s30 + $0x1c8] sm:$0xf] }
 0x233   : > { %v4711_v60 = vld [vmem:[%s5905_s30 + $0x750] sm:$0xf0]  ;;  %v4954_v2 = vld [vmem:[%s5905_s30 + $0x424] sm:$0xf]  ;;  %v4586_v49 = vor.u32 %v5022_v59, %v4583_v50  ;;  %v4913_v53 = vld [vmem:[%s5905_s30 + $0x2d4] sm:$0xf0] }
 0x234   : > { %3191 = vmatpush.bf16.msrb.mxu0 %v4362_v39  ;;  %3204 = vmatpush.bf16.msrb.mxu1 %v4490_v8  ;;  %v4311_v3 = vld [vmem:[%s5905_s30 + $0x430] sm:$0xf0]  ;;  %v4714_v9 = vor.u32 %v5054_v46, %v4711_v60  ;;  %v4986_v63 = vld [vmem:[%s5905_s30 + $0x524] sm:$0xf]  ;;  %v4917_v39 = vld [vmem:[%s5905_s30 + $0x2f4] sm:$0xf0] }
 0x235   : > { %3217 = vmatpush.bf16.msrb.mxu2 %v4618_v43  ;;  %3230 = vmatpush.bf16.msrb.mxu3 %v4746_v45  ;;  %v4439_v12 = vld [vmem:[%s5905_s30 + $0x530] sm:$0xf0]  ;;  %v5018_v13 = vld [vmem:[%s5905_s30 + $0x624] sm:$0xf]  ;;  %v4314_v44 = vor.u32 %v4954_v2, %v4311_v3  ;;  %v4285_v8 = vld [vmem:[%s5905_s30 + $0x3e8] sm:$0xf]  ;;  %v3902_v45 = vor.u32 %v4853_v36, %v3901_v62  ;;  %v4158_v47 = vor.u32 %v4917_v39, %v4157_v38 }
 0x236   : > { %v4567_v15 = vld [vmem:[%s5905_s30 + $0x630] sm:$0xf0]  ;;  %v5050_v16 = vld [vmem:[%s5905_s30 + $0x724] sm:$0xf]  ;;  %v4442_v22 = vor.u32 %v4986_v63, %v4439_v12  ;;  %v4286_v23 = vor.u32 %v4949_v40, %v4285_v8  ;;  %v4269_v4 = vld [vmem:[%s5905_s30 + $0x3c8] sm:$0xf] }
 0x237   : > { %v4695_v7 = vld [vmem:[%s5905_s30 + $0x730] sm:$0xf0]  ;;  %v4950_v20 = vld [vmem:[%s5905_s30 + $0x404] sm:$0xf]  ;;  %v4570_v31 = vor.u32 %v5018_v13, %v4567_v15  ;;  %v3869_v58 = vld [vmem:[%s5905_s30 + $0xa8] sm:$0xf] }
 0x238   : > { %3192 = vmatpush.bf16.msrb.mxu0 %v4346_v51  ;;  %3205 = vmatpush.bf16.msrb.mxu1 %v4474_v24  ;;  %v4295_v27 = vld [vmem:[%s5905_s30 + $0x410] sm:$0xf0]  ;;  %v4982_v18 = vld [vmem:[%s5905_s30 + $0x504] sm:$0xf]  ;;  %v4698_v33 = vor.u32 %v5050_v16, %v4695_v7  ;;  %v4881_v51 = vld [vmem:[%s5905_s30 + $0x1d4] sm:$0xf0] }
 0x239   : > { %3218 = vmatpush.bf16.msrb.mxu2 %v4602_v54  ;;  %3231 = vmatpush.bf16.msrb.mxu3 %v4730_v55  ;;  %v4423_v30 = vld [vmem:[%s5905_s30 + $0x510] sm:$0xf0]  ;;  %v5014_v34 = vld [vmem:[%s5905_s30 + $0x604] sm:$0xf]  ;;  %v4298_v35 = vor.u32 %v4950_v20, %v4295_v27  ;;  %v4141_v24 = vld [vmem:[%s5905_s30 + $0x2c8] sm:$0xf]  ;;  %v3886_v55 = vor.u32 %v4849_v48, %v3885_v41  ;;  %v4014_v57 = vor.u32 %v4881_v51, %v4013_v25 }
 0x23a   : > { %v4551_v21 = vld [vmem:[%s5905_s30 + $0x610] sm:$0xf0]  ;;  %v5046_v19 = vld [vmem:[%s5905_s30 + $0x704] sm:$0xf]  ;;  %v4426_v28 = vor.u32 %v4982_v18, %v4423_v30  ;;  %v4945_v54 = vld [vmem:[%s5905_s30 + $0x3d4] sm:$0xf0]  ;;  %v4142_v50 = vor.u32 %v4913_v53, %v4141_v24 }
 0x23b   : > { %v4679_v61 = vld [vmem:[%s5905_s30 + $0x710] sm:$0xf0]  ;;  %v4554_v42 = vor.u32 %v5014_v34, %v4551_v21  ;;  %v4845_v59 = vld [vmem:[%s5905_s30 + $0xb4] sm:$0xf0]  ;;  %v4270_v46 = vor.u32 %v4945_v54, %v4269_v4  ;;  %v3997_v60 = vld [vmem:[%s5905_s30 + $0x1a8] sm:$0xf] }
 0x23c   : > { %3193 = vmatpush.bf16.msrb.mxu0 %v4330_v52  ;;  %3206 = vmatpush.bf16.msrb.mxu1 %v4458_v1  ;;  %v4682_v43 = vor.u32 %v5046_v19, %v4679_v61  ;;  %v4877_v52 = vld [vmem:[%s5905_s30 + $0x1b4] sm:$0xf0]  ;;  %v4125_v1 = vld [vmem:[%s5905_s30 + $0x2a8] sm:$0xf] }
 0x23d   : > { %3219 = vmatpush.bf16.msrb.mxu2 %v4586_v49  ;;  %3232 = vmatpush.bf16.msrb.mxu3 %v4714_v9  ;;  %v4909_v2 = vld [vmem:[%s5905_s30 + $0x2b4] sm:$0xf0]  ;;  %v4253_v3 = vld [vmem:[%s5905_s30 + $0x3a8] sm:$0xf]  ;;  %v3870_v9 = vor.u32 %v4845_v59, %v3869_v58  ;;  %v3998_v63 = vor.u32 %v4877_v52, %v3997_v60 }
 0x23e   : > { %v4941_v49 = vld [vmem:[%s5905_s30 + $0x3b4] sm:$0xf0]  ;;  %v3853_v12 = vld [vmem:[%s5905_s30 + $0x88] sm:$0xf]  ;;  %v4126_v15 = vor.u32 %v4909_v2, %v4125_v1 }
 0x23f   : > { %v4841_v13 = vld [vmem:[%s5905_s30 + $0x94] sm:$0xf0]  ;;  %v4254_v16 = vor.u32 %v4941_v49, %v4253_v3  ;;  %v3981_v7 = vld [vmem:[%s5905_s30 + $0x188] sm:$0xf] }
 0x240   : > { %3194 = vmatpush.bf16.msrb.mxu0 %v4314_v44  ;;  %3207 = vmatpush.bf16.msrb.mxu1 %v4442_v22  ;;  %v4873_v20 = vld [vmem:[%s5905_s30 + $0x194] sm:$0xf0]  ;;  %v4109_v44 = vld [vmem:[%s5905_s30 + $0x288] sm:$0xf]  ;;  %v3854_v30 = vor.u32 %v4841_v13, %v3853_v12 }
 0x241   : > { %3220 = vmatpush.bf16.msrb.mxu2 %v4570_v31  ;;  %3233 = vmatpush.bf16.msrb.mxu3 %v4698_v33  ;;  %v4905_v22 = vld [vmem:[%s5905_s30 + $0x294] sm:$0xf0]  ;;  %v4237_v27 = vld [vmem:[%s5905_s30 + $0x388] sm:$0xf]  ;;  %v3982_v31 = vor.u32 %v4873_v20, %v3981_v7 }
 0x242   : > { %v4937_v18 = vld [vmem:[%s5905_s30 + $0x394] sm:$0xf0]  ;;  %v3837_v33 = vld [vmem:[%s5905_s30 + $0x68] sm:$0xf]  ;;  %v4110_v21 = vor.u32 %v4905_v22, %v4109_v44 }
 0x243   : > { %v4837_v34 = vld [vmem:[%s5905_s30 + $0x74] sm:$0xf0]  ;;  %v4238_v19 = vor.u32 %v4937_v18, %v4237_v27  ;;  %v3965_v61 = vld [vmem:[%s5905_s30 + $0x168] sm:$0xf] }
 0x244   : > { %3195 = vmatpush.bf16.msrb.mxu0 %v4298_v35  ;;  %3208 = vmatpush.bf16.msrb.mxu1 %v4426_v28  ;;  %v4869_v62 = vld [vmem:[%s5905_s30 + $0x174] sm:$0xf0]  ;;  %v4093_v36 = vld [vmem:[%s5905_s30 + $0x268] sm:$0xf]  ;;  %v3838_v35 = vor.u32 %v4837_v34, %v3837_v33 }
 0x245   : > { %3221 = vmatpush.bf16.msrb.mxu2 %v4554_v42  ;;  %3234 = vmatpush.bf16.msrb.mxu3 %v4682_v43  ;;  %v4901_v37 = vld [vmem:[%s5905_s30 + $0x274] sm:$0xf0]  ;;  %v4221_v10 = vld [vmem:[%s5905_s30 + $0x368] sm:$0xf]  ;;  %v3966_v28 = vor.u32 %v4869_v62, %v3965_v61 }
 0x246   : > { %v4933_v38 = vld [vmem:[%s5905_s30 + $0x374] sm:$0xf0]  ;;  %v3821_v39 = vld [vmem:[%s5905_s30 + $0x48] sm:$0xf]  ;;  %v4094_v40 = vor.u32 %v4901_v37, %v4093_v36 }
 0x247   : > { %3196 = vmatmul.bf16.vlgmr.msrb.gmra.mxu0 %v6382_v56  ;;  %3209 = vmatmul.bf16.vlgmr.msrb.gmra.mxu1 %v6384_v29  ;;  %v4833_v8 = vld [vmem:[%s5905_s30 + $0x54] sm:$0xf0]  ;;  %v4222_v42 = vor.u32 %v4933_v38, %v4221_v10  ;;  %v3949_v43 = vld [vmem:[%s5905_s30 + $0x148] sm:$0xf] }
 0x248   : > { %3240 = vmatpush.bf16.msra.mxu0 %v3902_v45  ;;  %3253 = vmatpush.bf16.msra.mxu1 %v4030_v32  ;;  %v4865_v45 = vld [vmem:[%s5905_s30 + $0x154] sm:$0xf0]  ;;  %v4077_v32 = vld [vmem:[%s5905_s30 + $0x248] sm:$0xf] }
 0x249   : > { %3266 = vmatpush.bf16.msra.mxu2 %v4158_v47  ;;  %3279 = vmatpush.bf16.msra.mxu3 %v4286_v23  ;;  %v4897_v41 = vld [vmem:[%s5905_s30 + $0x254] sm:$0xf0]  ;;  %v4205_v48 = vld [vmem:[%s5905_s30 + $0x348] sm:$0xf]  ;;  %v3822_v23 = vor.u32 %v4833_v8, %v3821_v39  ;;  %v3950_v25 = vor.u32 %v4865_v45, %v3949_v43 }
 0x24a   : > { %3222 = vmatmul.bf16.vlgmr.msrb.gmra.mxu2 %v6388_v11  ;;  %3235 = vmatmul.bf16.vlgmr.msrb.gmra.mxu3 %v6390_v5  ;;  %v4929_v47 = vld [vmem:[%s5905_s30 + $0x354] sm:$0xf0]  ;;  %v3805_v51 = vld [vmem:[%s5905_s30 + $0x28] sm:$0xf]  ;;  %v4078_v53 = vor.u32 %v4897_v41, %v4077_v32 }
 0x24b   : > { %v4829_v24 = vld [vmem:[%s5905_s30 + $0x34] sm:$0xf0]  ;;  %v4206_v4 = vor.u32 %v4929_v47, %v4205_v48  ;;  %v3933_v54 = vld [vmem:[%s5905_s30 + $0x128] sm:$0xf] }
 0x24c   : > { %3241 = vmatpush.bf16.msra.mxu0 %v3886_v55  ;;  %3254 = vmatpush.bf16.msra.mxu1 %v4014_v57  ;;  %v4861_v55 = vld [vmem:[%s5905_s30 + $0x134] sm:$0xf0]  ;;  %v4061_v57 = vld [vmem:[%s5905_s30 + $0x228] sm:$0xf]  ;;  %v3806_v60 = vor.u32 %v4829_v24, %v3805_v51 }
 0x24d   : > { %3267 = vmatpush.bf16.msra.mxu2 %v4142_v50  ;;  %3280 = vmatpush.bf16.msra.mxu3 %v4270_v46  ;;  %v4893_v58 = vld [vmem:[%s5905_s30 + $0x234] sm:$0xf0]  ;;  %v4189_v59 = vld [vmem:[%s5905_s30 + $0x328] sm:$0xf]  ;;  %v3934_v52 = vor.u32 %v4861_v55, %v3933_v54 }
 0x24e   : > { %v4925_v50 = vld [vmem:[%s5905_s30 + $0x334] sm:$0xf0]  ;;  %v3789_v46 = vld [vmem:[%s5905_s30 + $0x8] sm:$0xf]  ;;  %v4062_v49 = vor.u32 %v4893_v58, %v4061_v57 }
 0x24f   : > { %v4825_v1 = vld [vmem:[%s5905_s30 + $0x14] sm:$0xf0]  ;;  %v3917_v2 = vld [vmem:[%s5905_s30 + $0x108] sm:$0xf] }
 0x250   : > { %3242 = vmatpush.bf16.msra.mxu0 %v3870_v9  ;;  %3255 = vmatpush.bf16.msra.mxu1 %v3998_v63  ;;  %v4857_v3 = vld [vmem:[%s5905_s30 + $0x114] sm:$0xf0]  ;;  %v4190_v9 = vor.u32 %v4925_v50, %v4189_v59  ;;  %v4045_v63 = vld [vmem:[%s5905_s30 + $0x208] sm:$0xf]  ;;  %v3790_v27 = vor.u32 %v4825_v1, %v3789_v46 }
 0x251   : > { %3268 = vmatpush.bf16.msra.mxu2 %v4126_v15  ;;  %3281 = vmatpush.bf16.msra.mxu3 %v4254_v16  ;;  %v4889_v12 = vld [vmem:[%s5905_s30 + $0x214] sm:$0xf0]  ;;  %v4173_v13 = vld [vmem:[%s5905_s30 + $0x308] sm:$0xf]  ;;  %v3918_v18 = vor.u32 %v4857_v3, %v3917_v2 }
 0x252   : > { %v4921_v15 = vld [vmem:[%s5905_s30 + $0x314] sm:$0xf0]  ;;  %v4413_v16 = vld [vmem:[%s5905_s30 + $0x4e8] sm:$0xf]  ;;  %v4046_v34 = vor.u32 %v4889_v12, %v4045_v63 }
 0x253   : > { %v4981_v7 = vld [vmem:[%s5905_s30 + $0x4f4] sm:$0xf0]  ;;  %v4541_v20 = vld [vmem:[%s5905_s30 + $0x5e8] sm:$0xf] }
 0x254   : > { %3243 = vmatpush.bf16.msra.mxu0 %v3854_v30  ;;  %3256 = vmatpush.bf16.msra.mxu1 %v3982_v31  ;;  %v5013_v44 = vld [vmem:[%s5905_s30 + $0x5f4] sm:$0xf0]  ;;  %v4669_v22 = vld [vmem:[%s5905_s30 + $0x6e8] sm:$0xf] }
 0x255   : > { %3269 = vmatpush.bf16.msra.mxu2 %v4110_v21  ;;  %3282 = vmatpush.bf16.msra.mxu3 %v4238_v19  ;;  %v5045_v30 = vld [vmem:[%s5905_s30 + $0x6f4] sm:$0xf0]  ;;  %v4797_v31 = vld [vmem:[%s5905_s30 + $0x7e8] sm:$0xf]  ;;  %v4174_v21 = vor.u32 %v4921_v15, %v4173_v13  ;;  %v4414_v19 = vor.u32 %v4981_v7, %v4413_v16  ;;  %v4542_v61 = vor.u32 %v5013_v44, %v4541_v20 }
 0x256   : > { %v5077_v33 = vld [vmem:[%s5905_s30 + $0x7f4] sm:$0xf0]  ;;  %v4397_v62 = vld [vmem:[%s5905_s30 + $0x4c8] sm:$0xf]  ;;  %v4670_v37 = vor.u32 %v5045_v30, %v4669_v22 }
 0x257   : > { %v4977_v36 = vld [vmem:[%s5905_s30 + $0x4d4] sm:$0xf0]  ;;  %v4798_v10 = vor.u32 %v5077_v33, %v4797_v31  ;;  %v4525_v38 = vld [vmem:[%s5905_s30 + $0x5c8] sm:$0xf] }
 0x258   : > { %3244 = vmatpush.bf16.msra.mxu0 %v3838_v35  ;;  %3257 = vmatpush.bf16.msra.mxu1 %v3966_v28  ;;  %v5009_v35 = vld [vmem:[%s5905_s30 + $0x5d4] sm:$0xf0]  ;;  %v4653_v28 = vld [vmem:[%s5905_s30 + $0x6c8] sm:$0xf] }
 0x259   : > { %3270 = vmatpush.bf16.msra.mxu2 %v4094_v40  ;;  %3283 = vmatpush.bf16.msra.mxu3 %v4222_v42  ;;  %v5041_v39 = vld [vmem:[%s5905_s30 + $0x6d4] sm:$0xf0]  ;;  %v4781_v8 = vld [vmem:[%s5905_s30 + $0x7c8] sm:$0xf]  ;;  %v4398_v42 = vor.u32 %v4977_v36, %v4397_v62  ;;  %v4526_v43 = vor.u32 %v5009_v35, %v4525_v38 }
 0x25a   : > { %v5073_v40 = vld [vmem:[%s5905_s30 + $0x7d4] sm:$0xf0]  ;;  %v4381_v45 = vld [vmem:[%s5905_s30 + $0x4a8] sm:$0xf]  ;;  %v4654_v41 = vor.u32 %v5041_v39, %v4653_v28 }
 0x25b   : > { %v4973_v32 = vld [vmem:[%s5905_s30 + $0x4b4] sm:$0xf0]  ;;  %v4782_v48 = vor.u32 %v5073_v40, %v4781_v8  ;;  %v4509_v47 = vld [vmem:[%s5905_s30 + $0x5a8] sm:$0xf] }
 0x25c   : > { %3245 = vmatpush.bf16.msra.mxu0 %v3822_v23  ;;  %3258 = vmatpush.bf16.msra.mxu1 %v3950_v25  ;;  %v5005_v23 = vld [vmem:[%s5905_s30 + $0x5b4] sm:$0xf0]  ;;  %v4637_v25 = vld [vmem:[%s5905_s30 + $0x6a8] sm:$0xf] }
 0x25d   : > { %3271 = vmatpush.bf16.msra.mxu2 %v4078_v53  ;;  %3284 = vmatpush.bf16.msra.mxu3 %v4206_v4  ;;  %v5037_v51 = vld [vmem:[%s5905_s30 + $0x6b4] sm:$0xf0]  ;;  %v4765_v24 = vld [vmem:[%s5905_s30 + $0x7a8] sm:$0xf]  ;;  %v4382_v4 = vor.u32 %v4973_v32, %v4381_v45  ;;  %v4510_v54 = vor.u32 %v5005_v23, %v4509_v47 }
 0x25e   : > { %v5069_v53 = vld [vmem:[%s5905_s30 + $0x7b4] sm:$0xf0]  ;;  %v4365_v55 = vld [vmem:[%s5905_s30 + $0x488] sm:$0xf]  ;;  %v4638_v58 = vor.u32 %v5037_v51, %v4637_v25 }
 0x25f   : > { %v4969_v57 = vld [vmem:[%s5905_s30 + $0x494] sm:$0xf0]  ;;  %v4766_v59 = vor.u32 %v5069_v53, %v4765_v24  ;;  %v4493_v50 = vld [vmem:[%s5905_s30 + $0x588] sm:$0xf] }
 0x260   : > { %3246 = vmatpush.bf16.msra.mxu0 %v3806_v60  ;;  %3259 = vmatpush.bf16.msra.mxu1 %v3934_v52  ;;  %v5001_v46 = vld [vmem:[%s5905_s30 + $0x594] sm:$0xf0]  ;;  %v4621_v60 = vld [vmem:[%s5905_s30 + $0x688] sm:$0xf]  ;;  %v4366_v3 = vor.u32 %v4969_v57, %v4365_v55 }
 0x261   : > { %3272 = vmatpush.bf16.msra.mxu2 %v4062_v49  ;;  %3285 = vmatpush.bf16.msra.mxu3 %v4190_v9  ;;  %v5033_v52 = vld [vmem:[%s5905_s30 + $0x694] sm:$0xf0]  ;;  %v4749_v1 = vld [vmem:[%s5905_s30 + $0x788] sm:$0xf]  ;;  %v4494_v49 = vor.u32 %v5001_v46, %v4493_v50  ;;  %v3903_v50 = vld [vmem:[%s5905_s30 + $0xf8] sm:$0xf0] }
 0x262   : > { %v5065_v2 = vld [vmem:[%s5905_s30 + $0x794] sm:$0xf0]  ;;  %v4349_v9 = vld [vmem:[%s5905_s30 + $0x468] sm:$0xf]  ;;  %v4622_v12 = vor.u32 %v5033_v52, %v4621_v60  ;;  %v4883_v46 = vld [vmem:[%s5905_s30 + $0x1ec] sm:$0xf] }
 0x263   : > { %v4965_v63 = vld [vmem:[%s5905_s30 + $0x474] sm:$0xf0]  ;;  %v4750_v13 = vor.u32 %v5065_v2, %v4749_v1  ;;  %v4477_v15 = vld [vmem:[%s5905_s30 + $0x568] sm:$0xf]  ;;  %v4031_v60 = vld [vmem:[%s5905_s30 + $0x1f8] sm:$0xf0] }
 0x264   : > { %3247 = vmatpush.bf16.msra.mxu0 %v3790_v27  ;;  %3260 = vmatpush.bf16.msra.mxu1 %v3918_v18  ;;  %v4997_v16 = vld [vmem:[%s5905_s30 + $0x574] sm:$0xf0]  ;;  %v4605_v7 = vld [vmem:[%s5905_s30 + $0x668] sm:$0xf]  ;;  %v4350_v27 = vor.u32 %v4965_v63, %v4349_v9  ;;  %v4915_v52 = vld [vmem:[%s5905_s30 + $0x2ec] sm:$0xf] }
 0x265   : > { %3273 = vmatpush.bf16.msra.mxu2 %v4046_v34  ;;  %3286 = vmatpush.bf16.msra.mxu3 %v4174_v21  ;;  %v5029_v20 = vld [vmem:[%s5905_s30 + $0x674] sm:$0xf0]  ;;  %v4733_v44 = vld [vmem:[%s5905_s30 + $0x768] sm:$0xf]  ;;  %v4478_v18 = vor.u32 %v4997_v16, %v4477_v15  ;;  %v4287_v9 = vld [vmem:[%s5905_s30 + $0x3f8] sm:$0xf0]  ;;  %v4034_v15 = vor.u32 %v4883_v46, %v4031_v60 }
 0x266   : > { %v5061_v22 = vld [vmem:[%s5905_s30 + $0x774] sm:$0xf0]  ;;  %v4333_v30 = vld [vmem:[%s5905_s30 + $0x448] sm:$0xf]  ;;  %v4606_v33 = vor.u32 %v5029_v20, %v4605_v7  ;;  %v4847_v16 = vld [vmem:[%s5905_s30 + $0xcc] sm:$0xf] }
 0x267   : > { %3248 = vmatmul.bf16.vlgmr.msra.gmra.mxu0 %v6331_v14  ;;  %3261 = vmatmul.bf16.vlgmr.msra.gmra.mxu1 %v6333_v0  ;;  %v4961_v31 = vld [vmem:[%s5905_s30 + $0x454] sm:$0xf0]  ;;  %v4734_v34 = vor.u32 %v5061_v22, %v4733_v44  ;;  %v4461_v21 = vld [vmem:[%s5905_s30 + $0x548] sm:$0xf]  ;;  %v3887_v7 = vld [vmem:[%s5905_s30 + $0xd8] sm:$0xf0] }
 0x268   : > { %3292 = vmatpush.bf16.msrb.mxu0 %v4414_v19  ;;  %3305 = vmatpush.bf16.msrb.mxu1 %v4542_v61  ;;  %v4993_v19 = vld [vmem:[%s5905_s30 + $0x554] sm:$0xf0]  ;;  %v4589_v61 = vld [vmem:[%s5905_s30 + $0x648] sm:$0xf]  ;;  %v4879_v20 = vld [vmem:[%s5905_s30 + $0x1cc] sm:$0xf] }
 0x269   : > { %3318 = vmatpush.bf16.msrb.mxu2 %v4670_v37  ;;  %3331 = vmatpush.bf16.msrb.mxu3 %v4798_v10  ;;  %v5025_v62 = vld [vmem:[%s5905_s30 + $0x654] sm:$0xf0]  ;;  %v4717_v36 = vld [vmem:[%s5905_s30 + $0x748] sm:$0xf]  ;;  %v4334_v10 = vor.u32 %v4961_v31, %v4333_v30  ;;  %v4462_v38 = vor.u32 %v4993_v19, %v4461_v21  ;;  %v6644_v30 = vld [vmem:[%s904_s24] sm:$0xf]  ;;  %v3890_v21 = vor.u32 %v4847_v16, %v3887_v7 }
 0x26a   : > { %3274 = vmatmul.bf16.vlgmr.msra.gmra.mxu2 %v6335_v17  ;;  %3287 = vmatmul.bf16.vlgmr.msra.gmra.mxu3 %v6341_v6  ;;  %v5057_v37 = vld [vmem:[%s5905_s30 + $0x754] sm:$0xf0]  ;;  %v4317_v35 = vld [vmem:[%s5905_s30 + $0x428] sm:$0xf]  ;;  %v4590_v39 = vor.u32 %v5025_v62, %v4589_v61  ;;  %v4143_v31 = vld [vmem:[%s5905_s30 + $0x2d8] sm:$0xf0] }
 0x26b   : > { %v4957_v28 = vld [vmem:[%s5905_s30 + $0x434] sm:$0xf0]  ;;  %v4718_v8 = vor.u32 %v5057_v37, %v4717_v36  ;;  %v4445_v40 = vld [vmem:[%s5905_s30 + $0x528] sm:$0xf]  ;;  %v4843_v61 = vld [vmem:[%s5905_s30 + $0xac] sm:$0xf] }
 0x26c   : > { %3293 = vmatpush.bf16.msrb.mxu0 %v4398_v42  ;;  %3306 = vmatpush.bf16.msrb.mxu1 %v4526_v43  ;;  %v4989_v42 = vld [vmem:[%s5905_s30 + $0x534] sm:$0xf0]  ;;  %v4573_v43 = vld [vmem:[%s5905_s30 + $0x628] sm:$0xf]  ;;  %v4318_v47 = vor.u32 %v4957_v28, %v4317_v35  ;;  %v3871_v62 = vld [vmem:[%s5905_s30 + $0xb8] sm:$0xf0] }
 0x26d   : > { %3319 = vmatpush.bf16.msrb.mxu2 %v4654_v41  ;;  %3332 = vmatpush.bf16.msrb.mxu3 %v4782_v48  ;;  %v5021_v45 = vld [vmem:[%s5905_s30 + $0x634] sm:$0xf0]  ;;  %v4701_v32 = vld [vmem:[%s5905_s30 + $0x728] sm:$0xf]  ;;  %v4446_v23 = vor.u32 %v4989_v42, %v4445_v40  ;;  %v1744_v36 = vperm.slane %v6644_v30, 0 }
 0x26e   : > { %v5053_v41 = vld [vmem:[%s5905_s30 + $0x734] sm:$0xf0]  ;;  %v4301_v48 = vld [vmem:[%s5905_s30 + $0x408] sm:$0xf]  ;;  %v4574_v53 = vor.u32 %v5021_v45, %v4573_v43  ;;  %v3999_v35 = vld [vmem:[%s5905_s30 + $0x1b8] sm:$0xf0]  ;;  %v3874_v45 = vor.u32 %v4843_v61, %v3871_v62 }
 0x26f   : > { %v4953_v25 = vld [vmem:[%s5905_s30 + $0x414] sm:$0xf0]  ;;  %v4429_v51 = vld [vmem:[%s5905_s30 + $0x508] sm:$0xf]  ;;  %v4907_v28 = vld [vmem:[%s5905_s30 + $0x2ac] sm:$0xf] }
 0x270   : > { %3294 = vmatpush.bf16.msrb.mxu0 %v4382_v4  ;;  %3307 = vmatpush.bf16.msrb.mxu1 %v4510_v54  ;;  %v4985_v24 = vld [vmem:[%s5905_s30 + $0x514] sm:$0xf0]  ;;  %v4702_v4 = vor.u32 %v5053_v41, %v4701_v32  ;;  %v4557_v54 = vld [vmem:[%s5905_s30 + $0x608] sm:$0xf]  ;;  %v4302_v1 = vor.u32 %v4953_v25, %v4301_v48  ;;  %v4255_v40 = vld [vmem:[%s5905_s30 + $0x3b8] sm:$0xf0] }
 0x271   : > { %3320 = vmatpush.bf16.msrb.mxu2 %v4638_v58  ;;  %3333 = vmatpush.bf16.msrb.mxu3 %v4766_v59  ;;  %v5017_v55 = vld [vmem:[%s5905_s30 + $0x614] sm:$0xf0]  ;;  %v4685_v57 = vld [vmem:[%s5905_s30 + $0x708] sm:$0xf]  ;;  %v4851_v59 = vld [vmem:[%s5905_s30 + $0xec] sm:$0xf]  ;;  %v4430_v2 = vor.u32 %v4985_v24, %v4429_v51 }
 0x272   : > { %v5049_v58 = vld [vmem:[%s5905_s30 + $0x714] sm:$0xf0]  ;;  %v4558_v63 = vor.u32 %v5017_v55, %v4557_v54  ;;  %v4839_v48 = vld [vmem:[%s5905_s30 + $0x8c] sm:$0xf]  ;;  %v3983_v24 = vld [vmem:[%s5905_s30 + $0x198] sm:$0xf0] }
 0x273   : > { %v4871_v51 = vld [vmem:[%s5905_s30 + $0x18c] sm:$0xf]  ;;  %v4111_v54 = vld [vmem:[%s5905_s30 + $0x298] sm:$0xf0] }
 0x274   : > { %3295 = vmatpush.bf16.msrb.mxu0 %v4366_v3  ;;  %3308 = vmatpush.bf16.msrb.mxu1 %v4494_v49  ;;  %v4159_v3 = vld [vmem:[%s5905_s30 + $0x2f8] sm:$0xf0]  ;;  %v4947_v49 = vld [vmem:[%s5905_s30 + $0x3ec] sm:$0xf] }
 0x275   : > { %3321 = vmatpush.bf16.msrb.mxu2 %v4622_v12  ;;  %3334 = vmatpush.bf16.msrb.mxu3 %v4750_v13  ;;  %v4686_v12 = vor.u32 %v5049_v58, %v4685_v57  ;;  %v3906_v13 = vor.u32 %v4851_v59, %v3903_v50  ;;  %v4162_v44 = vor.u32 %v4915_v52, %v4159_v3  ;;  %v4935_v55 = vld [vmem:[%s5905_s30 + $0x38c] sm:$0xf]  ;;  %v4239_v57 = vld [vmem:[%s5905_s30 + $0x398] sm:$0xf0] }
 0x276   : > { %v4290_v22 = vor.u32 %v4947_v49, %v4287_v9  ;;  %v3986_v59 = vor.u32 %v4871_v51, %v3983_v24  ;;  %v4835_v50 = vld [vmem:[%s5905_s30 + $0x6c] sm:$0xf]  ;;  %v3839_v46 = vld [vmem:[%s5905_s30 + $0x78] sm:$0xf0]  ;;  %v4242_v52 = vor.u32 %v4935_v55, %v4239_v57 }
 0x277   : > { %v4899_v3 = vld [vmem:[%s5905_s30 + $0x26c] sm:$0xf]  ;;  %v4079_v61 = vld [vmem:[%s5905_s30 + $0x258] sm:$0xf0] }
 0x278   : > { %3296 = vmatpush.bf16.msrb.mxu0 %v4350_v27  ;;  %3309 = vmatpush.bf16.msrb.mxu1 %v4478_v18  ;;  %v4015_v27 = vld [vmem:[%s5905_s30 + $0x1d8] sm:$0xf0]  ;;  %v4911_v18 = vld [vmem:[%s5905_s30 + $0x2cc] sm:$0xf] }
 0x279   : > { %3322 = vmatpush.bf16.msrb.mxu2 %v4606_v33  ;;  %3335 = vmatpush.bf16.msrb.mxu3 %v4734_v34  ;;  %v4943_v33 = vld [vmem:[%s5905_s30 + $0x3cc] sm:$0xf]  ;;  %v4271_v34 = vld [vmem:[%s5905_s30 + $0x3d8] sm:$0xf0]  ;;  %v4018_v19 = vor.u32 %v4879_v20, %v4015_v27  ;;  %v4146_v37 = vor.u32 %v4911_v18, %v4143_v31  ;;  %v3842_v20 = vor.u32 %v4835_v50, %v3839_v46 }
 0x27a   : > { %v3823_v27 = vld [vmem:[%s5905_s30 + $0x58] sm:$0xf0]  ;;  %v4927_v62 = vld [vmem:[%s5905_s30 + $0x34c] sm:$0xf] }
 0x27b   : > { %v3919_v55 = vld [vmem:[%s5905_s30 + $0x118] sm:$0xf0]  ;;  %v4919_v46 = vld [vmem:[%s5905_s30 + $0x30c] sm:$0xf] }
 0x27c   : > { %3297 = vmatpush.bf16.msrb.mxu0 %v4334_v10  ;;  %3310 = vmatpush.bf16.msrb.mxu1 %v4462_v38  ;;  %v4274_v10 = vor.u32 %v4943_v33, %v4271_v34  ;;  %v4875_v38 = vld [vmem:[%s5905_s30 + $0x1ac] sm:$0xf]  ;;  %v4047_v50 = vld [vmem:[%s5905_s30 + $0x218] sm:$0xf0] }
 0x27d   : > { %3323 = vmatpush.bf16.msrb.mxu2 %v4590_v39  ;;  %3336 = vmatpush.bf16.msrb.mxu3 %v4718_v8  ;;  %v4127_v39 = vld [vmem:[%s5905_s30 + $0x2b8] sm:$0xf0]  ;;  %v4939_v8 = vld [vmem:[%s5905_s30 + $0x3ac] sm:$0xf]  ;;  %v4002_v32 = vor.u32 %v4875_v38, %v3999_v35 }
 0x27e   : > { %v4258_v25 = vor.u32 %v4939_v8, %v4255_v40  ;;  %v4863_v34 = vld [vmem:[%s5905_s30 + $0x14c] sm:$0xf]  ;;  %v3807_v35 = vld [vmem:[%s5905_s30 + $0x38] sm:$0xf0] }
 0x27f   : > { %v4827_v38 = vld [vmem:[%s5905_s30 + $0x2c] sm:$0xf]  ;;  %v3935_v40 = vld [vmem:[%s5905_s30 + $0x138] sm:$0xf0] }
 0x280   : > { %3298 = vmatpush.bf16.msrb.mxu0 %v4318_v47  ;;  %3311 = vmatpush.bf16.msrb.mxu1 %v4446_v23  ;;  %v3855_v47 = vld [vmem:[%s5905_s30 + $0x98] sm:$0xf0]  ;;  %v4130_v23 = vor.u32 %v4907_v28, %v4127_v39  ;;  %v4859_v8 = vld [vmem:[%s5905_s30 + $0x12c] sm:$0xf]  ;;  %v3810_v51 = vor.u32 %v4827_v38, %v3807_v35 }
 0x281   : > { %3324 = vmatpush.bf16.msrb.mxu2 %v4574_v53  ;;  %3337 = vmatpush.bf16.msrb.mxu3 %v4702_v4  ;;  %v4903_v53 = vld [vmem:[%s5905_s30 + $0x28c] sm:$0xf]  ;;  %v3858_v58 = vor.u32 %v4839_v48, %v3855_v47  ;;  %v4191_v48 = vld [vmem:[%s5905_s30 + $0x338] sm:$0xf0]  ;;  %v3938_v24 = vor.u32 %v4859_v8, %v3935_v40 }
 0x282   : > { %v4114_v60 = vor.u32 %v4903_v53, %v4111_v54  ;;  %v4855_v54 = vld [vmem:[%s5905_s30 + $0x10c] sm:$0xf]  ;;  %v4655_v38 = vld [vmem:[%s5905_s30 + $0x6d8] sm:$0xf0] }
 0x283   : > { %v3041_v42 = vpop.f32.mrf.mxu0  ;;  %v3054_v43 = vpop.f32.mrf.mxu1  ;;  %v5071_v35 = vld [vmem:[%s5905_s30 + $0x7cc] sm:$0xf] }
 0x284   : > { %3299 = vmatpush.bf16.msrb.mxu0 %v4302_v1  ;;  %3312 = vmatpush.bf16.msrb.mxu1 %v4430_v2  ;;  %v3042_v41 = vadd.f32 %v3041_v42, %v1744_v36  ;;  %v4867_v1 = vld [vmem:[%s5905_s30 + $0x16c] sm:$0xf]  ;;  %v3967_v2 = vld [vmem:[%s5905_s30 + $0x178] sm:$0xf0] }
 0x285   : > { %3325 = vmatpush.bf16.msrb.mxu2 %v4558_v63  ;;  %3338 = vmatpush.bf16.msrb.mxu3 %v4686_v12  ;;  %v4095_v63 = vld [vmem:[%s5905_s30 + $0x278] sm:$0xf0]  ;;  %v4931_v12 = vld [vmem:[%s5905_s30 + $0x36c] sm:$0xf] }
 0x286   : > { %v3055_v4 = vadd.f32 %v3054_v43, %v3042_v41  ;;  %v4098_v31 = vor.u32 %v4899_v3, %v4095_v63  ;;  %v4207_v36 = vld [vmem:[%s5905_s30 + $0x358] sm:$0xf0]  ;;  %v4891_v42 = vld [vmem:[%s5905_s30 + $0x22c] sm:$0xf] }
 0x287   : > { %3300 = vmatmul.bf16.vlgmr.msrb.gmra.mxu0 %v6382_v56  ;;  %3313 = vmatmul.bf16.vlgmr.msrb.gmra.mxu1 %v6384_v29  ;;  %v4210_v39 = vor.u32 %v4927_v62, %v4207_v36  ;;  %v4923_v41 = vld [vmem:[%s5905_s30 + $0x32c] sm:$0xf] }
 0x288   : > { %3344 = vmatpush.bf16.msra.mxu0 %v3906_v13  ;;  %3357 = vmatpush.bf16.msra.mxu1 %v4034_v15  ;;  %v4223_v13 = vld [vmem:[%s5905_s30 + $0x378] sm:$0xf0]  ;;  %v5011_v3 = vld [vmem:[%s5905_s30 + $0x5ec] sm:$0xf] }
 0x289   : > { %3370 = vmatpush.bf16.msra.mxu2 %v4162_v44  ;;  %3383 = vmatpush.bf16.msra.mxu3 %v4290_v22  ;;  %v3970_v44 = vor.u32 %v4867_v1, %v3967_v2  ;;  %v4831_v22 = vld [vmem:[%s5905_s30 + $0x4c] sm:$0xf]  ;;  %v4226_v33 = vor.u32 %v4931_v12, %v4223_v13  ;;  %v4415_v2 = vld [vmem:[%s5905_s30 + $0x4f8] sm:$0xf0]  ;;  %v3922_v12 = vor.u32 %v4855_v54, %v3919_v55 }
 0x28a   : > { %3326 = vmatmul.bf16.vlgmr.msrb.gmra.mxu2 %v6388_v11  ;;  %3339 = vmatmul.bf16.vlgmr.msrb.gmra.mxu3 %v6390_v5  ;;  %v3067_v49 = vpop.f32.mrf.mxu2  ;;  %v3080_v9 = vpop.f32.mrf.mxu3  ;;  %v4979_v1 = vld [vmem:[%s5905_s30 + $0x4ec] sm:$0xf]  ;;  %v4671_v13 = vld [vmem:[%s5905_s30 + $0x6f8] sm:$0xf0] }
 0x28b   : > { %v3068_v15 = vadd.f32 %v3067_v49, %v3055_v4  ;;  %v3043_v16 = vpop.f32.mrf.mxu0  ;;  %v3056_v7 = vpop.f32.mrf.mxu1  ;;  %v3791_v4 = vld [vmem:[%s5905_s30 + $0x18] sm:$0xf0]  ;;  %v5007_v36 = vld [vmem:[%s5905_s30 + $0x5cc] sm:$0xf] }
 0x28c   : > { %3345 = vmatpush.bf16.msra.mxu0 %v3890_v21  ;;  %3358 = vmatpush.bf16.msra.mxu1 %v4018_v19  ;;  %v3951_v21 = vld [vmem:[%s5905_s30 + $0x158] sm:$0xf0]  ;;  %v4895_v19 = vld [vmem:[%s5905_s30 + $0x24c] sm:$0xf] }
 0x28d   : > { %3371 = vmatpush.bf16.msra.mxu2 %v4146_v37  ;;  %3384 = vmatpush.bf16.msra.mxu3 %v4274_v10  ;;  %v3081_v18 = vadd.f32 %v3080_v9, %v3068_v15  ;;  %v3826_v37 = vor.u32 %v4831_v22, %v3823_v27  ;;  %v3954_v10 = vor.u32 %v4863_v34, %v3951_v21  ;;  %v4543_v49 = vld [vmem:[%s5905_s30 + $0x5f8] sm:$0xf0]  ;;  %v5043_v9 = vld [vmem:[%s5905_s30 + $0x6ec] sm:$0xf] }
 0x28e   : > { %v4082_v28 = vor.u32 %v4895_v19, %v4079_v61  ;;  %v5075_v15 = vld [vmem:[%s5905_s30 + $0x7ec] sm:$0xf]  ;;  %v4799_v16 = vld [vmem:[%s5905_s30 + $0x7f8] sm:$0xf0]  ;;  %v4546_v22 = vor.u32 %v5011_v3, %v4543_v49  ;;  %v4674_v34 = vor.u32 %v5043_v9, %v4671_v13 }
 0x28f   : > { %v4802_v21 = vor.u32 %v5075_v15, %v4799_v16  ;;  %v4367_v55 = vld [vmem:[%s5905_s30 + $0x498] sm:$0xf0] }
 0x290   : > { %3346 = vmatpush.bf16.msra.mxu0 %v3874_v45  ;;  %3359 = vmatpush.bf16.msra.mxu1 %v4002_v32  ;;  %v4063_v32 = vld [vmem:[%s5905_s30 + $0x238] sm:$0xf0] }
 0x291   : > { %3372 = vmatpush.bf16.msra.mxu2 %v4130_v23  ;;  %3385 = vmatpush.bf16.msra.mxu3 %v4258_v25  ;;  %v4823_v25 = vld [vmem:[%s5905_s30 + $0xc] sm:$0xf]  ;;  %v4066_v57 = vor.u32 %v4891_v42, %v4063_v32 }
 0x292   : > { %v3069_v43 = vpop.f32.mrf.mxu2  ;;  %v3082_v45 = vpop.f32.mrf.mxu3  ;;  %v3794_v63 = vor.u32 %v4823_v25, %v3791_v4  ;;  %v4971_v42 = vld [vmem:[%s5905_s30 + $0x4ac] sm:$0xf] }
 0x293   : > { %v3093_v47 = vpop.f32.mrf.mxu0  ;;  %v3106_v23 = vpop.f32.mrf.mxu1  ;;  %v4383_v43 = vld [vmem:[%s5905_s30 + $0x4b8] sm:$0xf0]  ;;  %v5067_v25 = vld [vmem:[%s5905_s30 + $0x7ac] sm:$0xf] }
 0x294   : > { %3347 = vmatpush.bf16.msra.mxu0 %v3858_v58  ;;  %3360 = vmatpush.bf16.msra.mxu1 %v3986_v59  ;;  %v3094_v53 = vadd.f32 %v3093_v47, %v3081_v18  ;;  %v4194_v58 = vor.u32 %v4923_v41, %v4191_v48  ;;  %v4887_v59 = vld [vmem:[%s5905_s30 + $0x20c] sm:$0xf]  ;;  %v4511_v48 = vld [vmem:[%s5905_s30 + $0x5b8] sm:$0xf0] }
 0x295   : > { %3373 = vmatpush.bf16.msra.mxu2 %v4114_v60  ;;  %3386 = vmatpush.bf16.msra.mxu3 %v4242_v52  ;;  %v4175_v52 = vld [vmem:[%s5905_s30 + $0x318] sm:$0xf0]  ;;  %v4050_v7 = vor.u32 %v4887_v59, %v4047_v50  ;;  %v5003_v41 = vld [vmem:[%s5905_s30 + $0x5ac] sm:$0xf] }
 0x296   : > { %v3107_v60 = vadd.f32 %v3106_v23, %v3094_v53  ;;  %v5035_v47 = vld [vmem:[%s5905_s30 + $0x6ac] sm:$0xf]  ;;  %v4639_v23 = vld [vmem:[%s5905_s30 + $0x6b8] sm:$0xf0]  ;;  %v4386_v53 = vor.u32 %v4971_v42, %v4383_v43 }
 0x297   : > { %v4495_v59 = vld [vmem:[%s5905_s30 + $0x598] sm:$0xf0]  ;;  %v5031_v50 = vld [vmem:[%s5905_s30 + $0x68c] sm:$0xf] }
 0x298   : > { %3348 = vmatpush.bf16.msra.mxu0 %v3842_v20  ;;  %3361 = vmatpush.bf16.msra.mxu1 %v3970_v44  ;;  %v4178_v20 = vor.u32 %v4919_v46, %v4175_v52  ;;  %v4418_v44 = vor.u32 %v4979_v1, %v4415_v2  ;;  %v4623_v46 = vld [vmem:[%s5905_s30 + $0x698] sm:$0xf0] }
 0x299   : > { %3374 = vmatpush.bf16.msra.mxu2 %v4098_v31  ;;  %3387 = vmatpush.bf16.msra.mxu3 %v4226_v33  ;;  %v4975_v31 = vld [vmem:[%s5905_s30 + $0x4cc] sm:$0xf]  ;;  %v4399_v33 = vld [vmem:[%s5905_s30 + $0x4d8] sm:$0xf0]  ;;  %v4626_v15 = vor.u32 %v5031_v50, %v4623_v46 }
 0x29a   : > { %v3119_v27 = vpop.f32.mrf.mxu2  ;;  %v3132_v18 = vpop.f32.mrf.mxu3  ;;  %v4402_v8 = vor.u32 %v4975_v31, %v4399_v33  ;;  %v4751_v52 = vld [vmem:[%s5905_s30 + $0x798] sm:$0xf0]  ;;  %v4959_v33 = vld [vmem:[%s5905_s30 + $0x44c] sm:$0xf] }
 0x29b   : > { %v3120_v19 = vadd.f32 %v3119_v27, %v3107_v60  ;;  %v3095_v61 = vpop.f32.mrf.mxu0  ;;  %v3108_v62 = vpop.f32.mrf.mxu1  ;;  %v5063_v60 = vld [vmem:[%s5905_s30 + $0x78c] sm:$0xf]  ;;  %v4607_v27 = vld [vmem:[%s5905_s30 + $0x678] sm:$0xf0] }
 0x29c   : > { %3349 = vmatpush.bf16.msra.mxu0 %v3826_v37  ;;  %3362 = vmatpush.bf16.msra.mxu1 %v3954_v10  ;;  %v4527_v37 = vld [vmem:[%s5905_s30 + $0x5d8] sm:$0xf0]  ;;  %v5039_v10 = vld [vmem:[%s5905_s30 + $0x6cc] sm:$0xf]  ;;  %v4754_v16 = vor.u32 %v5063_v60, %v4751_v52 }
 0x29d   : > { %3375 = vmatpush.bf16.msra.mxu2 %v4082_v28  ;;  %3388 = vmatpush.bf16.msra.mxu3 %v4210_v39  ;;  %v4783_v28 = vld [vmem:[%s5905_s30 + $0x7d8] sm:$0xf0]  ;;  %v6718_v39 = vadd.f32 %v3132_v18, %v3120_v19  ;;  %v4530_v40 = vor.u32 %v5007_v36, %v4527_v37  ;;  %v4658_v45 = vor.u32 %v5039_v10, %v4655_v38  ;;  %v5059_v18 = vld [vmem:[%s5905_s30 + $0x76c] sm:$0xf] }
 0x29e   : > { %v4786_v32 = vor.u32 %v5071_v35, %v4783_v28  ;;  %v4735_v31 = vld [vmem:[%s5905_s30 + $0x778] sm:$0xf0]  ;;  %v4991_v61 = vld [vmem:[%s5905_s30 + $0x54c] sm:$0xf] }
 0x29f   : > { %v4335_v19 = vld [vmem:[%s5905_s30 + $0x458] sm:$0xf0]  ;;  %v4738_v10 = vor.u32 %v5059_v18, %v4735_v31  ;;  %v5023_v38 = vld [vmem:[%s5905_s30 + $0x64c] sm:$0xf] }
 0x2a0   : > { %3350 = vmatpush.bf16.msra.mxu0 %v3810_v51  ;;  %3363 = vmatpush.bf16.msra.mxu1 %v3938_v24  ;;  %v4767_v51 = vld [vmem:[%s5905_s30 + $0x7b8] sm:$0xf0]  ;;  %v4967_v24 = vld [vmem:[%s5905_s30 + $0x48c] sm:$0xf] }
 0x2a1   : > { %3376 = vmatpush.bf16.msra.mxu2 %v4066_v57  ;;  %3389 = vmatpush.bf16.msra.mxu3 %v4194_v58  ;;  %v4999_v57 = vld [vmem:[%s5905_s30 + $0x58c] sm:$0xf]  ;;  %v4770_v58 = vor.u32 %v5067_v25, %v4767_v51  ;;  %v4370_v49 = vor.u32 %v4967_v24, %v4367_v55  ;;  %v4463_v62 = vld [vmem:[%s5905_s30 + $0x558] sm:$0xf0] }
 0x2a2   : > { %v3121_v4 = vpop.f32.mrf.mxu2  ;;  %v3134_v54 = vpop.f32.mrf.mxu3  ;;  %v4498_v9 = vor.u32 %v4999_v57, %v4495_v59  ;;  %v4591_v35 = vld [vmem:[%s5905_s30 + $0x658] sm:$0xf0]  ;;  %v5051_v55 = vld [vmem:[%s5905_s30 + $0x72c] sm:$0xf] }
 0x2a3   : > { %v4719_v42 = vld [vmem:[%s5905_s30 + $0x758] sm:$0xf0]  ;;  %v5019_v54 = vld [vmem:[%s5905_s30 + $0x62c] sm:$0xf] }
 0x2a4   : > { %3351 = vmatpush.bf16.msra.mxu0 %v3794_v63  ;;  %3364 = vmatpush.bf16.msra.mxu1 %v3922_v12  ;;  %v3145_v1 = vpop.f32.mrf.mxu0  ;;  %v3158_v2 = vpop.f32.mrf.mxu1  ;;  %v4963_v63 = vld [vmem:[%s5905_s30 + $0x46c] sm:$0xf]  ;;  %v4351_v12 = vld [vmem:[%s5905_s30 + $0x478] sm:$0xf0] }
 0x2a5   : > { %3377 = vmatpush.bf16.msra.mxu2 %v4050_v7  ;;  %3390 = vmatpush.bf16.msra.mxu3 %v4178_v20  ;;  %v4995_v7 = vld [vmem:[%s5905_s30 + $0x56c] sm:$0xf]  ;;  %v4479_v20 = vld [vmem:[%s5905_s30 + $0x578] sm:$0xf0] }
 0x2a6   : > { %v4319_v25 = vld [vmem:[%s5905_s30 + $0x438] sm:$0xf0]  ;;  %v4983_v50 = vld [vmem:[%s5905_s30 + $0x50c] sm:$0xf] }
 0x2a7   : > { %3352 = vmatmul.bf16.vlgmr.msra.gmra.mxu0 %v6331_v14  ;;  %3365 = vmatmul.bf16.vlgmr.msra.gmra.mxu1 %v6333_v0  ;;  %v4514_v14 = vor.u32 %v5003_v41, %v4511_v48  ;;  %v1745_v0 = vperm.slane %v6644_v30, 1  ;;  %v4338_v41 = vor.u32 %v4959_v33, %v4335_v19  ;;  %v4466_v48 = vor.u32 %v4991_v61, %v4463_v62  ;;  %v4447_v4 = vld [vmem:[%s5905_s30 + $0x538] sm:$0xf0] }
 0x2a8   : > { %3396 = vmatpush.bf16.msrb.mxu0 %v4418_v44  ;;  %3409 = vmatpush.bf16.msrb.mxu1 %v4546_v22  ;;  %v5027_v44 = vld [vmem:[%s5905_s30 + $0x66c] sm:$0xf]  ;;  %v4703_v57 = vld [vmem:[%s5905_s30 + $0x738] sm:$0xf0] }
 0x2a9   : > { %3422 = vmatpush.bf16.msrb.mxu2 %v4674_v34  ;;  %3435 = vmatpush.bf16.msrb.mxu3 %v4802_v21  ;;  %v3146_v3 = vadd.f32 %v3145_v1, %v1745_v0  ;;  %v4354_v34 = vor.u32 %v4963_v63, %v4351_v12  ;;  %v4482_v21 = vor.u32 %v4995_v7, %v4479_v20  ;;  %v4575_v0 = vld [vmem:[%s5905_s30 + $0x638] sm:$0xf0]  ;;  %v5047_v63 = vld [vmem:[%s5905_s30 + $0x70c] sm:$0xf] }
 0x2aa   : > { %3378 = vmatmul.bf16.vlgmr.msra.gmra.mxu2 %v6335_v17  ;;  %3391 = vmatmul.bf16.vlgmr.msra.gmra.mxu3 %v6341_v6  ;;  %v3448_v17 = vrot.slane %v6718_v39, 4  ;;  %v4642_v6 = vor.u32 %v5035_v47, %v4639_v23  ;;  %v4610_v37 = vor.u32 %v5027_v44, %v4607_v27  ;;  %v4594_v47 = vor.u32 %v5023_v38, %v4591_v35  ;;  %v4955_v23 = vld [vmem:[%s5905_s30 + $0x42c] sm:$0xf]  ;;  %v4303_v59 = vld [vmem:[%s5905_s30 + $0x418] sm:$0xf0] }
 0x2ab   : > { %v3159_v22 = vadd.f32 %v3158_v2, %v3146_v3  ;;  %v4578_v60 = vor.u32 %v5019_v54, %v4575_v0  ;;  %v4706_v52 = vor.u32 %v5051_v55, %v4703_v57  ;;  %v4431_v1 = vld [vmem:[%s5905_s30 + $0x518] sm:$0xf0]  ;;  %v5015_v2 = vld [vmem:[%s5905_s30 + $0x60c] sm:$0xf] }
 0x2ac   : > { %3397 = vmatpush.bf16.msrb.mxu0 %v4402_v8  ;;  %3410 = vmatpush.bf16.msrb.mxu1 %v4530_v40  ;;  %v3449_v13 = vadd.f32 %v3448_v17, %v6718_v39  ;;  %v5055_v40 = vld [vmem:[%s5905_s30 + $0x74c] sm:$0xf]  ;;  %v4322_v17 = vor.u32 %v4955_v23, %v4319_v25  ;;  %v4687_v12 = vld [vmem:[%s5905_s30 + $0x718] sm:$0xf0] }
 0x2ad   : > { %3423 = vmatpush.bf16.msrb.mxu2 %v4658_v45  ;;  %3436 = vmatpush.bf16.msrb.mxu3 %v4786_v32  ;;  %v3171_v28 = vpop.f32.mrf.mxu2  ;;  %v3184_v8 = vpop.f32.mrf.mxu3  ;;  %v4690_v20 = vor.u32 %v5047_v63, %v4687_v12 }
 0x2ae   : > { %v3450_v36 = vrot.slane %v3449_v13, 2  ;;  %v3172_v43 = vadd.f32 %v3171_v28, %v3159_v22  ;;  %v3147_v45 = vpop.f32.mrf.mxu0  ;;  %v3160_v32 = vpop.f32.mrf.mxu1 }
 0x2b0   : > { %3398 = vmatpush.bf16.msrb.mxu0 %v4386_v53  ;;  %3411 = vmatpush.bf16.msrb.mxu1 %v4514_v14  ;;  %v3451_v51 = vadd.f32 %v3450_v36, %v3449_v13  ;;  %v3185_v24 = vadd.f32 %v3184_v8, %v3172_v43  ;;  %v4722_v53 = vor.u32 %v5055_v40, %v4719_v42  ;;  %v4987_v14 = vld [vmem:[%s5905_s30 + $0x52c] sm:$0xf] }
 0x2b1   : > { %3424 = vmatpush.bf16.msrb.mxu2 %v4642_v6  ;;  %3437 = vmatpush.bf16.msrb.mxu3 %v4770_v58  ;;  %v4450_v6 = vor.u32 %v4987_v14, %v4447_v4  ;;  %v4951_v58 = vld [vmem:[%s5905_s30 + $0x40c] sm:$0xf] }
 0x2b2   : > { %v3452_v46 = vrot.slane %v3451_v51, 1  ;;  %v4306_v13 = vor.u32 %v4951_v58, %v4303_v59 }
 0x2b4   : > { %3399 = vmatpush.bf16.msrb.mxu0 %v4370_v49  ;;  %3412 = vmatpush.bf16.msrb.mxu1 %v4498_v9  ;;  %v4559_v9 = vld [vmem:[%s5905_s30 + $0x618] sm:$0xf0]  ;;  %s920_s30 = scalar_lea.vmem %s6842_s9, %s3706_s15 }
 0x2b5   : > { %3425 = vmatpush.bf16.msrb.mxu2 %v4626_v15  ;;  %3438 = vmatpush.bf16.msrb.mxu3 %v4754_v16  ;;  %v3173_v3 = vpop.f32.mrf.mxu2  ;;  %v3186_v49 = vpop.f32.mrf.mxu3  ;;  %v4434_v15 = vor.u32 %v4983_v50, %v4431_v1  ;;  %v3453_v16 = vadd.f32 %v3452_v46, %v3451_v51  ;;  %v4562_v7 = vor.u32 %v5015_v2, %v4559_v9 }
 0x2b7   : > { %v3472_v44 = vmul.f32 %v3453_v16, %v5887_v26 }
 0x2b8   : > { %3400 = vmatpush.bf16.msrb.mxu0 %v4354_v34  ;;  %3413 = vmatpush.bf16.msrb.mxu1 %v4482_v21 }
 0x2b9   : > { %3426 = vmatpush.bf16.msrb.mxu2 %v4610_v37  ;;  %3439 = vmatpush.bf16.msrb.mxu3 %v4738_v10  ;;  %v6781_v22 = vsub.f32 %v6718_v39, %v3472_v44 }
 0x2bb   : > { %v3480_v27 = vmul.f32 %v6781_v22, %v6781_v22 }
 0x2bc   : > { %3401 = vmatpush.bf16.msrb.mxu0 %v4338_v41  ;;  %3414 = vmatpush.bf16.msrb.mxu1 %v4466_v48  ;;  %v1746_v48 = vperm.slane %v6644_v30, 2 }
 0x2bd   : > { %3427 = vmatpush.bf16.msrb.mxu2 %v4594_v47  ;;  %3440 = vmatpush.bf16.msrb.mxu3 %v4722_v53  ;;  %v3484_v21 = vrot.slane %v3480_v27, 4 }
 0x2c0   : > { %3402 = vmatpush.bf16.msrb.mxu0 %v4322_v17  ;;  %3415 = vmatpush.bf16.msrb.mxu1 %v4450_v6 }
 0x2c1   : > { %3428 = vmatpush.bf16.msrb.mxu2 %v4578_v60  ;;  %3441 = vmatpush.bf16.msrb.mxu3 %v4706_v52 }
 0x2c4   : > { %3403 = vmatpush.bf16.msrb.mxu0 %v4306_v13  ;;  %3416 = vmatpush.bf16.msrb.mxu1 %v4434_v15  ;;  %v3197_v18 = vpop.f32.mrf.mxu0  ;;  %v3210_v31 = vpop.f32.mrf.mxu1 }
 0x2c5   : > { %3429 = vmatpush.bf16.msrb.mxu2 %v4562_v7  ;;  %3442 = vmatpush.bf16.msrb.mxu3 %v4690_v20  ;;  %v3198_v33 = vadd.f32 %v3197_v18, %v3185_v24 }
 0x2c7   : > { %3404 = vmatmul.bf16.vlgmr.msrb.gmra.mxu0 %v6382_v56  ;;  %3417 = vmatmul.bf16.vlgmr.msrb.gmra.mxu1 %v6384_v29  ;;  %v3211_v34 = vadd.f32 %v3210_v31, %v3198_v33  ;;  %v3485_v56 = vadd.f32 %v3484_v21, %v3480_v27 }
 0x2c8   : > { %3430 = vmatmul.bf16.vlgmr.msrb.gmra.mxu2 %v6388_v11  ;;  %3443 = vmatmul.bf16.vlgmr.msrb.gmra.mxu3 %v6390_v5 }
 0x2c9   : > { %v3486_v37 = vrot.slane %v3485_v56, 2 }
 0x2cb   : > { %v3487_v35 = vadd.f32 %v3486_v37, %v3485_v56 }
 0x2cc   : > { %v3199_v29 = vpop.f32.mrf.mxu0  ;;  %v3212_v36 = vpop.f32.mrf.mxu1 }
 0x2cd   : > { %v3223_v19 = vpop.f32.mrf.mxu2  ;;  %v3236_v61 = vpop.f32.mrf.mxu3  ;;  %v3488_v40 = vrot.slane %v3487_v35, 1 }
 0x2ce   : > { %v3224_v62 = vadd.f32 %v3223_v19, %v3211_v34 }
 0x2cf   : > { %v3489_v45 = vadd.f32 %v3488_v40, %v3487_v35 }
 0x2d0   : > { %v3237_v11 = vadd.f32 %v3236_v61, %v3224_v62 }
 0x2d1   : > { %v3508_v47 = vmul.f32 %v3489_v45, %v5887_v26 }
 0x2d2   : > { %v3454_v5 = vrot.slane %v3237_v11, 4 }
 0x2d3   : > { %v3513_v14 = vadd.f32 1e-05, %v3508_v47 }
 0x2d4   : > { %v3455_v10 = vadd.f32 %v3454_v5, %v3237_v11 }
 0x2d5   : > { %v3225_v39 = vpop.f32.mrf.mxu2  ;;  %v3238_v38 = vpop.f32.mrf.mxu3  ;;  %5121 = vrsqrt.f32 %v3513_v14  ;;  %vm3523_vm9 = vweird.f32 %v3513_v14 }
 0x2d6   : > { %v3456_v28 = vrot.slane %v3455_v10, 2 }
 0x2d8   : > { %v3457_v8 = vadd.f32 %v3456_v28, %v3455_v10 }
 0x2da   : > { %v3458_v42 = vrot.slane %v3457_v8, 1 }
 0x2db   : > { %v5122_v52 = vpop.eup %5121 }
 0x2dc   : > { %v3459_v43 = vadd.f32 %v3458_v42, %v3457_v8  ;;  %v3518_v3 = vmul.f32 %v5122_v52, %v3513_v14  ;;  %vm3524_vm6 = vweird.f32 %v5122_v52 }
 0x2dd   : > { %vm3525_vm10 = vmor %vm3523_vm9, %vm3524_vm6 }
 0x2de   : > { %v3473_v32 = vmul.f32 %v3459_v43, %v5887_v26  ;;  %v3519_v63 = vmul.f32 %v5122_v52, %v3518_v3 }
 0x2e0   : > { %v6786_v41 = vsub.f32 %v3237_v11, %v3473_v32  ;;  %v3520_v13 = vmul.f32 0.5, %v3519_v63 }
 0x2e2   : > { %v3481_v23 = vmul.f32 %v6786_v41, %v6786_v41  ;;  %v3521_v7 = vsub.f32 1.5, %v3520_v13 }
 0x2e4   : > { %v3490_v25 = vrot.slane %v3481_v23, 4  ;;  %v3249_v51 = vpop.f32.mrf.mxu0  ;;  %v3262_v24 = vpop.f32.mrf.mxu1  ;;  %v3522_v31 = vmul.f32 %v5122_v52, %v3521_v7 }
 0x2e5   : > { %v3250_v53 = vadd.f32 %v3249_v51, %v1746_v48  ;;  %v1747_v51 = vperm.slane %v6644_v30, 3 }
 0x2e6   : > { %v3491_v4 = vadd.f32 %v3490_v25, %v3481_v23  ;;  %v3526_v56 = vsel %vm3525_vm10, %v5122_v52, %v3522_v31 }
 0x2e7   : > { %v3263_v54 = vadd.f32 %v3262_v24, %v3250_v53 }
 0x2e8   : > { %v3492_v0 = vrot.slane %v3491_v4, 2 }
 0x2ea   : > { %v3493_v55 = vadd.f32 %v3492_v0, %v3491_v4 }
 0x2ec   : > { %v3494_v6 = vrot.slane %v3493_v55, 1  ;;  %v3251_v59 = vpop.f32.mrf.mxu0  ;;  %v3264_v50 = vpop.f32.mrf.mxu1 }
 0x2ed   : > { %v3275_v57 = vpop.f32.mrf.mxu2  ;;  %v3288_v17 = vpop.f32.mrf.mxu3 }
 0x2ee   : > { %v3276_v58 = vadd.f32 %v3275_v57, %v3263_v54  ;;  %v3495_v46 = vadd.f32 %v3494_v6, %v3493_v55 }
 0x2f0   : > { %v3289_v60 = vadd.f32 %v3288_v17, %v3276_v58  ;;  %v3509_v1 = vmul.f32 %v3495_v46, %v5887_v26 }
 0x2f2   : > { %v3514_v2 = vadd.f32 1e-05, %v3509_v1 }
 0x2f4   : > { %5123 = vrsqrt.f32 %v3514_v2  ;;  %vm3533_vm7 = vweird.f32 %v3514_v2 }
 0x2f5   : > { %v3277_v49 = vpop.f32.mrf.mxu2  ;;  %v3290_v9 = vpop.f32.mrf.mxu3 }
 0x2fa   : > { %v5124_v12 = vpop.eup %5123 }
 0x2fb   : > { %v3528_v15 = vmul.f32 %v5124_v12, %v3514_v2  ;;  %vm3534_vm5 = vweird.f32 %v5124_v12 }
 0x2fc   : > { %vm3535_vm8 = vmor %vm3533_vm7, %vm3534_vm5 }
 0x2fd   : > { %v3529_v16 = vmul.f32 %v5124_v12, %v3528_v15 }
 0x2ff   : > { %v3530_v20 = vmul.f32 0.5, %v3529_v16 }
 0x301   : > { %v3531_v44 = vsub.f32 1.5, %v3530_v20 }
 0x303   : > { %v3532_v33 = vmul.f32 %v5124_v12, %v3531_v44 }
 0x304   : > { %v3301_v27 = vpop.f32.mrf.mxu0  ;;  %v3314_v18 = vpop.f32.mrf.mxu1 }
 0x305   : > { %v3302_v34 = vadd.f32 %v3301_v27, %v3289_v60  ;;  %v3536_v21 = vsel %vm3535_vm8, %v5124_v12, %v3532_v33 }
 0x306   : > { %v3561_v61 = vrot.slane %v3536_v21, 7 }
 0x307   : > { %v3315_v19 = vadd.f32 %v3314_v18, %v3302_v34 }
 0x308   : > { %v6794_v62 = vsel %vm1403_vm0, %v3526_v56, %v3561_v61 }
 0x30c   : > { %v3303_v11 = vpop.f32.mrf.mxu0  ;;  %v3316_v37 = vpop.f32.mrf.mxu1 }
 0x30d   : > { %v3327_v29 = vpop.f32.mrf.mxu2  ;;  %v3340_v36 = vpop.f32.mrf.mxu3 }
 0x30e   : > { %v3328_v5 = vadd.f32 %v3327_v29, %v3315_v19 }
 0x310   : > { %v3341_v38 = vadd.f32 %v3340_v36, %v3328_v5 }
 0x312   : > { %v3460_v35 = vrot.slane %v3341_v38, 4 }
 0x314   : > { %v3461_v28 = vadd.f32 %v3460_v35, %v3341_v38 }
 0x315   : > { %v3329_v10 = vpop.f32.mrf.mxu2  ;;  %v3342_v39 = vpop.f32.mrf.mxu3 }
 0x316   : > { %v3462_v42 = vrot.slane %v3461_v28, 2 }
 0x318   : > { %v3463_v43 = vadd.f32 %v3462_v42, %v3461_v28 }
 0x31a   : > { %v3464_v23 = vrot.slane %v3463_v43, 1 }
 0x31c   : > { %v3465_v25 = vadd.f32 %v3464_v23, %v3463_v43 }
 0x31e   : > { %v3474_v14 = vmul.f32 %v3465_v25, %v5887_v26 }
 0x320   : > { %v6798_v54 = vsub.f32 %v3341_v38, %v3474_v14 }
 0x322   : > { %v3482_v55 = vmul.f32 %v6798_v54, %v6798_v54 }
 0x324   : > { %v3353_v8 = vpop.f32.mrf.mxu0  ;;  %v3366_v40 = vpop.f32.mrf.mxu1  ;;  %v3496_v17 = vrot.slane %v3482_v55, 4 }
 0x325   : > { %v3354_v4 = vadd.f32 %v3353_v8, %v1747_v51 }
 0x326   : > { %v3497_v46 = vadd.f32 %v3496_v17, %v3482_v55 }
 0x327   : > { %v3367_v0 = vadd.f32 %v3366_v40, %v3354_v4  ;;  %v3582_v4 = vld [vmem:[%s914_s14] sm:$0xf] }
 0x328   : > { %v3498_v1 = vrot.slane %v3497_v46, 2  ;;  %v3585_v17 = vperm.slane %v3582_v4, 1 }
 0x32a   : > { %v3499_v63 = vadd.f32 %v3498_v1, %v3497_v46 }
 0x32c   : > { %v3355_v48 = vpop.f32.mrf.mxu0  ;;  %v3368_v47 = vpop.f32.mrf.mxu1  ;;  %v3500_v7 = vrot.slane %v3499_v63, 1 }
 0x32d   : > { %v3379_v45 = vpop.f32.mrf.mxu2  ;;  %v3392_v32 = vpop.f32.mrf.mxu3 }
 0x32e   : > { %v3380_v57 = vadd.f32 %v3379_v45, %v3367_v0  ;;  %v3501_v27 = vadd.f32 %v3500_v7, %v3499_v63 }
 0x330   : > { %v3393_v6 = vadd.f32 %v3392_v32, %v3380_v57  ;;  %v3510_v33 = vmul.f32 %v3501_v27, %v5887_v26  ;;  %v3584_v57 = vperm.slane %v3582_v4, 0 }
 0x332   : > { %v3515_v19 = vadd.f32 1e-05, %v3510_v33 }
 0x334   : > { %5125 = vrsqrt.f32 %v3515_v19  ;;  %vm3543_vm13 = vweird.f32 %v3515_v19 }
 0x335   : > { %v3381_v24 = vpop.f32.mrf.mxu2  ;;  %v3394_v53 = vpop.f32.mrf.mxu3 }
 0x336   : > { %v3512_v53 = vld [vmem:[%s909_s27] sm:$0xf] }
 0x33a   : > { %v5126_v37 = vpop.eup %5125 }
 0x33b   : > { %v3538_v39 = vmul.f32 %v5126_v37, %v3515_v19  ;;  %vm3544_vm0 = vweird.f32 %v5126_v37 }
 0x33c   : > { %vm3545_vm15 = vmor %vm3543_vm13, %vm3544_vm0 }
 0x33d   : > { %v3539_v28 = vmul.f32 %v5126_v37, %v3538_v39 }
 0x33f   : > { %v3540_v8 = vmul.f32 0.5, %v3539_v28 }
 0x341   : > { %v3541_v42 = vsub.f32 1.5, %v3540_v8 }
 0x343   : > { %v3542_v32 = vmul.f32 %v5126_v37, %v3541_v42 }
 0x344   : > { %v3405_v58 = vpop.f32.mrf.mxu0  ;;  %v3418_v59 = vpop.f32.mrf.mxu1 }
 0x345   : > { %v3406_v50 = vadd.f32 %v3405_v58, %v3393_v6  ;;  %v3546_v23 = vsel %vm3545_vm15, %v5126_v37, %v3542_v32  ;;  %v3586_v6 = vperm.slane %v3582_v4, 2  ;;  %v3587_v58 = vperm.slane %v3582_v4, 3 }
 0x346   : > { %v3562_v51 = vrot.slane %v3546_v23, 6 }
 0x347   : > { %v3419_v60 = vadd.f32 %v3418_v59, %v3406_v50 }
 0x34b   : > { %v3431_v30 = vpop.f32.mrf.mxu2  ;;  %v3444_v52 = vpop.f32.mrf.mxu3 }
 0x34c   : > { %v3432_v2 = vadd.f32 %v3431_v30, %v3419_v60  ;;  %v3407_v3 = vpop.f32.mrf.mxu0  ;;  %v3420_v49 = vpop.f32.mrf.mxu1 }
 0x34e   : > { %v3445_v9 = vadd.f32 %v3444_v52, %v3432_v2 }
 0x350   : > { %v3466_v12 = vrot.slane %v3445_v9, 4 }
 0x352   : > { %v3467_v13 = vadd.f32 %v3466_v12, %v3445_v9 }
 0x353   : > { %v3433_v15 = vpop.f32.mrf.mxu2  ;;  %v3446_v16 = vpop.f32.mrf.mxu3 }
 0x354   : > { %v3468_v20 = vrot.slane %v3467_v13, 2 }
 0x356   : > { %v3469_v44 = vadd.f32 %v3468_v20, %v3467_v13 }
 0x358   : > { %v3470_v18 = vrot.slane %v3469_v44, 1 }
 0x35a   : > { %v3471_v31 = vadd.f32 %v3470_v18, %v3469_v44 }
 0x35c   : > { %v3475_v34 = vmul.f32 %v3471_v31, %v5887_v26 }
 0x35e   : > { %v3479_v21 = vsub.f32 %v3445_v9, %v3475_v34 }
 0x360   : > { %v3483_v61 = vmul.f32 %v3479_v21, %v3479_v21 }
 0x362   : > { %v3502_v56 = vrot.slane %v3483_v61, 4 }
 0x364   : > { %v3503_v29 = vadd.f32 %v3502_v56, %v3483_v61 }
 0x366   : > { %v3504_v36 = vrot.slane %v3503_v29, 2 }
 0x368   : > { %v3505_v11 = vadd.f32 %v3504_v36, %v3503_v29 }
 0x36a   : > { %v3506_v5 = vrot.slane %v3505_v11, 1 }
 0x36c   : > { %v3507_v10 = vadd.f32 %v3506_v5, %v3505_v11 }
 0x36e   : > { %v3511_v38 = vmul.f32 %v3507_v10, %v5887_v26 }
 0x370   : > { %v3516_v35 = vadd.f32 1e-05, %v3511_v38 }
 0x372   : > { %5127 = vrsqrt.f32 %v3516_v35  ;;  %vm3553_vm1 = vweird.f32 %v3516_v35 }
 0x378   : > { %v5128_v40 = vpop.eup %5127 }
 0x379   : > { %v3548_v43 = vmul.f32 %v5128_v40, %v3516_v35  ;;  %vm3554_vm14 = vweird.f32 %v5128_v40 }
 0x37a   : > { %vm3555_vm2 = vmor %vm3553_vm1, %vm3554_vm14 }
 0x37b   : > { %v3549_v45 = vmul.f32 %v5128_v40, %v3548_v43 }
 0x37d   : > { %v3550_v48 = vmul.f32 0.5, %v3549_v45 }
 0x37f   : > { %v3551_v47 = vsub.f32 1.5, %v3550_v48 }
 0x381   : > { %v3552_v25 = vmul.f32 %v5128_v40, %v3551_v47 }
 0x383   : > { %v3556_v26 = vsel %vm3555_vm2, %v5128_v40, %v3552_v25 }
 0x384   : > { %v3563_v24 = vrot.slane %v3556_v26, 5 }
 0x386   : > { %v3565_v14 = vsel %vm1405_vm12, %v3562_v51, %v3563_v24 }
 0x387   : > { %v3566_v0 = vsel %vm1407_vm3, %v6794_v62, %v3565_v14 }
 0x388   : > { %v3568_v55 = vmul.f32 %v3566_v0, %v3512_v53 }
 0x38a   : > { %v3570_v59 = vperm.slane %v3568_v55, 0  ;;  %v3571_v50 = vperm.slane %v3568_v55, 1  ;;  %v3572_v46 = vperm.slane %v3568_v55, 2  ;;  %v3573_v60 = vperm.slane %v3568_v55, 3 }
 0x38c   : > { %v3578_v30 = vmul.f32 %v3570_v59, %v6781_v22  ;;  %v3579_v52 = vmul.f32 %v3571_v50, %v6786_v41  ;;  %v3580_v1 = vmul.f32 %v3572_v46, %v6798_v54  ;;  %v3581_v2 = vmul.f32 %v3573_v60, %v3479_v21 }
 0x38e   : > { %v3592_v3 = vadd.f32 %v3584_v57, %v3578_v30  ;;  %v3593_v49 = vadd.f32 %v3585_v17, %v3579_v52  ;;  %v3594_v62 = vadd.f32 %v3586_v6, %v3580_v1  ;;  %v3595_v9 = vadd.f32 %v3587_v58, %v3581_v2 }
 0x390   : > { %v3596_v63 = vmax.f32 %v3592_v3, 0.0  ;;  %v3597_v12 = vmax.f32 %v3593_v49, 0.0  ;;  %v3598_v13 = vmax.f32 %v3594_v62, 0.0  ;;  %v3599_v15 = vmax.f32 %v3595_v9, 0.0 }
 0x392   : > { %3600 = vst [vmem:[%s920_s30] sm:$0xff] %v3596_v63 }
 0x393   : > { %3601 = vst [vmem:[%s920_s30 + $0x8] sm:$0xff] %v3597_v12 }
 0x394   : > { %3602 = vst [vmem:[%s920_s30 + $0x10] sm:$0xff] %v3598_v13 }
 0x395   : > { %3603 = vst [vmem:[%s920_s30 + $0x18] sm:$0xff] %v3599_v15 }
 0x396 PF: > { %p16_p9 = scmp.ge.s32.totalorder %s5221_s13, 6   ;;  %s6857_s30 = smov %s5147_s10 }
 0x397   : > { %s6858_s10 = smov %s5230_s16  ;;  %s6859_s11 = smov %s5221_s13 }
 0x398   :  { %18 = sbr.rel (!%p16_p9) target bundleno = 2 (0x2), region = 123 }

// kernel: generator_forward.4
= control target key start
LH: loop header
LB: loop body
LE: loop exit
PB: predicated region body
PF: predicated region fallthrough
CT: control target
= control target key end

     0   :  { %v3181_v25 = vmov 0   ;;  %s4375_s0 = inlined_call_operand.vmem [shape: bf16[9,128,128], index: 0, kind: input, shape index: {}]   ;;  %s4376_s2 = inlined_call_operand.vmem [shape: f32[64,1], index: 2, kind: input, shape index: {}]   ;;  %s4377_s1 = inlined_call_operand.vmem [shape: bf16[4,4,64,128], index: 1, kind: input, shape index: {}]   ;;  %s4378_s4 = inlined_call_operand.vmem [shape: f32[64,1], index: 4, kind: input, shape index: {}]   ;;  %s4379_s3 = inlined_call_operand.vmem [shape: f32[64,1], index: 3, kind: input, shape index: {}]   ;;  %s4380_s5 = inlined_call_operand.vmem [shape: f32[64,512], index: 5, kind: output, shape index: {}]  }
   0x1   :  { %v3216_v0 = vld [vmem:[%s4375_s0 + $0x78] sm:$0xff]  ;;  %v3235_v4 = vld [vmem:[%s4375_s0 + $0x70] sm:$0xff]  ;;  %v3256_v8 = vld [vmem:[%s4375_s0 + $0x68] sm:$0xff]  ;;  %3160 = vset.pattern.permute.xlu0 %v3181_v25  ;;  %3161 = vset.pattern.permute.xlu1 %v3181_v25 }
   0x2   :  { %v3033_v1 = vld [vmem:[%s4375_s0 + $0x38] sm:$0xff]  ;;  %142 = vmatpush.bf16.msra.mxu0 %v3216_v0  ;;  %v3032_v5 = vld [vmem:[%s4375_s0 + $0x30] sm:$0xff]  ;;  %v3031_v9 = vld [vmem:[%s4375_s0 + $0x28] sm:$0xff]  ;;  %3162 = vset.pattern.permute.xlu2 %v3181_v25 }
   0x3   :  { %v3224_v2 = vld [vmem:[%s4375_s0 + $0xf8] sm:$0xff]  ;;  %243 = vmatpush.bf16.msra.mxu1 %v3033_v1  ;;  %v3245_v6 = vld [vmem:[%s4375_s0 + $0xf0] sm:$0xff]  ;;  %v3266_v10 = vld [vmem:[%s4375_s0 + $0xe8] sm:$0xff] }
   0x4   :  { %v3229_v3 = vld [vmem:[%s4375_s0 + $0x138] sm:$0xff]  ;;  %370 = vmatpush.bf16.msra.mxu2 %v3224_v2  ;;  %v3250_v7 = vld [vmem:[%s4375_s0 + $0x130] sm:$0xff]  ;;  %v3271_v11 = vld [vmem:[%s4375_s0 + $0x128] sm:$0xff] }
   0x5   :  { %505 = vmatpush.bf16.msra.mxu3 %v3229_v3  ;;  %v3277_v12 = vld [vmem:[%s4375_s0 + $0x60] sm:$0xff]  ;;  %v3298_v16 = vld [vmem:[%s4375_s0 + $0x58] sm:$0xff]  ;;  %v3319_v20 = vld [vmem:[%s4375_s0 + $0x50] sm:$0xff] }
   0x6   :  { %143 = vmatpush.bf16.msra.mxu0 %v3235_v4  ;;  %v3030_v13 = vld [vmem:[%s4375_s0 + $0x20] sm:$0xff]  ;;  %v3029_v17 = vld [vmem:[%s4375_s0 + $0x18] sm:$0xff]  ;;  %v3028_v21 = vld [vmem:[%s4375_s0 + $0x10] sm:$0xff] }
   0x7   :  { %244 = vmatpush.bf16.msra.mxu1 %v3032_v5  ;;  %v3287_v14 = vld [vmem:[%s4375_s0 + $0xe0] sm:$0xff]  ;;  %v3308_v18 = vld [vmem:[%s4375_s0 + $0xd8] sm:$0xff]  ;;  %v3332_v23 = vld [vmem:[%s4375_s0 + $0xd0] sm:$0xff] }
   0x8   :  { %371 = vmatpush.bf16.msra.mxu2 %v3245_v6  ;;  %v3292_v15 = vld [vmem:[%s4375_s0 + $0x120] sm:$0xff]  ;;  %v3313_v19 = vld [vmem:[%s4375_s0 + $0x118] sm:$0xff]  ;;  %v3337_v24 = vld [vmem:[%s4375_s0 + $0x110] sm:$0xff] }
   0x9   :  { %506 = vmatpush.bf16.msra.mxu3 %v3250_v7  ;;  %v1659_v22 = vld [vmem:[%s4376_s2] sm:$0xff]  ;;  %v3343_v26 = vld [vmem:[%s4375_s0 + $0x48] sm:$0xff]  ;;  %v3387_v35 = vld [vmem:[%s4375_s0 + $0x178] sm:$0xff] }
   0xa   :  { %144 = vmatpush.bf16.msra.mxu0 %v3256_v8  ;;  %1669 = vperm.xlu0 %3160, %v1659_v22   ;;  %v3027_v27 = vld [vmem:[%s4375_s0 + $0x8] sm:$0xff]  ;;  %v3364_v30 = vld [vmem:[%s4375_s0 + $0x40] sm:$0xff]  ;;  %v3085_v40 = vld [vmem:[%s4375_s0 + $0xb8] sm:$0xff] }
   0xb   :  { %245 = vmatpush.bf16.msra.mxu1 %v3031_v9  ;;  %v3353_v28 = vld [vmem:[%s4375_s0 + $0xc8] sm:$0xff]  ;;  %v3026_v31 = vld [vmem:[%s4375_s0] sm:$0xff]  ;;  %v3412_v41 = vld [vmem:[%s4375_s0 + $0x170] sm:$0xff] }
   0xc   :  { %372 = vmatpush.bf16.msra.mxu2 %v3266_v10  ;;  %v3358_v29 = vld [vmem:[%s4375_s0 + $0x108] sm:$0xff]  ;;  %v3377_v33 = vld [vmem:[%s4375_s0 + $0xc0] sm:$0xff]  ;;  %v1661_v42 = vld [vmem:[%s4376_s2 + $0x10] sm:$0xff] }
   0xd   :  { %507 = vmatpush.bf16.msra.mxu3 %v3271_v11  ;;  %v1660_v32 = vld [vmem:[%s4376_s2 + $0x8] sm:$0xff]  ;;  %v3382_v34 = vld [vmem:[%s4375_s0 + $0x100] sm:$0xff]  ;;  %v3084_v43 = vld [vmem:[%s4375_s0 + $0xb0] sm:$0xff]  ;;  %1679 = vperm.xlu1 %3161, %v1661_v42  }
   0xe   :  { %145 = vmatpush.bf16.msra.mxu0 %v3277_v12  ;;  %v3034_v36 = vld [vmem:[%s4377_s1 + $0x20] sm:$0xff]  ;;  %v3426_v44 = vld [vmem:[%s4375_s0 + $0x168] sm:$0xff]  ;;  %v1662_v47 = vld [vmem:[%s4376_s2 + $0x18] sm:$0xff] }
   0xf   :  { %246 = vmatpush.bf16.msra.mxu1 %v3030_v13  ;;  %v3022_v37 = vld [vmem:[%s4377_s1] sm:$0xff]  ;;  %v3083_v45 = vld [vmem:[%s4375_s0 + $0xa8] sm:$0xff]  ;;  %v3451_v49 = vld [vmem:[%s4375_s0 + $0x158] sm:$0xff] }
  0x10   :  { %373 = vmatpush.bf16.msra.mxu2 %v3287_v14  ;;  %v3046_v38 = vld [vmem:[%s4377_s1 + $0x40] sm:$0xff]  ;;  %v3035_v50 = vld [vmem:[%s4377_s1 + $0x28] sm:$0xff]  ;;  %v3081_v54 = vld [vmem:[%s4375_s0 + $0x98] sm:$0xff] }
  0x11   :  { %508 = vmatpush.bf16.msra.mxu3 %v3292_v15  ;;  %v3058_v39 = vld [vmem:[%s4377_s1 + $0x60] sm:$0xff]  ;;  %v3023_v51 = vld [vmem:[%s4377_s1 + $0x8] sm:$0xff]  ;;  %v3474_v55 = vld [vmem:[%s4375_s0 + $0x150] sm:$0xff] }
  0x12   :  { %146 = vmatpush.bf16.msra.mxu0 %v3298_v16  ;;  %1674 = vperm.xlu0 %3160, %v1660_v32   ;;  %v3437_v46 = vld [vmem:[%s4375_s0 + $0x160] sm:$0xff]  ;;  %v3047_v52 = vld [vmem:[%s4377_s1 + $0x48] sm:$0xff]  ;;  %v3080_v56 = vld [vmem:[%s4375_s0 + $0x90] sm:$0xff] }
  0x13   :  { %247 = vmatpush.bf16.msra.mxu1 %v3029_v17  ;;  %v3082_v48 = vld [vmem:[%s4375_s0 + $0xa0] sm:$0xff]  ;;  %v3059_v53 = vld [vmem:[%s4377_s1 + $0x68] sm:$0xff]  ;;  %v3036_v61 = vld [vmem:[%s4377_s1 + $0x30] sm:$0xff] }
  0x14   :  { %374 = vmatpush.bf16.msra.mxu2 %v3308_v18  ;;  %v3485_v57 = vld [vmem:[%s4375_s0 + $0x148] sm:$0xff]  ;;  %v3496_v59 = vld [vmem:[%s4375_s0 + $0x140] sm:$0xff]  ;;  %v3024_v62 = vld [vmem:[%s4377_s1 + $0x10] sm:$0xff] }
  0x15   :  { %509 = vmatpush.bf16.msra.mxu3 %v3313_v19  ;;  %1684 = vperm.xlu1 %3161, %v1662_v47   ;;  %v3079_v58 = vld [vmem:[%s4375_s0 + $0x88] sm:$0xff]  ;;  %v3078_v60 = vld [vmem:[%s4375_s0 + $0x80] sm:$0xff]  ;;  %v3048_v63 = vld [vmem:[%s4377_s1 + $0x50] sm:$0xff] }
  0x16   :  { %147 = vmatpush.bf16.msra.mxu0 %v3319_v20  ;;  %v3121_v1 = vld [vmem:[%s4375_s0 + $0x1b8] sm:$0xff]  ;;  %v1665_v5 = vld [vmem:[%s4376_s2 + $0x30] sm:$0xff]  ;;  %v3119_v17 = vld [vmem:[%s4375_s0 + $0x1a8] sm:$0xff] }
  0x17   :  { %248 = vmatpush.bf16.msra.mxu1 %v3028_v21  ;;  %v3540_v9 = vld [vmem:[%s4375_s0 + $0x1f0] sm:$0xff]  ;;  %v3037_v13 = vld [vmem:[%s4377_s1 + $0x38] sm:$0xff]  ;;  %v3118_v21 = vld [vmem:[%s4375_s0 + $0x1a0] sm:$0xff] }
  0x18   :  { %375 = vmatpush.bf16.msra.mxu2 %v3332_v23  ;;  %v3583_v22 = vld [vmem:[%s4375_s0 + $0x1e0] sm:$0xff]  ;;  %v3075_v32 = vld [vmem:[%s4377_s1 + $0xa8] sm:$0xff]  ;;  %v3093_v42 = vld [vmem:[%s4377_s1 + $0xf8] sm:$0xff] }
  0x19   :  { %510 = vmatpush.bf16.msra.mxu3 %v3337_v24  ;;  %v3074_v25 = vld [vmem:[%s4377_s1 + $0xa0] sm:$0xff] }
  0x1a   :  { %148 = vmatpush.bf16.msra.mxu0 %v3343_v26  ;;  %1699 = vperm.xlu0 %3160, %v1665_v5  }
  0x1b   :  { %249 = vmatpush.bf16.msra.mxu1 %v3027_v27  ;;  %v3117_v27 = vld [vmem:[%s4375_s0 + $0x198] sm:$0xff] }
  0x1c   :  { %376 = vmatpush.bf16.msra.mxu2 %v3353_v28 }
  0x1d   :  { %511 = vmatpush.bf16.msra.mxu3 %v3358_v29 }
  0x1e   :  { %149 = vmatpush.bf16.msra.mxu0 %v3364_v30 }
  0x1f   :  { %250 = vmatpush.bf16.msra.mxu1 %v3026_v31  ;;  %v3128_v31 = vld [vmem:[%s4375_s0 + $0x1d0] sm:$0xff] }
  0x20   :  { %377 = vmatpush.bf16.msra.mxu2 %v3377_v33 }
  0x21   :  { %512 = vmatpush.bf16.msra.mxu3 %v3382_v34  ;;  %150 = vmatmul.bf16.vlgmr.msra.gmra.mxu0 %v3034_v36  ;;  %v3114_v36 = vld [vmem:[%s4375_s0 + $0x180] sm:$0xff] }
  0x22   :  { %251 = vmatmul.bf16.vlgmr.msra.gmra.mxu1 %v3022_v37  ;;  %649 = vmatpush.bf16.msrb.mxu0 %v3085_v40  ;;  %v3126_v37 = vld [vmem:[%s4375_s0 + $0x1c0] sm:$0xff]  ;;  %v3077_v40 = vld [vmem:[%s4377_s1 + $0xb8] sm:$0xff] }
  0x23   :  { %378 = vmatmul.bf16.vlgmr.msra.gmra.mxu2 %v3046_v38  ;;  %702 = vmatpush.bf16.msrb.mxu1 %v3216_v0  ;;  %v3060_v0 = vld [vmem:[%s4377_s1 + $0x70] sm:$0xff] }
  0x24   :  { %764 = vmatpush.bf16.msrb.mxu2 %v3229_v3  ;;  %513 = vmatmul.bf16.vlgmr.msra.gmra.mxu3 %v3058_v39  ;;  %v3072_v38 = vld [vmem:[%s4377_s1 + $0x90] sm:$0xff]  ;;  %v3157_v39 = vld [vmem:[%s4375_s0 + $0x238] sm:$0xff] }
  0x25   :  { %899 = vmatpush.bf16.msrb.mxu3 %v3387_v35 }
  0x26   :  { %650 = vmatpush.bf16.msrb.mxu0 %v3084_v43  ;;  %v3155_v43 = vld [vmem:[%s4375_s0 + $0x228] sm:$0xff] }
  0x27   :  { %703 = vmatpush.bf16.msrb.mxu1 %v3235_v4  ;;  %v3525_v4 = vld [vmem:[%s4375_s0 + $0x1f8] sm:$0xff] }
  0x28   :  { %765 = vmatpush.bf16.msrb.mxu2 %v3250_v7 }
  0x29   :  { %900 = vmatpush.bf16.msrb.mxu3 %v3412_v41 }
  0x2a   :  { %651 = vmatpush.bf16.msrb.mxu0 %v3083_v45  ;;  %v3106_v45 = vld [vmem:[%s4377_s1 + $0x120] sm:$0xff] }
  0x2b   :  { %704 = vmatpush.bf16.msrb.mxu1 %v3256_v8  ;;  %v3120_v8 = vld [vmem:[%s4375_s0 + $0x1b0] sm:$0xff] }
  0x2c   :  { %766 = vmatpush.bf16.msrb.mxu2 %v3271_v11 }
  0x2d   :  { %901 = vmatpush.bf16.msrb.mxu3 %v3426_v44 }
  0x2e   :  { %652 = vmatpush.bf16.msrb.mxu0 %v3082_v48 }
  0x2f   :  { %705 = vmatpush.bf16.msrb.mxu1 %v3277_v12  ;;  %v1666_v12 = vld [vmem:[%s4376_s2 + $0x38] sm:$0xff] }
  0x30   :  { %767 = vmatpush.bf16.msrb.mxu2 %v3292_v15  ;;  %1704 = vperm.xlu1 %3161, %v1666_v12  }
  0x31   :  { %902 = vmatpush.bf16.msrb.mxu3 %v3437_v46  ;;  %155 = vmatmul.bf16.gmra.mxu0 %v3035_v50  ;;  %v3122_v50 = vld [vmem:[%s4377_s1 + $0x160] sm:$0xff] }
  0x32   :  { %256 = vmatmul.bf16.gmra.mxu1 %v3023_v51  ;;  %653 = vmatpush.bf16.msrb.mxu0 %v3081_v54 }
  0x33   :  { %383 = vmatmul.bf16.gmra.mxu2 %v3047_v52  ;;  %706 = vmatpush.bf16.msrb.mxu1 %v3298_v16  ;;  %v3025_v16 = vld [vmem:[%s4377_s1 + $0x18] sm:$0xff] }
  0x34   :  { %768 = vmatpush.bf16.msrb.mxu2 %v3313_v19  ;;  %518 = vmatmul.bf16.gmra.mxu3 %v3059_v53  ;;  %v3153_v52 = vld [vmem:[%s4375_s0 + $0x218] sm:$0xff] }
  0x35   :  { %903 = vmatpush.bf16.msrb.mxu3 %v3451_v49 }
  0x36   :  { %654 = vmatpush.bf16.msrb.mxu0 %v3080_v56 }
  0x37   :  { %707 = vmatpush.bf16.msrb.mxu1 %v3319_v20  ;;  %v1664_v20 = vld [vmem:[%s4376_s2 + $0x28] sm:$0xff] }
  0x38   :  { %769 = vmatpush.bf16.msrb.mxu2 %v3337_v24 }
  0x39   :  { %904 = vmatpush.bf16.msrb.mxu3 %v3474_v55 }
  0x3a   :  { %655 = vmatpush.bf16.msrb.mxu0 %v3079_v58 }
  0x3b   :  { %708 = vmatpush.bf16.msrb.mxu1 %v3343_v26  ;;  %v3070_v26 = vld [vmem:[%s4377_s1 + $0x80] sm:$0xff] }
  0x3c   :  { %770 = vmatpush.bf16.msrb.mxu2 %v3358_v29 }
  0x3d   :  { %905 = vmatpush.bf16.msrb.mxu3 %v3485_v57 }
  0x3e   :  { %656 = vmatpush.bf16.msrb.mxu0 %v3078_v60  ;;  %v3152_v60 = vld [vmem:[%s4375_s0 + $0x210] sm:$0xff] }
  0x3f   :  { %709 = vmatpush.bf16.msrb.mxu1 %v3364_v30  ;;  %v3116_v30 = vld [vmem:[%s4375_s0 + $0x190] sm:$0xff] }
  0x40   :  { %771 = vmatpush.bf16.msrb.mxu2 %v3382_v34 }
  0x41   :  { %906 = vmatpush.bf16.msrb.mxu3 %v3496_v59  ;;  %160 = vmatmul.bf16.gmra.mxu0 %v3036_v61 }
  0x42   :  { %978 = vmatpush.bf16.msra.mxu0 %v3229_v3  ;;  %261 = vmatmul.bf16.gmra.mxu1 %v3024_v62 }
  0x43   :  { %1031 = vmatpush.bf16.msra.mxu1 %v3224_v2  ;;  %388 = vmatmul.bf16.gmra.mxu2 %v3048_v63  ;;  %v1663_v2 = vld [vmem:[%s4376_s2 + $0x20] sm:$0xff]  ;;  %v3107_v63 = vld [vmem:[%s4377_s1 + $0x128] sm:$0xff] }
  0x44   :  { %523 = vmatmul.bf16.gmra.mxu3 %v3060_v0  ;;  %1158 = vmatpush.bf16.msra.mxu2 %v3121_v1  ;;  %v3103_v0 = vld [vmem:[%s4377_s1 + $0x108] sm:$0xff] }
  0x45   :  { %1293 = vmatpush.bf16.msra.mxu3 %v3525_v4  ;;  %1689 = vperm.xlu2 %3162, %v1663_v2   ;;  %v3111_v2 = vld [vmem:[%s4377_s1 + $0x148] sm:$0xff] }
  0x46   :  { %979 = vmatpush.bf16.msra.mxu0 %v3250_v7 }
  0x47   :  { %1032 = vmatpush.bf16.msra.mxu1 %v3245_v6  ;;  %v3049_v6 = vld [vmem:[%s4377_s1 + $0x58] sm:$0xff] }
  0x48   :  { %1159 = vmatpush.bf16.msra.mxu2 %v3120_v8  ;;  %v3123_v8 = vld [vmem:[%s4377_s1 + $0x168] sm:$0xff] }
  0x49   :  { %1294 = vmatpush.bf16.msra.mxu3 %v3540_v9 }
  0x4a   :  { %980 = vmatpush.bf16.msra.mxu0 %v3271_v11 }
  0x4b   :  { %1033 = vmatpush.bf16.msra.mxu1 %v3266_v10  ;;  %v3061_v10 = vld [vmem:[%s4377_s1 + $0x78] sm:$0xff] }
  0x4c   :  { %1160 = vmatpush.bf16.msra.mxu2 %v3119_v17 }
  0x4d   :  { %1694 = vperm.xlu2 %3162, %v1664_v20  }
  0x4e   :  { %981 = vmatpush.bf16.msra.mxu0 %v3292_v15 }
  0x4f   :  { %1034 = vmatpush.bf16.msra.mxu1 %v3287_v14  ;;  %v3570_v14 = vld [vmem:[%s4375_s0 + $0x1e8] sm:$0xff] }
  0x50   :  { %1295 = vmatpush.bf16.msra.mxu3 %v3570_v14  ;;  %1161 = vmatpush.bf16.msra.mxu2 %v3118_v21 }
  0x51   :  { %165 = vmatmul.bf16.gmra.mxu0 %v3037_v13  ;;  %v3151_v13 = vld [vmem:[%s4375_s0 + $0x208] sm:$0xff] }
  0x52   :  { %266 = vmatmul.bf16.gmra.mxu1 %v3025_v16  ;;  %982 = vmatpush.bf16.msra.mxu0 %v3313_v19 }
  0x53   :  { %393 = vmatmul.bf16.gmra.mxu2 %v3049_v6  ;;  %1035 = vmatpush.bf16.msra.mxu1 %v3308_v18  ;;  %v3086_v18 = vld [vmem:[%s4377_s1 + $0xc0] sm:$0xff] }
  0x54   :  { %528 = vmatmul.bf16.gmra.mxu3 %v3061_v10  ;;  %1162 = vmatpush.bf16.msra.mxu2 %v3117_v27 }
  0x55   :  { %1296 = vmatpush.bf16.msra.mxu3 %v3583_v22 }
  0x56   :  { %983 = vmatpush.bf16.msra.mxu0 %v3337_v24 }
  0x57   :  { %1036 = vmatpush.bf16.msra.mxu1 %v3332_v23  ;;  %v3090_v23 = vld [vmem:[%s4377_s1 + $0xe0] sm:$0xff] }
  0x58   :  { %1163 = vmatpush.bf16.msra.mxu2 %v3116_v30 }
  0x5a   :  { %984 = vmatpush.bf16.msra.mxu0 %v3358_v29 }
  0x5b   :  { %1037 = vmatpush.bf16.msra.mxu1 %v3353_v28  ;;  %v3129_v28 = vld [vmem:[%s4375_s0 + $0x1d8] sm:$0xff] }
  0x5c   :  { %1297 = vmatpush.bf16.msra.mxu3 %v3129_v28 }
  0x5e   :  { %985 = vmatpush.bf16.msra.mxu0 %v3382_v34 }
  0x5f   :  { %1038 = vmatpush.bf16.msra.mxu1 %v3377_v33  ;;  %v3071_v33 = vld [vmem:[%s4377_s1 + $0x88] sm:$0xff] }
  0x60   :  { %1298 = vmatpush.bf16.msra.mxu3 %v3128_v31 }
  0x61   :  { %657 = vmatmul.bf16.vlgmr.msrb.gmra.mxu0 %v3074_v25 }
  0x62   :  { %710 = vmatmul.bf16.vlgmr.msrb.gmra.mxu1 %v3070_v26  ;;  %1372 = vmatpush.bf16.msrb.mxu0 %v3387_v35  ;;  %v3115_v35 = vld [vmem:[%s4375_s0 + $0x188] sm:$0xff] }
  0x63   :  { %772 = vmatmul.bf16.vlgmr.msrb.gmra.mxu2 %v3086_v18  ;;  %1425 = vmatpush.bf16.msrb.mxu1 %v3229_v3  ;;  %v3087_v3 = vld [vmem:[%s4377_s1 + $0xc8] sm:$0xff]  ;;  %v3108_v18 = vld [vmem:[%s4377_s1 + $0x130] sm:$0xff] }
  0x64   :  { %907 = vmatmul.bf16.vlgmr.msrb.gmra.mxu3 %v3090_v23  ;;  %1164 = vmatpush.bf16.msra.mxu2 %v3115_v35  ;;  %v3104_v23 = vld [vmem:[%s4377_s1 + $0x110] sm:$0xff] }
  0x66   :  { %1373 = vmatpush.bf16.msrb.mxu0 %v3412_v41  ;;  %v3073_v41 = vld [vmem:[%s4377_s1 + $0x98] sm:$0xff] }
  0x67   :  { %1426 = vmatpush.bf16.msrb.mxu1 %v3250_v7  ;;  %v3091_v7 = vld [vmem:[%s4377_s1 + $0xe8] sm:$0xff] }
  0x68   :  { %1165 = vmatpush.bf16.msra.mxu2 %v3114_v36 }
  0x6a   :  { %1374 = vmatpush.bf16.msrb.mxu0 %v3426_v44  ;;  %v3154_v44 = vld [vmem:[%s4375_s0 + $0x220] sm:$0xff] }
  0x6b   :  { %1427 = vmatpush.bf16.msrb.mxu1 %v3271_v11  ;;  %v3127_v11 = vld [vmem:[%s4375_s0 + $0x1c8] sm:$0xff] }
  0x6c   :  { %1299 = vmatpush.bf16.msra.mxu3 %v3127_v11  ;;  %1487 = vmatpush.bf16.msrb.mxu2 %v3525_v4 }
  0x6e   :  { %1375 = vmatpush.bf16.msrb.mxu0 %v3437_v46  ;;  %v3102_v46 = vld [vmem:[%s4377_s1 + $0x100] sm:$0xff] }
  0x6f   :  { %1428 = vmatpush.bf16.msrb.mxu1 %v3292_v15  ;;  %v3076_v15 = vld [vmem:[%s4377_s1 + $0xb0] sm:$0xff] }
  0x70   :  { %1300 = vmatpush.bf16.msra.mxu3 %v3126_v37  ;;  %1488 = vmatpush.bf16.msrb.mxu2 %v3540_v9 }
  0x71   :  { %662 = vmatmul.bf16.gmra.mxu0 %v3075_v32  ;;  %v3124_v32 = vld [vmem:[%s4377_s1 + $0x170] sm:$0xff] }
  0x72   :  { %715 = vmatmul.bf16.gmra.mxu1 %v3071_v33  ;;  %1376 = vmatpush.bf16.msrb.mxu0 %v3451_v49  ;;  %v3110_v49 = vld [vmem:[%s4377_s1 + $0x140] sm:$0xff] }
  0x73   :  { %777 = vmatmul.bf16.gmra.mxu2 %v3087_v3  ;;  %1429 = vmatpush.bf16.msrb.mxu1 %v3313_v19  ;;  %v3088_v19 = vld [vmem:[%s4377_s1 + $0xd0] sm:$0xff] }
  0x74   :  { %912 = vmatmul.bf16.gmra.mxu3 %v3091_v7  ;;  %1489 = vmatpush.bf16.msrb.mxu2 %v3570_v14 }
  0x75   :  { %1622 = vmatpush.bf16.msrb.mxu3 %v3157_v39  ;;  %v3109_v39 = vld [vmem:[%s4377_s1 + $0x138] sm:$0xff] }
  0x76   :  { %1377 = vmatpush.bf16.msrb.mxu0 %v3474_v55 }
  0x77   :  { %1430 = vmatpush.bf16.msrb.mxu1 %v3337_v24  ;;  %v3092_v24 = vld [vmem:[%s4377_s1 + $0xf0] sm:$0xff] }
  0x78   :  { %1490 = vmatpush.bf16.msrb.mxu2 %v3583_v22  ;;  %v3150_v22 = vld [vmem:[%s4375_s0 + $0x200] sm:$0xff] }
  0x7a   :  { %1378 = vmatpush.bf16.msrb.mxu0 %v3485_v57 }
  0x7b   :  { %1431 = vmatpush.bf16.msrb.mxu1 %v3358_v29  ;;  %v3156_v29 = vld [vmem:[%s4375_s0 + $0x230] sm:$0xff] }
  0x7c   :  { %1491 = vmatpush.bf16.msrb.mxu2 %v3129_v28  ;;  %1623 = vmatpush.bf16.msrb.mxu3 %v3156_v29  ;;  %v3105_v29 = vld [vmem:[%s4377_s1 + $0x118] sm:$0xff] }
  0x7e   :  { %1379 = vmatpush.bf16.msrb.mxu0 %v3496_v59 }
  0x7f   :  { %1432 = vmatpush.bf16.msrb.mxu1 %v3382_v34  ;;  %v3089_v34 = vld [vmem:[%s4377_s1 + $0xd8] sm:$0xff] }
  0x80   :  { %1492 = vmatpush.bf16.msrb.mxu2 %v3128_v31  ;;  %1624 = vmatpush.bf16.msrb.mxu3 %v3155_v43  ;;  %v3112_v31 = vld [vmem:[%s4377_s1 + $0x150] sm:$0xff]  ;;  %v3125_v43 = vld [vmem:[%s4377_s1 + $0x178] sm:$0xff] }
  0x81   :  { %667 = vmatmul.bf16.gmra.mxu0 %v3076_v15 }
  0x82   :  { %720 = vmatmul.bf16.gmra.mxu1 %v3072_v38 }
  0x83   :  { %782 = vmatmul.bf16.gmra.mxu2 %v3088_v19 }
  0x84   :  { %917 = vmatmul.bf16.gmra.mxu3 %v3092_v24  ;;  %1493 = vmatpush.bf16.msrb.mxu2 %v3127_v11 }
  0x85   :  { %1625 = vmatpush.bf16.msrb.mxu3 %v3154_v44 }
  0x88   :  { %1494 = vmatpush.bf16.msrb.mxu2 %v3126_v37 }
  0x89   :  { %1626 = vmatpush.bf16.msrb.mxu3 %v3153_v52 }
  0x8d   :  { %1627 = vmatpush.bf16.msrb.mxu3 %v3152_v60 }
  0x91   :  { %672 = vmatmul.bf16.gmra.mxu0 %v3077_v40  ;;  %1628 = vmatpush.bf16.msrb.mxu3 %v3151_v13 }
  0x92   :  { %725 = vmatmul.bf16.gmra.mxu1 %v3073_v41 }
  0x93   :  { %787 = vmatmul.bf16.gmra.mxu2 %v3089_v34 }
  0x94   :  { %922 = vmatmul.bf16.gmra.mxu3 %v3093_v42  ;;  %v3113_v42 = vld [vmem:[%s4377_s1 + $0x158] sm:$0xff] }
  0x95   :  { %1629 = vmatpush.bf16.msrb.mxu3 %v3150_v22 }
  0x9e   :  { %v151_v47 = vpop.f32.mrf.mxu0 }
  0x9f   :  { %v252_v48 = vpop.f32.mrf.mxu1 }
  0xa0   :  { %v253_v51 = vadd.f32 %v252_v48, %v151_v47 }
  0xa1   :  { %986 = vmatmul.bf16.vlgmr.msra.gmra.mxu0 %v3106_v45 }
  0xa2   :  { %1039 = vmatmul.bf16.vlgmr.msra.gmra.mxu1 %v3102_v46 }
  0xa3   :  { %1166 = vmatmul.bf16.vlgmr.msra.gmra.mxu2 %v3110_v49 }
  0xa4   :  { %1301 = vmatmul.bf16.vlgmr.msra.gmra.mxu3 %v3122_v50 }
  0xa6   :  { %v379_v53 = vpop.f32.mrf.mxu2  ;;  %v153_v56 = vpop.f32.mrf.mxu0 }
  0xa7   :  { %v514_v54 = vpop.f32.mrf.mxu3  ;;  %v399_v55 = vadd.f32 %v379_v53, %v253_v51  ;;  %v254_v57 = vpop.f32.mrf.mxu1 }
  0xa8   :  { %v255_v58 = vadd.f32 %v254_v57, %v153_v56  ;;  %v3134_v56 = vld [vmem:[%s4377_s1 + $0x180] sm:$0xff] }
  0xa9   :  { %v3712_v59 = vadd.f32 %v514_v54, %v399_v55  ;;  %v3138_v55 = vld [vmem:[%s4377_s1 + $0x1a0] sm:$0xff] }
  0xae   :  { %v381_v61 = vpop.f32.mrf.mxu2  ;;  %v156_v4 = vpop.f32.mrf.mxu0 }
  0xaf   :  { %v516_v62 = vpop.f32.mrf.mxu3  ;;  %v400_v1 = vadd.f32 %v381_v61, %v255_v58  ;;  %v257_v5 = vpop.f32.mrf.mxu1  ;;  %v3142_v61 = vld [vmem:[%s4377_s1 + $0x1c0] sm:$0xff] }
  0xb0   :  { %v258_v9 = vadd.f32 %v257_v5, %v156_v4 }
  0xb1   :  { %v3729_v12 = vadd.f32 %v516_v62, %v400_v1  ;;  %991 = vmatmul.bf16.gmra.mxu0 %v3107_v63  ;;  %v3146_v62 = vld [vmem:[%s4377_s1 + $0x1e0] sm:$0xff] }
  0xb2   :  { %1044 = vmatmul.bf16.gmra.mxu1 %v3103_v0 }
  0xb3   :  { %1171 = vmatmul.bf16.gmra.mxu2 %v3111_v2 }
  0xb4   :  { %1306 = vmatmul.bf16.gmra.mxu3 %v3123_v8 }
  0xb6   :  { %v384_v16 = vpop.f32.mrf.mxu2  ;;  %v158_v17 = vpop.f32.mrf.mxu0 }
  0xb7   :  { %v519_v6 = vpop.f32.mrf.mxu3  ;;  %v401_v10 = vadd.f32 %v384_v16, %v258_v9  ;;  %v259_v14 = vpop.f32.mrf.mxu1 }
  0xb8   :  { %v260_v20 = vadd.f32 %v259_v14, %v158_v17  ;;  %v3135_v17 = vld [vmem:[%s4377_s1 + $0x188] sm:$0xff] }
  0xb9   :  { %v3734_v21 = vadd.f32 %v519_v6, %v401_v10  ;;  %v3139_v10 = vld [vmem:[%s4377_s1 + $0x1a8] sm:$0xff] }
  0xbe   :  { %v386_v25 = vpop.f32.mrf.mxu2  ;;  %v161_v28 = vpop.f32.mrf.mxu0 }
  0xbf   :  { %v521_v26 = vpop.f32.mrf.mxu3  ;;  %v402_v27 = vadd.f32 %v386_v25, %v260_v20  ;;  %v262_v30 = vpop.f32.mrf.mxu1  ;;  %v3143_v25 = vld [vmem:[%s4377_s1 + $0x1c8] sm:$0xff] }
  0xc0   :  { %v263_v33 = vadd.f32 %v262_v30, %v161_v28 }
  0xc1   :  { %v3751_v3 = vadd.f32 %v521_v26, %v402_v27  ;;  %996 = vmatmul.bf16.gmra.mxu0 %v3108_v18  ;;  %v3147_v26 = vld [vmem:[%s4377_s1 + $0x1e8] sm:$0xff] }
  0xc2   :  { %1049 = vmatmul.bf16.gmra.mxu1 %v3104_v23 }
  0xc3   :  { %1176 = vmatmul.bf16.gmra.mxu2 %v3112_v31 }
  0xc4   :  { %1311 = vmatmul.bf16.gmra.mxu3 %v3124_v32 }
  0xc6   :  { %v389_v7 = vpop.f32.mrf.mxu2  ;;  %v163_v36 = vpop.f32.mrf.mxu0 }
  0xc7   :  { %v524_v35 = vpop.f32.mrf.mxu3  ;;  %v403_v11 = vadd.f32 %v389_v7, %v263_v33  ;;  %v264_v37 = vpop.f32.mrf.mxu1 }
  0xc8   :  { %v265_v15 = vadd.f32 %v264_v37, %v163_v36  ;;  %v3140_v36 = vld [vmem:[%s4377_s1 + $0x1b0] sm:$0xff] }
  0xc9   :  { %v3753_v38 = vadd.f32 %v524_v35, %v403_v11  ;;  %v3136_v37 = vld [vmem:[%s4377_s1 + $0x190] sm:$0xff] }
  0xce   :  { %v391_v19 = vpop.f32.mrf.mxu2  ;;  %v166_v41 = vpop.f32.mrf.mxu0 }
  0xcf   :  { %v526_v24 = vpop.f32.mrf.mxu3  ;;  %v404_v40 = vadd.f32 %v391_v19, %v265_v15  ;;  %v267_v34 = vpop.f32.mrf.mxu1 }
  0xd0   :  { %v268_v44 = vadd.f32 %v267_v34, %v166_v41 }
  0xd1   :  { %v3767_v45 = vadd.f32 %v526_v24, %v404_v40  ;;  %1001 = vmatmul.bf16.gmra.mxu0 %v3109_v39  ;;  %v3144_v39 = vld [vmem:[%s4377_s1 + $0x1d0] sm:$0xff] }
  0xd2   :  { %1054 = vmatmul.bf16.gmra.mxu1 %v3105_v29  ;;  %v3148_v29 = vld [vmem:[%s4377_s1 + $0x1f0] sm:$0xff] }
  0xd3   :  { %1181 = vmatmul.bf16.gmra.mxu2 %v3113_v42 }
  0xd4   :  { %1316 = vmatmul.bf16.gmra.mxu3 %v3125_v43 }
  0xd6   :  { %v394_v46 = vpop.f32.mrf.mxu2  ;;  %v168_v49 = vpop.f32.mrf.mxu0 }
  0xd7   :  { %v529_v47 = vpop.f32.mrf.mxu3  ;;  %v405_v48 = vadd.f32 %v394_v46, %v268_v44  ;;  %v269_v50 = vpop.f32.mrf.mxu1 }
  0xd8   :  { %v270_v51 = vadd.f32 %v269_v50, %v168_v49 }
  0xd9   :  { %v3769_v52 = vadd.f32 %v529_v47, %v405_v48 }
  0xde   :  { %v396_v53 = vpop.f32.mrf.mxu2  ;;  %v658_v58 = vpop.f32.mrf.mxu0 }
  0xdf   :  { %v531_v54 = vpop.f32.mrf.mxu3  ;;  %v406_v57 = vadd.f32 %v396_v53, %v270_v51  ;;  %v711_v60 = vpop.f32.mrf.mxu1  ;;  %v3141_v51 = vld [vmem:[%s4377_s1 + $0x1b8] sm:$0xff] }
  0xe0   :  { %v712_v63 = vadd.f32 %v711_v60, %v658_v58  ;;  %v3137_v53 = vld [vmem:[%s4377_s1 + $0x198] sm:$0xff] }
  0xe1   :  { %v3783_v0 = vadd.f32 %v531_v54, %v406_v57  ;;  %1380 = vmatmul.bf16.vlgmr.msrb.gmra.mxu0 %v3138_v55  ;;  %v3145_v57 = vld [vmem:[%s4377_s1 + $0x1d8] sm:$0xff] }
  0xe2   :  { %1433 = vmatmul.bf16.vlgmr.msrb.gmra.mxu1 %v3134_v56  ;;  %v3149_v58 = vld [vmem:[%s4377_s1 + $0x1f8] sm:$0xff] }
  0xe3   :  { %1495 = vmatmul.bf16.vlgmr.msrb.gmra.mxu2 %v3142_v61 }
  0xe4   :  { %1630 = vmatmul.bf16.vlgmr.msrb.gmra.mxu3 %v3146_v62 }
  0xe6   :  { %v773_v1 = vpop.f32.mrf.mxu2  ;;  %v660_v2 = vpop.f32.mrf.mxu0 }
  0xe7   :  { %v908_v4 = vpop.f32.mrf.mxu3  ;;  %v793_v5 = vadd.f32 %v773_v1, %v712_v63  ;;  %v713_v8 = vpop.f32.mrf.mxu1 }
  0xe8   :  { %v714_v9 = vadd.f32 %v713_v8, %v660_v2 }
  0xe9   :  { %v3785_v13 = vadd.f32 %v908_v4, %v793_v5 }
  0xee   :  { %v775_v16 = vpop.f32.mrf.mxu2  ;;  %v663_v20 = vpop.f32.mrf.mxu0 }
  0xef   :  { %v910_v6 = vpop.f32.mrf.mxu3  ;;  %v794_v14 = vadd.f32 %v775_v16, %v714_v9  ;;  %v716_v22 = vpop.f32.mrf.mxu1 }
  0xf0   :  { %v717_v18 = vadd.f32 %v716_v22, %v663_v20 }
  0xf1   :  { %v3799_v23 = vadd.f32 %v910_v6, %v794_v14  ;;  %1385 = vmatmul.bf16.gmra.mxu0 %v3139_v10 }
  0xf2   :  { %1438 = vmatmul.bf16.gmra.mxu1 %v3135_v17 }
  0xf3   :  { %1500 = vmatmul.bf16.gmra.mxu2 %v3143_v25 }
  0xf4   :  { %1635 = vmatmul.bf16.gmra.mxu3 %v3147_v26 }
  0xf6   :  { %v778_v27 = vpop.f32.mrf.mxu2  ;;  %v665_v31 = vpop.f32.mrf.mxu0 }
  0xf7   :  { %v913_v28 = vpop.f32.mrf.mxu3  ;;  %v795_v30 = vadd.f32 %v778_v27, %v717_v18  ;;  %v718_v32 = vpop.f32.mrf.mxu1 }
  0xf8   :  { %v719_v33 = vadd.f32 %v718_v32, %v665_v31 }
  0xf9   :  { %v3801_v7 = vadd.f32 %v913_v28, %v795_v30 }
  0xfe   :  { %v780_v35 = vpop.f32.mrf.mxu2  ;;  %v668_v19 = vpop.f32.mrf.mxu0 }
  0xff   :  { %v915_v11 = vpop.f32.mrf.mxu3  ;;  %v796_v15 = vadd.f32 %v780_v35, %v719_v33  ;;  %v721_v24 = vpop.f32.mrf.mxu1 }
 0x100   :  { %v722_v40 = vadd.f32 %v721_v24, %v668_v19 }
 0x101   :  { %v3815_v41 = vadd.f32 %v915_v11, %v796_v15  ;;  %1390 = vmatmul.bf16.gmra.mxu0 %v3140_v36 }
 0x102   :  { %1443 = vmatmul.bf16.gmra.mxu1 %v3136_v37 }
 0x103   :  { %1505 = vmatmul.bf16.gmra.mxu2 %v3144_v39 }
 0x104   :  { %1640 = vmatmul.bf16.gmra.mxu3 %v3148_v29 }
 0x106   :  { %v783_v34 = vpop.f32.mrf.mxu2  ;;  %v670_v44 = vpop.f32.mrf.mxu0 }
 0x107   :  { %v918_v42 = vpop.f32.mrf.mxu3  ;;  %v797_v43 = vadd.f32 %v783_v34, %v722_v40  ;;  %v723_v46 = vpop.f32.mrf.mxu1 }
 0x108   :  { %v724_v47 = vadd.f32 %v723_v46, %v670_v44 }
 0x109   :  { %v3817_v48 = vadd.f32 %v918_v42, %v797_v43 }
 0x10e   :  { %v785_v49 = vpop.f32.mrf.mxu2  ;;  %v673_v55 = vpop.f32.mrf.mxu0 }
 0x10f   :  { %v920_v50 = vpop.f32.mrf.mxu3  ;;  %v798_v54 = vadd.f32 %v785_v49, %v724_v47  ;;  %v726_v56 = vpop.f32.mrf.mxu1 }
 0x110   :  { %v727_v60 = vadd.f32 %v726_v56, %v673_v55 }
 0x111   :  { %v3831_v61 = vadd.f32 %v920_v50, %v798_v54  ;;  %1395 = vmatmul.bf16.gmra.mxu0 %v3141_v51 }
 0x112   :  { %1448 = vmatmul.bf16.gmra.mxu1 %v3137_v53 }
 0x113   :  { %1510 = vmatmul.bf16.gmra.mxu2 %v3145_v57  ;;  %v1670_v57 = vpop.permute.xlu0 %1669 }
 0x114   :  { %1645 = vmatmul.bf16.gmra.mxu3 %v3149_v58 }
 0x116   :  { %v788_v62 = vpop.f32.mrf.mxu2  ;;  %v675_v4 = vpop.f32.mrf.mxu0 }
 0x117   :  { %v923_v63 = vpop.f32.mrf.mxu3  ;;  %v799_v1 = vadd.f32 %v788_v62, %v727_v60  ;;  %v728_v5 = vpop.f32.mrf.mxu1  ;;  %v3878_v62 = vadd.f32 %v1670_v57, %v3785_v13 }
 0x118   :  { %v729_v2 = vadd.f32 %v728_v5, %v675_v4  ;;  %v3881_v5 = vadd.f32 %v1670_v57, %v3712_v59 }
 0x119   :  { %v3833_v8 = vadd.f32 %v923_v63, %v799_v1 }
 0x11e   :  { %v790_v9 = vpop.f32.mrf.mxu2  ;;  %v987_v10 = vpop.f32.mrf.mxu0 }
 0x11f   :  { %v925_v16 = vpop.f32.mrf.mxu3  ;;  %v800_v6 = vadd.f32 %v790_v9, %v729_v2  ;;  %v1040_v17 = vpop.f32.mrf.mxu1 }
 0x120   :  { %v1041_v50 = vadd.f32 %v1040_v17, %v987_v10  ;;  %v1739_v17 = vadd.f32 %v3878_v62, %v3881_v5 }
 0x121   :  { %v3835_v14 = vadd.f32 %v925_v16, %v800_v6 }
 0x126   :  { %v1167_v20 = vpop.f32.mrf.mxu2  ;;  %v989_v25 = vpop.f32.mrf.mxu0 }
 0x127   :  { %v1302_v22 = vpop.f32.mrf.mxu3  ;;  %v1042_v26 = vpop.f32.mrf.mxu1  ;;  %v1187_v54 = vadd.f32 %v1167_v20, %v1041_v50 }
 0x128   :  { %v1043_v63 = vadd.f32 %v1042_v26, %v989_v25  ;;  %v1675_v26 = vpop.permute.xlu0 %1674 }
 0x129   :  { %v1322_v58 = vadd.f32 %v1302_v22, %v1187_v54  ;;  %v3891_v59 = vadd.f32 %v1675_v26, %v3799_v23 }
 0x12b   :  { %v3883_v2 = vadd.f32 %v1670_v57, %v1322_v58  ;;  %v3895_v58 = vadd.f32 %v1675_v26, %v3729_v12 }
 0x12d   :  { %v1740_v25 = vadd.f32 %v1739_v17, %v3883_v2 }
 0x12e   :  { %v1169_v18 = vpop.f32.mrf.mxu2  ;;  %v992_v28 = vpop.f32.mrf.mxu0 }
 0x12f   :  { %v1304_v27 = vpop.f32.mrf.mxu3  ;;  %v1045_v30 = vpop.f32.mrf.mxu1  ;;  %v1188_v9 = vadd.f32 %v1169_v18, %v1043_v63  ;;  %v1744_v63 = vadd.f32 %v3891_v59, %v3895_v58 }
 0x130   :  { %v1046_v50 = vadd.f32 %v1045_v30, %v992_v28 }
 0x131   :  { %v1323_v22 = vadd.f32 %v1304_v27, %v1188_v9 }
 0x136   :  { %v1172_v31 = vpop.f32.mrf.mxu2  ;;  %v3837_v33 = vpop.f32.mrf.mxu0 }
 0x137   :  { %v1307_v32 = vpop.f32.mrf.mxu3  ;;  %v3839_v35 = vpop.f32.mrf.mxu1  ;;  %v1189_v27 = vadd.f32 %v1172_v31, %v1046_v50 }
 0x138   :  { %v1048_v31 = vadd.f32 %v3839_v35, %v3837_v33 }
 0x13e   :  { %v3841_v11 = vpop.f32.mrf.mxu2  ;;  %v3845_v37 = vpop.f32.mrf.mxu0 }
 0x13f   :  { %v3843_v36 = vpop.f32.mrf.mxu3  ;;  %v3847_v15 = vpop.f32.mrf.mxu1 }
 0x140   :  { %v1051_v35 = vadd.f32 %v3847_v15, %v3845_v37 }
 0x146   :  { %v3849_v19 = vpop.f32.mrf.mxu2  ;;  %v3853_v39 = vpop.f32.mrf.mxu0 }
 0x147   :  { %v3851_v24 = vpop.f32.mrf.mxu3  ;;  %v3855_v29 = vpop.f32.mrf.mxu1  ;;  %v1191_v37 = vadd.f32 %v3849_v19, %v1051_v35 }
 0x148   :  { %v1053_v19 = vadd.f32 %v3855_v29, %v3853_v39 }
 0x14e   :  { %v3857_v40 = vpop.f32.mrf.mxu2  ;;  %v3861_v42 = vpop.f32.mrf.mxu0 }
 0x14f   :  { %v3859_v34 = vpop.f32.mrf.mxu3  ;;  %v3863_v43 = vpop.f32.mrf.mxu1 }
 0x150   :  { %v1056_v29 = vadd.f32 %v3863_v43, %v3861_v42 }
 0x156   :  { %v3865_v44 = vpop.f32.mrf.mxu2  ;;  %v3869_v47 = vpop.f32.mrf.mxu0 }
 0x157   :  { %v3867_v46 = vpop.f32.mrf.mxu3  ;;  %v3871_v49 = vpop.f32.mrf.mxu1  ;;  %v1193_v42 = vadd.f32 %v3865_v44, %v1056_v29 }
 0x158   :  { %v1058_v44 = vadd.f32 %v3871_v49, %v3869_v47 }
 0x15e   :  { %v3873_v51 = vpop.f32.mrf.mxu2  ;;  %v1381_v55 = vpop.f32.mrf.mxu0 }
 0x15f   :  { %v3875_v53 = vpop.f32.mrf.mxu3  ;;  %v1434_v56 = vpop.f32.mrf.mxu1 }
 0x160   :  { %v1435_v60 = vadd.f32 %v1434_v56, %v1381_v55 }
 0x166   :  { %v1496_v1 = vpop.f32.mrf.mxu2  ;;  %v1383_v6 = vpop.f32.mrf.mxu0 }
 0x167   :  { %v1631_v4 = vpop.f32.mrf.mxu3  ;;  %v1516_v16 = vadd.f32 %v1496_v1, %v1435_v60  ;;  %v1436_v10 = vpop.f32.mrf.mxu1  ;;  %v3897_v60 = vadd.f32 %v1675_v26, %v1323_v22 }
 0x168   :  { %v1437_v54 = vadd.f32 %v1436_v10, %v1383_v6  ;;  %v1680_v1 = vpop.permute.xlu1 %1679 }
 0x169   :  { %v1651_v20 = vadd.f32 %v1631_v4, %v1516_v16  ;;  %v1324_v4 = vadd.f32 %v1307_v32, %v1189_v27  ;;  %v1745_v6 = vadd.f32 %v1744_v63, %v3897_v60  ;;  %v3905_v12 = vadd.f32 %v1680_v1, %v3801_v7 }
 0x16a   :  { %v3911_v22 = vadd.f32 %v1680_v1, %v3734_v21  ;;  %v1190_v32 = vadd.f32 %v3841_v11, %v1048_v31 }
 0x16b   :  { %v3887_v13 = vadd.f32 %v1670_v57, %v1651_v20  ;;  %v3913_v50 = vadd.f32 %v1680_v1, %v1324_v4 }
 0x16c   :  { %v1749_v7 = vadd.f32 %v3905_v12, %v3911_v22  ;;  %v1325_v33 = vadd.f32 %v3843_v36, %v1190_v32 }
 0x16d   :  { %v1741_v18 = vadd.f32 %v1740_v25, %v3887_v13 }
 0x16e   :  { %v1498_v55 = vpop.f32.mrf.mxu2  ;;  %v1386_v30 = vpop.f32.mrf.mxu0  ;;  %v1750_v21 = vadd.f32 %v1749_v7, %v3913_v50 }
 0x16f   :  { %v1633_v56 = vpop.f32.mrf.mxu3  ;;  %v1517_v28 = vadd.f32 %v1498_v55, %v1437_v54  ;;  %1742 = vadd.xlane.f32.xlu2 %v1741_v18  ;;  %v1439_v57 = vpop.f32.mrf.mxu1 }
 0x170   :  { %v1440_v16 = vadd.f32 %v1439_v57, %v1386_v30 }
 0x171   :  { %v1652_v23 = vadd.f32 %v1633_v56, %v1517_v28  ;;  %v1685_v56 = vpop.permute.xlu1 %1684 }
 0x172   :  { %v3925_v11 = vadd.f32 %v1685_v56, %v3815_v41  ;;  %v3929_v63 = vadd.f32 %v1685_v56, %v3751_v3  ;;  %v3931_v36 = vadd.f32 %v1685_v56, %v1325_v33 }
 0x173   :  { %v3901_v9 = vadd.f32 %v1675_v26, %v1652_v23 }
 0x174   :  { %v1754_v41 = vadd.f32 %v3925_v11, %v3929_v63 }
 0x175   :  { %v1746_v10 = vadd.f32 %v1745_v6, %v3901_v9  ;;  %v1326_v6 = vadd.f32 %v3851_v24, %v1191_v37  ;;  %v1192_v24 = vadd.f32 %v3857_v40, %v1053_v19 }
 0x176   :  { %v1501_v17 = vpop.f32.mrf.mxu2  ;;  %v1388_v26 = vpop.f32.mrf.mxu0  ;;  %v1755_v3 = vadd.f32 %v1754_v41, %v3931_v36  ;;  %v1328_v41 = vadd.f32 %v3867_v46, %v1193_v42 }
 0x177   :  { %v1636_v20 = vpop.f32.mrf.mxu3  ;;  %v1518_v25 = vadd.f32 %v1501_v17, %v1440_v16  ;;  %1747 = vadd.xlane.f32.xlu0 %v1746_v10  ;;  %v1441_v54 = vpop.f32.mrf.mxu1  ;;  %v1327_v39 = vadd.f32 %v3859_v34, %v1192_v24 }
 0x178   :  { %v1442_v27 = vadd.f32 %v1441_v54, %v1388_v26  ;;  %v1690_v16 = vpop.permute.xlu2 %1689 }
 0x179   :  { %v1653_v18 = vadd.f32 %v1636_v20, %v1518_v25  ;;  %v3941_v17 = vadd.f32 %v1690_v16, %v3817_v48  ;;  %v3947_v26 = vadd.f32 %v1690_v16, %v3753_v38  ;;  %v3949_v54 = vadd.f32 %v1690_v16, %v1326_v6  ;;  %v1700_v6 = vpop.permute.xlu0 %1699 }
 0x17a   :  { %v3985_v46 = vadd.f32 %v1700_v6, %v1328_v41 }
 0x17b   :  { %v3921_v55 = vadd.f32 %v1680_v1, %v1653_v18  ;;  %v1759_v48 = vadd.f32 %v3941_v17, %v3947_v26 }
 0x17d   :  { %v1751_v28 = vadd.f32 %v1750_v21, %v3921_v55  ;;  %v1760_v38 = vadd.f32 %v1759_v48, %v3949_v54 }
 0x17e   :  { %v1503_v30 = vpop.f32.mrf.mxu2  ;;  %v1391_v23 = vpop.f32.mrf.mxu0 }
 0x17f   :  { %v1638_v57 = vpop.f32.mrf.mxu3  ;;  %v1519_v15 = vadd.f32 %v1503_v30, %v1442_v27  ;;  %1752 = vadd.xlane.f32.xlu1 %v1751_v28  ;;  %v1444_v1 = vpop.f32.mrf.mxu1 }
 0x180   :  { %v1445_v10 = vadd.f32 %v1444_v1, %v1391_v23 }
 0x181   :  { %v1654_v4 = vadd.f32 %v1638_v57, %v1519_v15 }
 0x183   :  { %v3937_v31 = vadd.f32 %v1685_v56, %v1654_v4  ;;  %v1695_v56 = vpop.permute.xlu2 %1694 }
 0x184   :  { %v3961_v40 = vadd.f32 %v1695_v56, %v3831_v61  ;;  %v3965_v37 = vadd.f32 %v1695_v56, %v3767_v45  ;;  %v3967_v34 = vadd.f32 %v1695_v56, %v1327_v39 }
 0x185   :  { %v1756_v20 = vadd.f32 %v1755_v3, %v3937_v31 }
 0x186   :  { %v1506_v32 = vpop.f32.mrf.mxu2  ;;  %v1393_v18 = vpop.f32.mrf.mxu0  ;;  %v1764_v61 = vadd.f32 %v3961_v40, %v3965_v37 }
 0x187   :  { %v1641_v25 = vpop.f32.mrf.mxu3  ;;  %v1520_v7 = vadd.f32 %v1506_v32, %v1445_v10  ;;  %1757 = vadd.xlane.f32.xlu2 %v1756_v20  ;;  %v1446_v33 = vpop.f32.mrf.mxu1  ;;  %v3977_v10 = vadd.f32 %v1700_v6, %v3833_v8  ;;  %v3983_v32 = vadd.f32 %v1700_v6, %v3769_v52 }
 0x188   :  { %v1447_v27 = vadd.f32 %v1446_v33, %v1393_v18  ;;  %v1765_v45 = vadd.f32 %v1764_v61, %v3967_v34  ;;  %v1705_v52 = vpop.permute.xlu1 %1704 }
 0x189   :  { %v1655_v35 = vadd.f32 %v1641_v25, %v1520_v7  ;;  %v1194_v25 = vadd.f32 %v3873_v51, %v1058_v44  ;;  %v1769_v8 = vadd.f32 %v3977_v10, %v3983_v32 }
 0x18b   :  { %v3957_v21 = vadd.f32 %v1690_v16, %v1655_v35  ;;  %v1329_v47 = vadd.f32 %v3875_v53, %v1194_v25  ;;  %v1770_v48 = vadd.f32 %v1769_v8, %v3985_v46  ;;  %v3995_v35 = vadd.f32 %v1705_v52, %v3835_v14 }
 0x18d   :  { %v1761_v28 = vadd.f32 %v1760_v38, %v3957_v21  ;;  %v3999_v38 = vadd.f32 %v1705_v52, %v3783_v0  ;;  %v2083_v0 = vld [vmem:[%s4378_s4 + $0x8] sm:$0xff] }
 0x18e   :  { %v1508_v30 = vpop.f32.mrf.mxu2  ;;  %v1396_v15 = vpop.f32.mrf.mxu0 }
 0x18f   :  { %v1643_v57 = vpop.f32.mrf.mxu3  ;;  %v1521_v43 = vadd.f32 %v1508_v30, %v1447_v27  ;;  %1762 = vadd.xlane.f32.xlu2 %v1761_v28  ;;  %v1449_v23 = vpop.f32.mrf.mxu1  ;;  %v1774_v28 = vadd.f32 %v3995_v35, %v3999_v38 }
 0x190   :  { %v1450_v16 = vadd.f32 %v1449_v23, %v1396_v15  ;;  %v3182_v15 = vmov 512.0  }
 0x191   :  { %v1656_v1 = vadd.f32 %v1643_v57, %v1521_v43  ;;  %v2082_v43 = vld [vmem:[%s4378_s4] sm:$0xff]  ;;  %3163 = vrcp.f32 %v3182_v15 }
 0x193   :  { %v3973_v4 = vadd.f32 %v1695_v56, %v1656_v1  ;;  %v4001_v56 = vadd.f32 %v1705_v52, %v1329_v47 }
 0x195   :  { %v1766_v3 = vadd.f32 %v1765_v45, %v3973_v4  ;;  %v1775_v14 = vadd.f32 %v1774_v28, %v4001_v56 }
 0x196   :  { %v1511_v19 = vpop.f32.mrf.mxu2  ;;  %v1398_v18 = vpop.f32.mrf.mxu0 }
 0x197   :  { %v1646_v20 = vpop.f32.mrf.mxu3  ;;  %v1522_v24 = vadd.f32 %v1511_v19, %v1450_v16  ;;  %1767 = vadd.xlane.f32.xlu0 %v1766_v3  ;;  %v1451_v33 = vpop.f32.mrf.mxu1 }
 0x198   :  { %v1452_v39 = vadd.f32 %v1451_v33, %v1398_v18  ;;  %v3164_v23 = vpop.eup %3163 }
 0x199   :  { %v1657_v7 = vadd.f32 %v1646_v20, %v1522_v24  ;;  %v1780_v61 = vmul.f32 512.0, %v3164_v23  ;;  %vm1784_vm0 = vweird.f32 %v3164_v23 }
 0x19b   :  { %v3991_v49 = vadd.f32 %v1700_v6, %v1657_v7  ;;  %v1781_v1 = vsub.f32 1.0, %v1780_v61 }
 0x19d   :  { %v1771_v51 = vadd.f32 %v1770_v48, %v3991_v49  ;;  %v1782_v41 = vmul.f32 %v3164_v23, %v1781_v1 }
 0x19e   :  { %v1513_v29 = vpop.f32.mrf.mxu2 }
 0x19f   :  { %v1523_v27 = vadd.f32 %v1513_v29, %v1452_v39  ;;  %1772 = vadd.xlane.f32.xlu1 %v1771_v51  ;;  %v1648_v53 = vpop.f32.mrf.mxu3  ;;  %v1783_v16 = vadd.f32 %v3164_v23, %v1782_v41 }
 0x1a1   :  { %v1658_v30 = vadd.f32 %v1648_v53, %v1523_v27  ;;  %v4015_v45 = vsel %vm1784_vm0, %v3164_v23, %v1783_v16 }
 0x1a3   :  { %v4005_v57 = vadd.f32 %v1705_v52, %v1658_v30 }
 0x1a5   :  { %v1776_v42 = vadd.f32 %v1775_v14, %v4005_v57 }
 0x1a7   :  { %1777 = vadd.xlane.f32.xlu2 %v1776_v42 }
 0x1ab   :  { %2097 = vperm.xlu0 %3160, %v2083_v0  }
 0x1b8   :  { %2092 = vperm.xlu1 %3161, %v2082_v43  }
 0x1e2   :  { %v1743_v6 = vpop.xlane.xlu2 %1742 }
 0x1e3   :  { %v1786_v44 = vmul.f32 %v4015_v45, %v1743_v6 }
 0x1e5   :  { %v4019_v3 = vsub.f32 %v3881_v5, %v1786_v44  ;;  %v4022_v19 = vsub.f32 %v3878_v62, %v1786_v44  ;;  %v4025_v20 = vsub.f32 %v3883_v2, %v1786_v44  ;;  %v4028_v25 = vsub.f32 %v3887_v13, %v1786_v44 }
 0x1e7   :  { %v1826_v24 = vmul.f32 %v4019_v3, %v4019_v3  ;;  %v1827_v8 = vmul.f32 %v4022_v19, %v4022_v19  ;;  %v1828_v7 = vmul.f32 %v4025_v20, %v4025_v20  ;;  %v1829_v2 = vmul.f32 %v4028_v25, %v4028_v25 }
 0x1e9   :  { %v1858_v5 = vadd.f32 %v1827_v8, %v1826_v24 }
 0x1ea   :  { %v1748_v18 = vpop.xlane.xlu0 %1747 }
 0x1eb   :  { %v1787_v62 = vmul.f32 %v4015_v45, %v1748_v18  ;;  %v1859_v33 = vadd.f32 %v1858_v5, %v1828_v7 }
 0x1ed   :  { %v4040_v13 = vsub.f32 %v3895_v58, %v1787_v62  ;;  %v4043_v47 = vsub.f32 %v3891_v59, %v1787_v62  ;;  %v1860_v48 = vadd.f32 %v1859_v33, %v1829_v2  ;;  %v4046_v52 = vsub.f32 %v3897_v60, %v1787_v62 }
 0x1ee   :  { %v4049_v39 = vsub.f32 %v3901_v9, %v1787_v62 }
 0x1ef   :  { %1861 = vadd.xlane.f32.xlu0 %v1860_v48  ;;  %v1830_v51 = vmul.f32 %v4040_v13, %v4040_v13  ;;  %v1831_v29 = vmul.f32 %v4043_v47, %v4043_v47  ;;  %v1832_v58 = vmul.f32 %v4046_v52, %v4046_v52 }
 0x1f0   :  { %v1833_v60 = vmul.f32 %v4049_v39, %v4049_v39 }
 0x1f1   :  { %v1863_v27 = vadd.f32 %v1831_v29, %v1830_v51 }
 0x1f2   :  { %v1753_v59 = vpop.xlane.xlu1 %1752 }
 0x1f3   :  { %v1788_v53 = vmul.f32 %v4015_v45, %v1753_v59  ;;  %v1864_v28 = vadd.f32 %v1863_v27, %v1832_v58 }
 0x1f5   :  { %v4061_v9 = vsub.f32 %v3911_v22, %v1788_v53  ;;  %v4064_v30 = vsub.f32 %v3905_v12, %v1788_v53  ;;  %v1865_v14 = vadd.f32 %v1864_v28, %v1833_v60  ;;  %v4067_v42 = vsub.f32 %v3913_v50, %v1788_v53 }
 0x1f6   :  { %v4070_v0 = vsub.f32 %v3921_v55, %v1788_v53 }
 0x1f7   :  { %1866 = vadd.xlane.f32.xlu1 %v1865_v14  ;;  %v1834_v43 = vmul.f32 %v4061_v9, %v4061_v9  ;;  %v1835_v15 = vmul.f32 %v4064_v30, %v4064_v30  ;;  %v1836_v22 = vmul.f32 %v4067_v42, %v4067_v42 }
 0x1f8   :  { %v1837_v50 = vmul.f32 %v4070_v0, %v4070_v0 }
 0x1f9   :  { %v1868_v23 = vadd.f32 %v1835_v15, %v1834_v43 }
 0x1fa   :  { %v1758_v12 = vpop.xlane.xlu2 %1757 }
 0x1fb   :  { %v1789_v61 = vmul.f32 %v4015_v45, %v1758_v12  ;;  %v1869_v1 = vadd.f32 %v1868_v23, %v1836_v22 }
 0x1fd   :  { %v4082_v55 = vsub.f32 %v3929_v63, %v1789_v61  ;;  %v4085_v41 = vsub.f32 %v3925_v11, %v1789_v61  ;;  %v1870_v16 = vadd.f32 %v1869_v1, %v1837_v50  ;;  %v4088_v6 = vsub.f32 %v3931_v36, %v1789_v61 }
 0x1fe   :  { %v4091_v44 = vsub.f32 %v3937_v31, %v1789_v61 }
 0x1ff   :  { %1871 = vadd.xlane.f32.xlu2 %v1870_v16  ;;  %v1838_v24 = vmul.f32 %v4082_v55, %v4082_v55  ;;  %v1839_v8 = vmul.f32 %v4085_v41, %v4085_v41  ;;  %v1840_v63 = vmul.f32 %v4088_v6, %v4088_v6 }
 0x200   :  { %v1841_v36 = vmul.f32 %v4091_v44, %v4091_v44 }
 0x201   :  { %v1873_v7 = vadd.f32 %v1839_v8, %v1838_v24 }
 0x202   :  { %v1763_v11 = vpop.xlane.xlu2 %1762 }
 0x203   :  { %v1790_v5 = vmul.f32 %v4015_v45, %v1763_v11  ;;  %v1874_v18 = vadd.f32 %v1873_v7, %v1840_v63 }
 0x205   :  { %v4103_v31 = vsub.f32 %v3947_v26, %v1790_v5  ;;  %v4106_v62 = vsub.f32 %v3941_v17, %v1790_v5  ;;  %v1875_v2 = vadd.f32 %v1874_v18, %v1841_v36  ;;  %v4109_v33 = vsub.f32 %v3949_v54, %v1790_v5 }
 0x206   :  { %v4112_v48 = vsub.f32 %v3957_v21, %v1790_v5 }
 0x207   :  { %1876 = vadd.xlane.f32.xlu0 %v1875_v2  ;;  %v1842_v51 = vmul.f32 %v4103_v31, %v4103_v31  ;;  %v1843_v29 = vmul.f32 %v4106_v62, %v4106_v62  ;;  %v1844_v26 = vmul.f32 %v4109_v33, %v4109_v33 }
 0x208   :  { %v1845_v54 = vmul.f32 %v4112_v48, %v4112_v48 }
 0x209   :  { %v1878_v58 = vadd.f32 %v1843_v29, %v1842_v51 }
 0x20a   :  { %v1768_v17 = vpop.xlane.xlu0 %1767 }
 0x20b   :  { %v1791_v27 = vmul.f32 %v4015_v45, %v1768_v17  ;;  %v1879_v59 = vadd.f32 %v1878_v58, %v1844_v26  ;;  %v2086_v17 = vld [vmem:[%s4378_s4 + $0x20] sm:$0xff] }
 0x20d   :  { %v4124_v21 = vsub.f32 %v3965_v37, %v1791_v27  ;;  %v4127_v53 = vsub.f32 %v3961_v40, %v1791_v27  ;;  %v1880_v60 = vadd.f32 %v1879_v59, %v1845_v54  ;;  %v4130_v28 = vsub.f32 %v3967_v34, %v1791_v27 }
 0x20e   :  { %v4133_v14 = vsub.f32 %v3973_v4, %v1791_v27  ;;  %v2085_v27 = vld [vmem:[%s4378_s4 + $0x18] sm:$0xff] }
 0x20f   :  { %1881 = vadd.xlane.f32.xlu1 %v1880_v60  ;;  %v1846_v43 = vmul.f32 %v4124_v21, %v4124_v21  ;;  %v1847_v15 = vmul.f32 %v4127_v53, %v4127_v53  ;;  %v1848_v37 = vmul.f32 %v4130_v28, %v4130_v28 }
 0x210   :  { %v1849_v34 = vmul.f32 %v4133_v14, %v4133_v14 }
 0x211   :  { %v1883_v22 = vadd.f32 %v1847_v15, %v1846_v43 }
 0x212   :  { %v1773_v40 = vpop.xlane.xlu1 %1772 }
 0x213   :  { %v1792_v23 = vmul.f32 %v4015_v45, %v1773_v40  ;;  %v1884_v12 = vadd.f32 %v1883_v22, %v1848_v37 }
 0x215   :  { %v4145_v4 = vsub.f32 %v3983_v32, %v1792_v23  ;;  %v4148_v61 = vsub.f32 %v3977_v10, %v1792_v23  ;;  %v1885_v50 = vadd.f32 %v1884_v12, %v1849_v34  ;;  %v4151_v1 = vsub.f32 %v3985_v46, %v1792_v23 }
 0x216   :  { %v4154_v16 = vsub.f32 %v3991_v49, %v1792_v23 }
 0x217   :  { %1886 = vadd.xlane.f32.xlu2 %v1885_v50  ;;  %v1850_v24 = vmul.f32 %v4145_v4, %v4145_v4  ;;  %v1851_v8 = vmul.f32 %v4148_v61, %v4148_v61  ;;  %v1852_v32 = vmul.f32 %v4151_v1, %v4151_v1 }
 0x218   :  { %v1853_v46 = vmul.f32 %v4154_v16, %v4154_v16 }
 0x219   :  { %v1888_v63 = vadd.f32 %v1851_v8, %v1850_v24 }
 0x21a   :  { %v1778_v10 = vpop.xlane.xlu2 %1777 }
 0x21b   :  { %v1793_v7 = vmul.f32 %v4015_v45, %v1778_v10  ;;  %v1889_v11 = vadd.f32 %v1888_v63, %v1852_v32 }
 0x21d   :  { %v4166_v49 = vsub.f32 %v3999_v38, %v1793_v7  ;;  %v4169_v5 = vsub.f32 %v3995_v35, %v1793_v7  ;;  %v1890_v36 = vadd.f32 %v1889_v11, %v1853_v46  ;;  %v4172_v18 = vsub.f32 %v4001_v56, %v1793_v7  ;;  %v4194_v54 = vpop.permute.xlu0 %2097  ;;  %v1906_v46 = vld [vmem:[%s4379_s3] sm:$0xff] }
 0x21e   :  { %v4175_v2 = vsub.f32 %v4005_v57, %v1793_v7  ;;  %v2084_v57 = vld [vmem:[%s4378_s4 + $0x10] sm:$0xff] }
 0x21f   :  { %1891 = vadd.xlane.f32.xlu0 %v1890_v36  ;;  %v1854_v51 = vmul.f32 %v4166_v49, %v4166_v49  ;;  %v1855_v29 = vmul.f32 %v4169_v5, %v4169_v5  ;;  %v1856_v38 = vmul.f32 %v4172_v18, %v4172_v18 }
 0x220   :  { %v1857_v35 = vmul.f32 %v4175_v2, %v4175_v2 }
 0x221   :  { %v1893_v26 = vadd.f32 %v1855_v29, %v1854_v51 }
 0x223   :  { %v1894_v58 = vadd.f32 %v1893_v26, %v1856_v38 }
 0x225   :  { %v1895_v56 = vadd.f32 %v1894_v58, %v1857_v35 }
 0x227   :  { %1896 = vadd.xlane.f32.xlu1 %v1895_v56 }
 0x22a   :  { %v4196_v59 = vpop.permute.xlu1 %2092 }
 0x22f   :  { %2102 = vperm.xlu2 %3162, %v2084_v57  }
 0x233   :  { %2112 = vperm.xlu0 %3160, %v2086_v17  }
 0x240   :  { %2107 = vperm.xlu1 %3161, %v2085_v27   ;;  %v1907_v27 = vld [vmem:[%s4379_s3 + $0x8] sm:$0xff] }
 0x262   :  { %v1862_v60 = vpop.xlane.xlu0 %1861 }
 0x263   :  { %v1898_v43 = vmul.f32 %v1862_v60, %v4015_v45 }
 0x265   :  { %v1914_v15 = vadd.f32 1e-05, %v1898_v43 }
 0x267   :  { %3165 = vrsqrt.f32 %v1914_v15  ;;  %vm1928_vm2 = vweird.f32 %v1914_v15 }
 0x26a   :  { %v1867_v37 = vpop.xlane.xlu1 %1866 }
 0x26b   :  { %v1899_v22 = vmul.f32 %v1867_v37, %v4015_v45 }
 0x26d   :  { %v3166_v40 = vpop.eup %3165  ;;  %v1915_v23 = vadd.f32 1e-05, %v1899_v22 }
 0x26e   :  { %v1923_v34 = vmul.f32 %v3166_v40, %v1914_v15  ;;  %vm1929_vm1 = vweird.f32 %v3166_v40 }
 0x26f   :  { %3167 = vrsqrt.f32 %v1915_v23  ;;  %vm1930_vm3 = vmor %vm1928_vm2, %vm1929_vm1  ;;  %vm1938_vm5 = vweird.f32 %v1915_v23 }
 0x270   :  { %v1924_v12 = vmul.f32 %v3166_v40, %v1923_v34 }
 0x272   :  { %v1925_v50 = vmul.f32 0.5, %v1924_v12  ;;  %v1872_v24 = vpop.xlane.xlu2 %1871 }
 0x273   :  { %v1900_v8 = vmul.f32 %v1872_v24, %v4015_v45 }
 0x274   :  { %v1926_v32 = vsub.f32 1.5, %v1925_v50 }
 0x275   :  { %v3168_v63 = vpop.eup %3167  ;;  %v1916_v10 = vadd.f32 1e-05, %v1900_v8  ;;  %v1908_v8 = vld [vmem:[%s4379_s3 + $0x10] sm:$0xff] }
 0x276   :  { %v1933_v7 = vmul.f32 %v3168_v63, %v1915_v23  ;;  %v1927_v11 = vmul.f32 %v3166_v40, %v1926_v32  ;;  %vm1939_vm4 = vweird.f32 %v3168_v63 }
 0x277   :  { %3169 = vrsqrt.f32 %v1916_v10  ;;  %vm1940_vm6 = vmor %vm1938_vm5, %vm1939_vm4  ;;  %vm1948_vm8 = vweird.f32 %v1916_v10 }
 0x278   :  { %v1934_v36 = vmul.f32 %v3168_v63, %v1933_v7  ;;  %v1931_v51 = vsel %vm1930_vm3, %v3166_v40, %v1927_v11 }
 0x279   :  { %v2002_v29 = vmul.f32 %v1931_v51, %v1906_v46 }
 0x27a   :  { %v1935_v38 = vmul.f32 0.5, %v1934_v36  ;;  %v1877_v26 = vpop.xlane.xlu0 %1876 }
 0x27b   :  { %v1901_v35 = vmul.f32 %v1877_v26, %v4015_v45  ;;  %2012 = vperm.xlu2 %3162, %v2002_v29  }
 0x27c   :  { %v1936_v58 = vsub.f32 1.5, %v1935_v38 }
 0x27d   :  { %v3170_v56 = vpop.eup %3169  ;;  %v1917_v57 = vadd.f32 1e-05, %v1901_v35  ;;  %v1909_v35 = vld [vmem:[%s4379_s3 + $0x18] sm:$0xff] }
 0x27e   :  { %v1943_v17 = vmul.f32 %v3170_v56, %v1916_v10  ;;  %v1937_v60 = vmul.f32 %v3168_v63, %v1936_v58  ;;  %vm1949_vm7 = vweird.f32 %v3170_v56 }
 0x27f   :  { %3171 = vrsqrt.f32 %v1917_v57  ;;  %vm1950_vm9 = vmor %vm1948_vm8, %vm1949_vm7  ;;  %vm1958_vm11 = vweird.f32 %v1917_v57 }
 0x280   :  { %v1944_v43 = vmul.f32 %v3170_v56, %v1943_v17  ;;  %v1941_v15 = vsel %vm1940_vm6, %v3168_v63, %v1937_v60 }
 0x281   :  { %v2003_v37 = vmul.f32 %v1941_v15, %v1907_v27 }
 0x282   :  { %v1945_v22 = vmul.f32 0.5, %v1944_v43  ;;  %v1882_v40 = vpop.xlane.xlu1 %1881 }
 0x283   :  { %v1902_v34 = vmul.f32 %v1882_v40, %v4015_v45  ;;  %2017 = vperm.xlu0 %3160, %v2003_v37  }
 0x284   :  { %v1946_v12 = vsub.f32 1.5, %v1945_v22 }
 0x285   :  { %v3172_v50 = vpop.eup %3171  ;;  %v1918_v23 = vadd.f32 1e-05, %v1902_v34  ;;  %v1910_v34 = vld [vmem:[%s4379_s3 + $0x20] sm:$0xff] }
 0x286   :  { %v1953_v24 = vmul.f32 %v3172_v50, %v1917_v57  ;;  %v1947_v32 = vmul.f32 %v3170_v56, %v1946_v12  ;;  %vm1959_vm10 = vweird.f32 %v3172_v50 }
 0x287   :  { %3173 = vrsqrt.f32 %v1918_v23  ;;  %vm1960_vm12 = vmor %vm1958_vm11, %vm1959_vm10  ;;  %vm1968_vm14 = vweird.f32 %v1918_v23 }
 0x288   :  { %v1954_v63 = vmul.f32 %v3172_v50, %v1953_v24  ;;  %v1951_v7 = vsel %vm1950_vm9, %v3170_v56, %v1947_v32 }
 0x289   :  { %v2004_v46 = vmul.f32 %v1951_v7, %v1908_v8 }
 0x28a   :  { %v1955_v11 = vmul.f32 0.5, %v1954_v63  ;;  %v1887_v36 = vpop.xlane.xlu2 %1886 }
 0x28b   :  { %v1903_v51 = vmul.f32 %v1887_v36, %v4015_v45  ;;  %2022 = vperm.xlu1 %3161, %v2004_v46  }
 0x28c   :  { %v1956_v29 = vsub.f32 1.5, %v1955_v11 }
 0x28d   :  { %v3174_v38 = vpop.eup %3173  ;;  %v1919_v10 = vadd.f32 1e-05, %v1903_v51  ;;  %v1911_v51 = vld [vmem:[%s4379_s3 + $0x28] sm:$0xff] }
 0x28e   :  { %v1963_v26 = vmul.f32 %v3174_v38, %v1918_v23  ;;  %v1957_v58 = vmul.f32 %v3172_v50, %v1956_v29  ;;  %vm1969_vm13 = vweird.f32 %v3174_v38 }
 0x28f   :  { %3175 = vrsqrt.f32 %v1919_v10  ;;  %vm1970_vm15 = vmor %vm1968_vm14, %vm1969_vm13  ;;  %vm1978_vm1 = vweird.f32 %v1919_v10 }
 0x290   :  { %v1964_v56 = vmul.f32 %v3174_v38, %v1963_v26  ;;  %v1961_v17 = vsel %vm1960_vm12, %v3172_v50, %v1957_v58 }
 0x291   :  { %v2005_v27 = vmul.f32 %v1961_v17, %v1909_v35 }
 0x292   :  { %v1965_v60 = vmul.f32 0.5, %v1964_v56  ;;  %v1892_v43 = vpop.xlane.xlu0 %1891 }
 0x293   :  { %v1904_v15 = vmul.f32 %v1892_v43, %v4015_v45  ;;  %2027 = vperm.xlu0 %3160, %v2005_v27  }
 0x294   :  { %v1966_v37 = vsub.f32 1.5, %v1965_v60 }
 0x295   :  { %v3176_v22 = vpop.eup %3175  ;;  %v1920_v57 = vadd.f32 1e-05, %v1904_v15  ;;  %v2088_v15 = vld [vmem:[%s4378_s4 + $0x30] sm:$0xff] }
 0x296   :  { %v1973_v40 = vmul.f32 %v3176_v22, %v1919_v10  ;;  %v1967_v12 = vmul.f32 %v3174_v38, %v1966_v37  ;;  %vm1979_vm0 = vweird.f32 %v3176_v22  ;;  %v1912_v10 = vld [vmem:[%s4379_s3 + $0x30] sm:$0xff] }
 0x297   :  { %3177 = vrsqrt.f32 %v1920_v57  ;;  %vm1980_vm2 = vmor %vm1978_vm1, %vm1979_vm0  ;;  %vm1988_vm4 = vweird.f32 %v1920_v57 }
 0x298   :  { %v1974_v50 = vmul.f32 %v3176_v22, %v1973_v40  ;;  %v1971_v24 = vsel %vm1970_vm15, %v3174_v38, %v1967_v12  ;;  %v2089_v12 = vld [vmem:[%s4378_s4 + $0x38] sm:$0xff] }
 0x299   :  { %v2006_v8 = vmul.f32 %v1971_v24, %v1910_v34 }
 0x29a   :  { %v1975_v32 = vmul.f32 0.5, %v1974_v50  ;;  %v1897_v63 = vpop.xlane.xlu1 %1896 }
 0x29b   :  { %v1905_v7 = vmul.f32 %v1897_v63, %v4015_v45  ;;  %2032 = vperm.xlu2 %3162, %v2006_v8   ;;  %v2087_v8 = vld [vmem:[%s4378_s4 + $0x28] sm:$0xff] }
 0x29c   :  { %v1976_v46 = vsub.f32 1.5, %v1975_v32  ;;  %v2103_v32 = vpop.permute.xlu2 %2102 }
 0x29d   :  { %v3178_v11 = vpop.eup %3177  ;;  %v1921_v23 = vadd.f32 1e-05, %v1905_v7 }
 0x29e   :  { %v1983_v36 = vmul.f32 %v3178_v11, %v1920_v57  ;;  %v1977_v29 = vmul.f32 %v3176_v22, %v1976_v46  ;;  %vm1989_vm3 = vweird.f32 %v3178_v11  ;;  %v1913_v57 = vld [vmem:[%s4379_s3 + $0x38] sm:$0xff] }
 0x29f   :  { %3179 = vrsqrt.f32 %v1921_v23  ;;  %vm1990_vm5 = vmor %vm1988_vm4, %vm1989_vm3  ;;  %vm1998_vm7 = vweird.f32 %v1921_v23 }
 0x2a0   :  { %v1984_v38 = vmul.f32 %v3178_v11, %v1983_v36  ;;  %v1981_v26 = vsel %vm1980_vm2, %v3176_v22, %v1977_v29 }
 0x2a1   :  { %v2007_v35 = vmul.f32 %v1981_v26, %v1911_v51 }
 0x2a2   :  { %v1985_v58 = vmul.f32 0.5, %v1984_v38 }
 0x2a3   :  { %2037 = vperm.xlu1 %3161, %v2007_v35  }
 0x2a4   :  { %v1986_v45 = vsub.f32 1.5, %v1985_v58 }
 0x2a5   :  { %v3180_v56 = vpop.eup %3179 }
 0x2a6   :  { %v1993_v17 = vmul.f32 %v3180_v56, %v1921_v23  ;;  %v1987_v27 = vmul.f32 %v3178_v11, %v1986_v45  ;;  %vm1999_vm6 = vweird.f32 %v3180_v56 }
 0x2a7   :  { %vm2000_vm8 = vmor %vm1998_vm7, %vm1999_vm6 }
 0x2a8   :  { %v1994_v60 = vmul.f32 %v3180_v56, %v1993_v17  ;;  %v1991_v43 = vsel %vm1990_vm5, %v3178_v11, %v1987_v27 }
 0x2a9   :  { %v2008_v37 = vmul.f32 %v1991_v43, %v1912_v10 }
 0x2aa   :  { %v1995_v22 = vmul.f32 0.5, %v1994_v60 }
 0x2ab   :  { %2042 = vperm.xlu0 %3160, %v2008_v37   ;;  %2122 = vperm.xlu1 %3161, %v2088_v15  }
 0x2ac   :  { %v1996_v40 = vsub.f32 1.5, %v1995_v22 }
 0x2ae   :  { %v1997_v34 = vmul.f32 %v3180_v56, %v1996_v40 }
 0x2b0   :  { %v2001_v50 = vsel %vm2000_vm8, %v3180_v56, %v1997_v34 }
 0x2b1   :  { %v2009_v24 = vmul.f32 %v2001_v50, %v1913_v57 }
 0x2b3   :  { %2127 = vperm.xlu0 %3160, %v2089_v12   ;;  %2047 = vperm.xlu2 %3162, %v2009_v24  }
 0x2bb   :  { %2117 = vperm.xlu2 %3162, %v2087_v8  }
 0x2d5   :  { %v2013_v63 = vpop.permute.xlu2 %2012 }
 0x2d6   :  { %v2050_v7 = vmul.f32 %v2013_v63, %v4019_v3  ;;  %v2051_v46 = vmul.f32 %v2013_v63, %v4022_v19  ;;  %v2052_v11 = vmul.f32 %v2013_v63, %v4025_v20  ;;  %v2053_v23 = vmul.f32 %v2013_v63, %v4028_v25  ;;  %v2113_v3 = vpop.permute.xlu0 %2112  ;;  %v2108_v19 = vpop.permute.xlu1 %2107 }
 0x2d8   :  { %v2130_v36 = vadd.f32 %v4196_v59, %v2050_v7  ;;  %v2131_v51 = vadd.f32 %v4196_v59, %v2051_v46  ;;  %v2132_v29 = vadd.f32 %v4196_v59, %v2052_v11  ;;  %v2133_v38 = vadd.f32 %v4196_v59, %v2053_v23 }
 0x2da   :  { %v2162_v26 = vmax.f32 %v2130_v36, 0.0  ;;  %v2163_v35 = vmax.f32 %v2131_v51, 0.0  ;;  %v2164_v58 = vmax.f32 %v2132_v29, 0.0  ;;  %v2165_v45 = vmax.f32 %v2133_v38, 0.0 }
 0x2dc   :  { %2194 = vst [vmem:[%s4380_s5] sm:$0xff] %v2162_v26 }
 0x2dd   :  { %2195 = vst [vmem:[%s4380_s5 + $0x8] sm:$0xff] %v2163_v35 }
 0x2de   :  { %2196 = vst [vmem:[%s4380_s5 + $0x10] sm:$0xff] %v2164_v58 }
 0x2df   :  { %2197 = vst [vmem:[%s4380_s5 + $0x18] sm:$0xff] %v2165_v45 }
 0x2f5   :  { %v2018_v20 = vpop.permute.xlu0 %2017  ;;  %v2033_v25 = vpop.permute.xlu2 %2032 }
 0x2f6   :  { %v2054_v59 = vmul.f32 %v2018_v20, %v4040_v13  ;;  %v2055_v56 = vmul.f32 %v2018_v20, %v4043_v47  ;;  %v2056_v17 = vmul.f32 %v2018_v20, %v4046_v52  ;;  %v2057_v10 = vmul.f32 %v2018_v20, %v4049_v39 }
 0x2f7   :  { %v2066_v27 = vmul.f32 %v2033_v25, %v4103_v31  ;;  %v2067_v60 = vmul.f32 %v2033_v25, %v4106_v62  ;;  %v2068_v43 = vmul.f32 %v2033_v25, %v4109_v33  ;;  %v2069_v15 = vmul.f32 %v2033_v25, %v4112_v48 }
 0x2f8   :  { %v2134_v37 = vadd.f32 %v4194_v54, %v2054_v59  ;;  %v2135_v22 = vadd.f32 %v4194_v54, %v2055_v56  ;;  %v2136_v13 = vadd.f32 %v4194_v54, %v2056_v17  ;;  %v2137_v47 = vadd.f32 %v4194_v54, %v2057_v10 }
 0x2f9   :  { %v2146_v40 = vadd.f32 %v2113_v3, %v2066_v27  ;;  %v2147_v52 = vadd.f32 %v2113_v3, %v2067_v60  ;;  %v2148_v57 = vadd.f32 %v2113_v3, %v2068_v43  ;;  %v2149_v62 = vadd.f32 %v2113_v3, %v2069_v15 }
 0x2fa   :  { %v2166_v39 = vmax.f32 %v2134_v37, 0.0  ;;  %v2167_v34 = vmax.f32 %v2135_v22, 0.0  ;;  %v2168_v31 = vmax.f32 %v2136_v13, 0.0  ;;  %v2169_v12 = vmax.f32 %v2137_v47, 0.0 }
 0x2fb   :  { %v2178_v33 = vmax.f32 %v2146_v40, 0.0  ;;  %v2179_v48 = vmax.f32 %v2147_v52, 0.0  ;;  %v2180_v50 = vmax.f32 %v2148_v57, 0.0  ;;  %v2181_v46 = vmax.f32 %v2149_v62, 0.0 }
 0x2fc   :  { %2198 = vst [vmem:[%s4380_s5 + $0x20] sm:$0xff] %v2166_v39 }
 0x2fd   :  { %2199 = vst [vmem:[%s4380_s5 + $0x28] sm:$0xff] %v2167_v34  ;;  %v2023_v54 = vpop.permute.xlu1 %2022 }
 0x2fe   :  { %2200 = vst [vmem:[%s4380_s5 + $0x30] sm:$0xff] %v2168_v31  ;;  %v2058_v24 = vmul.f32 %v2023_v54, %v4061_v9  ;;  %v2059_v8 = vmul.f32 %v2023_v54, %v4064_v30  ;;  %v2060_v63 = vmul.f32 %v2023_v54, %v4067_v42  ;;  %v2061_v7 = vmul.f32 %v2023_v54, %v4070_v0 }
 0x2ff   :  { %2201 = vst [vmem:[%s4380_s5 + $0x38] sm:$0xff] %v2169_v12 }
 0x300   :  { %2210 = vst [vmem:[%s4380_s5 + $0x80] sm:$0xff] %v2178_v33  ;;  %v2138_v11 = vadd.f32 %v2103_v32, %v2058_v24  ;;  %v2139_v23 = vadd.f32 %v2103_v32, %v2059_v8  ;;  %v2140_v36 = vadd.f32 %v2103_v32, %v2060_v63  ;;  %v2141_v51 = vadd.f32 %v2103_v32, %v2061_v7 }
 0x301   :  { %2211 = vst [vmem:[%s4380_s5 + $0x88] sm:$0xff] %v2179_v48 }
 0x302   :  { %2212 = vst [vmem:[%s4380_s5 + $0x90] sm:$0xff] %v2180_v50  ;;  %v2170_v9 = vmax.f32 %v2138_v11, 0.0  ;;  %v2171_v30 = vmax.f32 %v2139_v23, 0.0  ;;  %v2172_v42 = vmax.f32 %v2140_v36, 0.0  ;;  %v2173_v0 = vmax.f32 %v2141_v51, 0.0 }
 0x303   :  { %2213 = vst [vmem:[%s4380_s5 + $0x98] sm:$0xff] %v2181_v46 }
 0x304   :  { %2202 = vst [vmem:[%s4380_s5 + $0x40] sm:$0xff] %v2170_v9 }
 0x305   :  { %2203 = vst [vmem:[%s4380_s5 + $0x48] sm:$0xff] %v2171_v30  ;;  %v2028_v32 = vpop.permute.xlu0 %2027 }
 0x306   :  { %2204 = vst [vmem:[%s4380_s5 + $0x50] sm:$0xff] %v2172_v42  ;;  %v2062_v29 = vmul.f32 %v2028_v32, %v4082_v55  ;;  %v2063_v38 = vmul.f32 %v2028_v32, %v4085_v41  ;;  %v2064_v26 = vmul.f32 %v2028_v32, %v4088_v6  ;;  %v2065_v35 = vmul.f32 %v2028_v32, %v4091_v44 }
 0x307   :  { %2205 = vst [vmem:[%s4380_s5 + $0x58] sm:$0xff] %v2173_v0 }
 0x308   :  { %v2142_v58 = vadd.f32 %v2108_v19, %v2062_v29  ;;  %v2143_v45 = vadd.f32 %v2108_v19, %v2063_v38  ;;  %v2144_v3 = vadd.f32 %v2108_v19, %v2064_v26  ;;  %v2145_v20 = vadd.f32 %v2108_v19, %v2065_v35 }
 0x30a   :  { %v2174_v25 = vmax.f32 %v2142_v58, 0.0  ;;  %v2175_v59 = vmax.f32 %v2143_v45, 0.0  ;;  %v2176_v56 = vmax.f32 %v2144_v3, 0.0  ;;  %v2177_v17 = vmax.f32 %v2145_v20, 0.0 }
 0x30c   :  { %2206 = vst [vmem:[%s4380_s5 + $0x60] sm:$0xff] %v2174_v25 }
 0x30d   :  { %2207 = vst [vmem:[%s4380_s5 + $0x68] sm:$0xff] %v2175_v59  ;;  %v2048_v55 = vpop.permute.xlu2 %2047 }
 0x30e   :  { %2208 = vst [vmem:[%s4380_s5 + $0x70] sm:$0xff] %v2176_v56 }
 0x30f   :  { %2209 = vst [vmem:[%s4380_s5 + $0x78] sm:$0xff] %v2177_v17 }
 0x315   :  { %v2038_v41 = vpop.permute.xlu1 %2037  ;;  %v2118_v27 = vpop.permute.xlu2 %2117 }
 0x316   :  { %v2070_v6 = vmul.f32 %v2038_v41, %v4124_v21  ;;  %v2071_v44 = vmul.f32 %v2038_v41, %v4127_v53  ;;  %v2072_v19 = vmul.f32 %v2038_v41, %v4130_v28  ;;  %v2073_v10 = vmul.f32 %v2038_v41, %v4133_v14 }
 0x318   :  { %v2150_v60 = vadd.f32 %v2118_v27, %v2070_v6  ;;  %v2151_v43 = vadd.f32 %v2118_v27, %v2071_v44  ;;  %v2152_v15 = vadd.f32 %v2118_v27, %v2072_v19  ;;  %v2153_v37 = vadd.f32 %v2118_v27, %v2073_v10 }
 0x31a   :  { %v2182_v22 = vmax.f32 %v2150_v60, 0.0  ;;  %v2183_v13 = vmax.f32 %v2151_v43, 0.0  ;;  %v2184_v47 = vmax.f32 %v2152_v15, 0.0  ;;  %v2185_v40 = vmax.f32 %v2153_v37, 0.0 }
 0x31c   :  { %2214 = vst [vmem:[%s4380_s5 + $0xa0] sm:$0xff] %v2182_v22 }
 0x31d   :  { %2215 = vst [vmem:[%s4380_s5 + $0xa8] sm:$0xff] %v2183_v13  ;;  %v2043_v21 = vpop.permute.xlu0 %2042  ;;  %v2123_v57 = vpop.permute.xlu1 %2122 }
 0x31e   :  { %2216 = vst [vmem:[%s4380_s5 + $0xb0] sm:$0xff] %v2184_v47  ;;  %v2074_v53 = vmul.f32 %v2043_v21, %v4145_v4  ;;  %v2075_v28 = vmul.f32 %v2043_v21, %v4148_v61  ;;  %v2076_v14 = vmul.f32 %v2043_v21, %v4151_v1  ;;  %v2077_v52 = vmul.f32 %v2043_v21, %v4154_v16 }
 0x31f   :  { %2217 = vst [vmem:[%s4380_s5 + $0xb8] sm:$0xff] %v2185_v40  ;;  %v2078_v4 = vmul.f32 %v2048_v55, %v4166_v49  ;;  %v2079_v61 = vmul.f32 %v2048_v55, %v4169_v5  ;;  %v2080_v1 = vmul.f32 %v2048_v55, %v4172_v18  ;;  %v2081_v16 = vmul.f32 %v2048_v55, %v4175_v2 }
 0x320   :  { %v2154_v39 = vadd.f32 %v2123_v57, %v2074_v53  ;;  %v2155_v34 = vadd.f32 %v2123_v57, %v2075_v28  ;;  %v2156_v31 = vadd.f32 %v2123_v57, %v2076_v14  ;;  %v2157_v12 = vadd.f32 %v2123_v57, %v2077_v52 }
 0x322   :  { %v2186_v62 = vmax.f32 %v2154_v39, 0.0  ;;  %v2187_v33 = vmax.f32 %v2155_v34, 0.0  ;;  %v2188_v48 = vmax.f32 %v2156_v31, 0.0  ;;  %v2189_v50 = vmax.f32 %v2157_v12, 0.0 }
 0x324   :  { %2218 = vst [vmem:[%s4380_s5 + $0xc0] sm:$0xff] %v2186_v62 }
 0x325   :  { %2219 = vst [vmem:[%s4380_s5 + $0xc8] sm:$0xff] %v2187_v33  ;;  %v2128_v54 = vpop.permute.xlu0 %2127 }
 0x326   :  { %2220 = vst [vmem:[%s4380_s5 + $0xd0] sm:$0xff] %v2188_v48  ;;  %v2158_v24 = vadd.f32 %v2128_v54, %v2078_v4  ;;  %v2159_v8 = vadd.f32 %v2128_v54, %v2079_v61  ;;  %v2160_v63 = vadd.f32 %v2128_v54, %v2080_v1  ;;  %v2161_v7 = vadd.f32 %v2128_v54, %v2081_v16 }
 0x327   :  { %2221 = vst [vmem:[%s4380_s5 + $0xd8] sm:$0xff] %v2189_v50 }
 0x328   :  { %v2190_v49 = vmax.f32 %v2158_v24, 0.0  ;;  %v2191_v5 = vmax.f32 %v2159_v8, 0.0  ;;  %v2192_v18 = vmax.f32 %v2160_v63, 0.0  ;;  %v2193_v2 = vmax.f32 %v2161_v7, 0.0 }
 0x32a   :  { %2222 = vst [vmem:[%s4380_s5 + $0xe0] sm:$0xff] %v2190_v49 }
 0x32b   :  { %2223 = vst [vmem:[%s4380_s5 + $0xe8] sm:$0xff] %v2191_v5 }
 0x32c   :  { %2224 = vst [vmem:[%s4380_s5 + $0xf0] sm:$0xff] %v2192_v18 }
 0x32d   :  { %2225 = vst [vmem:[%s4380_s5 + $0xf8] sm:$0xff] %v2193_v2 }

// kernel: generator_forward.5
= control target key start
LH: loop header
LB: loop body
LE: loop exit
PB: predicated region body
PF: predicated region fallthrough
CT: control target
= control target key end

     0   :  { %vm131_vm0 = vcmask 523264   ;;  %vm1893_vm1 = vcmask 1043456   ;;  %s4333_s0 = inlined_call_operand.vmem [shape: bf16[9,64,512], index: 0, kind: input, shape index: {}]   ;;  %s4334_s1 = inlined_call_operand.vmem [shape: bf16[4,4,3,64], index: 1, kind: input, shape index: {}]   ;;  %s4335_s2 = inlined_call_operand.vmem [shape: f32[3,1], index: 2, kind: input, shape index: {}]   ;;  %s4336_s3 = inlined_call_operand.vmem [shape: f32[3,2048], index: 3, kind: output, shape index: {}]  }
   0x1   :  { %v1989_v0 = vld [vmem:[%s4333_s0 + $0xe0] sm:$0xf]  ;;  %v2735_v1 = vld [vmem:[%s4333_s0 + $0xec] sm:$0xf0]  ;;  %v2733_v2 = vld [vmem:[%s4333_s0 + $0xe4] sm:$0xf] }
   0x2   :  { %v2913_v3 = vor.u32 %v2735_v1, %v1989_v0  ;;  %v1991_v4 = vld [vmem:[%s4333_s0 + $0xf0] sm:$0xf0]  ;;  %v1997_v5 = vld [vmem:[%s4333_s0 + $0xe8] sm:$0xf]  ;;  %v2736_v6 = vld [vmem:[%s4333_s0 + $0xf4] sm:$0xf0] }
   0x3   :  { %v2924_v7 = vor.u32 %v2733_v2, %v1991_v4  ;;  %v2926_v8 = vor.u32 %v2736_v6, %v1997_v5  ;;  %v2734_v9 = vld [vmem:[%s4333_s0 + $0xec] sm:$0xf]  ;;  %v1999_v10 = vld [vmem:[%s4333_s0 + $0xf8] sm:$0xf0]  ;;  %v1973_v11 = vld [vmem:[%s4333_s0 + $0xc0] sm:$0xf] }
   0x4   :  { %139 = vmatpush.bf16.msra.mxu0 %v2913_v3  ;;  %v2938_v12 = vor.u32 %v2734_v9, %v1999_v10  ;;  %v2731_v13 = vld [vmem:[%s4333_s0 + $0xcc] sm:$0xf0]  ;;  %v2729_v14 = vld [vmem:[%s4333_s0 + $0xc4] sm:$0xf]  ;;  %v1975_v15 = vld [vmem:[%s4333_s0 + $0xd0] sm:$0xf0] }
   0x5   :  { %152 = vmatpush.bf16.msra.mxu1 %v2924_v7  ;;  %165 = vmatpush.bf16.msra.mxu2 %v2926_v8  ;;  %v2951_v16 = vor.u32 %v2731_v13, %v1973_v11  ;;  %v2953_v17 = vor.u32 %v2729_v14, %v1975_v15  ;;  %v1981_v18 = vld [vmem:[%s4333_s0 + $0xc8] sm:$0xf]  ;;  %v2732_v19 = vld [vmem:[%s4333_s0 + $0xd4] sm:$0xf0]  ;;  %v2730_v20 = vld [vmem:[%s4333_s0 + $0xcc] sm:$0xf] }
   0x6   :  { %178 = vmatpush.bf16.msra.mxu3 %v2938_v12  ;;  %v2965_v21 = vor.u32 %v2732_v19, %v1981_v18  ;;  %v1983_v22 = vld [vmem:[%s4333_s0 + $0xd8] sm:$0xf0]  ;;  %v1957_v23 = vld [vmem:[%s4333_s0 + $0xa0] sm:$0xf]  ;;  %v2727_v24 = vld [vmem:[%s4333_s0 + $0xac] sm:$0xf0] }
   0x7   :  { %v2976_v25 = vor.u32 %v2730_v20, %v1983_v22  ;;  %v2725_v26 = vld [vmem:[%s4333_s0 + $0xa4] sm:$0xf]  ;;  %v1959_v27 = vld [vmem:[%s4333_s0 + $0xb0] sm:$0xf0]  ;;  %v1965_v28 = vld [vmem:[%s4333_s0 + $0xa8] sm:$0xf]  ;;  %v2988_v29 = vor.u32 %v2727_v24, %v1957_v23 }
   0x8   :  { %140 = vmatpush.bf16.msra.mxu0 %v2951_v16  ;;  %v2728_v30 = vld [vmem:[%s4333_s0 + $0xb4] sm:$0xf0]  ;;  %v2726_v31 = vld [vmem:[%s4333_s0 + $0xac] sm:$0xf]  ;;  %v1967_v32 = vld [vmem:[%s4333_s0 + $0xb8] sm:$0xf0]  ;;  %v3001_v33 = vor.u32 %v2725_v26, %v1959_v27 }
   0x9   :  { %153 = vmatpush.bf16.msra.mxu1 %v2953_v17  ;;  %166 = vmatpush.bf16.msra.mxu2 %v2965_v21  ;;  %v3003_v34 = vor.u32 %v2728_v30, %v1965_v28  ;;  %v1941_v35 = vld [vmem:[%s4333_s0 + $0x80] sm:$0xf]  ;;  %v2723_v36 = vld [vmem:[%s4333_s0 + $0x8c] sm:$0xf0]  ;;  %v2721_v37 = vld [vmem:[%s4333_s0 + $0x84] sm:$0xf]  ;;  %v3015_v38 = vor.u32 %v2726_v31, %v1967_v32 }
   0xa   :  { %179 = vmatpush.bf16.msra.mxu3 %v2976_v25  ;;  %v1943_v39 = vld [vmem:[%s4333_s0 + $0x90] sm:$0xf0]  ;;  %v1949_v40 = vld [vmem:[%s4333_s0 + $0x88] sm:$0xf]  ;;  %v2724_v41 = vld [vmem:[%s4333_s0 + $0x94] sm:$0xf0]  ;;  %v3033_v44 = vor.u32 %v2723_v36, %v1941_v35 }
   0xb   :  { %v2722_v42 = vld [vmem:[%s4333_s0 + $0x8c] sm:$0xf]  ;;  %v1951_v43 = vld [vmem:[%s4333_s0 + $0x98] sm:$0xf0]  ;;  %v2057_v47 = vld [vmem:[%s4333_s0 + $0x60] sm:$0xf]  ;;  %v3046_v48 = vor.u32 %v2721_v37, %v1943_v39  ;;  %v3048_v49 = vor.u32 %v2724_v41, %v1949_v40 }
   0xc   :  { %141 = vmatpush.bf16.msra.mxu0 %v2988_v29  ;;  %v2718_v45 = vld [vmem:[%s4333_s0 + $0x6c] sm:$0xf]  ;;  %v2067_v46 = vld [vmem:[%s4333_s0 + $0x78] sm:$0xf0]  ;;  %v2719_v50 = vld [vmem:[%s4333_s0 + $0x6c] sm:$0xf0]  ;;  %v3054_v51 = vor.u32 %v2722_v42, %v1951_v43 }
   0xd   :  { %154 = vmatpush.bf16.msra.mxu1 %v3001_v33  ;;  %167 = vmatpush.bf16.msra.mxu2 %v3003_v34  ;;  %v2058_v52 = vor.u32 %v2719_v50, %v2057_v47  ;;  %v2717_v53 = vld [vmem:[%s4333_s0 + $0x64] sm:$0xf]  ;;  %v2059_v54 = vld [vmem:[%s4333_s0 + $0x70] sm:$0xf0]  ;;  %v2065_v55 = vld [vmem:[%s4333_s0 + $0x68] sm:$0xf]  ;;  %v2070_v56 = vor.u32 %v2718_v45, %v2067_v46 }
   0xe   :  { %180 = vmatpush.bf16.msra.mxu3 %v3015_v38  ;;  %v2720_v57 = vld [vmem:[%s4333_s0 + $0x74] sm:$0xf0]  ;;  %v2041_v58 = vld [vmem:[%s4333_s0 + $0x40] sm:$0xf]  ;;  %v2715_v59 = vld [vmem:[%s4333_s0 + $0x4c] sm:$0xf0]  ;;  %v2062_v63 = vor.u32 %v2717_v53, %v2059_v54 }
   0xf   :  { %v1922_v60 = vld [vmem:[%s4334_s1 + $0x2] sm:$0x3]  ;;  %v2714_v61 = vld [vmem:[%s4333_s0 + $0x4c] sm:$0xf]  ;;  %v2051_v62 = vld [vmem:[%s4333_s0 + $0x58] sm:$0xf0]  ;;  %v2066_v0 = vor.u32 %v2720_v57, %v2065_v55  ;;  %v2042_v1 = vor.u32 %v2715_v59, %v2041_v58 }
  0x10   :  { %142 = vmatpush.bf16.msra.mxu0 %v3033_v44  ;;  %v2713_v2 = vld [vmem:[%s4333_s0 + $0x44] sm:$0xf]  ;;  %v2043_v4 = vld [vmem:[%s4333_s0 + $0x50] sm:$0xf0]  ;;  %v2049_v5 = vld [vmem:[%s4333_s0 + $0x48] sm:$0xf]  ;;  %v2054_v6 = vor.u32 %v2714_v61, %v2051_v62 }
  0x11   :  { %155 = vmatpush.bf16.msra.mxu1 %v3046_v48  ;;  %168 = vmatpush.bf16.msra.mxu2 %v3048_v49  ;;  %v2716_v9 = vld [vmem:[%s4333_s0 + $0x54] sm:$0xf0]  ;;  %v2025_v10 = vld [vmem:[%s4333_s0 + $0x20] sm:$0xf]  ;;  %v2711_v11 = vld [vmem:[%s4333_s0 + $0x2c] sm:$0xf0]  ;;  %v2046_v15 = vor.u32 %v2713_v2, %v2043_v4 }
  0x12   :  { %181 = vmatpush.bf16.msra.mxu3 %v3054_v51  ;;  %v2710_v13 = vld [vmem:[%s4333_s0 + $0x2c] sm:$0xf]  ;;  %v2035_v14 = vld [vmem:[%s4333_s0 + $0x38] sm:$0xf0]  ;;  %v2709_v18 = vld [vmem:[%s4333_s0 + $0x24] sm:$0xf]  ;;  %v2050_v19 = vor.u32 %v2716_v9, %v2049_v5  ;;  %v2026_v20 = vor.u32 %v2711_v11, %v2025_v10 }
  0x13   :  { %2003 = vmatmul.msk.bf16.vlgmr.msra.gmra.mxu0 %vm131_vm0, %v1922_v60  ;;  %v2027_v22 = vld [vmem:[%s4333_s0 + $0x30] sm:$0xf0]  ;;  %v2033_v23 = vld [vmem:[%s4333_s0 + $0x28] sm:$0xf]  ;;  %v2712_v24 = vld [vmem:[%s4333_s0 + $0x34] sm:$0xf0]  ;;  %v2038_v26 = vor.u32 %v2710_v13, %v2035_v14 }
  0x14   :  { %274 = vmatpush.bf16.msrb.mxu0 %v2058_v52  ;;  %2004 = vmatmul.msk.bf16.vlgmr.msra.gmra.mxu1 %vm131_vm0, %v1922_v60  ;;  %v2706_v27 = vld [vmem:[%s4333_s0 + $0xc] sm:$0xf]  ;;  %v2009_v28 = vld [vmem:[%s4333_s0] sm:$0xf]  ;;  %v2707_v30 = vld [vmem:[%s4333_s0 + $0xc] sm:$0xf0]  ;;  %v2030_v36 = vor.u32 %v2709_v18, %v2027_v22  ;;  %v2034_v40 = vor.u32 %v2712_v24, %v2033_v23 }
  0x15   :  { %2005 = vmatmul.msk.bf16.vlgmr.msra.gmra.mxu2 %vm131_vm0, %v1922_v60  ;;  %2006 = vmatmul.msk.bf16.vlgmr.msra.gmra.mxu3 %vm131_vm0, %v1922_v60  ;;  %v2019_v31 = vld [vmem:[%s4333_s0 + $0x18] sm:$0xf0]  ;;  %v2142_v32 = vld [vmem:[%s4333_s0 + $0x1e0] sm:$0xf]  ;;  %v2751_v35 = vld [vmem:[%s4333_s0 + $0x1ec] sm:$0xf0]  ;;  %v2010_v41 = vor.u32 %v2707_v30, %v2009_v28 }
  0x16   :  { %313 = vmatpush.bf16.msrb.mxu3 %v2070_v56  ;;  %287 = vmatpush.bf16.msrb.mxu1 %v2062_v63  ;;  %v2750_v37 = vld [vmem:[%s4333_s0 + $0x1ec] sm:$0xf]  ;;  %v2152_v39 = vld [vmem:[%s4333_s0 + $0x1f8] sm:$0xf0]  ;;  %v2705_v42 = vld [vmem:[%s4333_s0 + $0x4] sm:$0xf]  ;;  %v2022_v46 = vor.u32 %v2706_v27, %v2019_v31  ;;  %v3163_v50 = vor.u32 %v2751_v35, %v2142_v32 }
  0x17   :  { %300 = vmatpush.bf16.msrb.mxu2 %v2066_v0  ;;  %v2011_v43 = vld [vmem:[%s4333_s0 + $0x10] sm:$0xf0]  ;;  %v2017_v45 = vld [vmem:[%s4333_s0 + $0x8] sm:$0xf]  ;;  %v2708_v47 = vld [vmem:[%s4333_s0 + $0x14] sm:$0xf0]  ;;  %v3171_v54 = vor.u32 %v2750_v37, %v2152_v39 }
  0x18   :  { %275 = vmatpush.bf16.msrb.mxu0 %v2042_v1  ;;  %v2749_v52 = vld [vmem:[%s4333_s0 + $0x1e4] sm:$0xf]  ;;  %v2144_v53 = vld [vmem:[%s4333_s0 + $0x1f0] sm:$0xf0]  ;;  %v2150_v55 = vld [vmem:[%s4333_s0 + $0x1e8] sm:$0xf]  ;;  %v2014_v57 = vor.u32 %v2705_v42, %v2011_v43  ;;  %v2018_v60 = vor.u32 %v2708_v47, %v2017_v45 }
  0x19   :  { %v2752_v56 = vld [vmem:[%s4333_s0 + $0x1f4] sm:$0xf0]  ;;  %v2746_v58 = vld [vmem:[%s4333_s0 + $0x1cc] sm:$0xf]  ;;  %v2136_v59 = vld [vmem:[%s4333_s0 + $0x1d8] sm:$0xf0]  ;;  %v3185_v61 = vor.u32 %v2749_v52, %v2144_v53 }
  0x1a   :  { %314 = vmatpush.bf16.msrb.mxu3 %v2054_v6  ;;  %288 = vmatpush.bf16.msrb.mxu1 %v2046_v15  ;;  %v2126_v62 = vld [vmem:[%s4333_s0 + $0x1c0] sm:$0xf]  ;;  %v3191_v63 = vor.u32 %v2752_v56, %v2150_v55  ;;  %v2747_v0 = vld [vmem:[%s4333_s0 + $0x1cc] sm:$0xf0]  ;;  %v2745_v1 = vld [vmem:[%s4333_s0 + $0x1c4] sm:$0xf]  ;;  %v3206_v5 = vor.u32 %v2746_v58, %v2136_v59 }
  0x1b   :  { %301 = vmatpush.bf16.msrb.mxu2 %v2050_v19  ;;  %v2128_v2 = vld [vmem:[%s4333_s0 + $0x1d0] sm:$0xf0]  ;;  %v15_v4 = vld [vmem:[%s4334_s1] sm:$0x3]  ;;  %v2134_v6 = vld [vmem:[%s4333_s0 + $0x1c8] sm:$0xf]  ;;  %v3221_v13 = vor.u32 %v2747_v0, %v2126_v62 }
  0x1c   :  { %276 = vmatpush.bf16.msrb.mxu0 %v2026_v20  ;;  %v2748_v9 = vld [vmem:[%s4333_s0 + $0x1d4] sm:$0xf0]  ;;  %v2742_v10 = vld [vmem:[%s4333_s0 + $0x1ac] sm:$0xf]  ;;  %v2120_v11 = vld [vmem:[%s4333_s0 + $0x1b8] sm:$0xf0]  ;;  %v3223_v14 = vor.u32 %v2745_v1, %v2128_v2 }
  0x1d   :  { %v2110_v15 = vld [vmem:[%s4333_s0 + $0x1a0] sm:$0xf]  ;;  %v3230_v18 = vor.u32 %v2748_v9, %v2134_v6  ;;  %v2743_v19 = vld [vmem:[%s4333_s0 + $0x1ac] sm:$0xf0]  ;;  %v2741_v20 = vld [vmem:[%s4333_s0 + $0x1a4] sm:$0xf]  ;;  %v3243_v23 = vor.u32 %v2742_v10, %v2120_v11 }
  0x1e   :  { %315 = vmatpush.bf16.msrb.mxu3 %v2038_v26  ;;  %289 = vmatpush.bf16.msrb.mxu1 %v2030_v36  ;;  %v2112_v22 = vld [vmem:[%s4333_s0 + $0x1b0] sm:$0xf0]  ;;  %v2118_v24 = vld [vmem:[%s4333_s0 + $0x1a8] sm:$0xf]  ;;  %v2744_v26 = vld [vmem:[%s4333_s0 + $0x1b4] sm:$0xf0]  ;;  %v3267_v32 = vor.u32 %v2743_v19, %v2110_v15 }
  0x1f   :  { %302 = vmatpush.bf16.msrb.mxu2 %v2034_v40  ;;  %v2738_v27 = vld [vmem:[%s4333_s0 + $0x18c] sm:$0xf]  ;;  %v2104_v28 = vld [vmem:[%s4333_s0 + $0x198] sm:$0xf0]  ;;  %v2094_v30 = vld [vmem:[%s4333_s0 + $0x180] sm:$0xf]  ;;  %v3269_v35 = vor.u32 %v2741_v20, %v2112_v22  ;;  %v3281_v40 = vor.u32 %v2744_v26, %v2118_v24 }
  0x20   :  { %277 = vmatpush.bf16.msrb.mxu0 %v2010_v41  ;;  %v2739_v31 = vld [vmem:[%s4333_s0 + $0x18c] sm:$0xf0]  ;;  %v2737_v36 = vld [vmem:[%s4333_s0 + $0x184] sm:$0xf]  ;;  %v2766_v37 = vld [vmem:[%s4333_s0 + $0x26c] sm:$0xf]  ;;  %v3293_v45 = vor.u32 %v2738_v27, %v2104_v28 }
  0x21   :  { %v2237_v39 = vld [vmem:[%s4333_s0 + $0x278] sm:$0xf0]  ;;  %v2096_v41 = vld [vmem:[%s4333_s0 + $0x190] sm:$0xf0]  ;;  %v2102_v42 = vld [vmem:[%s4333_s0 + $0x188] sm:$0xf]  ;;  %v3317_v58 = vor.u32 %v2739_v31, %v2094_v30 }
  0x22   :  { %316 = vmatpush.bf16.msrb.mxu3 %v2022_v46  ;;  %290 = vmatpush.bf16.msrb.mxu1 %v2014_v57  ;;  %v2740_v43 = vld [vmem:[%s4333_s0 + $0x194] sm:$0xf0]  ;;  %v2227_v46 = vld [vmem:[%s4333_s0 + $0x260] sm:$0xf]  ;;  %v2767_v47 = vld [vmem:[%s4333_s0 + $0x26c] sm:$0xf0]  ;;  %v3304_v53 = vor.u32 %v2766_v37, %v2237_v39  ;;  %v3319_v59 = vor.u32 %v2737_v36, %v2096_v41 }
  0x23   :  { %303 = vmatpush.bf16.msrb.mxu2 %v2018_v60  ;;  %2071 = vmatmul.msk.bf16.vlgmr.msrb.gmra.mxu0 %vm131_vm0, %v15_v4  ;;  %v2765_v52 = vld [vmem:[%s4333_s0 + $0x264] sm:$0xf]  ;;  %v2229_v55 = vld [vmem:[%s4333_s0 + $0x270] sm:$0xf0]  ;;  %v2235_v56 = vld [vmem:[%s4333_s0 + $0x268] sm:$0xf]  ;;  %v3328_v0 = vor.u32 %v2740_v43, %v2102_v42  ;;  %v3330_v1 = vor.u32 %v2767_v47, %v2227_v46 }
  0x24   :  { %428 = vmatpush.bf16.msra.mxu0 %v3163_v50  ;;  %v2768_v57 = vld [vmem:[%s4333_s0 + $0x274] sm:$0xf0]  ;;  %v2762_v60 = vld [vmem:[%s4333_s0 + $0x24c] sm:$0xf]  ;;  %v2221_v62 = vld [vmem:[%s4333_s0 + $0x258] sm:$0xf0]  ;;  %v3333_v2 = vor.u32 %v2765_v52, %v2229_v55 }
  0x25   :  { %2072 = vmatmul.msk.bf16.vlgmr.msrb.gmra.mxu1 %vm131_vm0, %v15_v4  ;;  %2074 = vmatmul.msk.bf16.vlgmr.msrb.gmra.mxu3 %vm131_vm0, %v15_v4  ;;  %4341 = vst [vmem:[#allocation2_spill] sm:$0xff] %v3328_v0  ;;  %v3338_v6 = vor.u32 %v2762_v60, %v2221_v62  ;;  %v2211_v9 = vld [vmem:[%s4333_s0 + $0x240] sm:$0xf]  ;;  %v2763_v10 = vld [vmem:[%s4333_s0 + $0x24c] sm:$0xf0] }
  0x26   :  { %467 = vmatpush.bf16.msra.mxu3 %v3171_v54  ;;  %441 = vmatpush.bf16.msra.mxu1 %v3185_v61  ;;  %v2761_v11 = vld [vmem:[%s4333_s0 + $0x244] sm:$0xf]  ;;  %v2213_v15 = vld [vmem:[%s4333_s0 + $0x250] sm:$0xf0]  ;;  %v2219_v19 = vld [vmem:[%s4333_s0 + $0x248] sm:$0xf]  ;;  %v3367_v24 = vor.u32 %v2763_v10, %v2211_v9 }
  0x27   :  { %454 = vmatpush.bf16.msra.mxu2 %v3191_v63  ;;  %v2764_v20 = vld [vmem:[%s4333_s0 + $0x254] sm:$0xf0]  ;;  %v2075_v22 = vld [vmem:[%s4334_s1 + $0x4] sm:$0x3]  ;;  %v2758_v26 = vld [vmem:[%s4333_s0 + $0x22c] sm:$0xf]  ;;  %v3382_v31 = vor.u32 %v2761_v11, %v2213_v15 }
  0x28   :  { %2073 = vmatmul.msk.bf16.vlgmr.msrb.gmra.mxu2 %vm131_vm0, %v15_v4  ;;  %429 = vmatpush.bf16.msra.mxu0 %v3221_v13  ;;  %v3335_v4 = vor.u32 %v2768_v57, %v2235_v56  ;;  %v2205_v27 = vld [vmem:[%s4333_s0 + $0x238] sm:$0xf0]  ;;  %v2195_v28 = vld [vmem:[%s4333_s0 + $0x220] sm:$0xf]  ;;  %v2759_v30 = vld [vmem:[%s4333_s0 + $0x22c] sm:$0xf0]  ;;  %v3384_v36 = vor.u32 %v2764_v20, %v2219_v19 }
  0x29   :  { %v2757_v37 = vld [vmem:[%s4333_s0 + $0x224] sm:$0xf]  ;;  %v2197_v39 = vld [vmem:[%s4333_s0 + $0x230] sm:$0xf0]  ;;  %v3393_v41 = vor.u32 %v2758_v26, %v2205_v27  ;;  %v2203_v42 = vld [vmem:[%s4333_s0 + $0x228] sm:$0xf]  ;;  %v3406_v47 = vor.u32 %v2759_v30, %v2195_v28 }
  0x2a   :  { %468 = vmatpush.bf16.msra.mxu3 %v3206_v5  ;;  %442 = vmatpush.bf16.msra.mxu1 %v3223_v14  ;;  %v2760_v43 = vld [vmem:[%s4333_s0 + $0x234] sm:$0xf0]  ;;  %v2754_v46 = vld [vmem:[%s4333_s0 + $0x20c] sm:$0xf]  ;;  %v2189_v52 = vld [vmem:[%s4333_s0 + $0x218] sm:$0xf0]  ;;  %v3433_v10 = vor.u32 %v2757_v37, %v2197_v39 }
  0x2b   :  { %455 = vmatpush.bf16.msra.mxu2 %v3230_v18  ;;  %v2179_v55 = vld [vmem:[%s4333_s0 + $0x200] sm:$0xf]  ;;  %v2755_v56 = vld [vmem:[%s4333_s0 + $0x20c] sm:$0xf0]  ;;  %v2753_v57 = vld [vmem:[%s4333_s0 + $0x204] sm:$0xf]  ;;  %v3435_v11 = vor.u32 %v2760_v43, %v2203_v42 }
  0x2c   :  { %430 = vmatpush.bf16.msra.mxu0 %v3267_v32  ;;  %v2181_v60 = vld [vmem:[%s4333_s0 + $0x210] sm:$0xf0]  ;;  %v2782_v62 = vld [vmem:[%s4333_s0 + $0x16c] sm:$0xf]  ;;  %v2323_v9 = vld [vmem:[%s4333_s0 + $0x178] sm:$0xf0]  ;;  %v3459_v37 = vor.u32 %v2755_v56, %v2179_v55 }
  0x2d   :  { %v2313_v15 = vld [vmem:[%s4333_s0 + $0x160] sm:$0xf]  ;;  %v2783_v19 = vld [vmem:[%s4333_s0 + $0x16c] sm:$0xf0]  ;;  %v2187_v26 = vld [vmem:[%s4333_s0 + $0x208] sm:$0xf]  ;;  %v2326_v39 = vor.u32 %v2782_v62, %v2323_v9  ;;  %v3478_v62 = vor.u32 %v2753_v57, %v2181_v60 }
  0x2e   :  { %469 = vmatpush.bf16.msra.mxu3 %v3243_v23  ;;  %443 = vmatpush.bf16.msra.mxu1 %v3269_v35  ;;  %v1831_v20 = vld [vmem:[%s4335_s2] sm:$0x7]  ;;  %v2756_v27 = vld [vmem:[%s4333_s0 + $0x214] sm:$0xf0]  ;;  %v2781_v28 = vld [vmem:[%s4333_s0 + $0x164] sm:$0xf] }
  0x2f   :  { %456 = vmatpush.bf16.msra.mxu2 %v3281_v40  ;;  %v2883_v30 = vmov 0   ;;  %v2315_v42 = vld [vmem:[%s4333_s0 + $0x170] sm:$0xf0]  ;;  %v2321_v43 = vld [vmem:[%s4333_s0 + $0x168] sm:$0xf]  ;;  %v3480_v9 = vor.u32 %v2756_v27, %v2187_v26 }
  0x30   :  { %431 = vmatpush.bf16.msra.mxu0 %v3317_v58  ;;  %2850 = vset.pattern.permute.xlu0 %v2883_v30  ;;  %v2778_v55 = vld [vmem:[%s4333_s0 + $0x14c] sm:$0xf]  ;;  %v2307_v56 = vld [vmem:[%s4333_s0 + $0x158] sm:$0xf0]  ;;  %v2777_v57 = vld [vmem:[%s4333_s0 + $0x144] sm:$0xf] }
  0x31   :  { %1834 = vperm.xlu0 %2850, %v1831_v20   ;;  %v2318_v20 = vor.u32 %v2781_v28, %v2315_v42  ;;  %v2299_v60 = vld [vmem:[%s4333_s0 + $0x150] sm:$0xf0]  ;;  %v2305_v27 = vld [vmem:[%s4333_s0 + $0x148] sm:$0xf]  ;;  %v2780_v28 = vld [vmem:[%s4333_s0 + $0x154] sm:$0xf0] }
  0x32   :  { %470 = vmatpush.bf16.msra.mxu3 %v3293_v45  ;;  %444 = vmatpush.bf16.msra.mxu1 %v3319_v59  ;;  %v2302_v42 = vor.u32 %v2777_v57, %v2299_v60  ;;  %v2770_v60 = vld [vmem:[%s4333_s0 + $0x10c] sm:$0xf] }
  0x33   :  { %457 = vmatpush.bf16.msra.mxu2 %v3328_v0  ;;  %2156 = vmatmul.msk.bf16.vlgmr.msra.gmra.mxu0 %vm131_vm0, %v2075_v22  ;;  %v2310_v0 = vor.u32 %v2778_v55, %v2307_v56  ;;  %v2160_v55 = vld [vmem:[%s4334_s1 + $0x6] sm:$0x3]  ;;  %v2306_v56 = vor.u32 %v2780_v28, %v2305_v27  ;;  %v2265_v28 = vld [vmem:[%s4333_s0 + $0x100] sm:$0xf] }
  0x34   :  { %586 = vmatpush.bf16.msrb.mxu0 %v3330_v1 }
  0x35   :  { %2157 = vmatmul.msk.bf16.vlgmr.msra.gmra.mxu1 %vm131_vm0, %v2075_v22  ;;  %2159 = vmatmul.msk.bf16.vlgmr.msra.gmra.mxu3 %vm131_vm0, %v2075_v22 }
  0x36   :  { %625 = vmatpush.bf16.msrb.mxu3 %v3304_v53  ;;  %599 = vmatpush.bf16.msrb.mxu1 %v3333_v2 }
  0x37   :  { %612 = vmatpush.bf16.msrb.mxu2 %v3335_v4 }
  0x38   :  { %587 = vmatpush.bf16.msrb.mxu0 %v3367_v24  ;;  %2158 = vmatmul.msk.bf16.vlgmr.msra.gmra.mxu2 %vm131_vm0, %v2075_v22  ;;  %v3447_v22 = vor.u32 %v2754_v46, %v2189_v52  ;;  %v2784_v46 = vld [vmem:[%s4333_s0 + $0x174] sm:$0xf0]  ;;  %v2314_v52 = vor.u32 %v2783_v19, %v2313_v15  ;;  %v2297_v15 = vld [vmem:[%s4333_s0 + $0x140] sm:$0xf]  ;;  %v2779_v19 = vld [vmem:[%s4333_s0 + $0x14c] sm:$0xf0] }
  0x39   :  { %v2322_v30 = vor.u32 %v2784_v46, %v2321_v43  ;;  %v2298_v26 = vor.u32 %v2779_v19, %v2297_v15  ;;  %v2291_v43 = vld [vmem:[%s4333_s0 + $0x138] sm:$0xf0]  ;;  %v2281_v46 = vld [vmem:[%s4333_s0 + $0x120] sm:$0xf]  ;;  %v2773_v15 = vld [vmem:[%s4333_s0 + $0x124] sm:$0xf] }
  0x3a   :  { %626 = vmatpush.bf16.msrb.mxu3 %v3338_v6  ;;  %600 = vmatpush.bf16.msrb.mxu1 %v3382_v31  ;;  %v2283_v19 = vld [vmem:[%s4333_s0 + $0x130] sm:$0xf0] }
  0x3b   :  { %613 = vmatpush.bf16.msrb.mxu2 %v3384_v36  ;;  %v2286_v27 = vor.u32 %v2773_v15, %v2283_v19 }
  0x3c   :  { %588 = vmatpush.bf16.msrb.mxu0 %v3406_v47 }
  0x3e   :  { %627 = vmatpush.bf16.msrb.mxu3 %v3393_v41  ;;  %601 = vmatpush.bf16.msrb.mxu1 %v3433_v10 }
  0x3f   :  { %614 = vmatpush.bf16.msrb.mxu2 %v3435_v11 }
  0x40   :  { %589 = vmatpush.bf16.msrb.mxu0 %v3459_v37 }
  0x42   :  { %628 = vmatpush.bf16.msrb.mxu3 %v3447_v22  ;;  %602 = vmatpush.bf16.msrb.mxu1 %v3478_v62 }
  0x43   :  { %615 = vmatpush.bf16.msrb.mxu2 %v3480_v9  ;;  %2241 = vmatmul.msk.bf16.vlgmr.msrb.gmra.mxu0 %vm131_vm0, %v2160_v55 }
  0x44   :  { %746 = vmatpush.bf16.msra.mxu0 %v2314_v52  ;;  %v2775_v52 = vld [vmem:[%s4333_s0 + $0x12c] sm:$0xf0] }
  0x45   :  { %2242 = vmatmul.msk.bf16.vlgmr.msrb.gmra.mxu1 %vm131_vm0, %v2160_v55  ;;  %2244 = vmatmul.msk.bf16.vlgmr.msrb.gmra.mxu3 %vm131_vm0, %v2160_v55 }
  0x46   :  { %785 = vmatpush.bf16.msra.mxu3 %v2326_v39  ;;  %v2774_v39 = vld [vmem:[%s4333_s0 + $0x12c] sm:$0xf]  ;;  %759 = vmatpush.bf16.msra.mxu1 %v2318_v20  ;;  %v2289_v20 = vld [vmem:[%s4333_s0 + $0x128] sm:$0xf] }
  0x47   :  { %772 = vmatpush.bf16.msra.mxu2 %v2322_v30  ;;  %v2776_v30 = vld [vmem:[%s4333_s0 + $0x134] sm:$0xf0]  ;;  %v2294_v57 = vor.u32 %v2774_v39, %v2291_v43  ;;  %v2771_v39 = vld [vmem:[%s4333_s0 + $0x10c] sm:$0xf0] }
  0x48   :  { %747 = vmatpush.bf16.msra.mxu0 %v2298_v26  ;;  %v2275_v26 = vld [vmem:[%s4333_s0 + $0x118] sm:$0xf0]  ;;  %v2290_v43 = vor.u32 %v2776_v30, %v2289_v20  ;;  %2243 = vmatmul.msk.bf16.vlgmr.msrb.gmra.mxu2 %vm131_vm0, %v2160_v55  ;;  %v2266_v19 = vor.u32 %v2771_v39, %v2265_v28  ;;  %v2246_v55 = vld [vmem:[%s4334_s1 + $0xa] sm:$0x3] }
  0x49   :  { %v2278_v15 = vor.u32 %v2770_v60, %v2275_v26  ;;  %v2393_v60 = vld [vmem:[%s4333_s0 + $0x2d0] sm:$0xf0]  ;;  %v2796_v26 = vld [vmem:[%s4333_s0 + $0x2d4] sm:$0xf0] }
  0x4a   :  { %786 = vmatpush.bf16.msra.mxu3 %v2310_v0  ;;  %v2282_v0 = vor.u32 %v2775_v52, %v2281_v46  ;;  %760 = vmatpush.bf16.msra.mxu1 %v2302_v42  ;;  %v2769_v42 = vld [vmem:[%s4333_s0 + $0x104] sm:$0xf]  ;;  %v2267_v46 = vld [vmem:[%s4333_s0 + $0x110] sm:$0xf0]  ;;  %v2273_v52 = vld [vmem:[%s4333_s0 + $0x108] sm:$0xf] }
  0x4b   :  { %773 = vmatpush.bf16.msra.mxu2 %v2306_v56  ;;  %v2772_v56 = vld [vmem:[%s4333_s0 + $0x114] sm:$0xf0]  ;;  %v2270_v20 = vor.u32 %v2769_v42, %v2267_v46  ;;  %v2385_v42 = vld [vmem:[%s4333_s0 + $0x2b8] sm:$0xf0] }
  0x4c   :  { %748 = vmatpush.bf16.msra.mxu0 %v2282_v0  ;;  %v2274_v30 = vor.u32 %v2772_v56, %v2273_v52  ;;  %v2793_v0 = vld [vmem:[%s4333_s0 + $0x2c4] sm:$0xf]  ;;  %v2375_v56 = vld [vmem:[%s4333_s0 + $0x2a0] sm:$0xf] }
  0x4d   :  { %v3675_v46 = vor.u32 %v2793_v0, %v2393_v60  ;;  %v2335_v0 = vld [vmem:[%s4334_s1 + $0xc] sm:$0x3] }
  0x4e   :  { %787 = vmatpush.bf16.msra.mxu3 %v2294_v57  ;;  %761 = vmatpush.bf16.msra.mxu1 %v2286_v27  ;;  %v2795_v57 = vld [vmem:[%s4333_s0 + $0x2cc] sm:$0xf0]  ;;  %v2399_v27 = vld [vmem:[%s4333_s0 + $0x2c8] sm:$0xf] }
  0x4f   :  { %774 = vmatpush.bf16.msra.mxu2 %v2290_v43  ;;  %v2790_v43 = vld [vmem:[%s4333_s0 + $0x2ac] sm:$0xf]  ;;  %v3677_v52 = vor.u32 %v2796_v26, %v2399_v27 }
  0x50   :  { %749 = vmatpush.bf16.msra.mxu0 %v2266_v19  ;;  %v2789_v19 = vld [vmem:[%s4333_s0 + $0x2a4] sm:$0xf] }
  0x52   :  { %788 = vmatpush.bf16.msra.mxu3 %v2278_v15  ;;  %762 = vmatpush.bf16.msra.mxu1 %v2270_v20  ;;  %v2791_v15 = vld [vmem:[%s4333_s0 + $0x2ac] sm:$0xf0]  ;;  %v2377_v20 = vld [vmem:[%s4333_s0 + $0x2b0] sm:$0xf0] }
  0x53   :  { %775 = vmatpush.bf16.msra.mxu2 %v2274_v30  ;;  %2327 = vmatmul.msk.bf16.vlgmr.msra.gmra.mxu0 %vm131_vm0, %v2246_v55  ;;  %v2383_v30 = vld [vmem:[%s4333_s0 + $0x2a8] sm:$0xf] }
  0x54   :  { %801 = vmatpush.bf16.msrb.mxu0 %v2913_v3  ;;  %v2245_v3 = vld [vmem:[%s4334_s1 + $0x8] sm:$0x3] }
  0x55   :  { %2328 = vmatmul.msk.bf16.vlgmr.msra.gmra.mxu1 %vm131_vm0, %v2246_v55  ;;  %2330 = vmatmul.msk.bf16.vlgmr.msra.gmra.mxu3 %vm131_vm0, %v2246_v55 }
  0x56   :  { %840 = vmatpush.bf16.msrb.mxu3 %v2938_v12  ;;  %814 = vmatpush.bf16.msrb.mxu1 %v2924_v7  ;;  %v2798_v7 = vld [vmem:[%s4333_s0 + $0x2ec] sm:$0xf]  ;;  %v2407_v12 = vld [vmem:[%s4333_s0 + $0x2e0] sm:$0xf] }
  0x57   :  { %827 = vmatpush.bf16.msrb.mxu2 %v2926_v8  ;;  %v2417_v8 = vld [vmem:[%s4333_s0 + $0x2f8] sm:$0xf0] }
  0x58   :  { %802 = vmatpush.bf16.msrb.mxu0 %v2951_v16  ;;  %2329 = vmatmul.msk.bf16.vlgmr.msra.gmra.mxu2 %vm131_vm0, %v2246_v55  ;;  %v2799_v16 = vld [vmem:[%s4333_s0 + $0x2ec] sm:$0xf0]  ;;  %v2792_v55 = vld [vmem:[%s4333_s0 + $0x2b4] sm:$0xf0] }
  0x5a   :  { %841 = vmatpush.bf16.msrb.mxu3 %v2976_v25  ;;  %815 = vmatpush.bf16.msrb.mxu1 %v2953_v17  ;;  %v2797_v17 = vld [vmem:[%s4333_s0 + $0x2e4] sm:$0xf]  ;;  %v2415_v25 = vld [vmem:[%s4333_s0 + $0x2e8] sm:$0xf] }
  0x5b   :  { %828 = vmatpush.bf16.msrb.mxu2 %v2965_v21  ;;  %v2409_v21 = vld [vmem:[%s4333_s0 + $0x2f0] sm:$0xf0] }
  0x5c   :  { %803 = vmatpush.bf16.msrb.mxu0 %v2988_v29  ;;  %v2800_v29 = vld [vmem:[%s4333_s0 + $0x2f4] sm:$0xf0] }
  0x5e   :  { %842 = vmatpush.bf16.msrb.mxu3 %v3015_v38  ;;  %816 = vmatpush.bf16.msrb.mxu1 %v3001_v33  ;;  %v3621_v33 = vor.u32 %v2798_v7, %v2417_v8  ;;  %v2794_v38 = vld [vmem:[%s4333_s0 + $0x2cc] sm:$0xf]  ;;  %v3701_v7 = vor.u32 %v2791_v15, %v2375_v56  ;;  %v2496_v15 = vld [vmem:[%s4333_s0 + $0x358] sm:$0xf0] }
  0x5f   :  { %829 = vmatpush.bf16.msrb.mxu2 %v3003_v34  ;;  %v3625_v34 = vor.u32 %v2799_v16, %v2407_v12  ;;  %v2786_v8 = vld [vmem:[%s4333_s0 + $0x28c] sm:$0xf]  ;;  %v2369_v12 = vld [vmem:[%s4333_s0 + $0x298] sm:$0xf0]  ;;  %v3711_v16 = vor.u32 %v2789_v19, %v2377_v20 }
  0x60   :  { %804 = vmatpush.bf16.msrb.mxu0 %v3033_v44  ;;  %v2401_v44 = vld [vmem:[%s4333_s0 + $0x2d8] sm:$0xf0]  ;;  %v2810_v56 = vld [vmem:[%s4333_s0 + $0x34c] sm:$0xf] }
  0x61   :  { %v3661_v28 = vor.u32 %v2794_v38, %v2401_v44  ;;  %v3725_v38 = vor.u32 %v2786_v8, %v2369_v12  ;;  %v2361_v44 = vld [vmem:[%s4333_s0 + $0x290] sm:$0xf0]  ;;  %v2494_v8 = vld [vmem:[%s4333_s0 + $0x348] sm:$0xf]  ;;  %v2812_v12 = vld [vmem:[%s4333_s0 + $0x354] sm:$0xf0] }
  0x62   :  { %843 = vmatpush.bf16.msrb.mxu3 %v3054_v51  ;;  %817 = vmatpush.bf16.msrb.mxu1 %v3046_v48  ;;  %v3635_v48 = vor.u32 %v2797_v17, %v2409_v21  ;;  %v2391_v51 = vld [vmem:[%s4333_s0 + $0x2c0] sm:$0xf]  ;;  %v3713_v17 = vor.u32 %v2792_v55, %v2383_v30  ;;  %v2811_v30 = vld [vmem:[%s4333_s0 + $0x34c] sm:$0xf0]  ;;  %v2809_v55 = vld [vmem:[%s4333_s0 + $0x344] sm:$0xf] }
  0x63   :  { %830 = vmatpush.bf16.msrb.mxu2 %v3048_v49  ;;  %2331 = vmatmul.msk.bf16.vlgmr.msrb.gmra.mxu0 %vm131_vm0, %v2245_v3  ;;  %v3637_v49 = vor.u32 %v2800_v29, %v2415_v25  ;;  %v3665_v39 = vor.u32 %v2795_v57, %v2391_v51  ;;  %v2359_v21 = vld [vmem:[%s4333_s0 + $0x280] sm:$0xf]  ;;  %v2787_v25 = vld [vmem:[%s4333_s0 + $0x28c] sm:$0xf0]  ;;  %v2785_v29 = vld [vmem:[%s4333_s0 + $0x284] sm:$0xf] }
  0x64   :  { %858 = vmatpush.bf16.msra.mxu0 %v3330_v1  ;;  %v2367_v51 = vld [vmem:[%s4333_s0 + $0x288] sm:$0xf]  ;;  %v2788_v57 = vld [vmem:[%s4333_s0 + $0x294] sm:$0xf0]  ;;  %v3740_v60 = vor.u32 %v2787_v25, %v2359_v21  ;;  %v3744_v27 = vor.u32 %v2785_v29, %v2361_v44  ;;  %v4342_v21 = vld [vmem:[#allocation2_spill] sm:$0xff]  ;;  %v2499_v29 = vor.u32 %v2810_v56, %v2496_v15 }
  0x65   :  { %2332 = vmatmul.msk.bf16.vlgmr.msrb.gmra.mxu1 %vm131_vm0, %v2245_v3  ;;  %2334 = vmatmul.msk.bf16.vlgmr.msrb.gmra.mxu3 %vm131_vm0, %v2245_v3  ;;  %v3746_v26 = vor.u32 %v2788_v57, %v2367_v51  ;;  %v2806_v51 = vld [vmem:[%s4333_s0 + $0x32c] sm:$0xf]  ;;  %v2480_v57 = vld [vmem:[%s4333_s0 + $0x338] sm:$0xf0] }
  0x66   :  { %897 = vmatpush.bf16.msra.mxu3 %v3304_v53  ;;  %871 = vmatpush.bf16.msra.mxu1 %v3333_v2  ;;  %v2802_v15 = vld [vmem:[%s4333_s0 + $0x30c] sm:$0xf] }
  0x67   :  { %884 = vmatpush.bf16.msra.mxu2 %v3335_v4 }
  0x68   :  { %859 = vmatpush.bf16.msra.mxu0 %v3367_v24  ;;  %2333 = vmatmul.msk.bf16.vlgmr.msrb.gmra.mxu2 %vm131_vm0, %v2245_v3  ;;  %v3698_v3 = vor.u32 %v2790_v43, %v2385_v42  ;;  %v2340_v43 = vld [vmem:[%s4334_s1 + $0xe] sm:$0x3]  ;;  %v2426_v42 = vld [vmem:[%s4334_s1 + $0x12] sm:$0x3] }
  0x6a   :  { %898 = vmatpush.bf16.msra.mxu3 %v3338_v6  ;;  %872 = vmatpush.bf16.msra.mxu1 %v3382_v31 }
  0x6b   :  { %885 = vmatpush.bf16.msra.mxu2 %v3384_v36 }
  0x6c   :  { %860 = vmatpush.bf16.msra.mxu0 %v3406_v47 }
  0x6e   :  { %899 = vmatpush.bf16.msra.mxu3 %v3393_v41  ;;  %873 = vmatpush.bf16.msra.mxu1 %v3433_v10 }
  0x6f   :  { %886 = vmatpush.bf16.msra.mxu2 %v3435_v11 }
  0x70   :  { %861 = vmatpush.bf16.msra.mxu0 %v3459_v37 }
  0x72   :  { %900 = vmatpush.bf16.msra.mxu3 %v3447_v22  ;;  %874 = vmatpush.bf16.msra.mxu1 %v3478_v62 }
  0x73   :  { %887 = vmatpush.bf16.msra.mxu2 %v3480_v9  ;;  %2336 = vmatmul.msk.bf16.vlgmr.msra.gmra.mxu0 %vm131_vm0, %v2335_v0 }
  0x74   :  { %1016 = vmatpush.bf16.msrb.mxu0 %v3625_v34 }
  0x75   :  { %2337 = vmatmul.msk.bf16.vlgmr.msra.gmra.mxu1 %vm131_vm0, %v2335_v0  ;;  %2339 = vmatmul.msk.bf16.vlgmr.msra.gmra.mxu3 %vm131_vm0, %v2335_v0 }
  0x76   :  { %1055 = vmatpush.bf16.msrb.mxu3 %v3621_v33  ;;  %1029 = vmatpush.bf16.msrb.mxu1 %v3635_v48 }
  0x77   :  { %1042 = vmatpush.bf16.msrb.mxu2 %v3637_v49 }
  0x78   :  { %1017 = vmatpush.bf16.msrb.mxu0 %v3665_v39  ;;  %2338 = vmatmul.msk.bf16.vlgmr.msra.gmra.mxu2 %vm131_vm0, %v2335_v0 }
  0x7a   :  { %1056 = vmatpush.bf16.msrb.mxu3 %v3661_v28  ;;  %1030 = vmatpush.bf16.msrb.mxu1 %v3675_v46 }
  0x7b   :  { %1043 = vmatpush.bf16.msrb.mxu2 %v3677_v52 }
  0x7c   :  { %1018 = vmatpush.bf16.msrb.mxu0 %v3701_v7 }
  0x7e   :  { %1057 = vmatpush.bf16.msrb.mxu3 %v3698_v3  ;;  %1031 = vmatpush.bf16.msrb.mxu1 %v3711_v16 }
  0x7f   :  { %1044 = vmatpush.bf16.msrb.mxu2 %v3713_v17 }
  0x80   :  { %1019 = vmatpush.bf16.msrb.mxu0 %v3740_v60 }
  0x82   :  { %1058 = vmatpush.bf16.msrb.mxu3 %v3725_v38  ;;  %1032 = vmatpush.bf16.msrb.mxu1 %v3744_v27 }
  0x83   :  { %1045 = vmatpush.bf16.msrb.mxu2 %v3746_v26  ;;  %2421 = vmatmul.msk.bf16.vlgmr.msrb.gmra.mxu0 %vm131_vm0, %v2340_v43 }
  0x84   :  { %1079 = vmatpush.bf16.msra.mxu0 %v3330_v1 }
  0x85   :  { %2422 = vmatmul.msk.bf16.vlgmr.msrb.gmra.mxu1 %vm131_vm0, %v2340_v43  ;;  %2424 = vmatmul.msk.bf16.vlgmr.msrb.gmra.mxu3 %vm131_vm0, %v2340_v43 }
  0x86   :  { %1118 = vmatpush.bf16.msra.mxu3 %v3304_v53  ;;  %1092 = vmatpush.bf16.msra.mxu1 %v3333_v2 }
  0x87   :  { %1105 = vmatpush.bf16.msra.mxu2 %v3335_v4 }
  0x88   :  { %1080 = vmatpush.bf16.msra.mxu0 %v3367_v24  ;;  %2423 = vmatmul.msk.bf16.vlgmr.msrb.gmra.mxu2 %vm131_vm0, %v2340_v43 }
  0x8a   :  { %1119 = vmatpush.bf16.msra.mxu3 %v3338_v6  ;;  %1093 = vmatpush.bf16.msra.mxu1 %v3382_v31 }
  0x8b   :  { %1106 = vmatpush.bf16.msra.mxu2 %v3384_v36 }
  0x8c   :  { %1081 = vmatpush.bf16.msra.mxu0 %v3406_v47 }
  0x8e   :  { %1120 = vmatpush.bf16.msra.mxu3 %v3393_v41  ;;  %1094 = vmatpush.bf16.msra.mxu1 %v3433_v10 }
  0x8f   :  { %1107 = vmatpush.bf16.msra.mxu2 %v3435_v11 }
  0x90   :  { %1082 = vmatpush.bf16.msra.mxu0 %v3459_v37 }
  0x92   :  { %1121 = vmatpush.bf16.msra.mxu3 %v3447_v22  ;;  %1095 = vmatpush.bf16.msra.mxu1 %v3478_v62 }
  0x93   :  { %1108 = vmatpush.bf16.msra.mxu2 %v3480_v9  ;;  %2427 = vmatmul.msk.bf16.vlgmr.msra.gmra.mxu0 %vm131_vm0, %v2426_v42 }
  0x94   :  { %1134 = vmatpush.bf16.msrb.mxu0 %v3163_v50  ;;  %v2814_v50 = vld [vmem:[%s4333_s0 + $0x36c] sm:$0xf] }
  0x95   :  { %2428 = vmatmul.msk.bf16.vlgmr.msra.gmra.mxu1 %vm131_vm0, %v2426_v42  ;;  %2430 = vmatmul.msk.bf16.vlgmr.msra.gmra.mxu3 %vm131_vm0, %v2426_v42 }
  0x96   :  { %1173 = vmatpush.bf16.msrb.mxu3 %v3171_v54  ;;  %1147 = vmatpush.bf16.msrb.mxu1 %v3185_v61  ;;  %v2512_v54 = vld [vmem:[%s4333_s0 + $0x378] sm:$0xf0]  ;;  %v3798_v61 = vpop.f32.mrf.mxu0 }
  0x97   :  { %1160 = vmatpush.bf16.msrb.mxu2 %v3191_v63  ;;  %v2502_v63 = vld [vmem:[%s4333_s0 + $0x360] sm:$0xf] }
  0x98   :  { %1135 = vmatpush.bf16.msrb.mxu0 %v3221_v13  ;;  %v2813_v13 = vld [vmem:[%s4333_s0 + $0x364] sm:$0xf]  ;;  %2429 = vmatmul.msk.bf16.vlgmr.msra.gmra.mxu2 %vm131_vm0, %v2426_v42  ;;  %v3854_v25 = vpop.f32.mrf.mxu2  ;;  %v3862_v0 = vpop.f32.mrf.mxu3  ;;  %v2495_v42 = vor.u32 %v2812_v12, %v2494_v8  ;;  %v2462_v8 = vld [vmem:[%s4333_s0 + $0x308] sm:$0xf] }
  0x9a   :  { %1174 = vmatpush.bf16.msrb.mxu3 %v3206_v5  ;;  %1148 = vmatpush.bf16.msrb.mxu1 %v3223_v14  ;;  %v2815_v5 = vld [vmem:[%s4333_s0 + $0x36c] sm:$0xf0]  ;;  %v3811_v14 = vpop.f32.mrf.mxu1 }
  0x9b   :  { %1161 = vmatpush.bf16.msrb.mxu2 %v3230_v18  ;;  %v2504_v18 = vld [vmem:[%s4333_s0 + $0x370] sm:$0xf0] }
  0x9c   :  { %1136 = vmatpush.bf16.msrb.mxu0 %v3267_v32  ;;  %v2816_v32 = vld [vmem:[%s4333_s0 + $0x374] sm:$0xf0]  ;;  %v2507_v19 = vor.u32 %v2813_v13, %v2504_v18  ;;  %v2472_v13 = vld [vmem:[%s4333_s0 + $0x330] sm:$0xf0]  ;;  %v2478_v18 = vld [vmem:[%s4333_s0 + $0x328] sm:$0xf] }
  0x9e   :  { %1175 = vmatpush.bf16.msrb.mxu3 %v3243_v23  ;;  %1149 = vmatpush.bf16.msrb.mxu1 %v3269_v35  ;;  %v2510_v23 = vld [vmem:[%s4333_s0 + $0x368] sm:$0xf]  ;;  %v2515_v35 = vor.u32 %v2814_v50, %v2512_v54  ;;  %v146_v43 = vpop.f32.mrf.mxu0  ;;  %v2470_v50 = vld [vmem:[%s4333_s0 + $0x320] sm:$0xf]  ;;  %v2807_v54 = vld [vmem:[%s4333_s0 + $0x32c] sm:$0xf0] }
  0x9f   :  { %1162 = vmatpush.bf16.msrb.mxu2 %v3281_v40  ;;  %v2503_v40 = vor.u32 %v2815_v5, %v2502_v63  ;;  %v2511_v20 = vor.u32 %v2816_v32, %v2510_v23  ;;  %v2805_v63 = vld [vmem:[%s4333_s0 + $0x324] sm:$0xf]  ;;  %v2808_v23 = vld [vmem:[%s4333_s0 + $0x334] sm:$0xf0]  ;;  %v2483_v32 = vor.u32 %v2806_v51, %v2480_v57  ;;  %v2597_v51 = vld [vmem:[%s4333_s0 + $0x3f8] sm:$0xf0] }
  0xa0   :  { %1137 = vmatpush.bf16.msrb.mxu0 %v3317_v58  ;;  %v2488_v58 = vld [vmem:[%s4333_s0 + $0x350] sm:$0xf0]  ;;  %v2479_v56 = vor.u32 %v2808_v23, %v2478_v18  ;;  %v172_v12 = vpop.f32.mrf.mxu2  ;;  %v185_v57 = vpop.f32.mrf.mxu3  ;;  %v2832_v18 = vld [vmem:[%s4333_s0 + $0x3f4] sm:$0xf0] }
  0xa1   :  { %v2579_v12 = vld [vmem:[%s4333_s0 + $0x3c8] sm:$0xf] }
  0xa2   :  { %1176 = vmatpush.bf16.msrb.mxu3 %v3293_v45  ;;  %v2486_v45 = vld [vmem:[%s4333_s0 + $0x340] sm:$0xf]  ;;  %1150 = vmatpush.bf16.msrb.mxu1 %v3319_v59  ;;  %v2491_v59 = vor.u32 %v2809_v55, %v2488_v58  ;;  %v159_v5 = vpop.f32.mrf.mxu1  ;;  %v2801_v55 = vld [vmem:[%s4333_s0 + $0x304] sm:$0xf]  ;;  %v2456_v58 = vld [vmem:[%s4333_s0 + $0x310] sm:$0xf0] }
  0xa3   :  { %1163 = vmatpush.bf16.msrb.mxu2 %v4342_v21  ;;  %v2487_v44 = vor.u32 %v2811_v30, %v2486_v45  ;;  %v2803_v45 = vld [vmem:[%s4333_s0 + $0x30c] sm:$0xf0]  ;;  %v2589_v5 = vld [vmem:[%s4333_s0 + $0x3f0] sm:$0xf0]  ;;  %v2459_v23 = vor.u32 %v2801_v55, %v2456_v58  ;;  %v2825_v58 = vld [vmem:[%s4333_s0 + $0x3c4] sm:$0xf] }
  0xa4   :  { %1288 = vmatpush.bf16.msra.mxu0 %v2503_v40  ;;  %v2475_v40 = vor.u32 %v2805_v63, %v2472_v13  ;;  %v2425_v30 = vld [vmem:[%s4334_s1 + $0x10] sm:$0x3]  ;;  %v2595_v13 = vld [vmem:[%s4333_s0 + $0x3e8] sm:$0xf] }
  0xa5   :  { %2431 = vmatmul.msk.bf16.vlgmr.msrb.gmra.mxu0 %vm131_vm0, %v2425_v30  ;;  %2432 = vmatmul.msk.bf16.vlgmr.msrb.gmra.mxu1 %vm131_vm0, %v2425_v30  ;;  %v2827_v55 = vld [vmem:[%s4333_s0 + $0x3cc] sm:$0xf0] }
  0xa6   :  { %1327 = vmatpush.bf16.msra.mxu3 %v2515_v35  ;;  %1301 = vmatpush.bf16.msra.mxu1 %v2507_v19  ;;  %v2471_v35 = vor.u32 %v2807_v54, %v2470_v50  ;;  %v2464_v19 = vld [vmem:[%s4333_s0 + $0x318] sm:$0xf0]  ;;  %v3915_v43 = vpop.f32.mrf.mxu0  ;;  %v2831_v50 = vld [vmem:[%s4333_s0 + $0x3ec] sm:$0xf0]  ;;  %v2829_v54 = vld [vmem:[%s4333_s0 + $0x3e4] sm:$0xf] }
  0xa7   :  { %1314 = vmatpush.bf16.msra.mxu2 %v2511_v20  ;;  %v2454_v20 = vld [vmem:[%s4333_s0 + $0x300] sm:$0xf]  ;;  %v2467_v21 = vor.u32 %v2802_v15, %v2464_v19  ;;  %v2581_v15 = vld [vmem:[%s4333_s0 + $0x3d8] sm:$0xf0]  ;;  %v3949_v19 = vor.u32 %v2829_v54, %v2589_v5  ;;  %2434 = vmatmul.msk.bf16.vlgmr.msrb.gmra.mxu3 %vm131_vm0, %v2425_v30  ;;  %v2823_v5 = vld [vmem:[%s4333_s0 + $0x3ac] sm:$0xf0] }
  0xa8   :  { %1289 = vmatpush.bf16.msra.mxu0 %v2487_v44  ;;  %v2830_v44 = vld [vmem:[%s4333_s0 + $0x3ec] sm:$0xf]  ;;  %2433 = vmatmul.msk.bf16.vlgmr.msrb.gmra.mxu2 %vm131_vm0, %v2425_v30  ;;  %v2555_v54 = vld [vmem:[%s4333_s0 + $0x3a0] sm:$0xf] }
  0xaa   :  { %1328 = vmatpush.bf16.msra.mxu3 %v2499_v29  ;;  %1302 = vmatpush.bf16.msra.mxu1 %v2491_v59  ;;  %v2804_v29 = vld [vmem:[%s4333_s0 + $0x314] sm:$0xf0]  ;;  %v2455_v59 = vor.u32 %v2803_v45, %v2454_v20  ;;  %v3926_v63 = vpop.f32.mrf.mxu1  ;;  %v3951_v20 = vor.u32 %v2832_v18, %v2595_v13  ;;  %v2571_v45 = vld [vmem:[%s4333_s0 + $0x3c0] sm:$0xf]  ;;  %v2821_v13 = vld [vmem:[%s4333_s0 + $0x3a4] sm:$0xf] }
  0xab   :  { %1315 = vmatpush.bf16.msra.mxu2 %v2495_v42  ;;  %v2587_v42 = vld [vmem:[%s4333_s0 + $0x3e0] sm:$0xf]  ;;  %v3977_v30 = vor.u32 %v2827_v55, %v2571_v45  ;;  %v3985_v57 = vpop.f32.mrf.mxu2  ;;  %v4017_v55 = vor.u32 %v2823_v5, %v2555_v54  ;;  %v2817_v54 = vld [vmem:[%s4333_s0 + $0x384] sm:$0xf] }
  0xac   :  { %1290 = vmatpush.bf16.msra.mxu0 %v2471_v35  ;;  %v3938_v35 = vor.u32 %v2830_v44, %v2597_v51  ;;  %v2822_v44 = vld [vmem:[%s4333_s0 + $0x3ac] sm:$0xf]  ;;  %v2565_v51 = vld [vmem:[%s4333_s0 + $0x3b8] sm:$0xf0] }
  0xad   :  { %v4015_v45 = vor.u32 %v2822_v44, %v2565_v51  ;;  %4345 = vst [vmem:[#allocation4_spill] sm:$0xff] %v4017_v55  ;;  %v2539_v44 = vld [vmem:[%s4333_s0 + $0x380] sm:$0xf]  ;;  %v2819_v51 = vld [vmem:[%s4333_s0 + $0x38c] sm:$0xf0] }
  0xae   :  { %1329 = vmatpush.bf16.msra.mxu3 %v2483_v32  ;;  %1303 = vmatpush.bf16.msra.mxu1 %v2475_v40  ;;  %v2463_v32 = vor.u32 %v2804_v29, %v2462_v8  ;;  %v3940_v40 = vor.u32 %v2831_v50, %v2587_v42  ;;  %v2573_v8 = vld [vmem:[%s4333_s0 + $0x3d0] sm:$0xf0]  ;;  %v281_v18 = vpop.f32.mrf.mxu0 }
  0xaf   :  { %1316 = vmatpush.bf16.msra.mxu2 %v2479_v56  ;;  %v2826_v56 = vld [vmem:[%s4333_s0 + $0x3cc] sm:$0xf]  ;;  %v3991_v42 = vor.u32 %v2825_v58, %v2573_v8  ;;  %4344 = vst [vmem:[#allocation3_spill] sm:$0xff] %v4015_v45  ;;  %v2547_v18 = vld [vmem:[%s4333_s0 + $0x388] sm:$0xf] }
  0xb0   :  { %1291 = vmatpush.bf16.msra.mxu0 %v2455_v59  ;;  %v3975_v29 = vor.u32 %v2826_v56, %v2581_v15  ;;  %v3987_v59 = vpop.f32.mrf.mxu3  ;;  %v2563_v56 = vld [vmem:[%s4333_s0 + $0x3a8] sm:$0xf]  ;;  %v2824_v15 = vld [vmem:[%s4333_s0 + $0x3b4] sm:$0xf0] }
  0xb1   :  { %v4023_v8 = vor.u32 %v2824_v15, %v2563_v56  ;;  %v2435_v15 = vld [vmem:[%s4334_s1 + $0x14] sm:$0x3] }
  0xb2   :  { %1330 = vmatpush.bf16.msra.mxu3 %v2467_v21  ;;  %v2828_v21 = vld [vmem:[%s4333_s0 + $0x3d4] sm:$0xf0]  ;;  %1304 = vmatpush.bf16.msra.mxu1 %v2459_v23  ;;  %v294_v23 = vpop.f32.mrf.mxu1 }
  0xb3   :  { %1317 = vmatpush.bf16.msra.mxu2 %v2463_v32  ;;  %v3993_v50 = vor.u32 %v2828_v21, %v2579_v12  ;;  %v2557_v32 = vld [vmem:[%s4333_s0 + $0x3b0] sm:$0xf0]  ;;  %v2818_v12 = vld [vmem:[%s4333_s0 + $0x38c] sm:$0xf]  ;;  %v2549_v21 = vld [vmem:[%s4333_s0 + $0x398] sm:$0xf0] }
  0xb4   :  { %1446 = vmatpush.bf16.msrb.mxu0 %v3940_v40  ;;  %v4021_v58 = vor.u32 %v2821_v13, %v2557_v32  ;;  %v4042_v5 = vor.u32 %v2818_v12, %v2549_v21  ;;  %v2541_v13 = vld [vmem:[%s4333_s0 + $0x390] sm:$0xf0]  ;;  %v2820_v23 = vld [vmem:[%s4333_s0 + $0x394] sm:$0xf0]  ;;  %v307_v32 = vpop.f32.mrf.mxu2  ;;  %v4058_v12 = vor.u32 %v2819_v51, %v2539_v44 }
  0xb5   :  { %4343 = vst [vmem:[#allocation2_spill] sm:$0xff] %v3993_v50  ;;  %2516 = vmatmul.msk.bf16.vlgmr.msra.gmra.mxu0 %vm131_vm0, %v2435_v15  ;;  %2517 = vmatmul.msk.bf16.vlgmr.msra.gmra.mxu1 %vm131_vm0, %v2435_v15 }
  0xb6   :  { %1485 = vmatpush.bf16.msrb.mxu3 %v3938_v35  ;;  %1459 = vmatpush.bf16.msrb.mxu1 %v3949_v19  ;;  %v433_v21 = vpop.f32.mrf.mxu0  ;;  %v4347_v32 = vld [vmem:[#allocation3_spill] sm:$0xff] }
  0xb7   :  { %1472 = vmatpush.bf16.msrb.mxu2 %v3951_v20  ;;  %2519 = vmatmul.msk.bf16.vlgmr.msra.gmra.mxu3 %vm131_vm0, %v2435_v15 }
  0xb8   :  { %1447 = vmatpush.bf16.msrb.mxu0 %v3977_v30  ;;  %v320_v56 = vpop.f32.mrf.mxu3  ;;  %2518 = vmatmul.msk.bf16.vlgmr.msra.gmra.mxu2 %vm131_vm0, %v2435_v15  ;;  %v2847_v15 = vld [vmem:[%s4333_s0 + $0x46c] sm:$0xf0] }
  0xb9   :  { %v4348_v56 = vld [vmem:[#allocation4_spill] sm:$0xff] }
  0xba   :  { %1486 = vmatpush.bf16.msrb.mxu3 %v3975_v29  ;;  %1460 = vmatpush.bf16.msrb.mxu1 %v3991_v42 }
  0xbb   :  { %1473 = vmatpush.bf16.msrb.mxu2 %v3993_v50  ;;  %v4062_v50 = vor.u32 %v2820_v23, %v2547_v18  ;;  %v4084_v18 = vpop.permute.xlu0 %1834 }
  0xbc   :  { %1448 = vmatpush.bf16.msrb.mxu0 %v4017_v55  ;;  %v446_v55 = vpop.f32.mrf.mxu1  ;;  %v459_v44 = vpop.f32.mrf.mxu2 }
  0xbe   :  { %1487 = vmatpush.bf16.msrb.mxu3 %v4015_v45  ;;  %1461 = vmatpush.bf16.msrb.mxu1 %v4021_v58  ;;  %v4060_v45 = vor.u32 %v2817_v54, %v2541_v13  ;;  %v435_v54 = vpop.f32.mrf.mxu0 }
  0xbf   :  { %1474 = vmatpush.bf16.msrb.mxu2 %v4023_v8  ;;  %v2848_v54 = vld [vmem:[%s4333_s0 + $0x474] sm:$0xf0] }
  0xc0   :  { %1449 = vmatpush.bf16.msrb.mxu0 %v4058_v12  ;;  %v472_v51 = vpop.f32.mrf.mxu3 }
  0xc2   :  { %1488 = vmatpush.bf16.msrb.mxu3 %v4042_v5  ;;  %1462 = vmatpush.bf16.msrb.mxu1 %v4060_v45 }
  0xc3   :  { %1475 = vmatpush.bf16.msrb.mxu2 %v4062_v50 }
  0xc4   :  { %1509 = vmatpush.bf16.msra.mxu0 %v3625_v34  ;;  %v448_v13 = vpop.f32.mrf.mxu1  ;;  %v293_v34 = vadd.f32 %v3926_v63, %v3811_v14 }
  0xc6   :  { %1548 = vmatpush.bf16.msra.mxu3 %v3621_v33  ;;  %1522 = vmatpush.bf16.msra.mxu1 %v3635_v48  ;;  %v280_v33 = vadd.f32 %v3915_v43, %v3798_v61 }
  0xc7   :  { %1535 = vmatpush.bf16.msra.mxu2 %v3637_v49  ;;  %v477_v49 = vadd.f32 %v446_v55, %v293_v34  ;;  %v2842_v34 = vld [vmem:[%s4333_s0 + $0x44c] sm:$0xf] }
  0xc8   :  { %1510 = vmatpush.bf16.msra.mxu0 %v3665_v39  ;;  %v476_v48 = vadd.f32 %v433_v21, %v280_v33  ;;  %v474_v39 = vpop.f32.mrf.mxu3  ;;  %v2845_v21 = vld [vmem:[%s4333_s0 + $0x464] sm:$0xf] }
  0xc9   :  { %v2843_v39 = vld [vmem:[%s4333_s0 + $0x44c] sm:$0xf0] }
  0xca   :  { %1549 = vmatpush.bf16.msra.mxu3 %v3661_v28  ;;  %1523 = vmatpush.bf16.msra.mxu1 %v3675_v46  ;;  %v461_v28 = vpop.f32.mrf.mxu2  ;;  %v2520_v46 = vld [vmem:[%s4334_s1 + $0x16] sm:$0x3] }
  0xcb   :  { %1536 = vmatpush.bf16.msra.mxu2 %v3677_v52  ;;  %v591_v52 = vpop.f32.mrf.mxu0  ;;  %2601 = vmatmul.msk.bf16.vlgmr.msrb.gmra.mxu0 %vm131_vm0, %v2520_v46 }
  0xcc   :  { %1511 = vmatpush.bf16.msra.mxu0 %v3701_v7  ;;  %v604_v61 = vpop.f32.mrf.mxu1  ;;  %v634_v14 = vadd.f32 %v591_v52, %v476_v48  ;;  %2602 = vmatmul.msk.bf16.vlgmr.msrb.gmra.mxu1 %vm131_vm0, %v2520_v46  ;;  %v306_v7 = vadd.f32 %v3985_v57, %v3854_v25  ;;  %v2681_v48 = vld [vmem:[%s4333_s0 + $0x458] sm:$0xf0]  ;;  %v2679_v52 = vld [vmem:[%s4333_s0 + $0x448] sm:$0xf] }
  0xcd   :  { %v635_v43 = vadd.f32 %v604_v61, %v477_v49  ;;  %2603 = vmatmul.msk.bf16.vlgmr.msrb.gmra.mxu2 %vm131_vm0, %v2520_v46  ;;  %2604 = vmatmul.msk.bf16.vlgmr.msrb.gmra.mxu3 %vm131_vm0, %v2520_v46  ;;  %v2841_v46 = vld [vmem:[%s4333_s0 + $0x444] sm:$0xf]  ;;  %v2844_v61 = vld [vmem:[%s4333_s0 + $0x454] sm:$0xf0] }
  0xce   :  { %1550 = vmatpush.bf16.msra.mxu3 %v3698_v3  ;;  %1524 = vmatpush.bf16.msra.mxu1 %v3711_v16  ;;  %v319_v16 = vadd.f32 %v3987_v59, %v3862_v0 }
  0xcf   :  { %1537 = vmatpush.bf16.msra.mxu2 %v3713_v17  ;;  %v1838_v3 = vadd.f32 %v4084_v18, %v635_v43  ;;  %v1837_v17 = vadd.f32 %v4084_v18, %v634_v14  ;;  %v2684_v14 = vor.u32 %v2842_v34, %v2681_v48  ;;  %v2620_v34 = vld [vmem:[%s4334_s1 + $0x1e] sm:$0x3] }
  0xd0   :  { %1512 = vmatpush.bf16.msra.mxu0 %v3740_v60  ;;  %v479_v63 = vadd.f32 %v472_v51, %v319_v16  ;;  %v630_v25 = vpop.f32.mrf.mxu3 }
  0xd1   :  { %2851 = vtanh.f32 %v1838_v3  ;;  %v2838_v3 = vld [vmem:[%s4333_s0 + $0x42c] sm:$0xf] }
  0xd2   :  { %1551 = vmatpush.bf16.msra.mxu3 %v3725_v38  ;;  %1525 = vmatpush.bf16.msra.mxu1 %v3744_v27  ;;  %v478_v38 = vadd.f32 %v459_v44, %v306_v7  ;;  %v617_v60 = vpop.f32.mrf.mxu2  ;;  %v637_v57 = vadd.f32 %v630_v25, %v479_v63  ;;  %2853 = vtanh.f32 %v1837_v17  ;;  %v2665_v7 = vld [vmem:[%s4333_s0 + $0x438] sm:$0xf0]  ;;  %v2839_v63 = vld [vmem:[%s4333_s0 + $0x42c] sm:$0xf0] }
  0xd3   :  { %1538 = vmatpush.bf16.msra.mxu2 %v3746_v26  ;;  %v593_v59 = vpop.f32.mrf.mxu0 }
  0xd4   :  { %1564 = vmatpush.bf16.msrb.mxu0 %v3330_v1  ;;  %v636_v0 = vadd.f32 %v617_v60, %v478_v38  ;;  %v606_v27 = vpop.f32.mrf.mxu1  ;;  %v1840_v26 = vadd.f32 %v4084_v18, %v637_v57  ;;  %v2655_v38 = vld [vmem:[%s4333_s0 + $0x420] sm:$0xf]  ;;  %v2837_v60 = vld [vmem:[%s4333_s0 + $0x424] sm:$0xf]  ;;  %v2657_v57 = vld [vmem:[%s4333_s0 + $0x430] sm:$0xf0] }
  0xd5   :  { %v2663_v59 = vld [vmem:[%s4333_s0 + $0x428] sm:$0xf]  ;;  %v2840_v27 = vld [vmem:[%s4333_s0 + $0x434] sm:$0xf0] }
  0xd6   :  { %1603 = vmatpush.bf16.msrb.mxu3 %v3304_v53  ;;  %1577 = vmatpush.bf16.msrb.mxu1 %v3333_v2  ;;  %v1839_v53 = vadd.f32 %v4084_v18, %v636_v0  ;;  %2855 = vtanh.f32 %v1840_v26  ;;  %v2668_v26 = vor.u32 %v2838_v3, %v2665_v7 }
  0xd7   :  { %1590 = vmatpush.bf16.msrb.mxu2 %v3335_v4  ;;  %v2852_v1 = vpop.eup %2851 }
  0xd8   :  { %1565 = vmatpush.bf16.msrb.mxu0 %v3367_v24  ;;  %v1885_v2 = vrot.slane %v2852_v1, 4  ;;  %v2854_v4 = vpop.eup %2853  ;;  %2857 = vtanh.f32 %v1839_v53  ;;  %v632_v24 = vpop.f32.mrf.mxu3  ;;  %v2656_v53 = vor.u32 %v2839_v63, %v2655_v38  ;;  %v2660_v1 = vor.u32 %v2837_v60, %v2657_v57 }
  0xd9   :  { %v2835_v24 = vld [vmem:[%s4333_s0 + $0x40c] sm:$0xf0] }
  0xda   :  { %1604 = vmatpush.bf16.msrb.mxu3 %v3338_v6  ;;  %1578 = vmatpush.bf16.msrb.mxu1 %v3382_v31  ;;  %v1894_v6 = vsel %vm1893_vm1, %v2854_v4, %v1885_v2  ;;  %v619_v55 = vpop.f32.mrf.mxu2  ;;  %v2606_v31 = vld [vmem:[%s4334_s1 + $0x1a] sm:$0x3]  ;;  %v2664_v2 = vor.u32 %v2840_v27, %v2663_v59  ;;  %v2834_v4 = vld [vmem:[%s4333_s0 + $0x40c] sm:$0xf] }
  0xdb   :  { %1591 = vmatpush.bf16.msrb.mxu2 %v3384_v36  ;;  %1910 = vst [vmem:[%s4336_s3] sm:$0x77] %v1894_v6  ;;  %v4128_v36 = vpop.f32.mrf.mxu0  ;;  %2607 = vmatmul.msk.bf16.vlgmr.msra.gmra.mxu0 %vm131_vm0, %v2606_v31  ;;  %v2649_v6 = vld [vmem:[%s4333_s0 + $0x418] sm:$0xf0]  ;;  %v2639_v55 = vld [vmem:[%s4333_s0 + $0x400] sm:$0xf] }
  0xdc   :  { %1566 = vmatpush.bf16.msrb.mxu0 %v3406_v47  ;;  %v2856_v47 = vpop.eup %2855  ;;  %2608 = vmatmul.msk.bf16.vlgmr.msra.gmra.mxu1 %vm131_vm0, %v2606_v31 }
  0xdd   :  { %2609 = vmatmul.msk.bf16.vlgmr.msra.gmra.mxu2 %vm131_vm0, %v2606_v31  ;;  %2610 = vmatmul.msk.bf16.vlgmr.msra.gmra.mxu3 %vm131_vm0, %v2606_v31  ;;  %v2833_v31 = vld [vmem:[%s4333_s0 + $0x404] sm:$0xf] }
  0xde   :  { %1605 = vmatpush.bf16.msrb.mxu3 %v3393_v41  ;;  %1579 = vmatpush.bf16.msrb.mxu1 %v3433_v10  ;;  %v4130_v41 = vpop.f32.mrf.mxu1  ;;  %v1886_v10 = vrot.slane %v2856_v47, 4  ;;  %v2652_v47 = vor.u32 %v2834_v4, %v2649_v6 }
  0xdf   :  { %1592 = vmatpush.bf16.msrb.mxu2 %v3435_v11  ;;  %v2858_v11 = vpop.eup %2857 }
  0xe0   :  { %1567 = vmatpush.bf16.msrb.mxu0 %v3459_v37  ;;  %v1895_v23 = vsel %vm1893_vm1, %v2858_v11, %v1886_v10  ;;  %v4148_v37 = vpop.f32.mrf.mxu3  ;;  %v2641_v10 = vld [vmem:[%s4333_s0 + $0x410] sm:$0xf0]  ;;  %v2647_v11 = vld [vmem:[%s4333_s0 + $0x408] sm:$0xf] }
  0xe1   :  { %1911 = vst [vmem:[%s4336_s3 + $0x8] sm:$0x77] %v1895_v23  ;;  %v2836_v23 = vld [vmem:[%s4333_s0 + $0x414] sm:$0xf0] }
  0xe2   :  { %1606 = vmatpush.bf16.msrb.mxu3 %v3447_v22  ;;  %1580 = vmatpush.bf16.msrb.mxu1 %v3478_v62  ;;  %v4146_v22 = vpop.f32.mrf.mxu2 }
  0xe3   :  { %1593 = vmatpush.bf16.msrb.mxu2 %v3480_v9  ;;  %v753_v62 = vpop.f32.mrf.mxu0 }
  0xe4   :  { %1621 = vmatpush.bf16.msra.mxu0 %v3940_v40  ;;  %v2605_v40 = vld [vmem:[%s4334_s1 + $0x18] sm:$0x3] }
  0xe6   :  { %1660 = vmatpush.bf16.msra.mxu3 %v3938_v35  ;;  %1634 = vmatpush.bf16.msra.mxu1 %v3949_v19  ;;  %v766_v9 = vpop.f32.mrf.mxu1  ;;  %v4346_v35 = vld [vmem:[#allocation2_spill] sm:$0xff]  ;;  %v2846_v19 = vld [vmem:[%s4333_s0 + $0x46c] sm:$0xf] }
  0xe7   :  { %1647 = vmatpush.bf16.msra.mxu2 %v3951_v20  ;;  %v2697_v20 = vld [vmem:[%s4333_s0 + $0x478] sm:$0xf0] }
  0xe8   :  { %1622 = vmatpush.bf16.msra.mxu0 %v3977_v30  ;;  %v792_v30 = vpop.f32.mrf.mxu3  ;;  %v2700_v13 = vor.u32 %v2846_v19, %v2697_v20  ;;  %v2644_v19 = vor.u32 %v2833_v31, %v2641_v10  ;;  %v2648_v20 = vor.u32 %v2836_v23, %v2647_v11 }
  0xea   :  { %1661 = vmatpush.bf16.msra.mxu3 %v3975_v29  ;;  %1635 = vmatpush.bf16.msra.mxu1 %v3991_v42  ;;  %v779_v29 = vpop.f32.mrf.mxu2  ;;  %v2687_v42 = vld [vmem:[%s4333_s0 + $0x460] sm:$0xf] }
  0xeb   :  { %1648 = vmatpush.bf16.msra.mxu2 %v4346_v35  ;;  %v4178_v44 = vpop.f32.mrf.mxu0  ;;  %2611 = vmatmul.msk.bf16.vlgmr.msrb.gmra.mxu0 %vm131_vm0, %v2605_v40  ;;  %v2688_v33 = vor.u32 %v2847_v15, %v2687_v42  ;;  %v2615_v35 = vld [vmem:[%s4334_s1 + $0x1c] sm:$0x3] }
  0xec   :  { %1623 = vmatpush.bf16.msra.mxu0 %v4348_v56  ;;  %2612 = vmatmul.msk.bf16.vlgmr.msrb.gmra.mxu1 %vm131_vm0, %v2605_v40 }
  0xed   :  { %2613 = vmatmul.msk.bf16.vlgmr.msrb.gmra.mxu2 %vm131_vm0, %v2605_v40  ;;  %2614 = vmatmul.msk.bf16.vlgmr.msrb.gmra.mxu3 %vm131_vm0, %v2605_v40  ;;  %v2640_v40 = vor.u32 %v2835_v24, %v2639_v55 }
  0xee   :  { %1662 = vmatpush.bf16.msra.mxu3 %v4347_v32  ;;  %1636 = vmatpush.bf16.msra.mxu1 %v4021_v58  ;;  %v4180_v51 = vpop.f32.mrf.mxu1  ;;  %v2689_v58 = vld [vmem:[%s4333_s0 + $0x470] sm:$0xf0] }
  0xef   :  { %1649 = vmatpush.bf16.msra.mxu2 %v4023_v8  ;;  %v2695_v8 = vld [vmem:[%s4333_s0 + $0x468] sm:$0xf]  ;;  %v2692_v49 = vor.u32 %v2845_v21, %v2689_v58  ;;  %v807_v21 = vadd.f32 %v4178_v44, %v4128_v36  ;;  %v820_v58 = vadd.f32 %v4180_v51, %v4130_v41 }
  0xf0   :  { %1624 = vmatpush.bf16.msra.mxu0 %v4058_v12  ;;  %v2696_v28 = vor.u32 %v2848_v54, %v2695_v8  ;;  %v2673_v12 = vld [vmem:[%s4333_s0 + $0x450] sm:$0xf0]  ;;  %v4231_v17 = vpop.f32.mrf.mxu3 }
  0xf1   :  { %v846_v41 = vadd.f32 %v4231_v17, %v4148_v37 }
  0xf2   :  { %1663 = vmatpush.bf16.msra.mxu3 %v4042_v5  ;;  %v2671_v5 = vld [vmem:[%s4333_s0 + $0x440] sm:$0xf]  ;;  %1637 = vmatpush.bf16.msra.mxu1 %v4060_v45  ;;  %v4229_v16 = vpop.f32.mrf.mxu2  ;;  %v2676_v45 = vor.u32 %v2841_v46, %v2673_v12 }
  0xf3   :  { %1650 = vmatpush.bf16.msra.mxu2 %v4062_v50  ;;  %v2672_v43 = vor.u32 %v2843_v39, %v2671_v5  ;;  %v2680_v50 = vor.u32 %v2844_v61, %v2679_v52  ;;  %v808_v25 = vpop.f32.mrf.mxu0  ;;  %v833_v36 = vadd.f32 %v4229_v16, %v4146_v22 }
  0xf4   :  { %1779 = vmatpush.bf16.msrb.mxu0 %v2688_v33 }
  0xf6   :  { %1818 = vmatpush.bf16.msrb.mxu3 %v2700_v13  ;;  %1792 = vmatpush.bf16.msrb.mxu1 %v2692_v49  ;;  %v821_v0 = vpop.f32.mrf.mxu1 }
  0xf7   :  { %1805 = vmatpush.bf16.msrb.mxu2 %v2696_v28 }
  0xf8   :  { %1780 = vmatpush.bf16.msrb.mxu0 %v2672_v43  ;;  %v847_v9 = vpop.f32.mrf.mxu3 }
  0xfa   :  { %1819 = vmatpush.bf16.msrb.mxu3 %v2684_v14  ;;  %1793 = vmatpush.bf16.msrb.mxu1 %v2676_v45  ;;  %v834_v62 = vpop.f32.mrf.mxu2 }
  0xfb   :  { %1806 = vmatpush.bf16.msrb.mxu2 %v2680_v50  ;;  %v863_v32 = vpop.f32.mrf.mxu0  ;;  %2616 = vmatmul.msk.bf16.vlgmr.msra.gmra.mxu0 %vm131_vm0, %v2615_v35 }
  0xfc   :  { %1781 = vmatpush.bf16.msrb.mxu0 %v2656_v53  ;;  %2617 = vmatmul.msk.bf16.vlgmr.msra.gmra.mxu1 %vm131_vm0, %v2615_v35  ;;  %v906_v8 = vadd.f32 %v863_v32, %v807_v21 }
  0xfd   :  { %2618 = vmatmul.msk.bf16.vlgmr.msra.gmra.mxu2 %vm131_vm0, %v2615_v35  ;;  %2619 = vmatmul.msk.bf16.vlgmr.msra.gmra.mxu3 %vm131_vm0, %v2615_v35 }
  0xfe   :  { %1820 = vmatpush.bf16.msrb.mxu3 %v2668_v26  ;;  %1794 = vmatpush.bf16.msrb.mxu1 %v2660_v1  ;;  %v876_v56 = vpop.f32.mrf.mxu1 }
  0xff   :  { %1807 = vmatpush.bf16.msrb.mxu2 %v2664_v2  ;;  %v907_v54 = vadd.f32 %v876_v56, %v820_v58 }
 0x100   :  { %1782 = vmatpush.bf16.msrb.mxu0 %v2640_v40  ;;  %v902_v30 = vpop.f32.mrf.mxu3 }
 0x101   :  { %v909_v46 = vadd.f32 %v902_v30, %v846_v41 }
 0x102   :  { %1821 = vmatpush.bf16.msrb.mxu3 %v2652_v47  ;;  %1795 = vmatpush.bf16.msrb.mxu1 %v2644_v19  ;;  %v889_v29 = vpop.f32.mrf.mxu2 }
 0x103   :  { %1808 = vmatpush.bf16.msrb.mxu2 %v2648_v20  ;;  %v865_v42 = vpop.f32.mrf.mxu0  ;;  %v908_v51 = vadd.f32 %v889_v29, %v833_v36 }
 0x106   :  { %v878_v15 = vpop.f32.mrf.mxu1 }
 0x108   :  { %v904_v33 = vpop.f32.mrf.mxu3 }
 0x10a   :  { %v891_v13 = vpop.f32.mrf.mxu2 }
 0x10b   :  { %v1021_v48 = vpop.f32.mrf.mxu0  ;;  %2701 = vmatmul.msk.bf16.vlgmr.msrb.gmra.mxu0 %vm131_vm0, %v2620_v34 }
 0x10c   :  { %v1064_v28 = vadd.f32 %v1021_v48, %v906_v8  ;;  %2702 = vmatmul.msk.bf16.vlgmr.msrb.gmra.mxu1 %vm131_vm0, %v2620_v34 }
 0x10d   :  { %2703 = vmatmul.msk.bf16.vlgmr.msrb.gmra.mxu2 %vm131_vm0, %v2620_v34  ;;  %2704 = vmatmul.msk.bf16.vlgmr.msrb.gmra.mxu3 %vm131_vm0, %v2620_v34 }
 0x10e   :  { %v1034_v49 = vpop.f32.mrf.mxu1  ;;  %v1841_v44 = vadd.f32 %v4084_v18, %v1064_v28 }
 0x10f   :  { %v1065_v5 = vadd.f32 %v1034_v49, %v907_v54 }
 0x110   :  { %v1060_v52 = vpop.f32.mrf.mxu3 }
 0x111   :  { %v1842_v39 = vadd.f32 %v4084_v18, %v1065_v5  ;;  %v1067_v14 = vadd.f32 %v1060_v52, %v909_v46 }
 0x112   :  { %v1047_v12 = vpop.f32.mrf.mxu2 }
 0x113   :  { %2859 = vtanh.f32 %v1842_v39  ;;  %v1066_v61 = vadd.f32 %v1047_v12, %v908_v51  ;;  %v1023_v43 = vpop.f32.mrf.mxu0  ;;  %v1844_v22 = vadd.f32 %v4084_v18, %v1067_v14 }
 0x114   :  { %2861 = vtanh.f32 %v1841_v44 }
 0x115   :  { %v1843_v37 = vadd.f32 %v4084_v18, %v1066_v61  ;;  %2863 = vtanh.f32 %v1844_v22 }
 0x116   :  { %v1036_v3 = vpop.f32.mrf.mxu1 }
 0x117   :  { %2865 = vtanh.f32 %v1843_v37 }
 0x118   :  { %v1062_v38 = vpop.f32.mrf.mxu3 }
 0x119   :  { %v2860_v7 = vpop.eup %2859 }
 0x11a   :  { %v1887_v16 = vrot.slane %v2860_v7, 4  ;;  %v2862_v17 = vpop.eup %2861  ;;  %v1049_v50 = vpop.f32.mrf.mxu2 }
 0x11b   :  { %v1084_v63 = vpop.f32.mrf.mxu0  ;;  %v2864_v25 = vpop.eup %2863 }
 0x11c   :  { %v1896_v45 = vsel %vm1893_vm1, %v2862_v17, %v1887_v16  ;;  %v1888_v0 = vrot.slane %v2864_v25, 4 }
 0x11d   :  { %1912 = vst [vmem:[%s4336_s3 + $0x10] sm:$0x77] %v1896_v45  ;;  %v2866_v57 = vpop.eup %2865 }
 0x11e   :  { %v1097_v60 = vpop.f32.mrf.mxu1  ;;  %v1897_v59 = vsel %vm1893_vm1, %v2866_v57, %v1888_v0 }
 0x11f   :  { %1913 = vst [vmem:[%s4336_s3 + $0x18] sm:$0x77] %v1897_v59 }
 0x120   :  { %v1123_v26 = vpop.f32.mrf.mxu3 }
 0x122   :  { %v1110_v27 = vpop.f32.mrf.mxu2 }
 0x123   :  { %v1086_v53 = vpop.f32.mrf.mxu0 }
 0x126   :  { %v1099_v1 = vpop.f32.mrf.mxu1 }
 0x128   :  { %v1125_v4 = vpop.f32.mrf.mxu3 }
 0x12a   :  { %v1112_v2 = vpop.f32.mrf.mxu2 }
 0x12b   :  { %v1139_v6 = vpop.f32.mrf.mxu0 }
 0x12c   :  { %v1140_v19 = vadd.f32 %v1139_v6, %v1084_v63 }
 0x12e   :  { %v1152_v55 = vpop.f32.mrf.mxu1 }
 0x12f   :  { %v1153_v20 = vadd.f32 %v1152_v55, %v1097_v60 }
 0x130   :  { %v1178_v31 = vpop.f32.mrf.mxu3 }
 0x131   :  { %v1179_v34 = vadd.f32 %v1178_v31, %v1123_v26 }
 0x132   :  { %v1165_v24 = vpop.f32.mrf.mxu2 }
 0x133   :  { %v1141_v47 = vpop.f32.mrf.mxu0  ;;  %v1166_v33 = vadd.f32 %v1165_v24, %v1110_v27 }
 0x136   :  { %v1154_v10 = vpop.f32.mrf.mxu1 }
 0x138   :  { %v1180_v23 = vpop.f32.mrf.mxu3 }
 0x13a   :  { %v1167_v11 = vpop.f32.mrf.mxu2 }
 0x13b   :  { %v1293_v62 = vpop.f32.mrf.mxu0 }
 0x13c   :  { %v1336_v29 = vadd.f32 %v1293_v62, %v1140_v19 }
 0x13e   :  { %v1306_v9 = vpop.f32.mrf.mxu1 }
 0x13f   :  { %v1337_v30 = vadd.f32 %v1306_v9, %v1153_v20 }
 0x140   :  { %v1332_v40 = vpop.f32.mrf.mxu3 }
 0x141   :  { %v1339_v28 = vadd.f32 %v1332_v40, %v1179_v34 }
 0x142   :  { %v1319_v35 = vpop.f32.mrf.mxu2 }
 0x143   :  { %v1295_v32 = vpop.f32.mrf.mxu0  ;;  %v1338_v49 = vadd.f32 %v1319_v35, %v1166_v33 }
 0x146   :  { %v1308_v56 = vpop.f32.mrf.mxu1 }
 0x148   :  { %v1334_v15 = vpop.f32.mrf.mxu3 }
 0x14a   :  { %v1321_v42 = vpop.f32.mrf.mxu2 }
 0x14b   :  { %v1451_v21 = vpop.f32.mrf.mxu0 }
 0x14c   :  { %v1494_v8 = vadd.f32 %v1451_v21, %v1336_v29 }
 0x14e   :  { %v1464_v58 = vpop.f32.mrf.mxu1  ;;  %v1845_v48 = vadd.f32 %v4084_v18, %v1494_v8 }
 0x14f   :  { %v1495_v54 = vadd.f32 %v1464_v58, %v1337_v30 }
 0x150   :  { %v1490_v39 = vpop.f32.mrf.mxu3 }
 0x151   :  { %v1846_v13 = vadd.f32 %v4084_v18, %v1495_v54  ;;  %v1497_v41 = vadd.f32 %v1490_v39, %v1339_v28 }
 0x152   :  { %v1477_v5 = vpop.f32.mrf.mxu2 }
 0x153   :  { %2867 = vtanh.f32 %v1846_v13  ;;  %v1496_v36 = vadd.f32 %v1477_v5, %v1338_v49  ;;  %v1453_v44 = vpop.f32.mrf.mxu0  ;;  %v1848_v46 = vadd.f32 %v4084_v18, %v1497_v41 }
 0x154   :  { %2869 = vtanh.f32 %v1845_v48 }
 0x155   :  { %v1847_v12 = vadd.f32 %v4084_v18, %v1496_v36  ;;  %2871 = vtanh.f32 %v1848_v46 }
 0x156   :  { %v1466_v51 = vpop.f32.mrf.mxu1 }
 0x157   :  { %2873 = vtanh.f32 %v1847_v12 }
 0x158   :  { %v1492_v22 = vpop.f32.mrf.mxu3 }
 0x159   :  { %v2868_v52 = vpop.eup %2867 }
 0x15a   :  { %v1889_v61 = vrot.slane %v2868_v52, 4  ;;  %v2870_v14 = vpop.eup %2869  ;;  %v1479_v3 = vpop.f32.mrf.mxu2 }
 0x15b   :  { %v1514_v37 = vpop.f32.mrf.mxu0  ;;  %v2872_v16 = vpop.eup %2871 }
 0x15c   :  { %v1898_v43 = vsel %vm1893_vm1, %v2870_v14, %v1889_v61  ;;  %v1890_v17 = vrot.slane %v2872_v16, 4 }
 0x15d   :  { %1914 = vst [vmem:[%s4336_s3 + $0x20] sm:$0x77] %v1898_v43  ;;  %v2874_v45 = vpop.eup %2873 }
 0x15e   :  { %v1527_v7 = vpop.f32.mrf.mxu1  ;;  %v1899_v50 = vsel %vm1893_vm1, %v2874_v45, %v1890_v17 }
 0x15f   :  { %1915 = vst [vmem:[%s4336_s3 + $0x28] sm:$0x77] %v1899_v50 }
 0x160   :  { %v1553_v63 = vpop.f32.mrf.mxu3 }
 0x162   :  { %v1540_v38 = vpop.f32.mrf.mxu2 }
 0x163   :  { %v1516_v60 = vpop.f32.mrf.mxu0 }
 0x166   :  { %v1529_v25 = vpop.f32.mrf.mxu1 }
 0x168   :  { %v1555_v57 = vpop.f32.mrf.mxu3 }
 0x16a   :  { %v1542_v0 = vpop.f32.mrf.mxu2 }
 0x16b   :  { %v1569_v59 = vpop.f32.mrf.mxu0 }
 0x16c   :  { %v1570_v23 = vadd.f32 %v1569_v59, %v1514_v37 }
 0x16e   :  { %v1582_v27 = vpop.f32.mrf.mxu1 }
 0x16f   :  { %v1583_v62 = vadd.f32 %v1582_v27, %v1527_v7 }
 0x170   :  { %v1608_v53 = vpop.f32.mrf.mxu3 }
 0x171   :  { %v1609_v15 = vadd.f32 %v1608_v53, %v1553_v63 }
 0x172   :  { %v1595_v26 = vpop.f32.mrf.mxu2 }
 0x173   :  { %v1571_v1 = vpop.f32.mrf.mxu0  ;;  %v1596_v42 = vadd.f32 %v1595_v26, %v1540_v38 }
 0x176   :  { %v1584_v2 = vpop.f32.mrf.mxu1 }
 0x178   :  { %v1610_v6 = vpop.f32.mrf.mxu3 }
 0x17a   :  { %v1597_v4 = vpop.f32.mrf.mxu2 }
 0x17b   :  { %v1626_v55 = vpop.f32.mrf.mxu0 }
 0x17c   :  { %v1669_v9 = vadd.f32 %v1626_v55, %v1570_v23 }
 0x17e   :  { %v1639_v24 = vpop.f32.mrf.mxu1 }
 0x17f   :  { %v1670_v35 = vadd.f32 %v1639_v24, %v1583_v62 }
 0x180   :  { %v1665_v47 = vpop.f32.mrf.mxu3 }
 0x181   :  { %v1672_v8 = vadd.f32 %v1665_v47, %v1609_v15 }
 0x182   :  { %v1652_v31 = vpop.f32.mrf.mxu2 }
 0x183   :  { %v1628_v10 = vpop.f32.mrf.mxu0  ;;  %v1671_v58 = vadd.f32 %v1652_v31, %v1596_v42 }
 0x186   :  { %v1641_v11 = vpop.f32.mrf.mxu1 }
 0x188   :  { %v1667_v32 = vpop.f32.mrf.mxu3 }
 0x18a   :  { %v1654_v40 = vpop.f32.mrf.mxu2 }
 0x18b   :  { %v1784_v56 = vpop.f32.mrf.mxu0 }
 0x18c   :  { %v1827_v20 = vadd.f32 %v1784_v56, %v1669_v9 }
 0x18e   :  { %v1797_v19 = vpop.f32.mrf.mxu1  ;;  %v1849_v21 = vadd.f32 %v4084_v18, %v1827_v20 }
 0x18f   :  { %v1828_v29 = vadd.f32 %v1797_v19, %v1670_v35 }
 0x190   :  { %v1823_v13 = vpop.f32.mrf.mxu3 }
 0x191   :  { %v1850_v30 = vadd.f32 %v4084_v18, %v1828_v29  ;;  %v1830_v34 = vadd.f32 %v1823_v13, %v1672_v8 }
 0x192   :  { %v1810_v54 = vpop.f32.mrf.mxu2 }
 0x193   :  { %2875 = vtanh.f32 %v1850_v30  ;;  %v1829_v33 = vadd.f32 %v1810_v54, %v1671_v58  ;;  %v1786_v48 = vpop.f32.mrf.mxu0  ;;  %v1852_v28 = vadd.f32 %v4084_v18, %v1830_v34 }
 0x194   :  { %2877 = vtanh.f32 %v1849_v21 }
 0x195   :  { %v1851_v5 = vadd.f32 %v4084_v18, %v1829_v33  ;;  %2879 = vtanh.f32 %v1852_v28 }
 0x196   :  { %v1799_v49 = vpop.f32.mrf.mxu1 }
 0x197   :  { %2881 = vtanh.f32 %v1851_v5 }
 0x198   :  { %v1825_v46 = vpop.f32.mrf.mxu3 }
 0x199   :  { %v2876_v39 = vpop.eup %2875 }
 0x19a   :  { %v1891_v36 = vrot.slane %v2876_v39, 4  ;;  %v2878_v41 = vpop.eup %2877  ;;  %v1812_v51 = vpop.f32.mrf.mxu2 }
 0x19b   :  { %v2880_v12 = vpop.eup %2879 }
 0x19c   :  { %v1900_v44 = vsel %vm1893_vm1, %v2878_v41, %v1891_v36  ;;  %v1892_v52 = vrot.slane %v2880_v12, 4 }
 0x19d   :  { %1916 = vst [vmem:[%s4336_s3 + $0x30] sm:$0x77] %v1900_v44  ;;  %v2882_v61 = vpop.eup %2881 }
 0x19e   :  { %v1901_v14 = vsel %vm1893_vm1, %v2882_v61, %v1892_v52 }
 0x19f   :  { %1917 = vst [vmem:[%s4336_s3 + $0x38] sm:$0x77] %v1901_v14 }

</bundles_post_ra>
